<compile_context>
chip_gen: v7x
topology: tpu7x:2x2x1
jax: 0.10.0
libtpu: 0.0.40
codegen_flags: <defaults>
</compile_context>

<pallas_src>
import functools
import math

import jax
import jax.numpy as jnp
from jax.experimental import pallas as pl
from jax.experimental.pallas import tpu as pltpu


_LN_EPS = 1e-6                      # matches nn.LayerNorm(dim, eps=1e-06) in the spec
_MM_VMEM_LIMIT = 48 * 1024 * 1024   # explicit scoped-VMEM budget (fits v7x's 64 MiB)


# ----------------------------------------------------------------------------- tiling
def _pick_tm(m: int, target: int = 256) -> int:
    """Row tile: full if small, else `target` (edge tiles handled by a cdiv grid)."""
    return m if m <= target else target


def _pick_tn(n: int, target: int = 768) -> int:
    """Lane tile: full if small, else the largest 128-multiple divisor <= target,
    else `target` with cdiv edge masking."""
    if n <= target:
        return n
    t = (target // 128) * 128
    for cand in range(t, 127, -128):
        if n % cand == 0:
            return cand
    return t


# --------------------------------------------------------------- fused matmul kernel
def fused_matmul(a, w, bias=None, *, bias_axis="n", activation=None, residual=None,
                 ln=None, compute_dtype=jnp.bfloat16, out_dtype=None,
                 tm_target=256, tn_target=768):
    """out[g] = act( LN(a[ga]) @ w[gw] + bias ) (+ residual[g])

    a: (Ga, M, K), w: (Gw, K, N) with Ga, Gw in {1, G}.
    bias: (N,) if bias_axis == 'n' else (M,).   residual: (G, M, N) or None.
    ln = (gamma, beta): LayerNorm over K applied to each row of `a` in the prologue.
    The contraction dim K is kept whole (no K grid / accumulator scratch).
    """
    ga, m, k = a.shape
    gw, k2, n = w.shape
    assert k == k2
    g = max(ga, gw)
    assert ga in (1, g) and gw in (1, g)
    out_dtype = out_dtype if out_dtype is not None else a.dtype

    tm = _pick_tm(m, tm_target)
    tn = _pick_tn(n, tn_target)

    has_bias = bias is not None
    has_res = residual is not None
    has_ln = ln is not None

    def kernel(*refs):
        it = iter(refs)
        a_ref = next(it)
        w_ref = next(it)
        g_ref = next(it) if has_ln else None
        be_ref = next(it) if has_ln else None
        b_ref = next(it) if has_bias else None
        r_ref = next(it) if has_res else None
        o_ref = next(it)

        av = a_ref[0]                                        # (tm, K)
        if has_ln:
            xf = av.astype(jnp.float32)
            mu = jnp.mean(xf, axis=-1, keepdims=True)
            xc = xf - mu
            var = jnp.mean(xc * xc, axis=-1, keepdims=True)
            xf = xc * jax.lax.rsqrt(var + _LN_EPS)
            xf = xf * g_ref[...].astype(jnp.float32) + be_ref[...].astype(jnp.float32)
            av = xf.astype(compute_dtype)
        elif av.dtype != compute_dtype:
            av = av.astype(compute_dtype)

        acc = jnp.dot(av, w_ref[0], preferred_element_type=jnp.float32)  # (tm, tn) f32
        if has_bias:
            acc = acc + b_ref[...].astype(jnp.float32)       # (1, tn) or (tm, 1) bcast
        if activation == "gelu":
            # TODO(synk): PyTorch F.gelu default is exact erf-GELU; tanh approx here.
            acc = jax.nn.gelu(acc, approximate=True)
        if has_res:
            acc = acc + r_ref[0].astype(jnp.float32)
        o_ref[0] = acc.astype(o_ref.dtype)

    in_specs = [
        pl.BlockSpec((1, tm, k), lambda gi, i, j: ((gi if ga > 1 else 0), i, 0)),
        pl.BlockSpec((1, k, tn), lambda gi, i, j: ((gi if gw > 1 else 0), 0, j)),
    ]
    inputs = [a, w]
    if has_ln:
        gamma, beta = ln
        inputs += [gamma.reshape(1, k), beta.reshape(1, k)]
        in_specs += [pl.BlockSpec((1, k), lambda gi, i, j: (0, 0)),
                     pl.BlockSpec((1, k), lambda gi, i, j: (0, 0))]
    if has_bias:
        if bias_axis == "n":
            inputs.append(bias.reshape(1, n))
            in_specs.append(pl.BlockSpec((1, tn), lambda gi, i, j: (0, j)))
        else:  # bias along rows (Conv1d(S, S, 1) over the sequence axis)
            inputs.append(bias.reshape(m, 1))
            in_specs.append(pl.BlockSpec((tm, 1), lambda gi, i, j: (i, 0)))
    if has_res:
        inputs.append(residual)
        in_specs.append(pl.BlockSpec((1, tm, tn), lambda gi, i, j: (gi, i, j)))

    return pl.pallas_call(
        kernel,
        out_shape=jax.ShapeDtypeStruct((g, m, n), out_dtype),
        grid_spec=pltpu.PrefetchScalarGridSpec(
            num_scalar_prefetch=0,
            grid=(g, pl.cdiv(m, tm), pl.cdiv(n, tn)),
            in_specs=in_specs,
            out_specs=pl.BlockSpec((1, tm, tn), lambda gi, i, j: (gi, i, j)),
        ),
        compiler_params=pltpu.CompilerParams(
            dimension_semantics=("parallel", "parallel", "parallel"),
            vmem_limit_bytes=_MM_VMEM_LIMIT,
        ),
    )(*inputs)


# ---------------------------------------------------------------- multi-head attention
def _mha_kernel(q_ref, k_ref, v_ref, o_ref, *, scale, head_w, heads_per_block):
    qg = q_ref[0]                                  # (S, heads_per_block * head_w)
    kg = k_ref[0]
    vg = v_ref[0]
    outs = []
    for hh in range(heads_per_block):
        lo = hh * head_w
        hi = lo + head_w
        q = qg[:, lo:hi] * scale
        s = jax.lax.dot_general(q, kg[:, lo:hi], (((1,), (1,)), ((), ())),
                                preferred_element_type=jnp.float32)        # (S, S)
        m = jnp.max(s, axis=-1, keepdims=True)
        e = jnp.exp(s - m)
        l = jnp.sum(e, axis=-1, keepdims=True)
        p = (e * pl.reciprocal(l, approx=True)).astype(vg.dtype)           # bf16 P
        outs.append(jnp.dot(p, vg[:, lo:hi], preferred_element_type=jnp.float32))
    o = outs[0] if len(outs) == 1 else jnp.concatenate(outs, axis=-1)
    o_ref[0] = o.astype(o_ref.dtype)


def mha_attention(qkv, num_heads):
    """qkv: (B, S, 3*D) packed [Q | K | V] (head-major within each section).
    Computes softmax(q k^T / sqrt(W)) v per (batch, head-group) and writes the
    head-merged (B, S, D) output directly -- no HBM transposes for head split/merge."""
    b, s, d3 = qkv.shape
    d = d3 // 3
    h = num_heads
    w = d // h
    scale = 1.0 / math.sqrt(w)

    # Group heads so one grid step reads/writes a lane-dense (128-multiple) slab.
    hp = None
    for cand in range(1, h + 1):
        if h % cand == 0 and (cand * w) % 128 == 0:
            hp = cand
            break
    if hp is None:
        hp = h                       # fallback: all heads per step (still correct)
    hp_w = hp * w
    nhb = d // hp_w                  # head-groups per Q/K/V section

    def blk(sec):
        return pl.BlockSpec((1, s, hp_w),
                            lambda bi, gi, sec=sec: (bi, 0, sec * nhb + gi))

    return pl.pallas_call(
        functools.partial(_mha_kernel, scale=scale, head_w=w, heads_per_block=hp),
        out_shape=jax.ShapeDtypeStruct((b, s, d), qkv.dtype),
        grid_spec=pltpu.PrefetchScalarGridSpec(
            num_scalar_prefetch=0,
            grid=(b, h // hp),
            in_specs=[blk(0), blk(1), blk(2)],
            out_specs=pl.BlockSpec((1, s, hp_w), lambda bi, gi: (bi, 0, gi)),
        ),
        compiler_params=pltpu.CompilerParams(
            dimension_semantics=("parallel", "parallel"),
            vmem_limit_bytes=32 * 1024 * 1024,
        ),
    )(qkv, qkv, qkv)


# --------------------------------------------------------------------------- Conformer
def block_forward(x, p, num_heads):
    b, s, d = x.shape
    m = b * s
    cdt = p["wqkv"].dtype            # matmul compute dtype (bf16 in production)

    x2 = x.reshape(1, m, d)

    # LN1 fused into the QKV projection prologue; Q, K, V fused into one matmul.
    qkv = fused_matmul(x2, p["wqkv"][None], p["bqkv"],
                       ln=(p["ln1_g"], p["ln1_b"]),
                       compute_dtype=cdt, out_dtype=cdt)                   # (1, M, 3D)
    attn = mha_attention(qkv.reshape(b, s, 3 * d), num_heads)              # (B, S, D)

    # proj = Conv1d(S, S, 1) over the sequence axis: out_b = Wp @ attn_b + bp[:, None];
    # the `x +` residual is fused into the epilogue.
    x = fused_matmul(p["wp"][None], attn, p["bp"], bias_axis="m",
                     residual=x, compute_dtype=cdt, out_dtype=x.dtype)     # (B, S, D)

    # Position-wise convolution (per-position MLP): LN2 fused into W1's prologue,
    # GELU into W1's epilogue, residual into W2's epilogue.
    x2 = x.reshape(1, m, d)
    h1 = fused_matmul(x2, p["w1"][None], p["b1"],
                      ln=(p["ln2_g"], p["ln2_b"]), activation="gelu",
                      compute_dtype=cdt, out_dtype=cdt)                    # (1, M, FF)
    x2 = fused_matmul(h1, p["w2"][None], p["b2"],
                      residual=x2, compute_dtype=cdt, out_dtype=x.dtype)   # (1, M, D)
    return x2.reshape(b, s, d)


def prepare_params(params, compute_dtype=jnp.bfloat16):
    """Fuse Q/K/V weights into one (D, 3D) matrix and cast matmul weights to the MXU
    compute dtype (bf16).  Done once, outside jit."""
    out = []
    for p in params:
        out.append({
            "ln1_g": p["ln1_g"], "ln1_b": p["ln1_b"],
            "wqkv": jnp.concatenate([p["wq"], p["wk"], p["wv"]], axis=1)
                       .astype(compute_dtype),
            "bqkv": jnp.concatenate([p["bq"], p["bk"], p["bv"]]),
            "wp": p["wp"].astype(compute_dtype), "bp": p["bp"],
            "ln2_g": p["ln2_g"], "ln2_b": p["ln2_b"],
            "w1": p["w1"].astype(compute_dtype), "b1": p["b1"],
            "w2": p["w2"].astype(compute_dtype), "b2": p["b2"],
        })
    return out


def conformer_forward(x, prepared_params, mask=None, *, num_heads):
    if mask is not None:
        # TODO(synk): attention mask path not implemented (default forward uses mask=None).
        raise NotImplementedError("mask is not supported")
    # TODO(synk): dropout(0.1) treated as identity (eval semantics).
    for p in prepared_params:
        x = block_forward(x, p, num_heads)
    return x


# --------------------------------------------------------------------- plain-JAX reference
def conformer_reference(x, params, num_heads):
    def ln(t, g, b):
        mu = t.mean(-1, keepdims=True)
        var = ((t - mu) ** 2).mean(-1, keepdims=True)
        return (t - mu) / jnp.sqrt(var + _LN_EPS) * g + b

    for p in params:
        b, s, d = x.shape
        h = num_heads
        wd = d // h
        xn = ln(x, p["ln1_g"], p["ln1_b"])
        q = xn @ p["wq"] + p["bq"]
        k = xn @ p["wk"] + p["bk"]
        v = xn @ p["wv"] + p["bv"]

        def heads(t):
            return t.reshape(b, s, h, wd).transpose(0, 2, 1, 3)

        q, k, v = heads(q), heads(k), heads(v)
        scores = (q @ jnp.swapaxes(k, -1, -2)) / math.sqrt(wd)
        attn = jax.nn.softmax(scores, axis=-1)
        hh = (attn @ v).transpose(0, 2, 1, 3).reshape(b, s, d)
        hh = jnp.einsum("os,bsd->bod", p["wp"], hh) + p["bp"][None, :, None]
        x = x + hh
        xn2 = ln(x, p["ln2_g"], p["ln2_b"])
        h1 = jax.nn.gelu(xn2 @ p["w1"] + p["b1"], approximate=True)
        x = x + (h1 @ p["w2"] + p["b2"])
    return x


# --------------------------------------------------------------------------------- main
def init_block_params(key, seq, dim_, ff):
    keys = jax.random.split(key, 10)
    sc = 0.05
    return {
        "ln1_g": jnp.ones((dim_,), jnp.float32),
        "ln1_b": jnp.zeros((dim_,), jnp.float32),
        "wq": jax.random.normal(keys[0], (dim_, dim_), jnp.float32) * sc,
        "bq": jax.random.normal(keys[1], (dim_,), jnp.float32) * sc,
        "wk": jax.random.normal(keys[2], (dim_, dim_), jnp.float32) * sc,
        "bk": jax.random.normal(keys[3], (dim_,), jnp.float32) * sc,
        "wv": jax.random.normal(keys[4], (dim_, dim_), jnp.float32) * sc,
        "bv": jax.random.normal(keys[5], (dim_,), jnp.float32) * sc,
        "wp": jax.random.normal(keys[6], (seq, seq), jnp.float32) * sc,
        "bp": jax.random.normal(keys[7], (seq,), jnp.float32) * sc,
        "ln2_g": jnp.ones((dim_,), jnp.float32),
        "ln2_b": jnp.zeros((dim_,), jnp.float32),
        "w1": jax.random.normal(keys[8], (dim_, ff), jnp.float32) * sc,
        "b1": jnp.zeros((ff,), jnp.float32),
        "w2": jax.random.normal(keys[9], (ff, dim_), jnp.float32) * sc,
        "b2": jnp.zeros((dim_,), jnp.float32),
    }


if __name__ == "__main__":
    # Small, shape-consistent test config (full model: seq=577, dim=768, heads=12,
    # ff=3072, layers=12 -- the same kernels handle those shapes via cdiv edge tiles).
    # M = B*S = 288 > 256 so the masked-edge row tile path is exercised here too.
    BATCH, SEQ, DIM, HEADS, FF, LAYERS = 4, 72, 128, 4, 256, 2

    key = jax.random.PRNGKey(0)
    keys = jax.random.split(key, 1 + LAYERS)
    x = jax.random.normal(keys[0], (BATCH, SEQ, DIM), dtype=jnp.float32)
    params = [init_block_params(keys[1 + i], SEQ, DIM, FF) for i in range(LAYERS)]

    fwd = jax.jit(functools.partial(conformer_forward, num_heads=HEADS))
    ref = conformer_reference(x, params, HEADS)

    # f32 compute path: tight structural-correctness check of the kernels.
    out_f32 = jax.block_until_ready(fwd(x, prepare_params(params, jnp.float32)))
    assert out_f32.shape == (BATCH, SEQ, DIM)
    err_f32 = float(jnp.max(jnp.abs(out_f32 - ref)))
    assert jnp.allclose(out_f32, ref, atol=5e-3, rtol=5e-3), err_f32

    # bf16 compute path (production configuration): looser tolerance for bf16 rounding.
    out_bf16 = jax.block_until_ready(fwd(x, prepare_params(params, jnp.bfloat16)))
    assert out_bf16.shape == (BATCH, SEQ, DIM)
    err_bf16 = float(jnp.max(jnp.abs(out_bf16 - ref)))
    assert jnp.allclose(out_bf16, ref, atol=4e-2, rtol=4e-2), err_bf16

    print("KERNEL_OK")
</pallas_src>

<mosaic_0001>
module attributes {stable_mosaic.version = 11 : i64} {
  func.func @_mha_kernel(%arg0: i32, %arg1: i32, %arg2: memref<1x72x128xf32, #tpu.memory_space<vmem>>, %arg3: memref<1x72x128xf32, #tpu.memory_space<vmem>>, %arg4: memref<1x72x128xf32, #tpu.memory_space<vmem>>, %arg5: memref<1x72x128xf32, #tpu.memory_space<vmem>>) attributes {dimension_semantics = [#tpu.dimension_semantics<parallel>, #tpu.dimension_semantics<parallel>], iteration_bounds = array<i64: 4, 1>, scalar_prefetch = 0 : i64, scratch_operands = 0 : i64, tpu.core_type = #tpu.core_type<tc>, window_params = [{transform_indices = @transform_0, window_bounds = array<i64: 1, 72, 128>}, {transform_indices = @transform_1, window_bounds = array<i64: 1, 72, 128>}, {transform_indices = @transform_2, window_bounds = array<i64: 1, 72, 128>}, {transform_indices = @transform_3, window_bounds = array<i64: 1, 72, 128>}]} {
    %c0 = arith.constant 0 : index
    %c0_0 = arith.constant 0 : index
    %c0_1 = arith.constant 0 : index
    %0 = vector.load %arg2[%c0, %c0_0, %c0_1] : memref<1x72x128xf32, #tpu.memory_space<vmem>>, vector<1x72x128xf32>
    %1 = vector.shape_cast %0 : vector<1x72x128xf32> to vector<72x128xf32>
    %c0_2 = arith.constant 0 : index
    %c0_3 = arith.constant 0 : index
    %c0_4 = arith.constant 0 : index
    %2 = vector.load %arg3[%c0_2, %c0_3, %c0_4] : memref<1x72x128xf32, #tpu.memory_space<vmem>>, vector<1x72x128xf32>
    %3 = vector.shape_cast %2 : vector<1x72x128xf32> to vector<72x128xf32>
    %c0_5 = arith.constant 0 : index
    %c0_6 = arith.constant 0 : index
    %c0_7 = arith.constant 0 : index
    %4 = vector.load %arg4[%c0_5, %c0_6, %c0_7] : memref<1x72x128xf32, #tpu.memory_space<vmem>>, vector<1x72x128xf32>
    %5 = vector.shape_cast %4 : vector<1x72x128xf32> to vector<72x128xf32>
    %6 = vector.extract_strided_slice %1 {offsets = [0, 0], sizes = [72, 32], strides = [1, 1]} : vector<72x128xf32> to vector<72x32xf32>
    %cst = arith.constant 0.176776692 : f32
    %7 = vector.broadcast %cst : f32 to vector<72x32xf32>
    %8 = arith.mulf %6, %7 : vector<72x32xf32>
    %9 = vector.extract_strided_slice %3 {offsets = [0, 0], sizes = [72, 32], strides = [1, 1]} : vector<72x128xf32> to vector<72x32xf32>
    %cst_8 = arith.constant dense<0.000000e+00> : vector<72x72xf32>
    %10 = tpu.matmul %8, %9, %cst_8 {dimension_numbers = #tpu.dot_dimension_numbers<[1], [1], [0], [0], [0, 0, 1, 0], [], []>} : vector<72x32xf32>, vector<72x32xf32>, vector<72x72xf32> -> vector<72x72xf32>
    %cst_9 = arith.constant dense<0xFF800000> : vector<72xf32>
    %11 = vector.multi_reduction <maximumf>, %10, %cst_9 [1] : vector<72x72xf32> to vector<72xf32>
    %12 = vector.shape_cast %11 : vector<72xf32> to vector<72x1xf32>
    %13 = vector.broadcast %12 : vector<72x1xf32> to vector<72x72xf32>
    %14 = arith.subf %10, %13 : vector<72x72xf32>
    %15 = math.exp %14 : vector<72x72xf32>
    %cst_10 = arith.constant dense<0.000000e+00> : vector<72xf32>
    %16 = vector.multi_reduction <add>, %15, %cst_10 [1] : vector<72x72xf32> to vector<72xf32>
    %17 = vector.shape_cast %16 : vector<72xf32> to vector<72x1xf32>
    %18 = tpu.reciprocal %17 {approx = true} : vector<72x1xf32> -> vector<72x1xf32>
    %19 = vector.broadcast %18 : vector<72x1xf32> to vector<72x72xf32>
    %20 = arith.mulf %15, %19 : vector<72x72xf32>
    %21 = vector.extract_strided_slice %5 {offsets = [0, 0], sizes = [72, 32], strides = [1, 1]} : vector<72x128xf32> to vector<72x32xf32>
    %cst_11 = arith.constant dense<0.000000e+00> : vector<72x32xf32>
    %22 = tpu.matmul %20, %21, %cst_11 {dimension_numbers = #tpu.dot_dimension_numbers<[1], [0], [0], [1], [0, 0, 1, 1], [], []>} : vector<72x72xf32>, vector<72x32xf32>, vector<72x32xf32> -> vector<72x32xf32>
    %23 = vector.extract_strided_slice %1 {offsets = [0, 32], sizes = [72, 32], strides = [1, 1]} : vector<72x128xf32> to vector<72x32xf32>
    %cst_12 = arith.constant 0.176776692 : f32
    %24 = vector.broadcast %cst_12 : f32 to vector<72x32xf32>
    %25 = arith.mulf %23, %24 : vector<72x32xf32>
    %26 = vector.extract_strided_slice %3 {offsets = [0, 32], sizes = [72, 32], strides = [1, 1]} : vector<72x128xf32> to vector<72x32xf32>
    %cst_13 = arith.constant dense<0.000000e+00> : vector<72x72xf32>
    %27 = tpu.matmul %25, %26, %cst_13 {dimension_numbers = #tpu.dot_dimension_numbers<[1], [1], [0], [0], [0, 0, 1, 0], [], []>} : vector<72x32xf32>, vector<72x32xf32>, vector<72x72xf32> -> vector<72x72xf32>
    %cst_14 = arith.constant dense<0xFF800000> : vector<72xf32>
    %28 = vector.multi_reduction <maximumf>, %27, %cst_14 [1] : vector<72x72xf32> to vector<72xf32>
    %29 = vector.shape_cast %28 : vector<72xf32> to vector<72x1xf32>
    %30 = vector.broadcast %29 : vector<72x1xf32> to vector<72x72xf32>
    %31 = arith.subf %27, %30 : vector<72x72xf32>
    %32 = math.exp %31 : vector<72x72xf32>
    %cst_15 = arith.constant dense<0.000000e+00> : vector<72xf32>
    %33 = vector.multi_reduction <add>, %32, %cst_15 [1] : vector<72x72xf32> to vector<72xf32>
    %34 = vector.shape_cast %33 : vector<72xf32> to vector<72x1xf32>
    %35 = tpu.reciprocal %34 {approx = true} : vector<72x1xf32> -> vector<72x1xf32>
    %36 = vector.broadcast %35 : vector<72x1xf32> to vector<72x72xf32>
    %37 = arith.mulf %32, %36 : vector<72x72xf32>
    %38 = vector.extract_strided_slice %5 {offsets = [0, 32], sizes = [72, 32], strides = [1, 1]} : vector<72x128xf32> to vector<72x32xf32>
    %cst_16 = arith.constant dense<0.000000e+00> : vector<72x32xf32>
    %39 = tpu.matmul %37, %38, %cst_16 {dimension_numbers = #tpu.dot_dimension_numbers<[1], [0], [0], [1], [0, 0, 1, 1], [], []>} : vector<72x72xf32>, vector<72x32xf32>, vector<72x32xf32> -> vector<72x32xf32>
    %40 = vector.extract_strided_slice %1 {offsets = [0, 64], sizes = [72, 32], strides = [1, 1]} : vector<72x128xf32> to vector<72x32xf32>
    %cst_17 = arith.constant 0.176776692 : f32
    %41 = vector.broadcast %cst_17 : f32 to vector<72x32xf32>
    %42 = arith.mulf %40, %41 : vector<72x32xf32>
    %43 = vector.extract_strided_slice %3 {offsets = [0, 64], sizes = [72, 32], strides = [1, 1]} : vector<72x128xf32> to vector<72x32xf32>
    %cst_18 = arith.constant dense<0.000000e+00> : vector<72x72xf32>
    %44 = tpu.matmul %42, %43, %cst_18 {dimension_numbers = #tpu.dot_dimension_numbers<[1], [1], [0], [0], [0, 0, 1, 0], [], []>} : vector<72x32xf32>, vector<72x32xf32>, vector<72x72xf32> -> vector<72x72xf32>
    %cst_19 = arith.constant dense<0xFF800000> : vector<72xf32>
    %45 = vector.multi_reduction <maximumf>, %44, %cst_19 [1] : vector<72x72xf32> to vector<72xf32>
    %46 = vector.shape_cast %45 : vector<72xf32> to vector<72x1xf32>
    %47 = vector.broadcast %46 : vector<72x1xf32> to vector<72x72xf32>
    %48 = arith.subf %44, %47 : vector<72x72xf32>
    %49 = math.exp %48 : vector<72x72xf32>
    %cst_20 = arith.constant dense<0.000000e+00> : vector<72xf32>
    %50 = vector.multi_reduction <add>, %49, %cst_20 [1] : vector<72x72xf32> to vector<72xf32>
    %51 = vector.shape_cast %50 : vector<72xf32> to vector<72x1xf32>
    %52 = tpu.reciprocal %51 {approx = true} : vector<72x1xf32> -> vector<72x1xf32>
    %53 = vector.broadcast %52 : vector<72x1xf32> to vector<72x72xf32>
    %54 = arith.mulf %49, %53 : vector<72x72xf32>
    %55 = vector.extract_strided_slice %5 {offsets = [0, 64], sizes = [72, 32], strides = [1, 1]} : vector<72x128xf32> to vector<72x32xf32>
    %cst_21 = arith.constant dense<0.000000e+00> : vector<72x32xf32>
    %56 = tpu.matmul %54, %55, %cst_21 {dimension_numbers = #tpu.dot_dimension_numbers<[1], [0], [0], [1], [0, 0, 1, 1], [], []>} : vector<72x72xf32>, vector<72x32xf32>, vector<72x32xf32> -> vector<72x32xf32>
    %57 = vector.extract_strided_slice %1 {offsets = [0, 96], sizes = [72, 32], strides = [1, 1]} : vector<72x128xf32> to vector<72x32xf32>
    %cst_22 = arith.constant 0.176776692 : f32
    %58 = vector.broadcast %cst_22 : f32 to vector<72x32xf32>
    %59 = arith.mulf %57, %58 : vector<72x32xf32>
    %60 = vector.extract_strided_slice %3 {offsets = [0, 96], sizes = [72, 32], strides = [1, 1]} : vector<72x128xf32> to vector<72x32xf32>
    %cst_23 = arith.constant dense<0.000000e+00> : vector<72x72xf32>
    %61 = tpu.matmul %59, %60, %cst_23 {dimension_numbers = #tpu.dot_dimension_numbers<[1], [1], [0], [0], [0, 0, 1, 0], [], []>} : vector<72x32xf32>, vector<72x32xf32>, vector<72x72xf32> -> vector<72x72xf32>
    %cst_24 = arith.constant dense<0xFF800000> : vector<72xf32>
    %62 = vector.multi_reduction <maximumf>, %61, %cst_24 [1] : vector<72x72xf32> to vector<72xf32>
    %63 = vector.shape_cast %62 : vector<72xf32> to vector<72x1xf32>
    %64 = vector.broadcast %63 : vector<72x1xf32> to vector<72x72xf32>
    %65 = arith.subf %61, %64 : vector<72x72xf32>
    %66 = math.exp %65 : vector<72x72xf32>
    %cst_25 = arith.constant dense<0.000000e+00> : vector<72xf32>
    %67 = vector.multi_reduction <add>, %66, %cst_25 [1] : vector<72x72xf32> to vector<72xf32>
    %68 = vector.shape_cast %67 : vector<72xf32> to vector<72x1xf32>
    %69 = tpu.reciprocal %68 {approx = true} : vector<72x1xf32> -> vector<72x1xf32>
    %70 = vector.broadcast %69 : vector<72x1xf32> to vector<72x72xf32>
    %71 = arith.mulf %66, %70 : vector<72x72xf32>
    %72 = vector.extract_strided_slice %5 {offsets = [0, 96], sizes = [72, 32], strides = [1, 1]} : vector<72x128xf32> to vector<72x32xf32>
    %cst_26 = arith.constant dense<0.000000e+00> : vector<72x32xf32>
    %73 = tpu.matmul %71, %72, %cst_26 {dimension_numbers = #tpu.dot_dimension_numbers<[1], [0], [0], [1], [0, 0, 1, 1], [], []>} : vector<72x72xf32>, vector<72x32xf32>, vector<72x32xf32> -> vector<72x32xf32>
    %74 = tpu.concatenate %22, %39, %56, %73 in 1 : vector<72x32xf32>, vector<72x32xf32>, vector<72x32xf32>, vector<72x32xf32> -> vector<72x128xf32>
    %c0_27 = arith.constant 0 : index
    %c0_28 = arith.constant 0 : index
    %c0_29 = arith.constant 0 : index
    %75 = vector.load %arg5[%c0_27, %c0_28, %c0_29] : memref<1x72x128xf32, #tpu.memory_space<vmem>>, vector<1x72x128xf32>
    %76 = vector.shape_cast %75 : vector<1x72x128xf32> to vector<72x128xf32>
    %77 = vector.shape_cast %74 : vector<72x128xf32> to vector<1x72x128xf32>
    tpu.vector_store %arg5[%c0_27, %c0_28, %c0_29], %77 {strides = array<i32>} : memref<1x72x128xf32, #tpu.memory_space<vmem>>, vector<1x72x128xf32>,
    return
  }
  func.func @transform_0(%arg0: i32, %arg1: i32) -> (i32, i32, i32) {
    %c0_i32 = arith.constant 0 : i32
    %0 = arith.addi %c0_i32, %arg1 : i32
    %c0_i32_0 = arith.constant 0 : i32
    %c0_i32_1 = arith.constant 0 : i32
    return %arg0, %c0_i32_0, %0 : i32, i32, i32
  }
  func.func @transform_1(%arg0: i32, %arg1: i32) -> (i32, i32, i32) {
    %c1_i32 = arith.constant 1 : i32
    %0 = arith.addi %c1_i32, %arg1 : i32
    %c0_i32 = arith.constant 0 : i32
    %c0_i32_0 = arith.constant 0 : i32
    return %arg0, %c0_i32, %0 : i32, i32, i32
  }
  func.func @transform_2(%arg0: i32, %arg1: i32) -> (i32, i32, i32) {
    %c2_i32 = arith.constant 2 : i32
    %0 = arith.addi %c2_i32, %arg1 : i32
    %c0_i32 = arith.constant 0 : i32
    %c0_i32_0 = arith.constant 0 : i32
    return %arg0, %c0_i32, %0 : i32, i32, i32
  }
  func.func @transform_3(%arg0: i32, %arg1: i32) -> (i32, i32, i32) {
    %c0_i32 = arith.constant 0 : i32
    %c0_i32_0 = arith.constant 0 : i32
    return %arg0, %c0_i32, %arg1 : i32, i32, i32
  }
}

module attributes {stable_mosaic.version = 11 : i64} {
  func.func @kernel(%arg0: i32, %arg1: i32, %arg2: i32, %arg3: memref<1x256x128xf32, #tpu.memory_space<vmem>>, %arg4: memref<1x128x384xf32, #tpu.memory_space<vmem>>, %arg5: memref<1x128xf32, #tpu.memory_space<vmem>>, %arg6: memref<1x128xf32, #tpu.memory_space<vmem>>, %arg7: memref<1x384xf32, #tpu.memory_space<vmem>>, %arg8: memref<1x256x384xf32, #tpu.memory_space<vmem>>) attributes {dimension_semantics = [#tpu.dimension_semantics<parallel>, #tpu.dimension_semantics<parallel>, #tpu.dimension_semantics<parallel>], iteration_bounds = array<i64: 1, 2, 1>, scalar_prefetch = 0 : i64, scratch_operands = 0 : i64, tpu.core_type = #tpu.core_type<tc>, window_params = [{transform_indices = @transform_0, window_bounds = array<i64: 1, 256, 128>}, {transform_indices = @transform_1, window_bounds = array<i64: 1, 128, 384>}, {pipeline_mode = #tpu.pipeline_mode<synchronous>, transform_indices = @transform_2, window_bounds = array<i64: 1, 128>}, {pipeline_mode = #tpu.pipeline_mode<synchronous>, transform_indices = @transform_3, window_bounds = array<i64: 1, 128>}, {transform_indices = @transform_4, window_bounds = array<i64: 1, 384>}, {transform_indices = @transform_5, window_bounds = array<i64: 1, 256, 384>}]} {
    %c0 = arith.constant 0 : index
    %c0_0 = arith.constant 0 : index
    %c0_1 = arith.constant 0 : index
    %0 = vector.load %arg3[%c0, %c0_0, %c0_1] : memref<1x256x128xf32, #tpu.memory_space<vmem>>, vector<1x256x128xf32>
    %1 = vector.shape_cast %0 : vector<1x256x128xf32> to vector<256x128xf32>
    %cst = arith.constant dense<0.000000e+00> : vector<256xf32>
    %2 = vector.multi_reduction <add>, %1, %cst [1] : vector<256x128xf32> to vector<256xf32>
    %3 = vector.shape_cast %2 : vector<256xf32> to vector<256x1xf32>
    %cst_2 = arith.constant 1.280000e+02 : f32
    %4 = vector.broadcast %cst_2 : f32 to vector<256x1xf32>
    %5 = arith.divf %3, %4 : vector<256x1xf32>
    %6 = vector.broadcast %5 : vector<256x1xf32> to vector<256x128xf32>
    %7 = arith.subf %1, %6 : vector<256x128xf32>
    %8 = arith.mulf %7, %7 : vector<256x128xf32>
    %cst_3 = arith.constant dense<0.000000e+00> : vector<256xf32>
    %9 = vector.multi_reduction <add>, %8, %cst_3 [1] : vector<256x128xf32> to vector<256xf32>
    %10 = vector.shape_cast %9 : vector<256xf32> to vector<256x1xf32>
    %cst_4 = arith.constant 1.280000e+02 : f32
    %11 = vector.broadcast %cst_4 : f32 to vector<256x1xf32>
    %12 = arith.divf %10, %11 : vector<256x1xf32>
    %cst_5 = arith.constant 9.99999997E-7 : f32
    %13 = vector.broadcast %cst_5 : f32 to vector<256x1xf32>
    %14 = arith.addf %12, %13 : vector<256x1xf32>
    %15 = math.rsqrt %14 : vector<256x1xf32>
    %16 = vector.broadcast %15 : vector<256x1xf32> to vector<256x128xf32>
    %17 = arith.mulf %7, %16 : vector<256x128xf32>
    %c0_6 = arith.constant 0 : index
    %c0_7 = arith.constant 0 : index
    %18 = vector.load %arg5[%c0_6, %c0_7] : memref<1x128xf32, #tpu.memory_space<vmem>>, vector<1x128xf32>
    %19 = vector.broadcast %18 : vector<1x128xf32> to vector<256x128xf32>
    %20 = arith.mulf %17, %19 : vector<256x128xf32>
    %c0_8 = arith.constant 0 : index
    %c0_9 = arith.constant 0 : index
    %21 = vector.load %arg6[%c0_8, %c0_9] : memref<1x128xf32, #tpu.memory_space<vmem>>, vector<1x128xf32>
    %22 = vector.broadcast %21 : vector<1x128xf32> to vector<256x128xf32>
    %23 = arith.addf %20, %22 : vector<256x128xf32>
    %c0_10 = arith.constant 0 : index
    %c0_11 = arith.constant 0 : index
    %c0_12 = arith.constant 0 : index
    %24 = vector.load %arg4[%c0_10, %c0_11, %c0_12] : memref<1x128x384xf32, #tpu.memory_space<vmem>>, vector<1x128x384xf32>
    %25 = vector.shape_cast %24 : vector<1x128x384xf32> to vector<128x384xf32>
    %cst_13 = arith.constant dense<0.000000e+00> : vector<256x384xf32>
    %26 = tpu.matmul %23, %25, %cst_13 {dimension_numbers = #tpu.dot_dimension_numbers<[1], [0], [0], [1], [0, 0, 1, 1], [], []>} : vector<256x128xf32>, vector<128x384xf32>, vector<256x384xf32> -> vector<256x384xf32>
    %c0_14 = arith.constant 0 : index
    %c0_15 = arith.constant 0 : index
    %27 = vector.load %arg7[%c0_14, %c0_15] : memref<1x384xf32, #tpu.memory_space<vmem>>, vector<1x384xf32>
    %28 = vector.broadcast %27 : vector<1x384xf32> to vector<256x384xf32>
    %29 = arith.addf %26, %28 : vector<256x384xf32>
    %c0_16 = arith.constant 0 : index
    %c0_17 = arith.constant 0 : index
    %c0_18 = arith.constant 0 : index
    %30 = vector.load %arg8[%c0_16, %c0_17, %c0_18] : memref<1x256x384xf32, #tpu.memory_space<vmem>>, vector<1x256x384xf32>
    %31 = vector.shape_cast %30 : vector<1x256x384xf32> to vector<256x384xf32>
    %32 = vector.shape_cast %29 : vector<256x384xf32> to vector<1x256x384xf32>
    tpu.vector_store %arg8[%c0_16, %c0_17, %c0_18], %32 {strides = array<i32>} : memref<1x256x384xf32, #tpu.memory_space<vmem>>, vector<1x256x384xf32>,
    return
  }
  func.func @transform_0(%arg0: i32, %arg1: i32, %arg2: i32) -> (i32, i32, i32) {
    %c0_i32 = arith.constant 0 : i32
    %c0_i32_0 = arith.constant 0 : i32
    %c0_i32_1 = arith.constant 0 : i32
    return %c0_i32, %arg1, %c0_i32_0 : i32, i32, i32
  }
  func.func @transform_1(%arg0: i32, %arg1: i32, %arg2: i32) -> (i32, i32, i32) {
    %c0_i32 = arith.constant 0 : i32
    %c0_i32_0 = arith.constant 0 : i32
    %c0_i32_1 = arith.constant 0 : i32
    return %c0_i32, %c0_i32_0, %arg2 : i32, i32, i32
  }
  func.func @transform_2(%arg0: i32, %arg1: i32, %arg2: i32) -> (i32, i32) {
    %c0_i32 = arith.constant 0 : i32
    %c0_i32_0 = arith.constant 0 : i32
    %c0_i32_1 = arith.constant 0 : i32
    return %c0_i32, %c0_i32_0 : i32, i32
  }
  func.func @transform_3(%arg0: i32, %arg1: i32, %arg2: i32) -> (i32, i32) {
    %c0_i32 = arith.constant 0 : i32
    %c0_i32_0 = arith.constant 0 : i32
    %c0_i32_1 = arith.constant 0 : i32
    return %c0_i32, %c0_i32_0 : i32, i32
  }
  func.func @transform_4(%arg0: i32, %arg1: i32, %arg2: i32) -> (i32, i32) {
    %c0_i32 = arith.constant 0 : i32
    %c0_i32_0 = arith.constant 0 : i32
    return %c0_i32, %arg2 : i32, i32
  }
  func.func @transform_5(%arg0: i32, %arg1: i32, %arg2: i32) -> (i32, i32, i32) {
    %c0_i32 = arith.constant 0 : i32
    return %arg0, %arg1, %arg2 : i32, i32, i32
  }
}

module attributes {stable_mosaic.version = 11 : i64} {
  func.func @kernel(%arg0: i32, %arg1: i32, %arg2: i32, %arg3: memref<1x72x72xf32, #tpu.memory_space<vmem>>, %arg4: memref<1x72x128xf32, #tpu.memory_space<vmem>>, %arg5: memref<72x1xf32, #tpu.memory_space<vmem>>, %arg6: memref<1x72x128xf32, #tpu.memory_space<vmem>>, %arg7: memref<1x72x128xf32, #tpu.memory_space<vmem>>) attributes {dimension_semantics = [#tpu.dimension_semantics<parallel>, #tpu.dimension_semantics<parallel>, #tpu.dimension_semantics<parallel>], iteration_bounds = array<i64: 4, 1, 1>, scalar_prefetch = 0 : i64, scratch_operands = 0 : i64, tpu.core_type = #tpu.core_type<tc>, window_params = [{transform_indices = @transform_0, window_bounds = array<i64: 1, 72, 72>}, {transform_indices = @transform_1, window_bounds = array<i64: 1, 72, 128>}, {transform_indices = @transform_2, window_bounds = array<i64: 72, 1>}, {transform_indices = @transform_3, window_bounds = array<i64: 1, 72, 128>}, {transform_indices = @transform_4, window_bounds = array<i64: 1, 72, 128>}]} {
    %c0 = arith.constant 0 : index
    %c0_0 = arith.constant 0 : index
    %c0_1 = arith.constant 0 : index
    %0 = vector.load %arg3[%c0, %c0_0, %c0_1] : memref<1x72x72xf32, #tpu.memory_space<vmem>>, vector<1x72x72xf32>
    %1 = vector.shape_cast %0 : vector<1x72x72xf32> to vector<72x72xf32>
    %c0_2 = arith.constant 0 : index
    %c0_3 = arith.constant 0 : index
    %c0_4 = arith.constant 0 : index
    %2 = vector.load %arg4[%c0_2, %c0_3, %c0_4] : memref<1x72x128xf32, #tpu.memory_space<vmem>>, vector<1x72x128xf32>
    %3 = vector.shape_cast %2 : vector<1x72x128xf32> to vector<72x128xf32>
    %cst = arith.constant dense<0.000000e+00> : vector<72x128xf32>
    %4 = tpu.matmul %1, %3, %cst {dimension_numbers = #tpu.dot_dimension_numbers<[1], [0], [0], [1], [0, 0, 1, 1], [], []>} : vector<72x72xf32>, vector<72x128xf32>, vector<72x128xf32> -> vector<72x128xf32>
    %c0_5 = arith.constant 0 : index
    %c0_6 = arith.constant 0 : index
    %5 = vector.load %arg5[%c0_5, %c0_6] : memref<72x1xf32, #tpu.memory_space<vmem>>, vector<72x1xf32>
    %6 = vector.broadcast %5 : vector<72x1xf32> to vector<72x128xf32>
    %7 = arith.addf %4, %6 : vector<72x128xf32>
    %c0_7 = arith.constant 0 : index
    %c0_8 = arith.constant 0 : index
    %c0_9 = arith.constant 0 : index
    %8 = vector.load %arg6[%c0_7, %c0_8, %c0_9] : memref<1x72x128xf32, #tpu.memory_space<vmem>>, vector<1x72x128xf32>
    %9 = vector.shape_cast %8 : vector<1x72x128xf32> to vector<72x128xf32>
    %10 = arith.addf %7, %9 : vector<72x128xf32>
    %c0_10 = arith.constant 0 : index
    %c0_11 = arith.constant 0 : index
    %c0_12 = arith.constant 0 : index
    %11 = vector.load %arg7[%c0_10, %c0_11, %c0_12] : memref<1x72x128xf32, #tpu.memory_space<vmem>>, vector<1x72x128xf32>
    %12 = vector.shape_cast %11 : vector<1x72x128xf32> to vector<72x128xf32>
    %13 = vector.shape_cast %10 : vector<72x128xf32> to vector<1x72x128xf32>
    tpu.vector_store %arg7[%c0_10, %c0_11, %c0_12], %13 {strides = array<i32>} : memref<1x72x128xf32, #tpu.memory_space<vmem>>, vector<1x72x128xf32>,
    return
  }
  func.func @transform_0(%arg0: i32, %arg1: i32, %arg2: i32) -> (i32, i32, i32) {
    %c0_i32 = arith.constant 0 : i32
    %c0_i32_0 = arith.constant 0 : i32
    %c0_i32_1 = arith.constant 0 : i32
    return %c0_i32, %arg1, %c0_i32_0 : i32, i32, i32
  }
  func.func @transform_1(%arg0: i32, %arg1: i32, %arg2: i32) -> (i32, i32, i32) {
    %c0_i32 = arith.constant 0 : i32
    %c0_i32_0 = arith.constant 0 : i32
    return %arg0, %c0_i32, %arg2 : i32, i32, i32
  }
  func.func @transform_2(%arg0: i32, %arg1: i32, %arg2: i32) -> (i32, i32) {
    %c0_i32 = arith.constant 0 : i32
    %c0_i32_0 = arith.constant 0 : i32
    return %arg1, %c0_i32 : i32, i32
  }
  func.func @transform_3(%arg0: i32, %arg1: i32, %arg2: i32) -> (i32, i32, i32) {
    %c0_i32 = arith.constant 0 : i32
    return %arg0, %arg1, %arg2 : i32, i32, i32
  }
  func.func @transform_4(%arg0: i32, %arg1: i32, %arg2: i32) -> (i32, i32, i32) {
    %c0_i32 = arith.constant 0 : i32
    return %arg0, %arg1, %arg2 : i32, i32, i32
  }
}

module attributes {stable_mosaic.version = 11 : i64} {
  func.func @kernel(%arg0: i32, %arg1: i32, %arg2: i32, %arg3: memref<1x256x128xf32, #tpu.memory_space<vmem>>, %arg4: memref<1x128x256xf32, #tpu.memory_space<vmem>>, %arg5: memref<1x128xf32, #tpu.memory_space<vmem>>, %arg6: memref<1x128xf32, #tpu.memory_space<vmem>>, %arg7: memref<1x256xf32, #tpu.memory_space<vmem>>, %arg8: memref<1x256x256xf32, #tpu.memory_space<vmem>>) attributes {dimension_semantics = [#tpu.dimension_semantics<parallel>, #tpu.dimension_semantics<parallel>, #tpu.dimension_semantics<parallel>], iteration_bounds = array<i64: 1, 2, 1>, scalar_prefetch = 0 : i64, scratch_operands = 0 : i64, tpu.core_type = #tpu.core_type<tc>, window_params = [{transform_indices = @transform_0, window_bounds = array<i64: 1, 256, 128>}, {transform_indices = @transform_1, window_bounds = array<i64: 1, 128, 256>}, {pipeline_mode = #tpu.pipeline_mode<synchronous>, transform_indices = @transform_2, window_bounds = array<i64: 1, 128>}, {pipeline_mode = #tpu.pipeline_mode<synchronous>, transform_indices = @transform_3, window_bounds = array<i64: 1, 128>}, {transform_indices = @transform_4, window_bounds = array<i64: 1, 256>}, {transform_indices = @transform_5, window_bounds = array<i64: 1, 256, 256>}]} {
    %c0 = arith.constant 0 : index
    %c0_0 = arith.constant 0 : index
    %c0_1 = arith.constant 0 : index
    %0 = vector.load %arg3[%c0, %c0_0, %c0_1] : memref<1x256x128xf32, #tpu.memory_space<vmem>>, vector<1x256x128xf32>
    %1 = vector.shape_cast %0 : vector<1x256x128xf32> to vector<256x128xf32>
    %cst = arith.constant dense<0.000000e+00> : vector<256xf32>
    %2 = vector.multi_reduction <add>, %1, %cst [1] : vector<256x128xf32> to vector<256xf32>
    %3 = vector.shape_cast %2 : vector<256xf32> to vector<256x1xf32>
    %cst_2 = arith.constant 1.280000e+02 : f32
    %4 = vector.broadcast %cst_2 : f32 to vector<256x1xf32>
    %5 = arith.divf %3, %4 : vector<256x1xf32>
    %6 = vector.broadcast %5 : vector<256x1xf32> to vector<256x128xf32>
    %7 = arith.subf %1, %6 : vector<256x128xf32>
    %8 = arith.mulf %7, %7 : vector<256x128xf32>
    %cst_3 = arith.constant dense<0.000000e+00> : vector<256xf32>
    %9 = vector.multi_reduction <add>, %8, %cst_3 [1] : vector<256x128xf32> to vector<256xf32>
    %10 = vector.shape_cast %9 : vector<256xf32> to vector<256x1xf32>
    %cst_4 = arith.constant 1.280000e+02 : f32
    %11 = vector.broadcast %cst_4 : f32 to vector<256x1xf32>
    %12 = arith.divf %10, %11 : vector<256x1xf32>
    %cst_5 = arith.constant 9.99999997E-7 : f32
    %13 = vector.broadcast %cst_5 : f32 to vector<256x1xf32>
    %14 = arith.addf %12, %13 : vector<256x1xf32>
    %15 = math.rsqrt %14 : vector<256x1xf32>
    %16 = vector.broadcast %15 : vector<256x1xf32> to vector<256x128xf32>
    %17 = arith.mulf %7, %16 : vector<256x128xf32>
    %c0_6 = arith.constant 0 : index
    %c0_7 = arith.constant 0 : index
    %18 = vector.load %arg5[%c0_6, %c0_7] : memref<1x128xf32, #tpu.memory_space<vmem>>, vector<1x128xf32>
    %19 = vector.broadcast %18 : vector<1x128xf32> to vector<256x128xf32>
    %20 = arith.mulf %17, %19 : vector<256x128xf32>
    %c0_8 = arith.constant 0 : index
    %c0_9 = arith.constant 0 : index
    %21 = vector.load %arg6[%c0_8, %c0_9] : memref<1x128xf32, #tpu.memory_space<vmem>>, vector<1x128xf32>
    %22 = vector.broadcast %21 : vector<1x128xf32> to vector<256x128xf32>
    %23 = arith.addf %20, %22 : vector<256x128xf32>
    %c0_10 = arith.constant 0 : index
    %c0_11 = arith.constant 0 : index
    %c0_12 = arith.constant 0 : index
    %24 = vector.load %arg4[%c0_10, %c0_11, %c0_12] : memref<1x128x256xf32, #tpu.memory_space<vmem>>, vector<1x128x256xf32>
    %25 = vector.shape_cast %24 : vector<1x128x256xf32> to vector<128x256xf32>
    %cst_13 = arith.constant dense<0.000000e+00> : vector<256x256xf32>
    %26 = tpu.matmul %23, %25, %cst_13 {dimension_numbers = #tpu.dot_dimension_numbers<[1], [0], [0], [1], [0, 0, 1, 1], [], []>} : vector<256x128xf32>, vector<128x256xf32>, vector<256x256xf32> -> vector<256x256xf32>
    %c0_14 = arith.constant 0 : index
    %c0_15 = arith.constant 0 : index
    %27 = vector.load %arg7[%c0_14, %c0_15] : memref<1x256xf32, #tpu.memory_space<vmem>>, vector<1x256xf32>
    %28 = vector.broadcast %27 : vector<1x256xf32> to vector<256x256xf32>
    %29 = arith.addf %26, %28 : vector<256x256xf32>
    %30 = arith.mulf %29, %29 : vector<256x256xf32>
    %31 = arith.mulf %29, %30 : vector<256x256xf32>
    %cst_16 = arith.constant 4.471500e-02 : f32
    %32 = vector.broadcast %cst_16 : f32 to vector<256x256xf32>
    %33 = arith.mulf %32, %31 : vector<256x256xf32>
    %34 = arith.addf %29, %33 : vector<256x256xf32>
    %cst_17 = arith.constant 0.797884583 : f32
    %35 = vector.broadcast %cst_17 : f32 to vector<256x256xf32>
    %36 = arith.mulf %35, %34 : vector<256x256xf32>
    %37 = math.tanh %36 : vector<256x256xf32>
    %cst_18 = arith.constant 1.000000e+00 : f32
    %38 = vector.broadcast %cst_18 : f32 to vector<256x256xf32>
    %39 = arith.addf %38, %37 : vector<256x256xf32>
    %cst_19 = arith.constant 5.000000e-01 : f32
    %40 = vector.broadcast %cst_19 : f32 to vector<256x256xf32>
    %41 = arith.mulf %40, %39 : vector<256x256xf32>
    %42 = arith.mulf %29, %41 : vector<256x256xf32>
    %c0_20 = arith.constant 0 : index
    %c0_21 = arith.constant 0 : index
    %c0_22 = arith.constant 0 : index
    %43 = vector.load %arg8[%c0_20, %c0_21, %c0_22] : memref<1x256x256xf32, #tpu.memory_space<vmem>>, vector<1x256x256xf32>
    %44 = vector.shape_cast %43 : vector<1x256x256xf32> to vector<256x256xf32>
    %45 = vector.shape_cast %42 : vector<256x256xf32> to vector<1x256x256xf32>
    tpu.vector_store %arg8[%c0_20, %c0_21, %c0_22], %45 {strides = array<i32>} : memref<1x256x256xf32, #tpu.memory_space<vmem>>, vector<1x256x256xf32>,
    return
  }
  func.func @transform_0(%arg0: i32, %arg1: i32, %arg2: i32) -> (i32, i32, i32) {
    %c0_i32 = arith.constant 0 : i32
    %c0_i32_0 = arith.constant 0 : i32
    %c0_i32_1 = arith.constant 0 : i32
    return %c0_i32, %arg1, %c0_i32_0 : i32, i32, i32
  }
  func.func @transform_1(%arg0: i32, %arg1: i32, %arg2: i32) -> (i32, i32, i32) {
    %c0_i32 = arith.constant 0 : i32
    %c0_i32_0 = arith.constant 0 : i32
    %c0_i32_1 = arith.constant 0 : i32
    return %c0_i32, %c0_i32_0, %arg2 : i32, i32, i32
  }
  func.func @transform_2(%arg0: i32, %arg1: i32, %arg2: i32) -> (i32, i32) {
    %c0_i32 = arith.constant 0 : i32
    %c0_i32_0 = arith.constant 0 : i32
    %c0_i32_1 = arith.constant 0 : i32
    return %c0_i32, %c0_i32_0 : i32, i32
  }
  func.func @transform_3(%arg0: i32, %arg1: i32, %arg2: i32) -> (i32, i32) {
    %c0_i32 = arith.constant 0 : i32
    %c0_i32_0 = arith.constant 0 : i32
    %c0_i32_1 = arith.constant 0 : i32
    return %c0_i32, %c0_i32_0 : i32, i32
  }
  func.func @transform_4(%arg0: i32, %arg1: i32, %arg2: i32) -> (i32, i32) {
    %c0_i32 = arith.constant 0 : i32
    %c0_i32_0 = arith.constant 0 : i32
    return %c0_i32, %arg2 : i32, i32
  }
  func.func @transform_5(%arg0: i32, %arg1: i32, %arg2: i32) -> (i32, i32, i32) {
    %c0_i32 = arith.constant 0 : i32
    return %arg0, %arg1, %arg2 : i32, i32, i32
  }
}

module attributes {stable_mosaic.version = 11 : i64} {
  func.func @kernel(%arg0: i32, %arg1: i32, %arg2: i32, %arg3: memref<1x256x256xf32, #tpu.memory_space<vmem>>, %arg4: memref<1x256x128xf32, #tpu.memory_space<vmem>>, %arg5: memref<1x128xf32, #tpu.memory_space<vmem>>, %arg6: memref<1x256x128xf32, #tpu.memory_space<vmem>>, %arg7: memref<1x256x128xf32, #tpu.memory_space<vmem>>) attributes {dimension_semantics = [#tpu.dimension_semantics<parallel>, #tpu.dimension_semantics<parallel>, #tpu.dimension_semantics<parallel>], iteration_bounds = array<i64: 1, 2, 1>, scalar_prefetch = 0 : i64, scratch_operands = 0 : i64, tpu.core_type = #tpu.core_type<tc>, window_params = [{transform_indices = @transform_0, window_bounds = array<i64: 1, 256, 256>}, {transform_indices = @transform_1, window_bounds = array<i64: 1, 256, 128>}, {transform_indices = @transform_2, window_bounds = array<i64: 1, 128>}, {transform_indices = @transform_3, window_bounds = array<i64: 1, 256, 128>}, {transform_indices = @transform_4, window_bounds = array<i64: 1, 256, 128>}]} {
    %c0 = arith.constant 0 : index
    %c0_0 = arith.constant 0 : index
    %c0_1 = arith.constant 0 : index
    %0 = vector.load %arg3[%c0, %c0_0, %c0_1] : memref<1x256x256xf32, #tpu.memory_space<vmem>>, vector<1x256x256xf32>
    %1 = vector.shape_cast %0 : vector<1x256x256xf32> to vector<256x256xf32>
    %c0_2 = arith.constant 0 : index
    %c0_3 = arith.constant 0 : index
    %c0_4 = arith.constant 0 : index
    %2 = vector.load %arg4[%c0_2, %c0_3, %c0_4] : memref<1x256x128xf32, #tpu.memory_space<vmem>>, vector<1x256x128xf32>
    %3 = vector.shape_cast %2 : vector<1x256x128xf32> to vector<256x128xf32>
    %cst = arith.constant dense<0.000000e+00> : vector<256x128xf32>
    %4 = tpu.matmul %1, %3, %cst {dimension_numbers = #tpu.dot_dimension_numbers<[1], [0], [0], [1], [0, 0, 1, 1], [], []>} : vector<256x256xf32>, vector<256x128xf32>, vector<256x128xf32> -> vector<256x128xf32>
    %c0_5 = arith.constant 0 : index
    %c0_6 = arith.constant 0 : index
    %5 = vector.load %arg5[%c0_5, %c0_6] : memref<1x128xf32, #tpu.memory_space<vmem>>, vector<1x128xf32>
    %6 = vector.broadcast %5 : vector<1x128xf32> to vector<256x128xf32>
    %7 = arith.addf %4, %6 : vector<256x128xf32>
    %c0_7 = arith.constant 0 : index
    %c0_8 = arith.constant 0 : index
    %c0_9 = arith.constant 0 : index
    %8 = vector.load %arg6[%c0_7, %c0_8, %c0_9] : memref<1x256x128xf32, #tpu.memory_space<vmem>>, vector<1x256x128xf32>
    %9 = vector.shape_cast %8 : vector<1x256x128xf32> to vector<256x128xf32>
    %10 = arith.addf %7, %9 : vector<256x128xf32>
    %c0_10 = arith.constant 0 : index
    %c0_11 = arith.constant 0 : index
    %c0_12 = arith.constant 0 : index
    %11 = vector.load %arg7[%c0_10, %c0_11, %c0_12] : memref<1x256x128xf32, #tpu.memory_space<vmem>>, vector<1x256x128xf32>
    %12 = vector.shape_cast %11 : vector<1x256x128xf32> to vector<256x128xf32>
    %13 = vector.shape_cast %10 : vector<256x128xf32> to vector<1x256x128xf32>
    tpu.vector_store %arg7[%c0_10, %c0_11, %c0_12], %13 {strides = array<i32>} : memref<1x256x128xf32, #tpu.memory_space<vmem>>, vector<1x256x128xf32>,
    return
  }
  func.func @transform_0(%arg0: i32, %arg1: i32, %arg2: i32) -> (i32, i32, i32) {
    %c0_i32 = arith.constant 0 : i32
    %c0_i32_0 = arith.constant 0 : i32
    %c0_i32_1 = arith.constant 0 : i32
    return %c0_i32, %arg1, %c0_i32_0 : i32, i32, i32
  }
  func.func @transform_1(%arg0: i32, %arg1: i32, %arg2: i32) -> (i32, i32, i32) {
    %c0_i32 = arith.constant 0 : i32
    %c0_i32_0 = arith.constant 0 : i32
    %c0_i32_1 = arith.constant 0 : i32
    return %c0_i32, %c0_i32_0, %arg2 : i32, i32, i32
  }
  func.func @transform_2(%arg0: i32, %arg1: i32, %arg2: i32) -> (i32, i32) {
    %c0_i32 = arith.constant 0 : i32
    %c0_i32_0 = arith.constant 0 : i32
    return %c0_i32, %arg2 : i32, i32
  }
  func.func @transform_3(%arg0: i32, %arg1: i32, %arg2: i32) -> (i32, i32, i32) {
    %c0_i32 = arith.constant 0 : i32
    return %arg0, %arg1, %arg2 : i32, i32, i32
  }
  func.func @transform_4(%arg0: i32, %arg1: i32, %arg2: i32) -> (i32, i32, i32) {
    %c0_i32 = arith.constant 0 : i32
    return %arg0, %arg1, %arg2 : i32, i32, i32
  }
}

module attributes {stable_mosaic.version = 11 : i64} {
  func.func @kernel(%arg0: i32, %arg1: i32, %arg2: i32, %arg3: memref<1x256x128xf32, #tpu.memory_space<vmem>>, %arg4: memref<1x128x384xf32, #tpu.memory_space<vmem>>, %arg5: memref<1x128xf32, #tpu.memory_space<vmem>>, %arg6: memref<1x128xf32, #tpu.memory_space<vmem>>, %arg7: memref<1x384xf32, #tpu.memory_space<vmem>>, %arg8: memref<1x256x384xf32, #tpu.memory_space<vmem>>) attributes {dimension_semantics = [#tpu.dimension_semantics<parallel>, #tpu.dimension_semantics<parallel>, #tpu.dimension_semantics<parallel>], iteration_bounds = array<i64: 1, 2, 1>, scalar_prefetch = 0 : i64, scratch_operands = 0 : i64, tpu.core_type = #tpu.core_type<tc>, window_params = [{transform_indices = @transform_0, window_bounds = array<i64: 1, 256, 128>}, {transform_indices = @transform_1, window_bounds = array<i64: 1, 128, 384>}, {pipeline_mode = #tpu.pipeline_mode<synchronous>, transform_indices = @transform_2, window_bounds = array<i64: 1, 128>}, {pipeline_mode = #tpu.pipeline_mode<synchronous>, transform_indices = @transform_3, window_bounds = array<i64: 1, 128>}, {transform_indices = @transform_4, window_bounds = array<i64: 1, 384>}, {transform_indices = @transform_5, window_bounds = array<i64: 1, 256, 384>}]} {
    %c0 = arith.constant 0 : index
    %c0_0 = arith.constant 0 : index
    %c0_1 = arith.constant 0 : index
    %0 = vector.load %arg3[%c0, %c0_0, %c0_1] : memref<1x256x128xf32, #tpu.memory_space<vmem>>, vector<1x256x128xf32>
    %1 = vector.shape_cast %0 : vector<1x256x128xf32> to vector<256x128xf32>
    %cst = arith.constant dense<0.000000e+00> : vector<256xf32>
    %2 = vector.multi_reduction <add>, %1, %cst [1] : vector<256x128xf32> to vector<256xf32>
    %3 = vector.shape_cast %2 : vector<256xf32> to vector<256x1xf32>
    %cst_2 = arith.constant 1.280000e+02 : f32
    %4 = vector.broadcast %cst_2 : f32 to vector<256x1xf32>
    %5 = arith.divf %3, %4 : vector<256x1xf32>
    %6 = vector.broadcast %5 : vector<256x1xf32> to vector<256x128xf32>
    %7 = arith.subf %1, %6 : vector<256x128xf32>
    %8 = arith.mulf %7, %7 : vector<256x128xf32>
    %cst_3 = arith.constant dense<0.000000e+00> : vector<256xf32>
    %9 = vector.multi_reduction <add>, %8, %cst_3 [1] : vector<256x128xf32> to vector<256xf32>
    %10 = vector.shape_cast %9 : vector<256xf32> to vector<256x1xf32>
    %cst_4 = arith.constant 1.280000e+02 : f32
    %11 = vector.broadcast %cst_4 : f32 to vector<256x1xf32>
    %12 = arith.divf %10, %11 : vector<256x1xf32>
    %cst_5 = arith.constant 9.99999997E-7 : f32
    %13 = vector.broadcast %cst_5 : f32 to vector<256x1xf32>
    %14 = arith.addf %12, %13 : vector<256x1xf32>
    %15 = math.rsqrt %14 : vector<256x1xf32>
    %16 = vector.broadcast %15 : vector<256x1xf32> to vector<256x128xf32>
    %17 = arith.mulf %7, %16 : vector<256x128xf32>
    %c0_6 = arith.constant 0 : index
    %c0_7 = arith.constant 0 : index
    %18 = vector.load %arg5[%c0_6, %c0_7] : memref<1x128xf32, #tpu.memory_space<vmem>>, vector<1x128xf32>
    %19 = vector.broadcast %18 : vector<1x128xf32> to vector<256x128xf32>
    %20 = arith.mulf %17, %19 : vector<256x128xf32>
    %c0_8 = arith.constant 0 : index
    %c0_9 = arith.constant 0 : index
    %21 = vector.load %arg6[%c0_8, %c0_9] : memref<1x128xf32, #tpu.memory_space<vmem>>, vector<1x128xf32>
    %22 = vector.broadcast %21 : vector<1x128xf32> to vector<256x128xf32>
    %23 = arith.addf %20, %22 : vector<256x128xf32>
    %c0_10 = arith.constant 0 : index
    %c0_11 = arith.constant 0 : index
    %c0_12 = arith.constant 0 : index
    %24 = vector.load %arg4[%c0_10, %c0_11, %c0_12] : memref<1x128x384xf32, #tpu.memory_space<vmem>>, vector<1x128x384xf32>
    %25 = vector.shape_cast %24 : vector<1x128x384xf32> to vector<128x384xf32>
    %cst_13 = arith.constant dense<0.000000e+00> : vector<256x384xf32>
    %26 = tpu.matmul %23, %25, %cst_13 {dimension_numbers = #tpu.dot_dimension_numbers<[1], [0], [0], [1], [0, 0, 1, 1], [], []>} : vector<256x128xf32>, vector<128x384xf32>, vector<256x384xf32> -> vector<256x384xf32>
    %c0_14 = arith.constant 0 : index
    %c0_15 = arith.constant 0 : index
    %27 = vector.load %arg7[%c0_14, %c0_15] : memref<1x384xf32, #tpu.memory_space<vmem>>, vector<1x384xf32>
    %28 = vector.broadcast %27 : vector<1x384xf32> to vector<256x384xf32>
    %29 = arith.addf %26, %28 : vector<256x384xf32>
    %c0_16 = arith.constant 0 : index
    %c0_17 = arith.constant 0 : index
    %c0_18 = arith.constant 0 : index
    %30 = vector.load %arg8[%c0_16, %c0_17, %c0_18] : memref<1x256x384xf32, #tpu.memory_space<vmem>>, vector<1x256x384xf32>
    %31 = vector.shape_cast %30 : vector<1x256x384xf32> to vector<256x384xf32>
    %32 = vector.shape_cast %29 : vector<256x384xf32> to vector<1x256x384xf32>
    tpu.vector_store %arg8[%c0_16, %c0_17, %c0_18], %32 {strides = array<i32>} : memref<1x256x384xf32, #tpu.memory_space<vmem>>, vector<1x256x384xf32>,
    return
  }
  func.func @transform_0(%arg0: i32, %arg1: i32, %arg2: i32) -> (i32, i32, i32) {
    %c0_i32 = arith.constant 0 : i32
    %c0_i32_0 = arith.constant 0 : i32
    %c0_i32_1 = arith.constant 0 : i32
    return %c0_i32, %arg1, %c0_i32_0 : i32, i32, i32
  }
  func.func @transform_1(%arg0: i32, %arg1: i32, %arg2: i32) -> (i32, i32, i32) {
    %c0_i32 = arith.constant 0 : i32
    %c0_i32_0 = arith.constant 0 : i32
    %c0_i32_1 = arith.constant 0 : i32
    return %c0_i32, %c0_i32_0, %arg2 : i32, i32, i32
  }
  func.func @transform_2(%arg0: i32, %arg1: i32, %arg2: i32) -> (i32, i32) {
    %c0_i32 = arith.constant 0 : i32
    %c0_i32_0 = arith.constant 0 : i32
    %c0_i32_1 = arith.constant 0 : i32
    return %c0_i32, %c0_i32_0 : i32, i32
  }
  func.func @transform_3(%arg0: i32, %arg1: i32, %arg2: i32) -> (i32, i32) {
    %c0_i32 = arith.constant 0 : i32
    %c0_i32_0 = arith.constant 0 : i32
    %c0_i32_1 = arith.constant 0 : i32
    return %c0_i32, %c0_i32_0 : i32, i32
  }
  func.func @transform_4(%arg0: i32, %arg1: i32, %arg2: i32) -> (i32, i32) {
    %c0_i32 = arith.constant 0 : i32
    %c0_i32_0 = arith.constant 0 : i32
    return %c0_i32, %arg2 : i32, i32
  }
  func.func @transform_5(%arg0: i32, %arg1: i32, %arg2: i32) -> (i32, i32, i32) {
    %c0_i32 = arith.constant 0 : i32
    return %arg0, %arg1, %arg2 : i32, i32, i32
  }
}

module attributes {stable_mosaic.version = 11 : i64} {
  func.func @kernel(%arg0: i32, %arg1: i32, %arg2: i32, %arg3: memref<1x256x256xf32, #tpu.memory_space<vmem>>, %arg4: memref<1x256x128xf32, #tpu.memory_space<vmem>>, %arg5: memref<1x128xf32, #tpu.memory_space<vmem>>, %arg6: memref<1x256x128xf32, #tpu.memory_space<vmem>>, %arg7: memref<1x256x128xf32, #tpu.memory_space<vmem>>) attributes {dimension_semantics = [#tpu.dimension_semantics<parallel>, #tpu.dimension_semantics<parallel>, #tpu.dimension_semantics<parallel>], iteration_bounds = array<i64: 1, 2, 1>, scalar_prefetch = 0 : i64, scratch_operands = 0 : i64, tpu.core_type = #tpu.core_type<tc>, window_params = [{transform_indices = @transform_0, window_bounds = array<i64: 1, 256, 256>}, {transform_indices = @transform_1, window_bounds = array<i64: 1, 256, 128>}, {transform_indices = @transform_2, window_bounds = array<i64: 1, 128>}, {transform_indices = @transform_3, window_bounds = array<i64: 1, 256, 128>}, {transform_indices = @transform_4, window_bounds = array<i64: 1, 256, 128>}]} {
    %c0 = arith.constant 0 : index
    %c0_0 = arith.constant 0 : index
    %c0_1 = arith.constant 0 : index
    %0 = vector.load %arg3[%c0, %c0_0, %c0_1] : memref<1x256x256xf32, #tpu.memory_space<vmem>>, vector<1x256x256xf32>
    %1 = vector.shape_cast %0 : vector<1x256x256xf32> to vector<256x256xf32>
    %c0_2 = arith.constant 0 : index
    %c0_3 = arith.constant 0 : index
    %c0_4 = arith.constant 0 : index
    %2 = vector.load %arg4[%c0_2, %c0_3, %c0_4] : memref<1x256x128xf32, #tpu.memory_space<vmem>>, vector<1x256x128xf32>
    %3 = vector.shape_cast %2 : vector<1x256x128xf32> to vector<256x128xf32>
    %cst = arith.constant dense<0.000000e+00> : vector<256x128xf32>
    %4 = tpu.matmul %1, %3, %cst {dimension_numbers = #tpu.dot_dimension_numbers<[1], [0], [0], [1], [0, 0, 1, 1], [], []>} : vector<256x256xf32>, vector<256x128xf32>, vector<256x128xf32> -> vector<256x128xf32>
    %c0_5 = arith.constant 0 : index
    %c0_6 = arith.constant 0 : index
    %5 = vector.load %arg5[%c0_5, %c0_6] : memref<1x128xf32, #tpu.memory_space<vmem>>, vector<1x128xf32>
    %6 = vector.broadcast %5 : vector<1x128xf32> to vector<256x128xf32>
    %7 = arith.addf %4, %6 : vector<256x128xf32>
    %c0_7 = arith.constant 0 : index
    %c0_8 = arith.constant 0 : index
    %c0_9 = arith.constant 0 : index
    %8 = vector.load %arg6[%c0_7, %c0_8, %c0_9] : memref<1x256x128xf32, #tpu.memory_space<vmem>>, vector<1x256x128xf32>
    %9 = vector.shape_cast %8 : vector<1x256x128xf32> to vector<256x128xf32>
    %10 = arith.addf %7, %9 : vector<256x128xf32>
    %c0_10 = arith.constant 0 : index
    %c0_11 = arith.constant 0 : index
    %c0_12 = arith.constant 0 : index
    %11 = vector.load %arg7[%c0_10, %c0_11, %c0_12] : memref<1x256x128xf32, #tpu.memory_space<vmem>>, vector<1x256x128xf32>
    %12 = vector.shape_cast %11 : vector<1x256x128xf32> to vector<256x128xf32>
    %13 = vector.shape_cast %10 : vector<256x128xf32> to vector<1x256x128xf32>
    tpu.vector_store %arg7[%c0_10, %c0_11, %c0_12], %13 {strides = array<i32>} : memref<1x256x128xf32, #tpu.memory_space<vmem>>, vector<1x256x128xf32>,
    return
  }
  func.func @transform_0(%arg0: i32, %arg1: i32, %arg2: i32) -> (i32, i32, i32) {
    %c0_i32 = arith.constant 0 : i32
    %c0_i32_0 = arith.constant 0 : i32
    %c0_i32_1 = arith.constant 0 : i32
    return %c0_i32, %arg1, %c0_i32_0 : i32, i32, i32
  }
  func.func @transform_1(%arg0: i32, %arg1: i32, %arg2: i32) -> (i32, i32, i32) {
    %c0_i32 = arith.constant 0 : i32
    %c0_i32_0 = arith.constant 0 : i32
    %c0_i32_1 = arith.constant 0 : i32
    return %c0_i32, %c0_i32_0, %arg2 : i32, i32, i32
  }
  func.func @transform_2(%arg0: i32, %arg1: i32, %arg2: i32) -> (i32, i32) {
    %c0_i32 = arith.constant 0 : i32
    %c0_i32_0 = arith.constant 0 : i32
    return %c0_i32, %arg2 : i32, i32
  }
  func.func @transform_3(%arg0: i32, %arg1: i32, %arg2: i32) -> (i32, i32, i32) {
    %c0_i32 = arith.constant 0 : i32
    return %arg0, %arg1, %arg2 : i32, i32, i32
  }
  func.func @transform_4(%arg0: i32, %arg1: i32, %arg2: i32) -> (i32, i32, i32) {
    %c0_i32 = arith.constant 0 : i32
    return %arg0, %arg1, %arg2 : i32, i32, i32
  }
}

</mosaic_0001>

<bundles_post_ra>
// kernel: conformer_forward.12
= control target key start
LH: loop header
LB: loop body
LE: loop exit
PB: predicated region body
PF: predicated region fallthrough
CT: control target
= control target key end

     0   :  { %s916_s15 = smov 0   ;;  %s918_s16 = smov 0   ;;  %s1073_s0 = inlined_call_operand.vmem [shape: f32[1,72,72], index: 0, kind: input, shape index: {}]   ;;  %s1074_s1 = inlined_call_operand.vmem [shape: f32[4,72,128], index: 1, kind: input, shape index: {}]   ;;  %s1075_s2 = inlined_call_operand.vmem [shape: f32[72,1], index: 2, kind: input, shape index: {}]   ;;  %s1076_s3 = inlined_call_operand.vmem [shape: f32[4,72,128], index: 3, kind: input, shape index: {}]   ;;  %s1077_s4 = inlined_call_operand.vmem [shape: f32[4,72,128], index: 4, kind: output, shape index: {}]  }
   0x1   :  { %s920_s17 = smov 0  }
   0x2 LB: > { %s33_s18 = sadd.s32 1, %s881_s16  ;;  %p732_p0 = scmp.ge.s32.totalorder %s885_s17, 1  ;;  %s885_s17 = sphi %s920_s17, %s14_s17   ;;  %s881_s16 = sphi %s918_s16, %s1079_s16   ;;  %s877_s15 = sphi %s916_s15, %s1078_s15  }
   0x3   : > { %p35_p1 = scmp.ge.s32.totalorder %s33_s18, 4  ;;  %p234_p2 = scmp.lt.s32.totalorder %s885_s17, 5 }
   0x5   : > { %s1081_s18 = smov (%p35_p1, %s33_s18), 0  ;;  %p235_p3 = pnand %p732_p0, %p234_p2 }
   0x6   : > { %p298_p4 = scmp.lt.s32.totalorder (!%p235_p3), %s877_s15, 3  ;;  %v887_v0 = vmov (!%p235_p3), 0.0|0.0   ;;  %vm888_vm0 = vmmov (!%p235_p3), 0   ;;  %v889_v1 = vmov (!%p235_p3), 0.0   ;;  %v890_v2 = vmov (!%p235_p3), 0   ;;  %v356_v3 = vld [vmem:[%s1075_s2] sm:$0xff] (!%p235_p3) }
   0x7   : > { %238 = sbr.rel (%p235_p3) target bundleno = 271 (0x10f), region = 36  ;;  %810 = vmatprep.subr.bf16.mxu0 (!%p235_p3), %v887_v0  ;;  %822 = vmatprep.subr.bf16.mxu1 (!%p235_p3), %v887_v0  ;;  %v358_v4 = vld [vmem:[%s1075_s2 + $0x10] sm:$0xff] (!%p235_p3)  ;;  %v357_v5 = vld [vmem:[%s1075_s2 + $0x8] sm:$0xff] (!%p235_p3)  ;;  %v359_v6 = vld [vmem:[%s1075_s2 + $0x18] sm:$0xff] (!%p235_p3)  ;;  %vm410_vm1 = vcmask (!%p235_p3), 588800  }
   0x8   : > { %783 = vmatprep.mubr.msk.f32.mxu0 (!%p235_p3), %vm888_vm0, %v889_v1  ;;  %798 = vmatprep.mubr.msk.f32.mxu1 (!%p235_p3), %vm888_vm0, %v889_v1  ;;  %v360_v12 = vld [vmem:[%s1075_s2 + $0x20] sm:$0xff] (!%p235_p3)  ;;  %v361_v14 = vld [vmem:[%s1075_s2 + $0x28] sm:$0xff] (!%p235_p3)  ;;  %v362_v17 = vld [vmem:[%s1075_s2 + $0x30] sm:$0xff] (!%p235_p3) }
   0x9   : > { %861 = vset.pattern.permute.xlu0 (!%p235_p3), %v890_v2  ;;  %862 = vset.pattern.permute.xlu1 (!%p235_p3), %v890_v2  ;;  %v363_v19 = vld [vmem:[%s1075_s2 + $0x38] sm:$0xff] (!%p235_p3)  ;;  %v364_v22 = vld [vmem:[%s1075_s2 + $0x40] sm:$0xff] (!%p235_p3)  ;;  %v343_v26 = vld [vmem:[%s1073_s0 + $0x28] sm:$0xff] (!%p235_p3) }
   0xa   : > { %367 = vperm.xlu0 (!%p235_p3), %861, %v356_v3   ;;  %377 = vperm.xlu1 (!%p235_p3), %862, %v358_v4   ;;  %v338_v25 = vld [vmem:[%s1073_s0] sm:$0xff] (!%p235_p3)  ;;  %v339_v27 = vld [vmem:[%s1073_s0 + $0x8] sm:$0xff] (!%p235_p3)  ;;  %v344_v28 = vld [vmem:[%s1073_s0 + $0x30] sm:$0xff] (!%p235_p3) }
   0xb   : > { %v340_v29 = vld [vmem:[%s1073_s0 + $0x10] sm:$0xff] (!%p235_p3)  ;;  %v345_v30 = vld [vmem:[%s1073_s0 + $0x38] sm:$0xff] (!%p235_p3)  ;;  %v346_v32 = vld [vmem:[%s1073_s0 + $0x40] sm:$0xff] (!%p235_p3) }
   0xc   : > { %v341_v31 = vld [vmem:[%s1073_s0 + $0x18] sm:$0xff] (!%p235_p3)  ;;  %v342_v33 = vld [vmem:[%s1073_s0 + $0x20] sm:$0xff] (!%p235_p3) }
   0xe   : > { %s1083_s15 = smov (!%p298_p4, %s877_s15), 3  ;;  %372 = vperm.xlu0 %861, %v357_v5   ;;  %382 = vperm.xlu1 %862, %v359_v6  }
   0xf   : > { %s941_s21 = smul.u32 72, %s1083_s15 }
  0x11   : > { %s953_s28 = scalar_lea.vmem %s1074_s1, %s941_s21  ;;  %s1038_s13 = scalar_lea.vmem %s1076_s3, %s941_s21 }
  0x12   : > { %v347_v7 = vld [vmem:[%s953_s28] sm:$0xff]  ;;  %v348_v8 = vld [vmem:[%s953_s28 + $0x8] sm:$0xff]  ;;  %v349_v9 = vld [vmem:[%s953_s28 + $0x10] sm:$0xff]  ;;  %387 = vperm.xlu0 %861, %v360_v12   ;;  %392 = vperm.xlu1 %862, %v361_v14   ;;  %s1046_s19 = scalar_lea.vmem %s1077_s4, %s941_s21 }
  0x13   : > { %v811_v10 = vpack.c.bf16 %v348_v8, %v347_v7  ;;  %v350_v11 = vld [vmem:[%s953_s28 + $0x18] sm:$0xff]  ;;  %v351_v15 = vld [vmem:[%s953_s28 + $0x20] sm:$0xff]  ;;  %v352_v16 = vld [vmem:[%s953_s28 + $0x28] sm:$0xff] }
  0x14   : > { %v814_v13 = vpack.c.bf16 %v350_v11, %v349_v9  ;;  %v817_v18 = vpack.c.bf16 %v352_v16, %v351_v15  ;;  %v353_v20 = vld [vmem:[%s953_s28 + $0x30] sm:$0xff]  ;;  %v354_v21 = vld [vmem:[%s953_s28 + $0x38] sm:$0xff]  ;;  %v355_v24 = vld [vmem:[%s953_s28 + $0x40] sm:$0xff] }
  0x15   : > { %812 = vmatpush3.bf16.msra.mxu0 %v811_v10  ;;  %827 = vmatpush3.bf16.msra.mxu1 %v811_v10  ;;  %v820_v23 = vpack.c.bf16 %v354_v21, %v353_v20  ;;  %v548_v41 = vld [vmem:[%s1038_s13] sm:$0xff]  ;;  %v553_v43 = vld [vmem:[%s1038_s13 + $0x28] sm:$0xff]  ;;  %v554_v54 = vld [vmem:[%s1038_s13 + $0x30] sm:$0xff] }
  0x16   : > { %813 = vmatprep.subr.bf16.mxu0 %v887_v0  ;;  %823 = vmatprep.subr.bf16.mxu1 %v887_v0  ;;  %v549_v52 = vld [vmem:[%s1038_s13 + $0x8] sm:$0xff]  ;;  %v550_v63 = vld [vmem:[%s1038_s13 + $0x10] sm:$0xff]  ;;  %v551_v10 = vld [vmem:[%s1038_s13 + $0x18] sm:$0xff] }
  0x17   : > { %397 = vperm.xlu0 %861, %v362_v17   ;;  %402 = vperm.xlu1 %862, %v363_v19   ;;  %v556_v12 = vld [vmem:[%s1038_s13 + $0x40] sm:$0xff] }
  0x18   : > { %v552_v20 = vld [vmem:[%s1038_s13 + $0x20] sm:$0xff] }
  0x19   : > { %815 = vmatpush3.bf16.msra.mxu0 %v814_v13  ;;  %828 = vmatpush3.bf16.msra.mxu1 %v814_v13 }
  0x1a   : > { %816 = vmatprep.subr.bf16.mxu0 %v887_v0  ;;  %824 = vmatprep.subr.bf16.mxu1 %v887_v0 }
  0x1b   : > { %407 = vperm.xlu0 %861, %v364_v22  }
  0x1d   : > { %818 = vmatpush3.bf16.msra.mxu0 %v817_v18  ;;  %829 = vmatpush3.bf16.msra.mxu1 %v817_v18 }
  0x1e   : > { %819 = vmatprep.subr.bf16.mxu0 %v887_v0  ;;  %825 = vmatprep.subr.bf16.mxu1 %v887_v0 }
  0x21   : > { %821 = vmatpush3.bf16.msra.mxu0 %v820_v23  ;;  %830 = vmatpush3.bf16.msra.mxu1 %v820_v23 }
  0x22   : > { %781 = vmatprep.subr.mxu0 %v889_v1  ;;  %826 = vmatprep.subr.mxu1 %v889_v1 }
  0x25   : > { %782 = vmatpush3.msra.mxu0 %v355_v24  ;;  %831 = vmatpush3.msra.mxu1 %v355_v24 }
  0x26   : > { %784 = vmatmul.mubr.msk.f32.vlgmr.msra.gmra.mrb[0].mxu0 %vm410_vm1, %v338_v25  ;;  %799 = vmatmul.mubr.msk.f32.vlgmr.msra.gmra.mrb[0].mxu1 %vm410_vm1, %v343_v26 }
  0x27   : > { %786 = vmatprep.mubr.msk.f32.mxu0 %vm888_vm0, %v889_v1  ;;  %801 = vmatprep.mubr.msk.f32.mxu1 %vm888_vm0, %v889_v1 }
  0x2a   : > { %787 = vmatmul.mubr.msk.f32.gmra.mrb[2].mxu0 %vm410_vm1, %v339_v27  ;;  %802 = vmatmul.mubr.msk.f32.gmra.mrb[2].mxu1 %vm410_vm1, %v344_v28 }
  0x2b   : > { %789 = vmatprep.mubr.msk.f32.mxu0 %vm888_vm0, %v889_v1  ;;  %804 = vmatprep.mubr.msk.f32.mxu1 %vm888_vm0, %v889_v1 }
  0x2e   : > { %790 = vmatmul.mubr.msk.f32.gmra.mrb[4].mxu0 %vm410_vm1, %v340_v29  ;;  %805 = vmatmul.mubr.msk.f32.gmra.mrb[4].mxu1 %vm410_vm1, %v345_v30 }
  0x2f   : > { %792 = vmatprep.mubr.msk.f32.mxu0 %vm888_vm0, %v889_v1  ;;  %807 = vmatprep.mubr.msk.f32.mxu1 %vm888_vm0, %v889_v1 }
  0x32   : > { %793 = vmatmul.mubr.msk.f32.gmra.mrb[6].mxu0 %vm410_vm1, %v341_v31  ;;  %808 = vmatmul.mubr.msk.f32.gmra.mrb[6].mxu1 %vm410_vm1, %v346_v32 }
  0x33   : > { %795 = vmatprep.mubr.msk.f32.mxu0 %vm888_vm0, %v889_v1  ;;  %v555_v1 = vld [vmem:[%s1038_s13 + $0x38] sm:$0xff] }
  0x36   : > { %796 = vmatmul.mubr.msk.f32.gmra.mrb[8].mxu0 %vm410_vm1, %v342_v33 }
  0x89   : > { %v368_v34 = vpop.permute.xlu0 %367  ;;  %v378_v35 = vpop.permute.xlu1 %377 }
  0x8d   : > { %v373_v36 = vpop.permute.xlu0 %372  ;;  %v383_v37 = vpop.permute.xlu1 %382 }
  0x91   : > { %v388_v38 = vpop.permute.xlu0 %387  ;;  %v393_v39 = vpop.permute.xlu1 %392 }
  0x96   : > { %v398_v48 = vpop.permute.xlu0 %397  ;;  %v403_v59 = vpop.permute.xlu1 %402 }
  0x9a   : > { %v408_v6 = vpop.permute.xlu0 %407 }
  0xf9   : > { %v504_v40 = vpop.f32.mrb[0].mxu0  ;;  %v529_v42 = vpop.f32.mrb[0].mxu1 }
  0xfa   : > { %v505_v44 = vadd.f32 %v504_v40, %v368_v34  ;;  %v785_v45 = vpop.f32.mrb[1].mxu0  ;;  %v530_v46 = vadd.f32 %v529_v42, %v393_v39  ;;  %v800_v47 = vpop.f32.mrb[1].mxu1 }
  0xfc   : > { %v557_v49 = vadd.f32 %v548_v41, %v505_v44  ;;  %v562_v50 = vadd.f32 %v553_v43, %v530_v46 }
  0xfd   : > { %v509_v51 = vpop.f32.mrb[2].mxu0  ;;  %v534_v53 = vpop.f32.mrb[2].mxu1 }
  0xfe   : > { %566 = vst [vmem:[%s1046_s19] sm:$0xff] %v557_v49  ;;  %571 = vst [vmem:[%s1046_s19 + $0x28] sm:$0xff] %v562_v50  ;;  %v510_v55 = vadd.f32 %v509_v51, %v373_v36  ;;  %v535_v56 = vadd.f32 %v534_v53, %v398_v48  ;;  %v788_v57 = vpop.f32.mrb[3].mxu0  ;;  %v803_v58 = vpop.f32.mrb[3].mxu1 }
 0x100   : > { %v558_v60 = vadd.f32 %v549_v52, %v510_v55  ;;  %v563_v61 = vadd.f32 %v554_v54, %v535_v56 }
 0x101   : > { %v514_v62 = vpop.f32.mrb[4].mxu0  ;;  %v539_v0 = vpop.f32.mrb[4].mxu1 }
 0x102   : > { %567 = vst [vmem:[%s1046_s19 + $0x8] sm:$0xff] %v558_v60  ;;  %572 = vst [vmem:[%s1046_s19 + $0x30] sm:$0xff] %v563_v61  ;;  %v515_v2 = vadd.f32 %v514_v62, %v378_v35  ;;  %v540_v3 = vadd.f32 %v539_v0, %v403_v59  ;;  %v791_v4 = vpop.f32.mrb[5].mxu0  ;;  %v806_v5 = vpop.f32.mrb[5].mxu1 }
 0x104   : > { %v559_v7 = vadd.f32 %v550_v63, %v515_v2  ;;  %v564_v8 = vadd.f32 %v555_v1, %v540_v3 }
 0x105   : > { %v519_v9 = vpop.f32.mrb[6].mxu0  ;;  %v544_v11 = vpop.f32.mrb[6].mxu1 }
 0x106   : > { %568 = vst [vmem:[%s1046_s19 + $0x10] sm:$0xff] %v559_v7  ;;  %573 = vst [vmem:[%s1046_s19 + $0x38] sm:$0xff] %v564_v8  ;;  %v520_v13 = vadd.f32 %v519_v9, %v383_v37  ;;  %v545_v14 = vadd.f32 %v544_v11, %v408_v6  ;;  %v794_v15 = vpop.f32.mrb[7].mxu0  ;;  %v809_v16 = vpop.f32.mrb[7].mxu1 }
 0x108   : > { %v560_v17 = vadd.f32 %v551_v10, %v520_v13  ;;  %v565_v18 = vadd.f32 %v556_v12, %v545_v14 }
 0x109   : > { %v524_v19 = vpop.f32.mrb[8].mxu0 }
 0x10a   : > { %569 = vst [vmem:[%s1046_s19 + $0x18] sm:$0xff] %v560_v17  ;;  %574 = vst [vmem:[%s1046_s19 + $0x40] sm:$0xff] %v565_v18  ;;  %v525_v21 = vadd.f32 %v524_v19, %v388_v38  ;;  %v797_v22 = vpop.f32.mrb[9].mxu0 }
 0x10c   : > { %v561_v23 = vadd.f32 %v552_v20, %v525_v21 }
 0x10e   : > { %570 = vst [vmem:[%s1046_s19 + $0x20] sm:$0xff] %v561_v23 }
 0x10f PF: > { %s14_s17 = sadd.s32 1, %s885_s17   ;;  %s1078_s15 = smov %s881_s16 }
 0x110   : > { %p11_p5 = scmp.ge.s32.totalorder %s14_s17, 6   ;;  %s1079_s16 = smov %s1081_s18 }
 0x112   :  { %13 = sbr.rel (!%p11_p5) target bundleno = 2 (0x2), region = 75 }

// kernel: conformer_forward.10
= control target key start
LH: loop header
LB: loop body
LE: loop exit
PB: predicated region body
PF: predicated region fallthrough
CT: control target
= control target key end

     0   :  { %10 = vsyncpa [#allocation3], 0  ;;  %s3522_s0 = inlined_call_operand.hbm [shape: f32[1,288,128], index: 0, kind: input, shape index: {}]   ;;  %s3523_s1 = inlined_call_operand.hbm [shape: f32[1,128,384], index: 1, kind: input, shape index: {}]   ;;  %s3524_s2 = inlined_call_operand.vmem [shape: f32[1,128], index: 2, kind: input, shape index: {}]   ;;  %s3525_s3 = inlined_call_operand.vmem [shape: f32[1,128], index: 3, kind: input, shape index: {}]   ;;  %s3526_s4 = inlined_call_operand.vmem [shape: f32[1,384], index: 4, kind: input, shape index: {}]   ;;  %s3527_s5 = inlined_call_operand.vmem [shape: f32[1,288,384], index: 5, kind: output, shape index: {}]  }
   0x1   :  { %12 = vsyncpa [#allocation3 + $0x1], 0 }
   0x2   :  { %13 = vsyncpa [#allocation5], 0  ;;  %s2428_s18 = smov 0   ;;  %s2430_s19 = smov 0  }
   0x3   :  { %s2432_s20 = smov 0   ;;  %s2434_s21 = smov 0  }
   0x4   :  { %s2436_s22 = smov 0   ;;  %s2438_s23 = smov 0  }
   0x5 LB: > { %s1775_s24 = sadd.s32 4294967295, %s2357_s23   ;;  %s34_s25 = sadd.s32 1, %s2353_s22  ;;  %s2357_s23 = sphi %s2438_s23, %s19_s23   ;;  %s2353_s22 = sphi %s2436_s22, %s3552_s22   ;;  %s2349_s21 = sphi %s2434_s21, %s3551_s21   ;;  %s2345_s20 = sphi %s2432_s20, %s3550_s20   ;;  %s2341_s19 = sphi %s2430_s19, %s3549_s19   ;;  %s2337_s18 = sphi %s2428_s18, %s3548_s18  }
   0x6   : > { %p36_p0 = scmp.ge.s32.totalorder %s34_s25, 2  ;;  %s45_s26 = sadd.s32 1, %s2345_s20 }
   0x7   : > { %p52_p1 = scmp.ne.s32.totalorder %s2345_s20, %s2341_s19  ;;  %p53_p2 = scmp.eq.s32.totalorder %s2357_s23, 0 }
   0x8   : > { %s3554_s25 = smov (%p36_p0, %s34_s25), 0  ;;  %p58_p4 = scmp.ne.s32.totalorder %s2341_s19, %s2337_s18 }
   0x9   : > { %p2464_p3 = por %p53_p2, %p52_p1  ;;  %s42_s28 = ssub.s32 %s2353_s22, %s3554_s25 }
   0xa   : > { %p2471_p5 = scmp.eq.s32.totalorder %s1775_s24, 0  ;;  %p43_p6 = scmp.eq.s32.totalorder %s42_s28, 0 }
   0xb   : > { %s3532_s27 = scalar_select %p2464_p3, 1, 0 }
   0xc   : > { %s3533_s29 = scalar_select %p2471_p5, 1, 0 }
   0xd   : > { %p180_p7 = scmp.eq.s32.totalorder %s1775_s24, 1  ;;  %p2477_p8 = por %p2471_p5, %p58_p4 }
   0xe   : > { %p1777_p9 = scmp.ge.s32.totalorder %s2357_s23, 1  ;;  %p193_p11 = scmp.lt.s32.totalorder %s2357_s23, 3 }
   0xf   : > { %s3534_s30 = scalar_select %p2477_p8, 1, 0 }
  0x10   : > { %s2483_s6 = scalar_select %p43_p6, %s2345_s20, %s45_s26  }
  0x11   : > { %p2485_p10 = por %p180_p7, %p52_p1  ;;  %p2490_p12 = pnand %p1777_p9, %p193_p11 }
  0x12   : > { %s2391_s9 = smov [#allocation4]   ;;  %s2215_s14 = scalar_lea.hbm %s3523_s1, 6144 }
  0x13   : > { %s3535_s7 = scalar_select %p2485_p10, 1, 0 }
  0x14   : > { %s3536_s8 = scalar_select %p2490_p12, 1, 0 }
  0x15   : > { %s208_s10 = sshll.u32 %s2391_s9, 4  ;;  %p2022_p13 = pneg %p2490_p12  ;;  %s209_s10 = int_to_ptr.vmem [resolvable:$true] %s208_s10 }
  0x16   : > { %p2216_p1 = scmp.ne.s32.totalorder %s3523_s1, %s2215_s14  ;;  %p2222_p7 = scmp.lt.u32.totalorder %s2215_s14, %s3523_s1 }
  0x17   : > { %p2498_p0 = pnand %p2022_p13, %p2471_p5 }
  0x19   : > { %p2217_p2 = pneg %p2498_p0 }
  0x1b   : > { %p2218_p4 = pnand %p2217_p2, %p2216_p1 }
  0x1d   : > { %p2219_p6 = pneg %p2218_p4 }
  0x1f   : > { %p2224_p9 = pnand %p2222_p7, %p2219_p6 }
  0x21   : > { %2227 = shalt.err (!%p2224_p9)
}
  0x22   : > { %s2228_s24 = scalar_lea.vmem %s209_s10, 6144  ;;  %p2236_p5 = scmp.lt.s32.totalorder %s209_s10, %s209_s10 }
  0x23   : > { %p2229_p11 = scmp.ne.s32.totalorder %s209_s10, %s2228_s24  ;;  %p2237_p8 = scmp.lt.s32.totalorder %s2228_s24, %s2228_s24 }
  0x25   : > { %p2231_p13 = pnand %p2229_p11, %p2217_p2  ;;  %p2238_p12 = por %p2237_p8, %p2236_p5 }
  0x27   : > { %p2232_p10 = pneg %p2231_p13 }
  0x29   : > { %p2239_p3 = pnand %p2238_p12, %p2232_p10 }
  0x2b   : > { %2242 = shalt.err (!%p2239_p3)
}
  0x2c   : > { %s2392_s26 = smov 384   ;;  %s2393_s28 = smov 24  }
  0x2d   : > { %2025 = dma.hbm_to_vmem [thread:$0]  (!%p2498_p0), %s3523_s1, 6144, %s209_s10, [#allocation5], %s2392_s26, %s2392_s26, %s2393_s28  }
  0x2e   : > { %p1780_p1 = scmp.ge.s32.totalorder %s2357_s23, 2 }
  0x2f   : > { %p3538_p4 = scmp.ne.s32.totalorder (!%p1780_p1), %s3532_s27, 0 }
  0x30   : > { %232 = sbr.rel (%p1780_p1) target bundleno = 90 (0x5a), region = 32 }
  0x37   : > { %235 = sbr.rel (!%p3538_p4) target bundleno = 90 (0x5a), region = 36  ;;  %s236_s13 = sand.u32 (%p3538_p4), 1, %s2345_s20  }
  0x38   : > { %s1782_s14 = sshll.u32 (%p3538_p4), %s2353_s22, 5  ;;  %s1781_s15 = sshll.u32 (%p3538_p4), %s236_s13, 8 }
  0x39   : > { %s242_s16 = ssub.s32 (%p3538_p4), 36, %s1782_s14  ;;  %s2526_s18 = scalar_lea.sflag (%p3538_p4), [#allocation3], %s236_s13 }
  0x3a   : > { %p243_p3 = scmp.lt.s32.totalorder (%p3538_p4), %s242_s16, 32  ;;  %s240_s10 = scalar_lea.vmem (%p3538_p4), [#allocation2], %s1781_s15 }
  0x3e   : > { %s3556_s16 = smov (!%p243_p3, %s242_s16), 32 }
  0x3f   : > { %s2523_s17 = sshll.u32 %s3556_s16, 7 }
  0x40   : > { %s247_s11 = ssub.s32 4096, %s2523_s17 }
  0x41   : > { %248 = vsyncadd %s2526_s18, %s247_s11  ;;  %p1784_p5 = scmp.ne.s32.totalorder %s2523_s17, 0  ;;  %s1806_s27 = sshll.u32 %s2353_s22, 12 }
  0x42   : > { %s2534_s28 = scalar_lea.hbm %s3522_s0, %s1806_s27  ;;  %s253_s9 = sshll.u32 %s240_s10, 4  ;;  %s2536_s9 = int_to_ptr.vmem [resolvable:$true] %s253_s9 }
  0x43   : > { %s2243_s12 = scalar_lea.hbm %s2534_s28, %s2523_s17  ;;  %s2247_s15 = scalar_lea.hbm %s3522_s0, 4608 }
  0x44   : > { %p2244_p8 = scmp.ne.s32.totalorder %s2534_s28, %s2243_s12  ;;  %p2248_p0 = scmp.lt.u32.totalorder %s2534_s28, %s3522_s0 }
  0x45   : > { %p2249_p2 = scmp.lt.u32.totalorder %s2247_s15, %s2243_s12  ;;  %p2251_p7 = scmp.lt.u32.totalorder %s2243_s12, %s2534_s28 }
  0x46   : > { %p2245_p10 = pnand %p2244_p8, %p1784_p5 }
  0x47   : > { %p2250_p6 = por %p2249_p2, %p2248_p0 }
  0x48   : > { %p2246_p12 = pneg %p2245_p10 }
  0x49   : > { %p2252_p9 = por %p2251_p7, %p2250_p6 }
  0x4b   : > { %p2253_p11 = pnand %p2252_p9, %p2246_p12 }
  0x4d   : > { %2256 = shalt.err (!%p2253_p11)
}
  0x4e   : > { %s2257_s10 = scalar_lea.vmem %s2536_s9, %s2523_s17  ;;  %s2394_s27 = smov [#allocation2]  }
  0x4f   : > { %p2258_p13 = scmp.ne.s32.totalorder %s2536_s9, %s2257_s10  ;;  %s2261_s24 = sshll.u32 %s2394_s27, 4  ;;  %s2262_s24 = int_to_ptr.vmem [resolvable:$false] %s2261_s24 }
  0x50   : > { %s2263_s26 = scalar_lea.vmem %s2262_s24, 8192  ;;  %p2264_p3 = scmp.lt.s32.totalorder %s2536_s9, %s2262_s24 }
  0x51   : > { %p2259_p1 = pnand %p2258_p13, %p1784_p5  ;;  %p2265_p8 = scmp.lt.s32.totalorder %s2263_s26, %s2257_s10 }
  0x53   : > { %p2260_p4 = pneg %p2259_p1  ;;  %p2266_p10 = por %p2265_p8, %p2264_p3 }
  0x55   : > { %p2267_p0 = pnand %p2266_p10, %p2260_p4 }
  0x57   : > { %2270 = shalt.err (!%p2267_p0)
}
  0x58   : > { %s2395_s12 = smov 128   ;;  %s2396_s13 = smov 8  }
  0x59   : > { %259 = dma.hbm_to_vmem [thread:$0]  (%p1784_p5), %s2534_s28, %s2523_s17, %s2536_s9, %s2526_s18, %s2395_s12, %s2395_s12, %s2396_s13  }
  0x5a PF: > { %p3539_p12 = scmp.ne.s32.totalorder %s3536_s8, 0 }
  0x5b   : > { %s2566_s14 = sand.u32 (!%p3539_p12), 1, %s2341_s19   ;;  %p3540_p2 = scmp.ne.s32.totalorder (!%p3539_p12), %s3534_s30, 0 }
  0x5c   : > { %265 = sbr.rel (%p3539_p12) target bundleno = 813 (0x32d), region = 40  ;;  %s1789_s15 = sshll.u32 (!%p3539_p12), %s2566_s14, 8 }
  0x5d   : > { %s268_s16 = scalar_lea.sflag (!%p3539_p12), [#allocation3], %s2566_s14  ;;  %s2570_s11 = scalar_lea.vmem (!%p3539_p12), [#allocation2], %s1789_s15 }
  0x63   : > { %2328 = dma.done.wait (%p3540_p2), %s268_s16, 4096  }
  0x64   : > { %2330 = vsyncadd (%p3540_p2), %s268_s16, 4294963200  ;;  %p3541_p5 = scmp.ne.s32.totalorder %s3533_s29, 0 }
  0x66   : > { %2332 = dma.done.wait (%p3541_p5), [#allocation5], 6144  }
  0x67   : > { %2334 = vsyncadd (%p3541_p5), [#allocation5], 4294961152  ;;  %v2581_v0 = vld [vmem:[%s2570_s11] sm:$0xff]  ;;  %v2584_v1 = vld [vmem:[%s2570_s11 + $0x8] sm:$0xff]  ;;  %s2015_s9 = smul.u32 768, %s2566_s14  ;;  %p3542_p6 = scmp.ne.s32.totalorder %s3535_s7, 0 }
  0x68   : > { %355 = vadd.xlane.f32.xlu0 %v2581_v0  ;;  %357 = vadd.xlane.f32.xlu1 %v2584_v1  ;;  %v2589_v2 = vld [vmem:[%s2570_s11 + $0xc0] sm:$0xff]  ;;  %v2592_v3 = vld [vmem:[%s2570_s11 + $0xc8] sm:$0xff]  ;;  %v2597_v4 = vld [vmem:[%s2570_s11 + $0x10] sm:$0xff]  ;;  %s1793_s27 = sshll.u32 (%p3542_p6), %s2349_s21, 5  ;;  %s2016_s24 = smul.u32 (%p3542_p6), 768, %s2349_s21 }
  0x69   : > { %v2600_v5 = vld [vmem:[%s2570_s11 + $0xd0] sm:$0xff]  ;;  %v2605_v6 = vld [vmem:[%s2570_s11 + $0x18] sm:$0xff]  ;;  %v2613_v8 = vld [vmem:[%s2570_s11 + $0x20] sm:$0xff]  ;;  %s3100_s10 = scalar_lea.vmem [#allocation6], %s2015_s9   ;;  %s1438_s26 = ssub.s32 (%p3542_p6), 36, %s1793_s27 }
  0x6a   : > { %v2608_v7 = vld [vmem:[%s2570_s11 + $0xd8] sm:$0xff]  ;;  %v2616_v9 = vld [vmem:[%s2570_s11 + $0xe0] sm:$0xff]  ;;  %v2621_v10 = vld [vmem:[%s2570_s11 + $0x28] sm:$0xff]  ;;  %p1439_p7 = scmp.lt.s32.totalorder (%p3542_p6), %s1438_s26, 32  ;;  %s3303_s14 = scalar_lea.vmem (%p3542_p6), %s3527_s5, %s2016_s24  }
  0x6b   : > { %v2624_v11 = vld [vmem:[%s2570_s11 + $0xe8] sm:$0xff]  ;;  %v2629_v12 = vld [vmem:[%s2570_s11 + $0x30] sm:$0xff]  ;;  %v2637_v14 = vld [vmem:[%s2570_s11 + $0x38] sm:$0xff] }
  0x6c   : > { %403 = vadd.xlane.f32.xlu0 %v2589_v2  ;;  %405 = vadd.xlane.f32.xlu1 %v2592_v3  ;;  %v2632_v13 = vld [vmem:[%s2570_s11 + $0xf0] sm:$0xff]  ;;  %v2640_v15 = vld [vmem:[%s2570_s11 + $0xf8] sm:$0xff]  ;;  %v2645_v16 = vld [vmem:[%s2570_s11 + $0x40] sm:$0xff] }
  0x6d   : > { %v2648_v17 = vld [vmem:[%s2570_s11 + $0x48] sm:$0xff]  ;;  %v2653_v18 = vld [vmem:[%s2570_s11 + $0x50] sm:$0xff]  ;;  %v2656_v19 = vld [vmem:[%s2570_s11 + $0x58] sm:$0xff] }
  0x6e   : > { %v2661_v20 = vld [vmem:[%s2570_s11 + $0x60] sm:$0xff]  ;;  %v2664_v21 = vld [vmem:[%s2570_s11 + $0x68] sm:$0xff]  ;;  %v2669_v22 = vld [vmem:[%s2570_s11 + $0x70] sm:$0xff] }
  0x6f   : > { %v2672_v23 = vld [vmem:[%s2570_s11 + $0x78] sm:$0xff]  ;;  %v2677_v24 = vld [vmem:[%s2570_s11 + $0x80] sm:$0xff]  ;;  %v2680_v25 = vld [vmem:[%s2570_s11 + $0x88] sm:$0xff] }
  0x70   : > { %359 = vadd.xlane.f32.xlu0 %v2597_v4  ;;  %407 = vadd.xlane.f32.xlu1 %v2600_v5  ;;  %v2685_v26 = vld [vmem:[%s2570_s11 + $0x90] sm:$0xff]  ;;  %v2688_v27 = vld [vmem:[%s2570_s11 + $0x98] sm:$0xff]  ;;  %v2693_v28 = vld [vmem:[%s2570_s11 + $0xa0] sm:$0xff] }
  0x71   : > { %v2696_v29 = vld [vmem:[%s2570_s11 + $0xa8] sm:$0xff]  ;;  %v2701_v30 = vld [vmem:[%s2570_s11 + $0xb0] sm:$0xff]  ;;  %v2704_v31 = vld [vmem:[%s2570_s11 + $0xb8] sm:$0xff] }
  0x72   : > { %v787_v32 = vld [vmem:[#allocation4 + $0x8] sm:$0xff]  ;;  %v790_v33 = vld [vmem:[#allocation4 + $0x20] sm:$0xff]  ;;  %v789_v36 = vld [vmem:[#allocation4 + $0x18] sm:$0xff] }
  0x73   : > { %v786_v34 = vld [vmem:[#allocation4] sm:$0xff]  ;;  %v1935_v35 = vpack.c.bf16 %v790_v33, %v787_v32  ;;  %v793_v37 = vld [vmem:[#allocation4 + $0x38] sm:$0xff]  ;;  %v796_v38 = vld [vmem:[#allocation4 + $0x50] sm:$0xff] }
  0x74   : > { %361 = vadd.xlane.f32.xlu0 %v2605_v6  ;;  %409 = vadd.xlane.f32.xlu1 %v2608_v7  ;;  %v1937_v39 = vpack.c.bf16 %v789_v36, %v786_v34  ;;  %v1939_v40 = vpack.c.bf16 %v796_v38, %v793_v37  ;;  %v792_v41 = vld [vmem:[#allocation4 + $0x30] sm:$0xff]  ;;  %v795_v42 = vld [vmem:[#allocation4 + $0x48] sm:$0xff]  ;;  %v802_v44 = vld [vmem:[#allocation4 + $0x80] sm:$0xff] }
  0x75   : > { %v799_v43 = vld [vmem:[#allocation4 + $0x68] sm:$0xff]  ;;  %1936 = vmatprep.subr.bf16.mxu0 %v1935_v35  ;;  %1999 = vmatprep.subr.bf16.mxu1 %v1935_v35  ;;  %v1941_v45 = vpack.c.bf16 %v795_v42, %v792_v41  ;;  %v798_v47 = vld [vmem:[#allocation4 + $0x60] sm:$0xff]  ;;  %v801_v48 = vld [vmem:[#allocation4 + $0x78] sm:$0xff] }
  0x76   : > { %1938 = vmatpush1.bf16.msra.mxu0 %v1937_v39  ;;  %2007 = vmatpush1.bf16.msra.mxu1 %v1937_v39  ;;  %v1943_v46 = vpack.c.bf16 %v802_v44, %v799_v43  ;;  %v1945_v49 = vpack.c.bf16 %v801_v48, %v798_v47  ;;  %v805_v48 = vld [vmem:[#allocation4 + $0x98] sm:$0xff] }
  0x77   : > { %1940 = vmatprep.subr.bf16.mxu0 %v1939_v40  ;;  %2000 = vmatprep.subr.bf16.mxu1 %v1939_v40 }
  0x78   : > { %363 = vadd.xlane.f32.xlu0 %v2613_v8  ;;  %411 = vadd.xlane.f32.xlu1 %v2616_v9 }
  0x7a   : > { %1942 = vmatpush1.bf16.msra.mxu0 %v1941_v45  ;;  %2008 = vmatpush1.bf16.msra.mxu1 %v1941_v45 }
  0x7b   : > { %1944 = vmatprep.subr.bf16.mxu0 %v1943_v46  ;;  %2001 = vmatprep.subr.bf16.mxu1 %v1943_v46 }
  0x7c   : > { %365 = vadd.xlane.f32.xlu0 %v2621_v10  ;;  %413 = vadd.xlane.f32.xlu1 %v2624_v11 }
  0x7e   : > { %1946 = vmatpush1.bf16.msra.mxu0 %v1945_v49  ;;  %2009 = vmatpush1.bf16.msra.mxu1 %v1945_v49  ;;  %v808_v49 = vld [vmem:[#allocation4 + $0xb0] sm:$0xff] }
  0x80   : > { %367 = vadd.xlane.f32.xlu0 %v2629_v12  ;;  %415 = vadd.xlane.f32.xlu1 %v2632_v13 }
  0x84   : > { %369 = vadd.xlane.f32.xlu0 %v2637_v14  ;;  %417 = vadd.xlane.f32.xlu1 %v2640_v15 }
  0x88   : > { %371 = vadd.xlane.f32.xlu0 %v2645_v16  ;;  %373 = vadd.xlane.f32.xlu1 %v2648_v17 }
  0x8c   : > { %375 = vadd.xlane.f32.xlu0 %v2653_v18  ;;  %377 = vadd.xlane.f32.xlu1 %v2656_v19 }
  0x90   : > { %379 = vadd.xlane.f32.xlu0 %v2661_v20  ;;  %381 = vadd.xlane.f32.xlu1 %v2664_v21 }
  0x94   : > { %383 = vadd.xlane.f32.xlu0 %v2669_v22  ;;  %385 = vadd.xlane.f32.xlu1 %v2672_v23 }
  0x98   : > { %387 = vadd.xlane.f32.xlu0 %v2677_v24  ;;  %389 = vadd.xlane.f32.xlu1 %v2680_v25 }
  0x9c   : > { %391 = vadd.xlane.f32.xlu0 %v2685_v26  ;;  %393 = vadd.xlane.f32.xlu1 %v2688_v27 }
  0xa0   : > { %395 = vadd.xlane.f32.xlu0 %v2693_v28  ;;  %397 = vadd.xlane.f32.xlu1 %v2696_v29 }
  0xa4   : > { %399 = vadd.xlane.f32.xlu0 %v2701_v30  ;;  %401 = vadd.xlane.f32.xlu1 %v2704_v31 }
  0xf5   : > { %v356_v50 = vpop.xlane.xlu0 %355  ;;  %v358_v51 = vpop.xlane.xlu1 %357 }
  0xf6   : > { %v420_v52 = vmul.f32 0.0078125, %v356_v50  ;;  %v421_v53 = vmul.f32 0.0078125, %v358_v51 }
  0xf8   : > { %v2709_v54 = vsub.f32 %v2581_v0, %v420_v52  ;;  %v2712_v55 = vsub.f32 %v2584_v1, %v421_v53  ;;  %v1947_v52 = vpack.c.bf16 %v808_v49, %v805_v48  ;;  %v804_v53 = vld [vmem:[#allocation4 + $0x90] sm:$0xff]  ;;  %v819_v49 = vld [vmem:[#allocation4 + $0x108] sm:$0xff] }
  0xf9   : > { %v404_v56 = vpop.xlane.xlu0 %403  ;;  %v406_v57 = vpop.xlane.xlu1 %405  ;;  %v816_v48 = vld [vmem:[#allocation4 + $0xf0] sm:$0xff] }
  0xfa   : > { %v444_v58 = vmul.f32 0.0078125, %v404_v56  ;;  %v484_v59 = vmul.f32 %v2709_v54, %v2709_v54  ;;  %v445_v60 = vmul.f32 0.0078125, %v406_v57  ;;  %v485_v63 = vmul.f32 %v2712_v55, %v2712_v55  ;;  %v807_v56 = vld [vmem:[#allocation4 + $0xa8] sm:$0xff]  ;;  %1948 = vmatprep.subr.bf16.mxu0 %v1947_v52  ;;  %2002 = vmatprep.subr.bf16.mxu1 %v1947_v52 }
  0xfc   : > { %v2717_v61 = vsub.f32 %v2589_v2, %v444_v58  ;;  %516 = vadd.xlane.f32.xlu0 %v484_v59  ;;  %v2720_v62 = vsub.f32 %v2592_v3, %v445_v60  ;;  %v1949_v59 = vpack.c.bf16 %v807_v56, %v804_v53 }
  0xfd   : > { %v360_v0 = vpop.xlane.xlu0 %359  ;;  %v408_v1 = vpop.xlane.xlu1 %407 }
  0xfe   : > { %v422_v32 = vmul.f32 0.0078125, %v360_v0  ;;  %v508_v33 = vmul.f32 %v2717_v61, %v2717_v61  ;;  %v446_v34 = vmul.f32 0.0078125, %v408_v1  ;;  %v509_v3 = vmul.f32 %v2720_v62, %v2720_v62  ;;  %1950 = vmatpush1.bf16.msra.mxu0 %v1949_v59  ;;  %2010 = vmatpush1.bf16.msra.mxu1 %v1949_v59 }
 0x100   : > { %v2727_v35 = vsub.f32 %v2597_v4, %v422_v32  ;;  %518 = vadd.xlane.f32.xlu0 %v485_v63  ;;  %564 = vadd.xlane.f32.xlu1 %v508_v33  ;;  %v2730_v2 = vsub.f32 %v2600_v5, %v446_v34  ;;  %v811_v32 = vld [vmem:[#allocation4 + $0xc8] sm:$0xff]  ;;  %v814_v33 = vld [vmem:[#allocation4 + $0xe0] sm:$0xff] }
 0x101   : > { %v362_v36 = vpop.xlane.xlu0 %361  ;;  %v410_v37 = vpop.xlane.xlu1 %409 }
 0x102   : > { %v423_v38 = vmul.f32 0.0078125, %v362_v36  ;;  %v486_v39 = vmul.f32 %v2727_v35, %v2727_v35  ;;  %v447_v40 = vmul.f32 0.0078125, %v410_v37  ;;  %v510_v5 = vmul.f32 %v2730_v2, %v2730_v2  ;;  %v810_v36 = vld [vmem:[#allocation4 + $0xc0] sm:$0xff]  ;;  %v813_v37 = vld [vmem:[#allocation4 + $0xd8] sm:$0xff] }
 0x104   : > { %v2737_v41 = vsub.f32 %v2605_v6, %v423_v38  ;;  %566 = vadd.xlane.f32.xlu1 %v509_v3  ;;  %520 = vadd.xlane.f32.xlu0 %v486_v39  ;;  %v2740_v4 = vsub.f32 %v2608_v7, %v447_v40  ;;  %v1951_v38 = vpack.c.bf16 %v814_v33, %v811_v32 }
 0x105   : > { %v364_v42 = vpop.xlane.xlu0 %363  ;;  %v412_v43 = vpop.xlane.xlu1 %411  ;;  %v1953_v39 = vpack.c.bf16 %v813_v37, %v810_v36  ;;  %v829_v37 = vld [vmem:[#allocation4 + $0x158] sm:$0xff] }
 0x106   : > { %v424_v44 = vmul.f32 0.0078125, %v364_v42  ;;  %v487_v45 = vmul.f32 %v2737_v41, %v2737_v41  ;;  %v448_v46 = vmul.f32 0.0078125, %v412_v43  ;;  %v511_v7 = vmul.f32 %v2740_v4, %v2740_v4  ;;  %1952 = vmatprep.subr.bf16.mxu0 %v1951_v38  ;;  %2003 = vmatprep.subr.bf16.mxu1 %v1951_v38  ;;  %v832_v38 = vld [vmem:[#allocation4 + $0x170] sm:$0xff] }
 0x107   : > { %1954 = vmatpush1.bf16.msra.mxu0 %v1953_v39  ;;  %2011 = vmatpush1.bf16.msra.mxu1 %v1953_v39 }
 0x108   : > { %v2747_v47 = vsub.f32 %v2613_v8, %v424_v44  ;;  %568 = vadd.xlane.f32.xlu1 %v510_v5  ;;  %522 = vadd.xlane.f32.xlu0 %v487_v45  ;;  %v2750_v6 = vsub.f32 %v2616_v9, %v448_v46  ;;  %v817_v44 = vld [vmem:[#allocation4 + $0xf8] sm:$0xff]  ;;  %v820_v45 = vld [vmem:[#allocation4 + $0x110] sm:$0xff] }
 0x109   : > { %v366_v50 = vpop.xlane.xlu0 %365  ;;  %v414_v51 = vpop.xlane.xlu1 %413 }
 0x10a   : > { %v425_v57 = vmul.f32 0.0078125, %v366_v50  ;;  %v488_v8 = vmul.f32 %v2747_v47, %v2747_v47  ;;  %v449_v58 = vmul.f32 0.0078125, %v414_v51  ;;  %v512_v63 = vmul.f32 %v2750_v6, %v2750_v6 }
 0x10b   : > { %v1957_v50 = vpack.c.bf16 %v819_v49, %v816_v48 }
 0x10c   : > { %v2757_v9 = vsub.f32 %v2621_v10, %v425_v57  ;;  %570 = vadd.xlane.f32.xlu1 %v511_v7  ;;  %524 = vadd.xlane.f32.xlu0 %v488_v8  ;;  %v2760_v60 = vsub.f32 %v2624_v11, %v449_v58  ;;  %v823_v8 = vld [vmem:[#allocation4 + $0x128] sm:$0xff]  ;;  %v826_v58 = vld [vmem:[#allocation4 + $0x140] sm:$0xff] }
 0x10d   : > { %v368_v0 = vpop.xlane.xlu0 %367  ;;  %v416_v1 = vpop.xlane.xlu1 %415 }
 0x10e   : > { %v426_v34 = vmul.f32 0.0078125, %v368_v0  ;;  %v489_v3 = vmul.f32 %v2757_v9, %v2757_v9  ;;  %v450_v10 = vmul.f32 0.0078125, %v416_v1  ;;  %v513_v5 = vmul.f32 %v2760_v60, %v2760_v60  ;;  %v822_v0 = vld [vmem:[#allocation4 + $0x120] sm:$0xff]  ;;  %v825_v1 = vld [vmem:[#allocation4 + $0x138] sm:$0xff] }
 0x10f   : > { %v1961_v32 = vpack.c.bf16 %v825_v1, %v822_v0 }
 0x110   : > { %v2767_v11 = vsub.f32 %v2629_v12, %v426_v34  ;;  %572 = vadd.xlane.f32.xlu1 %v512_v63  ;;  %526 = vadd.xlane.f32.xlu0 %v489_v3  ;;  %v2770_v40 = vsub.f32 %v2632_v13, %v450_v10  ;;  %v1955_v13 = vpack.c.bf16 %v820_v45, %v817_v44 }
 0x111   : > { %v370_v42 = vpop.xlane.xlu0 %369  ;;  %v418_v43 = vpop.xlane.xlu1 %417 }
 0x112   : > { %v427_v46 = vmul.f32 0.0078125, %v370_v42  ;;  %v490_v7 = vmul.f32 %v2767_v11, %v2767_v11  ;;  %v451_v12 = vmul.f32 0.0078125, %v418_v43  ;;  %v514_v53 = vmul.f32 %v2770_v40, %v2770_v40  ;;  %1956 = vmatprep.subr.bf16.mxu0 %v1955_v13  ;;  %2004 = vmatprep.subr.bf16.mxu1 %v1955_v13  ;;  %v828_v42 = vld [vmem:[#allocation4 + $0x150] sm:$0xff]  ;;  %v831_v43 = vld [vmem:[#allocation4 + $0x168] sm:$0xff] }
 0x113   : > { %1958 = vmatpush1.bf16.msra.mxu0 %v1957_v50  ;;  %2012 = vmatpush1.bf16.msra.mxu1 %v1957_v50  ;;  %v1965_v44 = vpack.c.bf16 %v831_v43, %v828_v42 }
 0x114   : > { %v2777_v51 = vsub.f32 %v2637_v14, %v427_v46  ;;  %574 = vadd.xlane.f32.xlu1 %v513_v5  ;;  %528 = vadd.xlane.f32.xlu0 %v490_v7  ;;  %v2780_v52 = vsub.f32 %v2640_v15, %v451_v12  ;;  %v1959_v15 = vpack.c.bf16 %v826_v58, %v823_v8  ;;  %v2397_v8 = vmov 0.0   ;;  %v788_v58 = vld [vmem:[#allocation4 + $0x10] sm:$0xff] }
 0x115   : > { %v372_v56 = vpop.xlane.xlu0 %371  ;;  %v374_v57 = vpop.xlane.xlu1 %373  ;;  %915 = vmatprep.mubr.f32.mxu0 %v2397_v8  ;;  %1059 = vmatprep.mubr.f32.mxu1 %v2397_v8 }
 0x116   : > { %v428_v59 = vmul.f32 0.0078125, %v372_v56  ;;  %v491_v63 = vmul.f32 %v2777_v51, %v2777_v51  ;;  %v429_v14 = vmul.f32 0.0078125, %v374_v57  ;;  %v515_v3 = vmul.f32 %v2780_v52, %v2780_v52  ;;  %1960 = vmatprep.subr.bf16.mxu0 %v1959_v15  ;;  %2005 = vmatprep.subr.bf16.mxu1 %v1959_v15 }
 0x117   : > { %1962 = vmatpush1.bf16.msra.mxu0 %v1961_v32  ;;  %2013 = vmatpush1.bf16.msra.mxu1 %v1961_v32 }
 0x118   : > { %v2787_v33 = vsub.f32 %v2645_v16, %v428_v59  ;;  %576 = vadd.xlane.f32.xlu1 %v514_v53  ;;  %530 = vadd.xlane.f32.xlu0 %v491_v63  ;;  %v2790_v34 = vsub.f32 %v2648_v17, %v429_v14  ;;  %v1963_v17 = vpack.c.bf16 %v832_v38, %v829_v37  ;;  %v791_v59 = vld [vmem:[#allocation4 + $0x28] sm:$0xff] }
 0x119   : > { %v376_v10 = vpop.xlane.xlu0 %375  ;;  %v378_v36 = vpop.xlane.xlu1 %377  ;;  %v2818_v0 = vpack.c.bf16 %v791_v59, %v788_v58 }
 0x11a   : > { %v430_v39 = vmul.f32 0.0078125, %v376_v10  ;;  %v492_v5 = vmul.f32 %v2787_v33, %v2787_v33  ;;  %v431_v16 = vmul.f32 0.0078125, %v378_v36  ;;  %v493_v7 = vmul.f32 %v2790_v34, %v2790_v34  ;;  %1964 = vmatprep.subr.bf16.mxu0 %v1963_v17  ;;  %2006 = vmatprep.subr.bf16.mxu1 %v1963_v17 }
 0x11b   : > { %1966 = vmatpush1.bf16.msra.mxu0 %v1965_v44  ;;  %2014 = vmatpush1.bf16.msra.mxu1 %v1965_v44 }
 0x11c   : > { %v2797_v45 = vsub.f32 %v2653_v18, %v430_v39  ;;  %578 = vadd.xlane.f32.xlu1 %v515_v3  ;;  %532 = vadd.xlane.f32.xlu0 %v492_v5  ;;  %v2800_v46 = vsub.f32 %v2656_v19, %v431_v16 }
 0x11d   : > { %v380_v12 = vpop.xlane.xlu0 %379  ;;  %v382_v48 = vpop.xlane.xlu1 %381  ;;  %1968 = vmatprep.subr.bf16.mxu1 %v2818_v0 }
 0x11e   : > { %v432_v49 = vmul.f32 0.0078125, %v380_v12  ;;  %v494_v13 = vmul.f32 %v2797_v45, %v2797_v45  ;;  %v433_v50 = vmul.f32 0.0078125, %v382_v48  ;;  %v495_v53 = vmul.f32 %v2800_v46, %v2800_v46 }
 0x120   : > { %v2807_v18 = vsub.f32 %v2661_v20, %v432_v49  ;;  %534 = vadd.xlane.f32.xlu1 %v493_v7  ;;  %536 = vadd.xlane.f32.xlu0 %v494_v13  ;;  %v2810_v19 = vsub.f32 %v2664_v21, %v433_v50 }
 0x121   : > { %v384_v56 = vpop.xlane.xlu0 %383  ;;  %v386_v57 = vpop.xlane.xlu1 %385 }
 0x122   : > { %v434_v63 = vmul.f32 0.0078125, %v384_v56  ;;  %v496_v20 = vmul.f32 %v2807_v18, %v2807_v18  ;;  %v435_v14 = vmul.f32 0.0078125, %v386_v57  ;;  %v497_v15 = vmul.f32 %v2810_v19, %v2810_v19 }
 0x124   : > { %v2821_v21 = vsub.f32 %v2669_v22, %v434_v63  ;;  %538 = vadd.xlane.f32.xlu1 %v495_v53  ;;  %540 = vadd.xlane.f32.xlu0 %v496_v20  ;;  %v2824_v1 = vsub.f32 %v2672_v23, %v435_v14 }
 0x125   : > { %v388_v32 = vpop.xlane.xlu0 %387  ;;  %v390_v3 = vpop.xlane.xlu1 %389 }
 0x126   : > { %v436_v10 = vmul.f32 0.0078125, %v388_v32  ;;  %v498_v36 = vmul.f32 %v2821_v21, %v2821_v21  ;;  %v437_v37 = vmul.f32 0.0078125, %v390_v3  ;;  %v499_v38 = vmul.f32 %v2824_v1, %v2824_v1 }
 0x128   : > { %v2832_v22 = vsub.f32 %v2677_v24, %v436_v10  ;;  %542 = vadd.xlane.f32.xlu1 %v497_v15  ;;  %544 = vadd.xlane.f32.xlu0 %v498_v36  ;;  %v2835_v23 = vsub.f32 %v2680_v25, %v437_v37 }
 0x129   : > { %v392_v39 = vpop.xlane.xlu0 %391  ;;  %v394_v5 = vpop.xlane.xlu1 %393 }
 0x12a   : > { %v438_v16 = vmul.f32 0.0078125, %v392_v39  ;;  %v500_v42 = vmul.f32 %v2832_v22, %v2832_v22  ;;  %v439_v43 = vmul.f32 0.0078125, %v394_v5  ;;  %v501_v25 = vmul.f32 %v2835_v23, %v2835_v23 }
 0x12c   : > { %v2842_v17 = vsub.f32 %v2685_v26, %v438_v16  ;;  %546 = vadd.xlane.f32.xlu1 %v499_v38  ;;  %548 = vadd.xlane.f32.xlu0 %v500_v42  ;;  %v2845_v24 = vsub.f32 %v2688_v27, %v439_v43 }
 0x12d   : > { %v396_v44 = vpop.xlane.xlu0 %395  ;;  %v398_v7 = vpop.xlane.xlu1 %397 }
 0x12e   : > { %v440_v12 = vmul.f32 0.0078125, %v396_v44  ;;  %v502_v48 = vmul.f32 %v2842_v17, %v2842_v17  ;;  %v441_v49 = vmul.f32 0.0078125, %v398_v7  ;;  %v503_v27 = vmul.f32 %v2845_v24, %v2845_v24 }
 0x130   : > { %v2852_v13 = vsub.f32 %v2693_v28, %v440_v12  ;;  %550 = vadd.xlane.f32.xlu1 %v501_v25  ;;  %552 = vadd.xlane.f32.xlu0 %v502_v48  ;;  %v2855_v26 = vsub.f32 %v2696_v29, %v441_v49 }
 0x131   : > { %v400_v50 = vpop.xlane.xlu0 %399  ;;  %v402_v53 = vpop.xlane.xlu1 %401 }
 0x132   : > { %v442_v56 = vmul.f32 0.0078125, %v400_v50  ;;  %v504_v57 = vmul.f32 %v2852_v13, %v2852_v13  ;;  %v443_v58 = vmul.f32 0.0078125, %v402_v53  ;;  %v505_v29 = vmul.f32 %v2855_v26, %v2855_v26  ;;  %v2876_v50 = vld [vmem:[%s3524_s2] ss:$0 sm:$0xff] }
 0x134   : > { %v2862_v59 = vsub.f32 %v2701_v30, %v442_v56  ;;  %554 = vadd.xlane.f32.xlu1 %v503_v27  ;;  %556 = vadd.xlane.f32.xlu0 %v504_v57  ;;  %v2865_v28 = vsub.f32 %v2704_v31, %v443_v58 }
 0x136   : > { %v506_v63 = vmul.f32 %v2862_v59, %v2862_v59  ;;  %v507_v20 = vmul.f32 %v2865_v28, %v2865_v28 }
 0x138   : > { %558 = vadd.xlane.f32.xlu1 %v505_v29  ;;  %560 = vadd.xlane.f32.xlu0 %v506_v63  ;;  %v2882_v63 = vld [vmem:[%s3525_s3] ss:$0 sm:$0xff] }
 0x13c   : > { %562 = vadd.xlane.f32.xlu1 %v507_v20 }
 0x189   : > { %v517_v14 = vpop.xlane.xlu0 %516 }
 0x18a   : > { %v580_v30 = vmul.f32 0.0078125, %v517_v14 }
 0x18c   : > { %v612_v15 = vadd.f32 1e-06, %v580_v30 }
 0x18d   : > { %v565_v32 = vpop.xlane.xlu1 %564  ;;  %v519_v3 = vpop.xlane.xlu0 %518 }
 0x18e   : > { %2147 = vrsqrt.f32 %v612_v15  ;;  %v604_v31 = vmul.f32 0.0078125, %v565_v32  ;;  %v581_v10 = vmul.f32 0.0078125, %v519_v3 }
 0x190   : > { %v636_v36 = vadd.f32 1e-06, %v604_v31  ;;  %v613_v37 = vadd.f32 1e-06, %v581_v10 }
 0x191   : > { %v567_v38 = vpop.xlane.xlu1 %566  ;;  %v521_v39 = vpop.xlane.xlu0 %520 }
 0x192   : > { %2149 = vrsqrt.f32 %v636_v36  ;;  %v605_v5 = vmul.f32 0.0078125, %v567_v38  ;;  %v582_v16 = vmul.f32 0.0078125, %v521_v39  ;;  %v794_v39 = vld [vmem:[#allocation4 + $0x40] sm:$0xff] }
 0x193   : > { %2151 = vrsqrt.f32 %v613_v37 }
 0x194   : > { %v637_v42 = vadd.f32 1e-06, %v605_v5  ;;  %v614_v43 = vadd.f32 1e-06, %v582_v16  ;;  %v797_v5 = vld [vmem:[#allocation4 + $0x58] sm:$0xff] }
 0x195   : > { %v569_v25 = vpop.xlane.xlu1 %568  ;;  %v523_v44 = vpop.xlane.xlu0 %522 }
 0x196   : > { %2153 = vrsqrt.f32 %v637_v42  ;;  %v606_v7 = vmul.f32 0.0078125, %v569_v25  ;;  %v583_v12 = vmul.f32 0.0078125, %v523_v44 }
 0x197   : > { %2155 = vrsqrt.f32 %v614_v43 }
 0x198   : > { %v2148_v48 = vpop.eup %2147  ;;  %v638_v49 = vadd.f32 1e-06, %v606_v7  ;;  %v615_v27 = vadd.f32 1e-06, %v583_v12 }
 0x199   : > { %v571_v53 = vpop.xlane.xlu1 %570  ;;  %v525_v56 = vpop.xlane.xlu0 %524  ;;  %v676_v57 = vmul.f32 %v2148_v48, %v2709_v54 }
 0x19a   : > { %2157 = vrsqrt.f32 %v638_v49  ;;  %v607_v58 = vmul.f32 0.0078125, %v571_v53  ;;  %v584_v29 = vmul.f32 0.0078125, %v525_v56  ;;  %v803_v53 = vld [vmem:[#allocation4 + $0x88] sm:$0xff] }
 0x19b   : > { %2159 = vrsqrt.f32 %v615_v27  ;;  %v715_v20 = vmul.f32 %v2876_v50, %v676_v57  ;;  %v800_v27 = vld [vmem:[#allocation4 + $0x70] sm:$0xff] }
 0x19c   : > { %v2150_v14 = vpop.eup %2149  ;;  %v639_v30 = vadd.f32 1e-06, %v607_v58  ;;  %v616_v15 = vadd.f32 1e-06, %v584_v29 }
 0x19d   : > { %v2152_v32 = vpop.eup %2151  ;;  %v573_v3 = vpop.xlane.xlu1 %572  ;;  %v2886_v10 = vadd.f32 %v2882_v63, %v715_v20  ;;  %v700_v54 = vmul.f32 %v2150_v14, %v2717_v61 }
 0x19e   : > { %v527_v31 = vpop.xlane.xlu0 %526  ;;  %2161 = vrsqrt.f32 %v639_v30  ;;  %v608_v36 = vmul.f32 0.0078125, %v573_v3  ;;  %v677_v38 = vmul.f32 %v2152_v32, %v2712_v55  ;;  %v1971_v55 = vpack.c.bf16 %v797_v5, %v794_v39  ;;  %v806_v39 = vld [vmem:[#allocation4 + $0xa0] sm:$0xff]  ;;  %v809_v5 = vld [vmem:[#allocation4 + $0xb8] sm:$0xff] }
 0x19f   : > { %v585_v37 = vmul.f32 0.0078125, %v527_v31  ;;  %2163 = vrsqrt.f32 %v616_v15  ;;  %916 = vmatmul.mubr.f32.vlgmr.msra.gmra.mrb[0].mxu0 %v2886_v10  ;;  %v739_v16 = vmul.f32 %v2876_v50, %v700_v54 }
 0x1a0   : > { %v2154_v42 = vpop.eup %2153  ;;  %v640_v43 = vadd.f32 1e-06, %v608_v36  ;;  %921 = vmatprep.mubr.f32.mxu0 %v2397_v8  ;;  %v716_v44 = vmul.f32 %v2876_v50, %v677_v38 }
 0x1a1   : > { %v617_v25 = vadd.f32 1e-06, %v585_v37  ;;  %v2156_v61 = vpop.eup %2155  ;;  %v575_v7 = vpop.xlane.xlu1 %574  ;;  %v2895_v48 = vadd.f32 %v2882_v63, %v739_v16  ;;  %v701_v49 = vmul.f32 %v2154_v42, %v2720_v62  ;;  %v1975_v62 = vpack.c.bf16 %v803_v53, %v800_v27  ;;  %v812_v53 = vld [vmem:[#allocation4 + $0xd0] sm:$0xff] }
 0x1a2   : > { %v529_v12 = vpop.xlane.xlu0 %528  ;;  %2165 = vrsqrt.f32 %v640_v43  ;;  %v609_v56 = vmul.f32 0.0078125, %v575_v7  ;;  %v2899_v58 = vadd.f32 %v2882_v63, %v716_v44  ;;  %v678_v29 = vmul.f32 %v2156_v61, %v2727_v35 }
 0x1a3   : > { %v586_v57 = vmul.f32 0.0078125, %v529_v12  ;;  %2167 = vrsqrt.f32 %v617_v25  ;;  %1060 = vmatmul.mubr.f32.vlgmr.msra.gmra.mrb[0].mxu1 %v2895_v48  ;;  %v740_v20 = vmul.f32 %v2876_v50, %v701_v49  ;;  %v1979_v49 = vpack.c.bf16 %v809_v5, %v806_v39  ;;  %v818_v39 = vld [vmem:[#allocation4 + $0x100] sm:$0xff]  ;;  %v821_v5 = vld [vmem:[#allocation4 + $0x118] sm:$0xff] }
 0x1a4   : > { %v2158_v14 = vpop.eup %2157  ;;  %v641_v30 = vadd.f32 1e-06, %v609_v56  ;;  %922 = vmatmul.mubr.f32.gmra.mrb[2].mxu0 %v2899_v58  ;;  %1970 = vmatpush3.bf16.msra.mxu1 %v2818_v0  ;;  %v717_v54 = vmul.f32 %v2876_v50, %v678_v29  ;;  %v815_v56 = vld [vmem:[#allocation4 + $0xe8] sm:$0xff] }
 0x1a5   : > { %v618_v15 = vadd.f32 1e-06, %v586_v57  ;;  %v2160_v32 = vpop.eup %2159  ;;  %v577_v3 = vpop.xlane.xlu1 %576  ;;  %927 = vmatprep.mubr.f32.mxu0 %v2397_v8  ;;  %1065 = vmatprep.mubr.f32.mxu1 %v2397_v8  ;;  %v2910_v35 = vadd.f32 %v2882_v63, %v740_v20  ;;  %v702_v36 = vmul.f32 %v2158_v14, %v2730_v2 }
 0x1a6   : > { %v531_v31 = vpop.xlane.xlu0 %530  ;;  %2169 = vrsqrt.f32 %v641_v30  ;;  %v610_v37 = vmul.f32 0.0078125, %v577_v3  ;;  %1972 = vmatprep.subr.bf16.mxu1 %v1971_v55  ;;  %v679_v0 = vmul.f32 %v2160_v32, %v2737_v41  ;;  %v2915_v16 = vadd.f32 %v2882_v63, %v717_v54 }
 0x1a7   : > { %v587_v38 = vmul.f32 0.0078125, %v531_v31  ;;  %2171 = vrsqrt.f32 %v618_v15  ;;  %1066 = vmatmul.mubr.f32.gmra.mrb[2].mxu1 %v2910_v35  ;;  %v741_v42 = vmul.f32 %v2876_v50, %v702_v36  ;;  %v1983_v32 = vpack.c.bf16 %v815_v56, %v812_v53  ;;  %v824_v56 = vld [vmem:[#allocation4 + $0x130] sm:$0xff] }
 0x1a8   : > { %v2162_v43 = vpop.eup %2161  ;;  %v642_v25 = vadd.f32 1e-06, %v610_v37  ;;  %1974 = vmatpush3.bf16.msra.mxu1 %v1971_v55  ;;  %1071 = vmatprep.mubr.f32.mxu1 %v2397_v8  ;;  %v718_v2 = vmul.f32 %v2876_v50, %v679_v0 }
 0x1a9   : > { %v619_v44 = vadd.f32 1e-06, %v587_v38  ;;  %v2164_v61 = vpop.eup %2163  ;;  %928 = vmatmul.mubr.f32.gmra.mrb[4].mxu0 %v2915_v16  ;;  %v579_v41 = vpop.xlane.xlu1 %578  ;;  %1976 = vmatprep.subr.bf16.mxu1 %v1975_v62  ;;  %v2923_v12 = vadd.f32 %v2882_v63, %v741_v42  ;;  %v703_v27 = vmul.f32 %v2162_v43, %v2740_v4 }
 0x1aa   : > { %v533_v7 = vpop.xlane.xlu0 %532  ;;  %2173 = vrsqrt.f32 %v642_v25  ;;  %v611_v55 = vmul.f32 0.0078125, %v579_v41  ;;  %933 = vmatprep.mubr.f32.mxu0 %v2397_v8  ;;  %v2928_v29 = vadd.f32 %v2882_v63, %v718_v2  ;;  %v680_v20 = vmul.f32 %v2164_v61, %v2747_v47 }
 0x1ab   : > { %v588_v57 = vmul.f32 0.0078125, %v533_v7  ;;  %2175 = vrsqrt.f32 %v619_v44  ;;  %1072 = vmatmul.mubr.f32.gmra.mrb[4].mxu1 %v2923_v12  ;;  %v742_v14 = vmul.f32 %v2876_v50, %v703_v27  ;;  %v1987_v27 = vpack.c.bf16 %v821_v5, %v818_v39  ;;  %v833_v39 = vld [vmem:[#allocation4 + $0x178] sm:$0xff] }
 0x1ac   : > { %v2166_v30 = vpop.eup %2165  ;;  %v643_v15 = vadd.f32 1e-06, %v611_v55  ;;  %1978 = vmatpush3.bf16.msra.mxu1 %v1975_v62  ;;  %1077 = vmatprep.mubr.f32.mxu1 %v2397_v8  ;;  %v719_v36 = vmul.f32 %v2876_v50, %v680_v20  ;;  %v827_v55 = vld [vmem:[#allocation4 + $0x148] sm:$0xff] }
 0x1ad   : > { %v620_v4 = vadd.f32 1e-06, %v588_v57  ;;  %v2168_v3 = vpop.eup %2167  ;;  %934 = vmatmul.mubr.f32.gmra.mrb[6].mxu0 %v2928_v29  ;;  %v535_v31 = vpop.xlane.xlu1 %534  ;;  %1980 = vmatprep.subr.bf16.mxu1 %v1979_v49  ;;  %v2937_v37 = vadd.f32 %v2882_v63, %v742_v14  ;;  %v704_v47 = vmul.f32 %v2166_v30, %v2750_v6 }
 0x1ae   : > { %v537_v54 = vpop.xlane.xlu0 %536  ;;  %2177 = vrsqrt.f32 %v643_v15  ;;  %v589_v38 = vmul.f32 0.0078125, %v535_v31  ;;  %939 = vmatprep.mubr.f32.mxu0 %v2397_v8  ;;  %v681_v62 = vmul.f32 %v2168_v3, %v2757_v9  ;;  %v2943_v42 = vadd.f32 %v2882_v63, %v719_v36 }
 0x1af   : > { %v590_v0 = vmul.f32 0.0078125, %v537_v54  ;;  %2179 = vrsqrt.f32 %v620_v4  ;;  %1078 = vmatmul.mubr.f32.gmra.mrb[6].mxu1 %v2937_v37  ;;  %v743_v43 = vmul.f32 %v2876_v50, %v704_v47 }
 0x1b0   : > { %v2170_v25 = vpop.eup %2169  ;;  %v621_v44 = vadd.f32 1e-06, %v589_v38  ;;  %1982 = vmatpush3.bf16.msra.mxu1 %v1979_v49  ;;  %1083 = vmatprep.mubr.f32.mxu1 %v2397_v8  ;;  %v720_v2 = vmul.f32 %v2876_v50, %v681_v62  ;;  %v830_v62 = vld [vmem:[#allocation4 + $0x160] sm:$0xff] }
 0x1b1   : > { %v622_v6 = vadd.f32 1e-06, %v590_v0  ;;  %v2172_v61 = vpop.eup %2171  ;;  %940 = vmatmul.mubr.f32.gmra.mrb[8].mxu0 %v2943_v42  ;;  %v539_v9 = vpop.xlane.xlu1 %538  ;;  %1984 = vmatprep.subr.bf16.mxu1 %v1983_v32  ;;  %v2951_v7 = vadd.f32 %v2882_v63, %v743_v43  ;;  %v705_v53 = vmul.f32 %v2170_v25, %v2760_v60  ;;  %v1991_v60 = vpack.c.bf16 %v827_v55, %v824_v56 }
 0x1b2   : > { %v541_v41 = vpop.xlane.xlu0 %540  ;;  %2181 = vrsqrt.f32 %v621_v44  ;;  %v591_v49 = vmul.f32 0.0078125, %v539_v9  ;;  %945 = vmatprep.mubr.f32.mxu0 %v2397_v8  ;;  %v2956_v20 = vadd.f32 %v2882_v63, %v720_v2  ;;  %v682_v14 = vmul.f32 %v2172_v61, %v2767_v11 }
 0x1b3   : > { %v592_v57 = vmul.f32 0.0078125, %v541_v41  ;;  %2183 = vrsqrt.f32 %v622_v6  ;;  %1084 = vmatmul.mubr.f32.gmra.mrb[8].mxu1 %v2951_v7  ;;  %v744_v30 = vmul.f32 %v2876_v50, %v705_v53  ;;  %v1995_v9 = vpack.c.bf16 %v833_v39, %v830_v62 }
 0x1b4   : > { %v2174_v15 = vpop.eup %2173  ;;  %v623_v4 = vadd.f32 1e-06, %v591_v49  ;;  %1986 = vmatpush3.bf16.msra.mxu1 %v1983_v32  ;;  %1089 = vmatprep.mubr.f32.mxu1 %v2397_v8  ;;  %v721_v36 = vmul.f32 %v2876_v50, %v682_v14 }
 0x1b5   : > { %v2176_v3 = vpop.eup %2175  ;;  %946 = vmatmul.mubr.f32.gmra.mrb[10].mxu0 %v2956_v20  ;;  %v543_v31 = vpop.xlane.xlu1 %542  ;;  %1988 = vmatprep.subr.bf16.mxu1 %v1987_v27  ;;  %v2965_v47 = vadd.f32 %v2882_v63, %v744_v30  ;;  %v706_v11 = vmul.f32 %v2174_v15, %v2770_v40  ;;  %v624_v38 = vadd.f32 1e-06, %v592_v57 }
 0x1b6   : > { %v545_v54 = vpop.xlane.xlu0 %544  ;;  %2185 = vrsqrt.f32 %v623_v4  ;;  %v593_v0 = vmul.f32 0.0078125, %v543_v31  ;;  %951 = vmatprep.mubr.f32.mxu0 %v2397_v8  ;;  %v683_v32 = vmul.f32 %v2176_v3, %v2777_v51  ;;  %v2971_v5 = vadd.f32 %v2882_v63, %v721_v36 }
 0x1b7   : > { %1090 = vmatmul.mubr.f32.gmra.mrb[10].mxu1 %v2965_v47  ;;  %v745_v43 = vmul.f32 %v2876_v50, %v706_v11  ;;  %v594_v44 = vmul.f32 0.0078125, %v545_v54  ;;  %2187 = vrsqrt.f32 %v624_v38 }
 0x1b8   : > { %v2178_v25 = vpop.eup %2177  ;;  %1990 = vmatpush3.bf16.msra.mxu1 %v1987_v27  ;;  %1095 = vmatprep.mubr.f32.mxu1 %v2397_v8  ;;  %v722_v40 = vmul.f32 %v2876_v50, %v683_v32  ;;  %v625_v53 = vadd.f32 1e-06, %v593_v0 }
 0x1b9   : > { %v2180_v6 = vpop.eup %2179  ;;  %952 = vmatmul.mubr.f32.gmra.mrb[12].mxu0 %v2971_v5  ;;  %v547_v51 = vpop.xlane.xlu1 %546  ;;  %1992 = vmatprep.subr.bf16.mxu1 %v1991_v60  ;;  %v2979_v61 = vadd.f32 %v2882_v63, %v745_v43  ;;  %v707_v41 = vmul.f32 %v2178_v25, %v2780_v52  ;;  %v626_v14 = vadd.f32 1e-06, %v594_v44 }
 0x1ba   : > { %v549_v2 = vpop.xlane.xlu0 %548  ;;  %957 = vmatprep.mubr.f32.mxu0 %v2397_v8  ;;  %v2984_v27 = vadd.f32 %v2882_v63, %v722_v40  ;;  %v684_v55 = vmul.f32 %v2180_v6, %v2787_v33  ;;  %v595_v15 = vmul.f32 0.0078125, %v547_v51  ;;  %2189 = vrsqrt.f32 %v625_v53 }
 0x1bb   : > { %v596_v56 = vmul.f32 0.0078125, %v549_v2  ;;  %1096 = vmatmul.mubr.f32.gmra.mrb[12].mxu1 %v2979_v61  ;;  %v746_v49 = vmul.f32 %v2876_v50, %v707_v41 }
 0x1bc   : > { %v2182_v57 = vpop.eup %2181  ;;  %1994 = vmatpush3.bf16.msra.mxu1 %v1991_v60  ;;  %1101 = vmatprep.mubr.f32.mxu1 %v2397_v8  ;;  %v723_v31 = vmul.f32 %v2876_v50, %v684_v55 }
 0x1bd   : > { %v628_v30 = vadd.f32 1e-06, %v596_v56  ;;  %v2184_v52 = vpop.eup %2183  ;;  %958 = vmatmul.mubr.f32.gmra.mrb[14].mxu0 %v2984_v27  ;;  %v551_v4 = vpop.xlane.xlu1 %550  ;;  %1996 = vmatprep.subr.bf16.mxu1 %v1995_v9  ;;  %v2993_v54 = vadd.f32 %v2882_v63, %v746_v49  ;;  %v685_v33 = vmul.f32 %v2182_v57, %v2790_v34  ;;  %v627_v34 = vadd.f32 1e-06, %v595_v15 }
 0x1be   : > { %v553_v3 = vpop.xlane.xlu0 %552  ;;  %v597_v36 = vmul.f32 0.0078125, %v551_v4  ;;  %963 = vmatprep.mubr.f32.mxu0 %v2397_v8  ;;  %v2998_v60 = vadd.f32 %v2882_v63, %v723_v31  ;;  %v686_v0 = vmul.f32 %v2184_v52, %v2797_v45 }
 0x1bf   : > { %v598_v11 = vmul.f32 0.0078125, %v553_v3  ;;  %2191 = vrsqrt.f32 %v628_v30  ;;  %1102 = vmatmul.mubr.f32.gmra.mrb[14].mxu1 %v2993_v54  ;;  %v724_v38 = vmul.f32 %v2876_v50, %v685_v33 }
 0x1c0   : > { %v2186_v32 = vpop.eup %2185  ;;  %v629_v62 = vadd.f32 1e-06, %v597_v36  ;;  %1998 = vmatpush3.bf16.msra.mxu1 %v1995_v9  ;;  %1887 = vmatprep.mubr.f32.mxu1 %v2886_v10  ;;  %2193 = vrsqrt.f32 %v626_v14  ;;  %v725_v45 = vmul.f32 %v2876_v50, %v686_v0 }
 0x1c1   : > { %v630_v39 = vadd.f32 1e-06, %v598_v11  ;;  %964 = vmatmul.mubr.f32.gmra.mrb[16].mxu0 %v2998_v60  ;;  %v555_v43 = vpop.xlane.xlu1 %554  ;;  %v3006_v44 = vadd.f32 %v2882_v63, %v724_v38  ;;  %v687_v10 = vmul.f32 %v2186_v32, %v2800_v46  ;;  %v2188_v51 = vpop.eup %2187 }
 0x1c2   : > { %v557_v25 = vpop.xlane.xlu0 %556  ;;  %2195 = vrsqrt.f32 %v629_v62  ;;  %v599_v40 = vmul.f32 0.0078125, %v555_v43  ;;  %969 = vmatprep.mubr.f32.mxu0 %v2397_v8  ;;  %v688_v49 = vmul.f32 %v2188_v51, %v2807_v18 }
 0x1c3   : > { %v600_v6 = vmul.f32 0.0078125, %v557_v25  ;;  %2197 = vrsqrt.f32 %v630_v39  ;;  %1888 = vmatmul.mubr.f32.vlgmr.msra.gmra.mrb[16].mxu1 %v2899_v58  ;;  %v764_v58 = vadd.f32 %v2882_v63, %v725_v45  ;;  %v726_v46 = vmul.f32 %v2876_v50, %v687_v10 }
 0x1c4   : > { %v631_v2 = vadd.f32 1e-06, %v599_v40  ;;  %1890 = vmatprep.mubr.f32.mxu1 %v2915_v16  ;;  %2199 = vrsqrt.f32 %v627_v34  ;;  %v2190_v16 = vpop.eup %2189  ;;  %v727_v18 = vmul.f32 %v2876_v50, %v688_v49 }
 0x1c5   : > { %v632_v9 = vadd.f32 1e-06, %v600_v6  ;;  %970 = vmatmul.mubr.f32.gmra.mrb[18].mxu0 %v3006_v44  ;;  %v559_v41 = vpop.xlane.xlu1 %558  ;;  %v689_v31 = vmul.f32 %v2190_v16, %v2810_v19 }
 0x1c6   : > { %v561_v53 = vpop.xlane.xlu0 %560  ;;  %2201 = vrsqrt.f32 %v631_v2  ;;  %v601_v56 = vmul.f32 0.0078125, %v559_v41  ;;  %975 = vmatprep.mubr.f32.mxu0 %v2397_v8  ;;  %v766_v19 = vadd.f32 %v2882_v63, %v727_v18 }
 0x1c7   : > { %v602_v55 = vmul.f32 0.0078125, %v561_v53  ;;  %2203 = vrsqrt.f32 %v632_v9  ;;  %1891 = vmatmul.mubr.f32.gmra.mrb[18].mxu1 %v2928_v29  ;;  %v765_v29 = vadd.f32 %v2882_v63, %v726_v46 }
 0x1c8   : > { %v633_v57 = vadd.f32 1e-06, %v601_v56  ;;  %1893 = vmatprep.mubr.f32.mxu1 %v2943_v42 }
 0x1c9   : > { %v634_v14 = vadd.f32 1e-06, %v602_v55  ;;  %v2192_v30 = vpop.eup %2191  ;;  %976 = vmatmul.mubr.f32.gmra.mrb[20].mxu0 %v764_v58  ;;  %v563_v52 = vpop.xlane.xlu1 %562 }
 0x1ca   : > { %2205 = vrsqrt.f32 %v633_v57  ;;  %v603_v15 = vmul.f32 0.0078125, %v563_v52  ;;  %981 = vmatprep.mubr.f32.mxu0 %v2397_v8  ;;  %v692_v4 = vmul.f32 %v2192_v30, %v2832_v22  ;;  %v2194_v3 = vpop.eup %2193 }
 0x1cb   : > { %2207 = vrsqrt.f32 %v634_v14  ;;  %1894 = vmatmul.mubr.f32.gmra.mrb[20].mxu1 %v2956_v20  ;;  %v690_v32 = vmul.f32 %v2194_v3, %v2821_v21 }
 0x1cc   : > { %v2196_v42 = vpop.eup %2195  ;;  %v635_v33 = vadd.f32 1e-06, %v603_v15  ;;  %1896 = vmatprep.mubr.f32.mxu1 %v2971_v5  ;;  %v731_v36 = vmul.f32 %v2876_v50, %v692_v4  ;;  %v728_v5 = vmul.f32 %v2876_v50, %v689_v31 }
 0x1cd   : > { %v2198_v11 = vpop.eup %2197  ;;  %982 = vmatmul.mubr.f32.gmra.mrb[22].mxu0 %v765_v29  ;;  %v693_v22 = vmul.f32 %v2196_v42, %v2835_v23 }
 0x1ce   : > { %2209 = vrsqrt.f32 %v635_v33  ;;  %987 = vmatprep.mubr.f32.mxu0 %v2397_v8  ;;  %v770_v38 = vadd.f32 %v2882_v63, %v731_v36  ;;  %v694_v20 = vmul.f32 %v2198_v11, %v2842_v17  ;;  %v2200_v0 = vpop.eup %2199  ;;  %v767_v21 = vadd.f32 %v2882_v63, %v728_v5 }
 0x1cf   : > { %1897 = vmatmul.mubr.f32.gmra.mrb[22].mxu1 %v2984_v27  ;;  %v732_v62 = vmul.f32 %v2876_v50, %v693_v22  ;;  %v691_v40 = vmul.f32 %v2200_v0, %v2824_v1 }
 0x1d0   : > { %v2202_v39 = vpop.eup %2201  ;;  %1899 = vmatprep.mubr.f32.mxu1 %v2998_v60  ;;  %v733_v23 = vmul.f32 %v2876_v50, %v694_v20  ;;  %v729_v60 = vmul.f32 %v2876_v50, %v690_v32 }
 0x1d1   : > { %v2204_v34 = vpop.eup %2203  ;;  %988 = vmatmul.mubr.f32.gmra.mrb[24].mxu0 %v766_v19  ;;  %v771_v17 = vadd.f32 %v2882_v63, %v732_v62  ;;  %v695_v43 = vmul.f32 %v2202_v39, %v2845_v24  ;;  %v730_v9 = vmul.f32 %v2876_v50, %v691_v40 }
 0x1d2   : > { %993 = vmatprep.mubr.f32.mxu0 %v2397_v8  ;;  %v772_v27 = vadd.f32 %v2882_v63, %v733_v23  ;;  %v696_v25 = vmul.f32 %v2204_v34, %v2852_v13  ;;  %v768_v1 = vadd.f32 %v2882_v63, %v729_v60 }
 0x1d3   : > { %1900 = vmatmul.mubr.f32.gmra.mrb[24].mxu1 %v3006_v44  ;;  %v734_v6 = vmul.f32 %v2876_v50, %v695_v43 }
 0x1d4   : > { %v2206_v45 = vpop.eup %2205  ;;  %1902 = vmatprep.mubr.f32.mxu1 %v764_v58  ;;  %v735_v24 = vmul.f32 %v2876_v50, %v696_v25  ;;  %v769_v58 = vadd.f32 %v2882_v63, %v730_v9 }
 0x1d5   : > { %v2208_v10 = vpop.eup %2207  ;;  %994 = vmatmul.mubr.f32.gmra.mrb[26].mxu0 %v767_v21  ;;  %v773_v51 = vadd.f32 %v2882_v63, %v734_v6  ;;  %v697_v13 = vmul.f32 %v2206_v45, %v2855_v26 }
 0x1d6   : > { %999 = vmatprep.mubr.f32.mxu0 %v2397_v8  ;;  %v774_v44 = vadd.f32 %v2882_v63, %v735_v24  ;;  %v698_v2 = vmul.f32 %v2208_v10, %v2862_v59 }
 0x1d7   : > { %1903 = vmatmul.mubr.f32.gmra.mrb[26].mxu1 %v765_v29  ;;  %v736_v41 = vmul.f32 %v2876_v50, %v697_v13 }
 0x1d8   : > { %v2210_v53 = vpop.eup %2209  ;;  %1905 = vmatprep.mubr.f32.mxu1 %v766_v19  ;;  %v737_v56 = vmul.f32 %v2876_v50, %v698_v2 }
 0x1d9   : > { %1000 = vmatmul.mubr.f32.gmra.mrb[28].mxu0 %v768_v1  ;;  %v775_v26 = vadd.f32 %v2882_v63, %v736_v41  ;;  %v699_v55 = vmul.f32 %v2210_v53, %v2865_v28  ;;  %v836_v28 = vlaneseq }
 0x1da   : > { %1005 = vmatprep.mubr.f32.mxu0 %v2397_v8  ;;  %v776_v59 = vadd.f32 %v2882_v63, %v737_v56 }
 0x1db   : > { %1906 = vmatmul.mubr.f32.gmra.mrb[28].mxu1 %v767_v21  ;;  %v738_v46 = vmul.f32 %v2876_v50, %v699_v55  ;;  %v3082_v50 = vshrl.u32 %v836_v28, 7 }
 0x1dc   : > { %1908 = vmatprep.mubr.f32.mxu1 %v768_v1 }
 0x1dd   : > { %1006 = vmatmul.mubr.f32.gmra.mrb[30].mxu0 %v769_v58  ;;  %v777_v49 = vadd.f32 %v2882_v63, %v738_v46  ;;  %v838_v63 = vsub.s32 0, %v3082_v50  ;;  %v846_v46 = vsub.s32 2, %v3082_v50 }
 0x1de   : > { %1011 = vmatprep.mubr.f32.mxu0 %v2397_v8 }
 0x1df   : > { %1909 = vmatmul.mubr.f32.gmra.mrb[30].mxu1 %v769_v58 }
 0x1e0   : > { %1911 = vmatprep.mubr.f32.mxu1 %v770_v38 }
 0x1e1   : > { %1012 = vmatmul.mubr.f32.gmra.mrb[32].mxu0 %v770_v38 }
 0x1e2   : > { %1017 = vmatprep.mubr.f32.mxu0 %v2397_v8 }
 0x1e3   : > { %1912 = vmatmul.mubr.f32.gmra.mrb[32].mxu1 %v771_v17 }
 0x1e4   : > { %1914 = vmatprep.mubr.f32.mxu1 %v772_v27 }
 0x1e5   : > { %1018 = vmatmul.mubr.f32.gmra.mrb[34].mxu0 %v771_v17 }
 0x1e6   : > { %1023 = vmatprep.mubr.f32.mxu0 %v2397_v8 }
 0x1e7   : > { %1915 = vmatmul.mubr.f32.gmra.mrb[34].mxu1 %v773_v51 }
 0x1e8   : > { %1917 = vmatprep.mubr.f32.mxu1 %v774_v44 }
 0x1e9   : > { %1024 = vmatmul.mubr.f32.gmra.mrb[36].mxu0 %v772_v27 }
 0x1ea   : > { %1029 = vmatprep.mubr.f32.mxu0 %v2397_v8 }
 0x1eb   : > { %1918 = vmatmul.mubr.f32.gmra.mrb[36].mxu1 %v775_v26 }
 0x1ec   : > { %1920 = vmatprep.mubr.f32.mxu1 %v776_v59 }
 0x1ed   : > { %1030 = vmatmul.mubr.f32.gmra.mrb[38].mxu0 %v773_v51 }
 0x1ee   : > { %1035 = vmatprep.mubr.f32.mxu0 %v2397_v8 }
 0x1ef   : > { %1921 = vmatmul.mubr.f32.gmra.mrb[38].mxu1 %v777_v49 }
 0x1f0   : > { %1923 = vmatprep.mubr.f32.mxu1 %v2895_v48  ;;  %v3088_v48 = vld [vmem:[%s3526_s4] sm:$0x7] }
 0x1f1   : > { %1036 = vmatmul.mubr.f32.gmra.mrb[40].mxu0 %v774_v44 }
 0x1f2   : > { %1041 = vmatprep.mubr.f32.mxu0 %v2397_v8 }
 0x1f3   : > { %1924 = vmatmul.mubr.f32.gmra.mrb[40].mxu1 %v2910_v35  ;;  %v842_v35 = vsub.s32 1, %v3082_v50 }
 0x1f4   : > { %1926 = vmatprep.mubr.f32.mxu1 %v2923_v12 }
 0x1f5   : > { %1042 = vmatmul.mubr.f32.gmra.mrb[42].mxu0 %v775_v26  ;;  %v3096_v12 = vrot.slane %v3088_v48, %v842_v35 }
 0x1f6   : > { %1047 = vmatprep.mubr.f32.mxu0 %v2397_v8 }
 0x1f7   : > { %1927 = vmatmul.mubr.f32.gmra.mrb[42].mxu1 %v2937_v37 }
 0x1f8   : > { %1929 = vmatprep.mubr.f32.mxu1 %v2951_v7 }
 0x1f9   : > { %1048 = vmatmul.mubr.f32.gmra.mrb[44].mxu0 %v776_v59 }
 0x1fa   : > { %1053 = vmatprep.mubr.f32.mxu0 %v2397_v8  ;;  %v3093_v8 = vrot.slane %v3088_v48, %v838_v63 }
 0x1fb   : > { %1930 = vmatmul.mubr.f32.gmra.mrb[44].mxu1 %v2965_v47 }
 0x1fc   : > { %1932 = vmatprep.mubr.f32.mxu1 %v2979_v61 }
 0x1fd   : > { %1054 = vmatmul.mubr.f32.gmra.mrb[46].mxu0 %v777_v49 }
 0x1ff   : > { %1933 = vmatmul.mubr.f32.gmra.mrb[46].mxu1 %v2993_v54 }
 0x272   : > { %v917_v37 = vpop.f32.mrb[0].mxu0 }
 0x273   : > { %v918_v7 = vadd.f32 %v917_v37, %v3093_v8  ;;  %v919_v47 = vpop.f32.mrb[1].mxu0 }
 0x274   : > { %v920_v61 = vadd.f32 %v919_v47, %v3096_v12 }
 0x275   : > { %1333 = vst [vmem:[%s3100_s10] sm:$0xff] %v918_v7 }
 0x276   : > { %1334 = vst [vmem:[%s3100_s10 + $0x8] sm:$0xff] %v920_v61  ;;  %v1061_v54 = vpop.f32.mrb[0].mxu1  ;;  %v3162_v61 = vrot.slane %v3088_v48, %v846_v46 }
 0x277   : > { %v923_v16 = vpop.f32.mrb[2].mxu0  ;;  %v1062_v57 = vadd.f32 %v1061_v54, %v3093_v8  ;;  %v1063_v14 = vpop.f32.mrb[1].mxu1 }
 0x278   : > { %v924_v30 = vadd.f32 %v923_v16, %v3093_v8  ;;  %v925_v52 = vpop.f32.mrb[3].mxu0  ;;  %v1064_v15 = vadd.f32 %v1063_v14, %v3096_v12 }
 0x279   : > { %1405 = vst [vmem:[%s3100_s10 + $0x240] sm:$0xff] %v1062_v57  ;;  %v926_v4 = vadd.f32 %v925_v52, %v3096_v12 }
 0x27a   : > { %1336 = vst [vmem:[%s3100_s10 + $0x18] sm:$0xff] %v924_v30  ;;  %1406 = vst [vmem:[%s3100_s10 + $0x248] sm:$0xff] %v1064_v15  ;;  %v1067_v3 = vpop.f32.mrb[2].mxu1 }
 0x27b   : > { %1337 = vst [vmem:[%s3100_s10 + $0x20] sm:$0xff] %v926_v4  ;;  %v1068_v29 = vadd.f32 %v1067_v3, %v3093_v8  ;;  %v1069_v18 = vpop.f32.mrb[3].mxu1 }
 0x27c   : > { %v929_v31 = vpop.f32.mrb[4].mxu0  ;;  %v1070_v42 = vadd.f32 %v1069_v18, %v3096_v12 }
 0x27d   : > { %v930_v33 = vadd.f32 %v929_v31, %v3093_v8  ;;  %1408 = vst [vmem:[%s3100_s10 + $0x258] sm:$0xff] %v1068_v29  ;;  %v931_v36 = vpop.f32.mrb[5].mxu0 }
 0x27e   : > { %v932_v11 = vadd.f32 %v931_v36, %v3096_v12  ;;  %1409 = vst [vmem:[%s3100_s10 + $0x260] sm:$0xff] %v1070_v42  ;;  %v1073_v22 = vpop.f32.mrb[4].mxu1 }
 0x27f   : > { %1339 = vst [vmem:[%s3100_s10 + $0x30] sm:$0xff] %v930_v33  ;;  %v1074_v38 = vadd.f32 %v1073_v22, %v3093_v8  ;;  %v1075_v20 = vpop.f32.mrb[5].mxu1 }
 0x280   : > { %1340 = vst [vmem:[%s3100_s10 + $0x38] sm:$0xff] %v932_v11  ;;  %v935_v0 = vpop.f32.mrb[6].mxu0  ;;  %v1076_v19 = vadd.f32 %v1075_v20, %v3096_v12 }
 0x281   : > { %v936_v5 = vadd.f32 %v935_v0, %v3093_v8  ;;  %1411 = vst [vmem:[%s3100_s10 + $0x270] sm:$0xff] %v1074_v38  ;;  %v937_v32 = vpop.f32.mrb[7].mxu0 }
 0x282   : > { %v938_v62 = vadd.f32 %v937_v32, %v3096_v12  ;;  %1412 = vst [vmem:[%s3100_s10 + $0x278] sm:$0xff] %v1076_v19  ;;  %v1079_v39 = vpop.f32.mrb[6].mxu1 }
 0x283   : > { %1342 = vst [vmem:[%s3100_s10 + $0x48] sm:$0xff] %v936_v5  ;;  %v1080_v23 = vadd.f32 %v1079_v39, %v3093_v8  ;;  %v1081_v34 = vpop.f32.mrb[7].mxu1 }
 0x284   : > { %1343 = vst [vmem:[%s3100_s10 + $0x50] sm:$0xff] %v938_v62  ;;  %v941_v17 = vpop.f32.mrb[8].mxu0  ;;  %v1082_v43 = vadd.f32 %v1081_v34, %v3096_v12 }
 0x285   : > { %v942_v27 = vadd.f32 %v941_v17, %v3093_v8  ;;  %1414 = vst [vmem:[%s3100_s10 + $0x288] sm:$0xff] %v1080_v23  ;;  %v943_v25 = vpop.f32.mrb[9].mxu0 }
 0x286   : > { %v944_v21 = vadd.f32 %v943_v25, %v3096_v12  ;;  %1415 = vst [vmem:[%s3100_s10 + $0x290] sm:$0xff] %v1082_v43  ;;  %v1085_v60 = vpop.f32.mrb[8].mxu1 }
 0x287   : > { %1345 = vst [vmem:[%s3100_s10 + $0x60] sm:$0xff] %v942_v27  ;;  %v1086_v40 = vadd.f32 %v1085_v60, %v3093_v8  ;;  %v1087_v6 = vpop.f32.mrb[9].mxu1 }
 0x288   : > { %1346 = vst [vmem:[%s3100_s10 + $0x68] sm:$0xff] %v944_v21  ;;  %v947_v45 = vpop.f32.mrb[10].mxu0  ;;  %v1088_v24 = vadd.f32 %v1087_v6, %v3096_v12 }
 0x289   : > { %v948_v10 = vadd.f32 %v947_v45, %v3093_v8  ;;  %1417 = vst [vmem:[%s3100_s10 + $0x2a0] sm:$0xff] %v1086_v40  ;;  %v949_v51 = vpop.f32.mrb[11].mxu0 }
 0x28a   : > { %v950_v13 = vadd.f32 %v949_v51, %v3096_v12  ;;  %1418 = vst [vmem:[%s3100_s10 + $0x2a8] sm:$0xff] %v1088_v24  ;;  %v1091_v44 = vpop.f32.mrb[10].mxu1 }
 0x28b   : > { %1348 = vst [vmem:[%s3100_s10 + $0x78] sm:$0xff] %v948_v10  ;;  %v1092_v2 = vadd.f32 %v1091_v44, %v3093_v8  ;;  %v1093_v1 = vpop.f32.mrb[11].mxu1 }
 0x28c   : > { %1349 = vst [vmem:[%s3100_s10 + $0x80] sm:$0xff] %v950_v13  ;;  %v953_v9 = vpop.f32.mrb[12].mxu0  ;;  %v1094_v41 = vadd.f32 %v1093_v1, %v3096_v12 }
 0x28d   : > { %v954_v53 = vadd.f32 %v953_v9, %v3093_v8  ;;  %1420 = vst [vmem:[%s3100_s10 + $0x2b8] sm:$0xff] %v1092_v2  ;;  %v955_v56 = vpop.f32.mrb[13].mxu0 }
 0x28e   : > { %v956_v26 = vadd.f32 %v955_v56, %v3096_v12  ;;  %1421 = vst [vmem:[%s3100_s10 + $0x2c0] sm:$0xff] %v1094_v41  ;;  %v1097_v55 = vpop.f32.mrb[12].mxu1 }
 0x28f   : > { %1351 = vst [vmem:[%s3100_s10 + $0x90] sm:$0xff] %v954_v53  ;;  %v1098_v59 = vadd.f32 %v1097_v55, %v3093_v8  ;;  %v1099_v58 = vpop.f32.mrb[13].mxu1 }
 0x290   : > { %1352 = vst [vmem:[%s3100_s10 + $0x98] sm:$0xff] %v956_v26  ;;  %v959_v49 = vpop.f32.mrb[14].mxu0  ;;  %v1100_v28 = vadd.f32 %v1099_v58, %v3096_v12 }
 0x291   : > { %v960_v63 = vadd.f32 %v959_v49, %v3093_v8  ;;  %1423 = vst [vmem:[%s3100_s10 + $0x2d0] sm:$0xff] %v1098_v59  ;;  %v961_v35 = vpop.f32.mrb[15].mxu0 }
 0x292   : > { %v962_v37 = vadd.f32 %v961_v35, %v3096_v12  ;;  %1424 = vst [vmem:[%s3100_s10 + $0x2d8] sm:$0xff] %v1100_v28  ;;  %v1103_v7 = vpop.f32.mrb[14].mxu1 }
 0x293   : > { %1354 = vst [vmem:[%s3100_s10 + $0xa8] sm:$0xff] %v960_v63  ;;  %v1104_v47 = vadd.f32 %v1103_v7, %v3093_v8  ;;  %v1105_v50 = vpop.f32.mrb[15].mxu1 }
 0x294   : > { %1355 = vst [vmem:[%s3100_s10 + $0xb0] sm:$0xff] %v962_v37  ;;  %v965_v54 = vpop.f32.mrb[16].mxu0  ;;  %v1106_v16 = vadd.f32 %v1105_v50, %v3096_v12 }
 0x295   : > { %v966_v57 = vadd.f32 %v965_v54, %v3093_v8  ;;  %1426 = vst [vmem:[%s3100_s10 + $0x2e8] sm:$0xff] %v1104_v47  ;;  %v967_v14 = vpop.f32.mrb[17].mxu0 }
 0x296   : > { %v968_v30 = vadd.f32 %v967_v14, %v3096_v12  ;;  %1427 = vst [vmem:[%s3100_s10 + $0x2f0] sm:$0xff] %v1106_v16  ;;  %v1889_v52 = vpop.f32.mrb[16].mxu1 }
 0x297   : > { %1357 = vst [vmem:[%s3100_s10 + $0xc0] sm:$0xff] %v966_v57  ;;  %v1180_v48 = vadd.f32 %v1889_v52, %v3162_v61  ;;  %v1174_v15 = vpop.f32.mrb[17].mxu1 }
 0x298   : > { %1358 = vst [vmem:[%s3100_s10 + $0xc8] sm:$0xff] %v968_v30  ;;  %v971_v4 = vpop.f32.mrb[18].mxu0  ;;  %v1175_v3 = vadd.f32 %v1174_v15, %v3162_v61 }
 0x299   : > { %v972_v29 = vadd.f32 %v971_v4, %v3093_v8  ;;  %1338 = vst [vmem:[%s3100_s10 + $0x28] sm:$0xff] %v1180_v48  ;;  %v973_v18 = vpop.f32.mrb[19].mxu0 }
 0x29a   : > { %v974_v31 = vadd.f32 %v973_v18, %v3096_v12  ;;  %1335 = vst [vmem:[%s3100_s10 + $0x10] sm:$0xff] %v1175_v3  ;;  %v1892_v42 = vpop.f32.mrb[18].mxu1 }
 0x29b   : > { %1360 = vst [vmem:[%s3100_s10 + $0xd8] sm:$0xff] %v972_v29  ;;  %v1190_v33 = vadd.f32 %v1892_v42, %v3162_v61  ;;  %v1184_v36 = vpop.f32.mrb[19].mxu1 }
 0x29c   : > { %1361 = vst [vmem:[%s3100_s10 + $0xe0] sm:$0xff] %v974_v31  ;;  %v977_v11 = vpop.f32.mrb[20].mxu0  ;;  %v1185_v22 = vadd.f32 %v1184_v36, %v3162_v61 }
 0x29d   : > { %v978_v38 = vadd.f32 %v977_v11, %v3093_v8  ;;  %1344 = vst [vmem:[%s3100_s10 + $0x58] sm:$0xff] %v1190_v33  ;;  %v979_v20 = vpop.f32.mrb[21].mxu0 }
 0x29e   : > { %v980_v0 = vadd.f32 %v979_v20, %v3096_v12  ;;  %1341 = vst [vmem:[%s3100_s10 + $0x40] sm:$0xff] %v1185_v22  ;;  %v1895_v19 = vpop.f32.mrb[20].mxu1 }
 0x29f   : > { %1363 = vst [vmem:[%s3100_s10 + $0xf0] sm:$0xff] %v978_v38  ;;  %v1200_v5 = vadd.f32 %v1895_v19, %v3162_v61  ;;  %v1194_v32 = vpop.f32.mrb[21].mxu1 }
 0x2a0   : > { %1364 = vst [vmem:[%s3100_s10 + $0xf8] sm:$0xff] %v980_v0  ;;  %v983_v62 = vpop.f32.mrb[22].mxu0  ;;  %v1195_v39 = vadd.f32 %v1194_v32, %v3162_v61 }
 0x2a1   : > { %v984_v23 = vadd.f32 %v983_v62, %v3093_v8  ;;  %1350 = vst [vmem:[%s3100_s10 + $0x88] sm:$0xff] %v1200_v5  ;;  %v985_v34 = vpop.f32.mrb[23].mxu0 }
 0x2a2   : > { %v986_v17 = vadd.f32 %v985_v34, %v3096_v12  ;;  %1347 = vst [vmem:[%s3100_s10 + $0x70] sm:$0xff] %v1195_v39  ;;  %v1898_v43 = vpop.f32.mrb[22].mxu1 }
 0x2a3   : > { %1366 = vst [vmem:[%s3100_s10 + $0x108] sm:$0xff] %v984_v23  ;;  %v1210_v27 = vadd.f32 %v1898_v43, %v3162_v61  ;;  %v1204_v25 = vpop.f32.mrb[23].mxu1 }
 0x2a4   : > { %1367 = vst [vmem:[%s3100_s10 + $0x110] sm:$0xff] %v986_v17  ;;  %v989_v21 = vpop.f32.mrb[24].mxu0  ;;  %v1205_v60 = vadd.f32 %v1204_v25, %v3162_v61 }
 0x2a5   : > { %v990_v40 = vadd.f32 %v989_v21, %v3093_v8  ;;  %1356 = vst [vmem:[%s3100_s10 + $0xb8] sm:$0xff] %v1210_v27  ;;  %v991_v6 = vpop.f32.mrb[25].mxu0 }
 0x2a6   : > { %v992_v45 = vadd.f32 %v991_v6, %v3096_v12  ;;  %1353 = vst [vmem:[%s3100_s10 + $0xa0] sm:$0xff] %v1205_v60  ;;  %v1901_v24 = vpop.f32.mrb[24].mxu1 }
 0x2a7   : > { %1369 = vst [vmem:[%s3100_s10 + $0x120] sm:$0xff] %v990_v40  ;;  %v1220_v10 = vadd.f32 %v1901_v24, %v3162_v61  ;;  %v1214_v51 = vpop.f32.mrb[25].mxu1 }
 0x2a8   : > { %1370 = vst [vmem:[%s3100_s10 + $0x128] sm:$0xff] %v992_v45  ;;  %v995_v13 = vpop.f32.mrb[26].mxu0  ;;  %v1215_v44 = vadd.f32 %v1214_v51, %v3162_v61 }
 0x2a9   : > { %v996_v2 = vadd.f32 %v995_v13, %v3093_v8  ;;  %1362 = vst [vmem:[%s3100_s10 + $0xe8] sm:$0xff] %v1220_v10  ;;  %v997_v1 = vpop.f32.mrb[27].mxu0 }
 0x2aa   : > { %v998_v9 = vadd.f32 %v997_v1, %v3096_v12  ;;  %1359 = vst [vmem:[%s3100_s10 + $0xd0] sm:$0xff] %v1215_v44  ;;  %v1904_v41 = vpop.f32.mrb[26].mxu1 }
 0x2ab   : > { %1372 = vst [vmem:[%s3100_s10 + $0x138] sm:$0xff] %v996_v2  ;;  %v1230_v53 = vadd.f32 %v1904_v41, %v3162_v61  ;;  %v1224_v56 = vpop.f32.mrb[27].mxu1 }
 0x2ac   : > { %1373 = vst [vmem:[%s3100_s10 + $0x140] sm:$0xff] %v998_v9  ;;  %v1001_v26 = vpop.f32.mrb[28].mxu0  ;;  %v1225_v55 = vadd.f32 %v1224_v56, %v3162_v61 }
 0x2ad   : > { %v1002_v59 = vadd.f32 %v1001_v26, %v3093_v8  ;;  %1368 = vst [vmem:[%s3100_s10 + $0x118] sm:$0xff] %v1230_v53  ;;  %v1003_v58 = vpop.f32.mrb[29].mxu0 }
 0x2ae   : > { %v1004_v46 = vadd.f32 %v1003_v58, %v3096_v12  ;;  %1365 = vst [vmem:[%s3100_s10 + $0x100] sm:$0xff] %v1225_v55  ;;  %v1907_v49 = vpop.f32.mrb[28].mxu1 }
 0x2af   : > { %1375 = vst [vmem:[%s3100_s10 + $0x150] sm:$0xff] %v1002_v59  ;;  %v1240_v28 = vadd.f32 %v1907_v49, %v3162_v61  ;;  %v1234_v63 = vpop.f32.mrb[29].mxu1 }
 0x2b0   : > { %1376 = vst [vmem:[%s3100_s10 + $0x158] sm:$0xff] %v1004_v46  ;;  %v1007_v35 = vpop.f32.mrb[30].mxu0  ;;  %v1235_v37 = vadd.f32 %v1234_v63, %v3162_v61 }
 0x2b1   : > { %v1008_v7 = vadd.f32 %v1007_v35, %v3093_v8  ;;  %1374 = vst [vmem:[%s3100_s10 + $0x148] sm:$0xff] %v1240_v28  ;;  %v1009_v47 = vpop.f32.mrb[31].mxu0 }
 0x2b2   : > { %v1010_v50 = vadd.f32 %v1009_v47, %v3096_v12  ;;  %1371 = vst [vmem:[%s3100_s10 + $0x130] sm:$0xff] %v1235_v37  ;;  %v1910_v54 = vpop.f32.mrb[30].mxu1 }
 0x2b3   : > { %1378 = vst [vmem:[%s3100_s10 + $0x168] sm:$0xff] %v1008_v7  ;;  %v1250_v16 = vadd.f32 %v1910_v54, %v3162_v61  ;;  %v1244_v57 = vpop.f32.mrb[31].mxu1 }
 0x2b4   : > { %1379 = vst [vmem:[%s3100_s10 + $0x170] sm:$0xff] %v1010_v50  ;;  %v1013_v14 = vpop.f32.mrb[32].mxu0  ;;  %v1245_v30 = vadd.f32 %v1244_v57, %v3162_v61 }
 0x2b5   : > { %v1014_v52 = vadd.f32 %v1013_v14, %v3093_v8  ;;  %1380 = vst [vmem:[%s3100_s10 + $0x178] sm:$0xff] %v1250_v16  ;;  %v1015_v48 = vpop.f32.mrb[33].mxu0 }
 0x2b6   : > { %v1016_v15 = vadd.f32 %v1015_v48, %v3096_v12  ;;  %1377 = vst [vmem:[%s3100_s10 + $0x160] sm:$0xff] %v1245_v30  ;;  %v1913_v4 = vpop.f32.mrb[32].mxu1 }
 0x2b7   : > { %1381 = vst [vmem:[%s3100_s10 + $0x180] sm:$0xff] %v1014_v52  ;;  %v1260_v3 = vadd.f32 %v1913_v4, %v3162_v61  ;;  %v1254_v29 = vpop.f32.mrb[33].mxu1 }
 0x2b8   : > { %1382 = vst [vmem:[%s3100_s10 + $0x188] sm:$0xff] %v1016_v15  ;;  %v1019_v18 = vpop.f32.mrb[34].mxu0  ;;  %v1255_v31 = vadd.f32 %v1254_v29, %v3162_v61 }
 0x2b9   : > { %v1020_v42 = vadd.f32 %v1019_v18, %v3093_v8  ;;  %1386 = vst [vmem:[%s3100_s10 + $0x1a8] sm:$0xff] %v1260_v3  ;;  %v1021_v33 = vpop.f32.mrb[35].mxu0 }
 0x2ba   : > { %v1022_v36 = vadd.f32 %v1021_v33, %v3096_v12  ;;  %1383 = vst [vmem:[%s3100_s10 + $0x190] sm:$0xff] %v1255_v31  ;;  %v1916_v11 = vpop.f32.mrb[34].mxu1 }
 0x2bb   : > { %1384 = vst [vmem:[%s3100_s10 + $0x198] sm:$0xff] %v1020_v42  ;;  %v1270_v22 = vadd.f32 %v1916_v11, %v3162_v61  ;;  %v1264_v38 = vpop.f32.mrb[35].mxu1 }
 0x2bc   : > { %1385 = vst [vmem:[%s3100_s10 + $0x1a0] sm:$0xff] %v1022_v36  ;;  %v1025_v20 = vpop.f32.mrb[36].mxu0  ;;  %v1265_v0 = vadd.f32 %v1264_v38, %v3162_v61 }
 0x2bd   : > { %v1026_v19 = vadd.f32 %v1025_v20, %v3093_v8  ;;  %1392 = vst [vmem:[%s3100_s10 + $0x1d8] sm:$0xff] %v1270_v22  ;;  %v1027_v5 = vpop.f32.mrb[37].mxu0 }
 0x2be   : > { %v1028_v32 = vadd.f32 %v1027_v5, %v3096_v12  ;;  %1389 = vst [vmem:[%s3100_s10 + $0x1c0] sm:$0xff] %v1265_v0  ;;  %v1919_v62 = vpop.f32.mrb[36].mxu1 }
 0x2bf   : > { %1387 = vst [vmem:[%s3100_s10 + $0x1b0] sm:$0xff] %v1026_v19  ;;  %v1280_v39 = vadd.f32 %v1919_v62, %v3162_v61  ;;  %v1274_v23 = vpop.f32.mrb[37].mxu1 }
 0x2c0   : > { %1388 = vst [vmem:[%s3100_s10 + $0x1b8] sm:$0xff] %v1028_v32  ;;  %v1031_v34 = vpop.f32.mrb[38].mxu0  ;;  %v1275_v17 = vadd.f32 %v1274_v23, %v3162_v61 }
 0x2c1   : > { %v1032_v43 = vadd.f32 %v1031_v34, %v3093_v8  ;;  %1398 = vst [vmem:[%s3100_s10 + $0x208] sm:$0xff] %v1280_v39  ;;  %v1033_v27 = vpop.f32.mrb[39].mxu0 }
 0x2c2   : > { %v1034_v25 = vadd.f32 %v1033_v27, %v3096_v12  ;;  %1395 = vst [vmem:[%s3100_s10 + $0x1f0] sm:$0xff] %v1275_v17  ;;  %v1922_v21 = vpop.f32.mrb[38].mxu1 }
 0x2c3   : > { %1390 = vst [vmem:[%s3100_s10 + $0x1c8] sm:$0xff] %v1032_v43  ;;  %v1290_v60 = vadd.f32 %v1922_v21, %v3162_v61  ;;  %v1284_v40 = vpop.f32.mrb[39].mxu1 }
 0x2c4   : > { %1391 = vst [vmem:[%s3100_s10 + $0x1d0] sm:$0xff] %v1034_v25  ;;  %v1037_v6 = vpop.f32.mrb[40].mxu0  ;;  %v1285_v45 = vadd.f32 %v1284_v40, %v3162_v61 }
 0x2c5   : > { %v1038_v24 = vadd.f32 %v1037_v6, %v3093_v8  ;;  %1404 = vst [vmem:[%s3100_s10 + $0x238] sm:$0xff] %v1290_v60  ;;  %v1039_v10 = vpop.f32.mrb[41].mxu0 }
 0x2c6   : > { %v1040_v51 = vadd.f32 %v1039_v10, %v3096_v12  ;;  %1401 = vst [vmem:[%s3100_s10 + $0x220] sm:$0xff] %v1285_v45  ;;  %v1925_v13 = vpop.f32.mrb[40].mxu1 }
 0x2c7   : > { %1393 = vst [vmem:[%s3100_s10 + $0x1e0] sm:$0xff] %v1038_v24  ;;  %v1300_v44 = vadd.f32 %v1925_v13, %v3162_v61  ;;  %v1294_v2 = vpop.f32.mrb[41].mxu1 }
 0x2c8   : > { %1394 = vst [vmem:[%s3100_s10 + $0x1e8] sm:$0xff] %v1040_v51  ;;  %v1043_v1 = vpop.f32.mrb[42].mxu0  ;;  %v1295_v9 = vadd.f32 %v1294_v2, %v3162_v61 }
 0x2c9   : > { %v1044_v41 = vadd.f32 %v1043_v1, %v3093_v8  ;;  %1410 = vst [vmem:[%s3100_s10 + $0x268] sm:$0xff] %v1300_v44  ;;  %v1045_v53 = vpop.f32.mrb[43].mxu0 }
 0x2ca   : > { %v1046_v56 = vadd.f32 %v1045_v53, %v3096_v12  ;;  %1407 = vst [vmem:[%s3100_s10 + $0x250] sm:$0xff] %v1295_v9  ;;  %v1928_v26 = vpop.f32.mrb[42].mxu1 }
 0x2cb   : > { %1396 = vst [vmem:[%s3100_s10 + $0x1f8] sm:$0xff] %v1044_v41  ;;  %v1310_v55 = vadd.f32 %v1928_v26, %v3162_v61  ;;  %v1304_v59 = vpop.f32.mrb[43].mxu1 }
 0x2cc   : > { %1397 = vst [vmem:[%s3100_s10 + $0x200] sm:$0xff] %v1046_v56  ;;  %v1049_v58 = vpop.f32.mrb[44].mxu0  ;;  %v1305_v46 = vadd.f32 %v1304_v59, %v3162_v61 }
 0x2cd   : > { %v1050_v49 = vadd.f32 %v1049_v58, %v3093_v8  ;;  %1416 = vst [vmem:[%s3100_s10 + $0x298] sm:$0xff] %v1310_v55  ;;  %v1051_v28 = vpop.f32.mrb[45].mxu0 }
 0x2ce   : > { %v1052_v63 = vadd.f32 %v1051_v28, %v3096_v12  ;;  %1413 = vst [vmem:[%s3100_s10 + $0x280] sm:$0xff] %v1305_v46  ;;  %v1931_v35 = vpop.f32.mrb[44].mxu1 }
 0x2cf   : > { %1399 = vst [vmem:[%s3100_s10 + $0x210] sm:$0xff] %v1050_v49  ;;  %v1320_v37 = vadd.f32 %v1931_v35, %v3162_v61  ;;  %v1314_v7 = vpop.f32.mrb[45].mxu1 }
 0x2d0   : > { %1400 = vst [vmem:[%s3100_s10 + $0x218] sm:$0xff] %v1052_v63  ;;  %v1055_v47 = vpop.f32.mrb[46].mxu0  ;;  %v1315_v50 = vadd.f32 %v1314_v7, %v3162_v61  ;;  %1435 = sbr.rel (!%p3542_p6) target bundleno = 813 (0x32d), region = 52 }
 0x2d1   : > { %v1056_v54 = vadd.f32 %v1055_v47, %v3093_v8  ;;  %1422 = vst [vmem:[%s3100_s10 + $0x2c8] sm:$0xff] %v1320_v37  ;;  %v1057_v16 = vpop.f32.mrb[47].mxu0 }
 0x2d2   : > { %v1058_v57 = vadd.f32 %v1057_v16, %v3096_v12  ;;  %1419 = vst [vmem:[%s3100_s10 + $0x2b0] sm:$0xff] %v1315_v50  ;;  %v1934_v14 = vpop.f32.mrb[46].mxu1 }
 0x2d3   : > { %1402 = vst [vmem:[%s3100_s10 + $0x228] sm:$0xff] %v1056_v54  ;;  %v1330_v30 = vadd.f32 %v1934_v14, %v3162_v61  ;;  %v1324_v52 = vpop.f32.mrb[47].mxu1 }
 0x2d4   : > { %1403 = vst [vmem:[%s3100_s10 + $0x230] sm:$0xff] %v1058_v57  ;;  %v1325_v48 = vadd.f32 %v1324_v52, %v3162_v61 }
 0x2d5   : > { %1428 = vst [vmem:[%s3100_s10 + $0x2f8] sm:$0xff] %v1330_v30 }
 0x2d6   : > { %1425 = vst [vmem:[%s3100_s10 + $0x2e0] sm:$0xff] %v1325_v48 }
 0x2d7   : > { %s3558_s26 = smov (!%p1439_p7, %s1438_s26), 32 }
 0x2d8   : > { %s1795_s15 = smul.u32 384, %s3558_s26 }
 0x2da   : > { %p1799_p9 = scmp.eq.s32.totalorder %s1795_s15, 0 }
 0x2db   : > { %2211 = sdivrem.u32 (!%p1799_p9), %s3558_s26, 22 }
 0x2dc   : > { %1452 = sbr.rel (%p1799_p9) target bundleno = 813 (0x32d), region = 56 }
 0x2e4   : > { %s3309_s7 = spop.drf %2211 }
 0x2e5   : > { %p1800_p11 = scmp.le.s32.totalorder %s3309_s7, 0 }
 0x2e6   : > { %s3543_s21 = smov (!%p1800_p11), %s3303_s14  ;;  %s3544_s16 = smov (!%p1800_p11), %s3100_s10 }
 0x2e7   : > { %1699 = sbr.rel (%p1800_p11) target bundleno = 784 (0x310), region = 114  ;;  %s3318_s11 = smov (!%p1800_p11), 0  }
 0x2e8   : > { %s3320_s29 = smov (!%p1800_p11), 0  }
 0x2ee LB: >> { %v1466_v8 = vld [vmem:[%s2365_s16] sm:$0xff]  ;;  %v1468_v12 = vld [vmem:[%s2365_s16 + $0x18] sm:$0xff]  ;;  %v1470_v61 = vld [vmem:[%s2365_s16 + $0x30] sm:$0xff]  ;;  %s1598_s30 = sadd.s32 1, %s2369_s11  ;;  %s1460_s29 = sadd.s32 1, %s2373_s29   ;;  %s2373_s29 = sphi %s3320_s29, %s1460_s29   ;;  %s2369_s11 = sphi %s3318_s11, %s3547_s11   ;;  %s2365_s16 = sphi %s3544_s16, %s3546_s16   ;;  %s2361_s21 = sphi %s3543_s21, %s3545_s21  }
 0x2ef   : >> { %1467 = vst [vmem:[%s2361_s21] sm:$0xff] %v1466_v8  ;;  %1469 = vst [vmem:[%s2361_s21 + $0x18] sm:$0xff] %v1468_v12  ;;  %v1472_v15 = vld [vmem:[%s2365_s16 + $0x48] sm:$0xff]  ;;  %v1474_v4 = vld [vmem:[%s2365_s16 + $0x60] sm:$0xff]  ;;  %p1599_p13 = scmp.ge.s32.totalorder %s1598_s30, %s3309_s7  ;;  %p1459_p1 = scmp.ge.s32.totalorder %s1460_s29, %s3309_s7 }
 0x2f0   : >> { %1471 = vst [vmem:[%s2361_s21 + $0x30] sm:$0xff] %v1470_v61  ;;  %v1476_v3 = vld [vmem:[%s2365_s16 + $0x78] sm:$0xff]  ;;  %1473 = vst [vmem:[%s2361_s21 + $0x48] sm:$0xff] %v1472_v15  ;;  %v1478_v29 = vld [vmem:[%s2365_s16 + $0x90] sm:$0xff] }
 0x2f1   : >> { %1475 = vst [vmem:[%s2361_s21 + $0x60] sm:$0xff] %v1474_v4  ;;  %1477 = vst [vmem:[%s2361_s21 + $0x78] sm:$0xff] %v1476_v3  ;;  %v1480_v18 = vld [vmem:[%s2365_s16 + $0xa8] sm:$0xff]  ;;  %v1482_v31 = vld [vmem:[%s2365_s16 + $0xc0] sm:$0xff]  ;;  %s3560_s30 = smov (%p1599_p13, %s1598_s30), 0 }
 0x2f2   : >> { %1479 = vst [vmem:[%s2361_s21 + $0x90] sm:$0xff] %v1478_v29  ;;  %1481 = vst [vmem:[%s2361_s21 + $0xa8] sm:$0xff] %v1480_v18  ;;  %v1484_v42 = vld [vmem:[%s2365_s16 + $0xd8] sm:$0xff]  ;;  %v1486_v33 = vld [vmem:[%s2365_s16 + $0xf0] sm:$0xff]  ;;  %s1601_s8 = smul.u32 528, %s3560_s30  ;;  %s3547_s11 = smov %s3560_s30 }
 0x2f3   : >> { %1483 = vst [vmem:[%s2361_s21 + $0xc0] sm:$0xff] %v1482_v31  ;;  %v1488_v36 = vld [vmem:[%s2365_s16 + $0x108] sm:$0xff]  ;;  %1485 = vst [vmem:[%s2361_s21 + $0xd8] sm:$0xff] %v1484_v42  ;;  %v1490_v11 = vld [vmem:[%s2365_s16 + $0x120] sm:$0xff] }
 0x2f4   : >> { %1487 = vst [vmem:[%s2361_s21 + $0xf0] sm:$0xff] %v1486_v33  ;;  %1489 = vst [vmem:[%s2361_s21 + $0x108] sm:$0xff] %v1488_v36  ;;  %v1492_v22 = vld [vmem:[%s2365_s16 + $0x138] sm:$0xff]  ;;  %v1494_v38 = vld [vmem:[%s2365_s16 + $0x150] sm:$0xff]  ;;  %s3382_s17 = scalar_lea.vmem %s3100_s10, %s1601_s8 [#allocation6]   ;;  %s3385_s18 = scalar_lea.vmem %s3303_s14, %s1601_s8  }
 0x2f5   : >> { %1491 = vst [vmem:[%s2361_s21 + $0x120] sm:$0xff] %v1490_v11  ;;  %1493 = vst [vmem:[%s2361_s21 + $0x138] sm:$0xff] %v1492_v22  ;;  %v1496_v20 = vld [vmem:[%s2365_s16 + $0x168] sm:$0xff]  ;;  %v1498_v0 = vld [vmem:[%s2365_s16 + $0x180] sm:$0xff] }
 0x2f6   : >> { %1495 = vst [vmem:[%s2361_s21 + $0x150] sm:$0xff] %v1494_v38  ;;  %v1500_v19 = vld [vmem:[%s2365_s16 + $0x198] sm:$0xff]  ;;  %1497 = vst [vmem:[%s2361_s21 + $0x168] sm:$0xff] %v1496_v20  ;;  %v1502_v5 = vld [vmem:[%s2365_s16 + $0x1b0] sm:$0xff] }
 0x2f7   : >> { %1499 = vst [vmem:[%s2361_s21 + $0x180] sm:$0xff] %v1498_v0  ;;  %1501 = vst [vmem:[%s2361_s21 + $0x198] sm:$0xff] %v1500_v19  ;;  %v1504_v32 = vld [vmem:[%s2365_s16 + $0x1c8] sm:$0xff]  ;;  %v1506_v62 = vld [vmem:[%s2365_s16 + $0x1e0] sm:$0xff] }
 0x2f8   : >> { %1503 = vst [vmem:[%s2361_s21 + $0x1b0] sm:$0xff] %v1502_v5  ;;  %1505 = vst [vmem:[%s2361_s21 + $0x1c8] sm:$0xff] %v1504_v32  ;;  %v1508_v39 = vld [vmem:[%s2365_s16 + $0x1f8] sm:$0xff]  ;;  %v1510_v23 = vld [vmem:[%s2365_s16 + $0x8] sm:$0xff] }
 0x2f9   : >> { %1507 = vst [vmem:[%s2361_s21 + $0x1e0] sm:$0xff] %v1506_v62  ;;  %v1512_v34 = vld [vmem:[%s2365_s16 + $0x20] sm:$0xff]  ;;  %1509 = vst [vmem:[%s2361_s21 + $0x1f8] sm:$0xff] %v1508_v39  ;;  %v1514_v17 = vld [vmem:[%s2365_s16 + $0x38] sm:$0xff] }
 0x2fa   : >> { %1511 = vst [vmem:[%s2361_s21 + $0x8] sm:$0xff] %v1510_v23  ;;  %1513 = vst [vmem:[%s2361_s21 + $0x20] sm:$0xff] %v1512_v34  ;;  %v1516_v43 = vld [vmem:[%s2365_s16 + $0x50] sm:$0xff]  ;;  %v1518_v27 = vld [vmem:[%s2365_s16 + $0x68] sm:$0xff] }
 0x2fb   : >> { %1515 = vst [vmem:[%s2361_s21 + $0x38] sm:$0xff] %v1514_v17  ;;  %1517 = vst [vmem:[%s2361_s21 + $0x50] sm:$0xff] %v1516_v43  ;;  %v1520_v25 = vld [vmem:[%s2365_s16 + $0x80] sm:$0xff]  ;;  %v1522_v21 = vld [vmem:[%s2365_s16 + $0x98] sm:$0xff] }
 0x2fc   : >> { %1519 = vst [vmem:[%s2361_s21 + $0x68] sm:$0xff] %v1518_v27  ;;  %v1524_v60 = vld [vmem:[%s2365_s16 + $0xb0] sm:$0xff]  ;;  %1521 = vst [vmem:[%s2361_s21 + $0x80] sm:$0xff] %v1520_v25  ;;  %v1526_v40 = vld [vmem:[%s2365_s16 + $0xc8] sm:$0xff] }
 0x2fd   : >> { %1523 = vst [vmem:[%s2361_s21 + $0x98] sm:$0xff] %v1522_v21  ;;  %1525 = vst [vmem:[%s2361_s21 + $0xb0] sm:$0xff] %v1524_v60  ;;  %v1528_v6 = vld [vmem:[%s2365_s16 + $0xe0] sm:$0xff]  ;;  %v1530_v45 = vld [vmem:[%s2365_s16 + $0xf8] sm:$0xff] }
 0x2fe   : >> { %1527 = vst [vmem:[%s2361_s21 + $0xc8] sm:$0xff] %v1526_v40  ;;  %1529 = vst [vmem:[%s2361_s21 + $0xe0] sm:$0xff] %v1528_v6  ;;  %v1532_v24 = vld [vmem:[%s2365_s16 + $0x110] sm:$0xff]  ;;  %v1534_v10 = vld [vmem:[%s2365_s16 + $0x128] sm:$0xff] }
 0x2ff   : >> { %1531 = vst [vmem:[%s2361_s21 + $0xf8] sm:$0xff] %v1530_v45  ;;  %v1536_v51 = vld [vmem:[%s2365_s16 + $0x140] sm:$0xff]  ;;  %1533 = vst [vmem:[%s2361_s21 + $0x110] sm:$0xff] %v1532_v24  ;;  %v1538_v13 = vld [vmem:[%s2365_s16 + $0x158] sm:$0xff] }
 0x300   : >> { %1535 = vst [vmem:[%s2361_s21 + $0x128] sm:$0xff] %v1534_v10  ;;  %1537 = vst [vmem:[%s2361_s21 + $0x140] sm:$0xff] %v1536_v51  ;;  %v1540_v44 = vld [vmem:[%s2365_s16 + $0x170] sm:$0xff]  ;;  %v1542_v2 = vld [vmem:[%s2365_s16 + $0x188] sm:$0xff] }
 0x301   : >> { %1539 = vst [vmem:[%s2361_s21 + $0x158] sm:$0xff] %v1538_v13  ;;  %1541 = vst [vmem:[%s2361_s21 + $0x170] sm:$0xff] %v1540_v44  ;;  %v1544_v1 = vld [vmem:[%s2365_s16 + $0x1a0] sm:$0xff]  ;;  %v1546_v9 = vld [vmem:[%s2365_s16 + $0x1b8] sm:$0xff] }
 0x302   : >> { %1543 = vst [vmem:[%s2361_s21 + $0x188] sm:$0xff] %v1542_v2  ;;  %v1548_v41 = vld [vmem:[%s2365_s16 + $0x1d0] sm:$0xff]  ;;  %1545 = vst [vmem:[%s2361_s21 + $0x1a0] sm:$0xff] %v1544_v1  ;;  %v1550_v53 = vld [vmem:[%s2365_s16 + $0x1e8] sm:$0xff] }
 0x303   : >> { %1547 = vst [vmem:[%s2361_s21 + $0x1b8] sm:$0xff] %v1546_v9  ;;  %1549 = vst [vmem:[%s2361_s21 + $0x1d0] sm:$0xff] %v1548_v41  ;;  %v1552_v56 = vld [vmem:[%s2365_s16 + $0x200] sm:$0xff]  ;;  %v1554_v26 = vld [vmem:[%s2365_s16 + $0x10] sm:$0xff] }
 0x304   : >> { %1551 = vst [vmem:[%s2361_s21 + $0x1e8] sm:$0xff] %v1550_v53  ;;  %1553 = vst [vmem:[%s2361_s21 + $0x200] sm:$0xff] %v1552_v56  ;;  %v1556_v55 = vld [vmem:[%s2365_s16 + $0x28] sm:$0xff]  ;;  %v1558_v59 = vld [vmem:[%s2365_s16 + $0x40] sm:$0xff] }
 0x305   : >> { %1555 = vst [vmem:[%s2361_s21 + $0x10] sm:$0xff] %v1554_v26  ;;  %v1560_v58 = vld [vmem:[%s2365_s16 + $0x58] sm:$0xff]  ;;  %1557 = vst [vmem:[%s2361_s21 + $0x28] sm:$0xff] %v1556_v55  ;;  %v1562_v46 = vld [vmem:[%s2365_s16 + $0x70] sm:$0xff] }
 0x306   : >> { %1559 = vst [vmem:[%s2361_s21 + $0x40] sm:$0xff] %v1558_v59  ;;  %1561 = vst [vmem:[%s2361_s21 + $0x58] sm:$0xff] %v1560_v58  ;;  %v1564_v49 = vld [vmem:[%s2365_s16 + $0x88] sm:$0xff]  ;;  %v1566_v28 = vld [vmem:[%s2365_s16 + $0xa0] sm:$0xff] }
 0x307   : >> { %1563 = vst [vmem:[%s2361_s21 + $0x70] sm:$0xff] %v1562_v46  ;;  %1565 = vst [vmem:[%s2361_s21 + $0x88] sm:$0xff] %v1564_v49  ;;  %v1568_v63 = vld [vmem:[%s2365_s16 + $0xb8] sm:$0xff]  ;;  %v1570_v35 = vld [vmem:[%s2365_s16 + $0xd0] sm:$0xff] }
 0x308   : >> { %1567 = vst [vmem:[%s2361_s21 + $0xa0] sm:$0xff] %v1566_v28  ;;  %v1572_v37 = vld [vmem:[%s2365_s16 + $0xe8] sm:$0xff]  ;;  %1569 = vst [vmem:[%s2361_s21 + $0xb8] sm:$0xff] %v1568_v63  ;;  %v1574_v7 = vld [vmem:[%s2365_s16 + $0x100] sm:$0xff] }
 0x309   : >> { %1571 = vst [vmem:[%s2361_s21 + $0xd0] sm:$0xff] %v1570_v35  ;;  %1573 = vst [vmem:[%s2361_s21 + $0xe8] sm:$0xff] %v1572_v37  ;;  %v1576_v47 = vld [vmem:[%s2365_s16 + $0x118] sm:$0xff]  ;;  %v1578_v50 = vld [vmem:[%s2365_s16 + $0x130] sm:$0xff]  ;;  %1462 = sbr.rel (!%p1459_p1) target bundleno = 750 (0x2ee), region = 120 }
 0x30a   : >> { %1575 = vst [vmem:[%s2361_s21 + $0x100] sm:$0xff] %v1574_v7  ;;  %1577 = vst [vmem:[%s2361_s21 + $0x118] sm:$0xff] %v1576_v47  ;;  %v1580_v54 = vld [vmem:[%s2365_s16 + $0x148] sm:$0xff]  ;;  %v1582_v16 = vld [vmem:[%s2365_s16 + $0x160] sm:$0xff] }
 0x30b   : >> { %1579 = vst [vmem:[%s2361_s21 + $0x130] sm:$0xff] %v1578_v50  ;;  %v1584_v57 = vld [vmem:[%s2365_s16 + $0x178] sm:$0xff]  ;;  %1581 = vst [vmem:[%s2361_s21 + $0x148] sm:$0xff] %v1580_v54  ;;  %v1586_v14 = vld [vmem:[%s2365_s16 + $0x190] sm:$0xff] }
 0x30c   : >> { %1583 = vst [vmem:[%s2361_s21 + $0x160] sm:$0xff] %v1582_v16  ;;  %1585 = vst [vmem:[%s2361_s21 + $0x178] sm:$0xff] %v1584_v57  ;;  %v1588_v30 = vld [vmem:[%s2365_s16 + $0x1a8] sm:$0xff]  ;;  %v1590_v52 = vld [vmem:[%s2365_s16 + $0x1c0] sm:$0xff] }
 0x30d   : >> { %1587 = vst [vmem:[%s2361_s21 + $0x190] sm:$0xff] %v1586_v14  ;;  %1589 = vst [vmem:[%s2361_s21 + $0x1a8] sm:$0xff] %v1588_v30  ;;  %v1592_v48 = vld [vmem:[%s2365_s16 + $0x1d8] sm:$0xff]  ;;  %v1594_v8 = vld [vmem:[%s2365_s16 + $0x1f0] sm:$0xff] }
 0x30e   : >> { %1591 = vst [vmem:[%s2361_s21 + $0x1c0] sm:$0xff] %v1590_v52  ;;  %v1596_v12 = vld [vmem:[%s2365_s16 + $0x208] sm:$0xff]  ;;  %1593 = vst [vmem:[%s2361_s21 + $0x1d8] sm:$0xff] %v1592_v48  ;;  %s3546_s16 = smov %s3382_s17 }
 0x30f   : >> { %1595 = vst [vmem:[%s2361_s21 + $0x1f0] sm:$0xff] %v1594_v8  ;;  %1597 = vst [vmem:[%s2361_s21 + $0x208] sm:$0xff] %v1596_v12  ;;  %s3545_s21 = smov %s3385_s18 }
 0x310 PF: > { %2213 = sdivrem.u32 %s3558_s26, 22 }
 0x311   : > { %s1801_s28 = smul.u32 528, %s3309_s7 }
 0x313   : > { %s3490_s9 = scalar_lea.vmem %s3100_s10, %s1801_s28 [#allocation6]   ;;  %s3493_s27 = scalar_lea.vmem %s3303_s14, %s1801_s28  }
 0x319   : > { %s3495_s24 = spop.drf %2213 }
 0x31a   : > { %p1803_p4 = scmp.le.s32.totalorder %s3495_s24, 0 }
 0x31b   : > { %s2375_s12 = smov (!%p1803_p4), %s3493_s27   ;;  %s2379_s13 = smov (!%p1803_p4), %s3490_s9  }
 0x31c   : > { %1713 = sbr.rel (%p1803_p4) target bundleno = 813 (0x32d), region = 125  ;;  %s2383_s15 = smov (!%p1803_p4), 0  }
 0x31d   : > { %s2387_s21 = smov (!%p1803_p4), 0  }
 0x323 LB: >> { %v1621_v61 = vld [vmem:[%s2381_s13] sm:$0xff]  ;;  %v1623_v15 = vld [vmem:[%s2381_s13 + $0x8] sm:$0xff]  ;;  %v1625_v4 = vld [vmem:[%s2381_s13 + $0x10] sm:$0xff]  ;;  %s1627_s10 = sadd.s32 1, %s2385_s15  ;;  %s1615_s21 = sadd.s32 1, %s2389_s21   ;;  %s2389_s21 = sphi %s2387_s21, %s1615_s21   ;;  %s2385_s15 = sphi %s2383_s15, %s2384_s15   ;;  %s2381_s13 = sphi %s2379_s13, %s1632_s13   ;;  %s2377_s12 = sphi %s2375_s12, %s1633_s12  }
 0x324   : >> { %1622 = vst [vmem:[%s2377_s12] sm:$0xff] %v1621_v61  ;;  %1624 = vst [vmem:[%s2377_s12 + $0x8] sm:$0xff] %v1623_v15  ;;  %p1628_p3 = scmp.ge.s32.totalorder %s1627_s10, %s3495_s24  ;;  %p1614_p8 = scmp.ge.s32.totalorder %s1615_s21, %s3495_s24 }
 0x325   : >> { %1626 = vst [vmem:[%s2377_s12 + $0x10] sm:$0xff] %v1625_v4 }
 0x326   : >> { %s3562_s10 = smov (%p1628_p3, %s1627_s10), 0  ;;  %1617 = sbr.rel (!%p1614_p8) target bundleno = 803 (0x323), region = 131 }
 0x327   : >> { %s1630_s26 = smul.u32 24, %s3562_s10  ;;  %s2384_s15 = smov %s3562_s10  }
 0x329   : >> { %s1632_s13 = scalar_lea.vmem %s3490_s9, %s1630_s26 [#allocation6]   ;;  %s1633_s12 = scalar_lea.vmem %s3493_s27, %s1630_s26  }
 0x32d PF: > { %s19_s23 = sadd.s32 1, %s2357_s23   ;;  %s3548_s18 = smov %s2341_s19 }
 0x32e   : > { %p16_p10 = scmp.ge.s32.totalorder %s19_s23, 4   ;;  %s3549_s19 = smov %s2345_s20 }
 0x32f   : > { %s3550_s20 = smov %s2483_s6  ;;  %s3551_s21 = smov %s2353_s22 }
 0x330   : > { %s3552_s22 = smov %s3554_s25  ;;  %18 = sbr.rel (!%p16_p10) target bundleno = 5 (0x5), region = 142 }
 0x337   :  { %1649 = vsyncpa [#allocation3], 1 }
 0x338   :  { %1651 = vsyncpa [#allocation3 + $0x1], 1 }
 0x339   :  { %1652 = vsyncpa [#allocation5], 1 }

// kernel: conformer_forward.11
= control target key start
LH: loop header
LB: loop body
LE: loop exit
PB: predicated region body
PF: predicated region fallthrough
CT: control target
= control target key end

     0   :  { %s3658_s12 = smov 0   ;;  %s3660_s13 = smov 0   ;;  %s4776_s0 = inlined_call_operand.vmem [shape: f32[4,72,384], index: 0, kind: input, shape index: {}, may-alias: {0,1,2}]   ;;  %s4777_s1 = inlined_call_operand.vmem [shape: f32[4,72,384], index: 1, kind: input, shape index: {}, may-alias: {0,1,2}]   ;;  %s4778_s2 = inlined_call_operand.vmem [shape: f32[4,72,384], index: 2, kind: input, shape index: {}, may-alias: {0,1,2}]   ;;  %s4779_s3 = inlined_call_operand.vmem [shape: f32[4,72,128], index: 3, kind: output, shape index: {}]  }
   0x1   :  { %s3662_s14 = smov 0   ;;  %s3664_s15 = smov 0  }
   0x2   :  { %s3666_s16 = smov 0  }
   0x3 LB: > { %s25_s17 = sadd.s32 1, %s3626_s15  ;;  %p41_p1 = scmp.ne.s32.totalorder %s3618_s13, %s3614_s12  ;;  %s3630_s16 = sphi %s3666_s16, %s13_s16   ;;  %s3626_s15 = sphi %s3664_s15, %s4786_s15   ;;  %s3622_s14 = sphi %s3662_s14, %s4785_s14   ;;  %s3618_s13 = sphi %s3660_s13, %s4784_s13   ;;  %s3614_s12 = sphi %s3658_s12, %s4783_s12  }
   0x4   : > { %p27_p0 = scmp.ge.s32.totalorder %s25_s17, 4  ;;  %p42_p2 = scmp.eq.s32.totalorder %s3630_s16, 0 }
   0x5   : > { %s34_s20 = sadd.s32 1, %s3618_s13  ;;  %p2507_p5 = scmp.ge.s32.totalorder %s3630_s16, 4 }
   0x6   : > { %s4788_s17 = smov (%p27_p0, %s25_s17), 0  ;;  %p3689_p3 = por %p42_p2, %p41_p1 }
   0x7   : > { %s29_s19 = ssub.s32 %s3626_s15, %s4788_s17  ;;  %155 = sbr.rel (%p2507_p5) target bundleno = 44 (0x2c), region = 16 }
   0x8   : > { %p32_p4 = scmp.eq.s32.totalorder %s29_s19, 0 }
   0xa   : > { %s3697_s21 = scalar_select %p32_p4, %s3618_s13, %s34_s20  }
   0xe   : > { %158 = sbr.rel (!%p3689_p3) target bundleno = 24 (0x18), region = 20  ;;  %s160_s22 = sand.u32 (%p3689_p3), 1, %s3618_s13  }
   0xf   : > { %s3268_s23 = smul.u32 (%p3689_p3), 216, %s3626_s15 }
  0x10   : > { %s3267_s24 = smul.u32 (%p3689_p3), 72, %s160_s22 }
  0x11   : > { %s166_s27 = scalar_lea.vmem (%p3689_p3), %s4776_s0, %s3268_s23 }
  0x12   : > { %v210_v0 = vld [vmem:[%s166_s27] sm:$0xff] (%p3689_p3)  ;;  %v212_v1 = vld [vmem:[%s166_s27 + $0x18] sm:$0xff] (%p3689_p3)  ;;  %v214_v2 = vld [vmem:[%s166_s27 + $0x30] sm:$0xff] (%p3689_p3)  ;;  %s162_s28 = scalar_lea.vmem (%p3689_p3), [#allocation2], %s3267_s24 }
  0x13   : > { %211 = vst [vmem:[%s162_s28] sm:$0xff] (%p3689_p3), %v210_v0  ;;  %213 = vst [vmem:[%s162_s28 + $0x8] sm:$0xff] (%p3689_p3), %v212_v1  ;;  %v216_v3 = vld [vmem:[%s166_s27 + $0x48] sm:$0xff] (%p3689_p3)  ;;  %v218_v4 = vld [vmem:[%s166_s27 + $0x60] sm:$0xff] (%p3689_p3) }
  0x14   : > { %215 = vst [vmem:[%s162_s28 + $0x10] sm:$0xff] (%p3689_p3), %v214_v2  ;;  %v220_v5 = vld [vmem:[%s166_s27 + $0x78] sm:$0xff] (%p3689_p3)  ;;  %217 = vst [vmem:[%s162_s28 + $0x18] sm:$0xff] (%p3689_p3), %v216_v3  ;;  %v222_v6 = vld [vmem:[%s166_s27 + $0x90] sm:$0xff] (%p3689_p3) }
  0x15   : > { %219 = vst [vmem:[%s162_s28 + $0x20] sm:$0xff] %v218_v4  ;;  %221 = vst [vmem:[%s162_s28 + $0x28] sm:$0xff] %v220_v5  ;;  %v224_v7 = vld [vmem:[%s166_s27 + $0xa8] sm:$0xff]  ;;  %v226_v8 = vld [vmem:[%s166_s27 + $0xc0] sm:$0xff] }
  0x16   : > { %223 = vst [vmem:[%s162_s28 + $0x30] sm:$0xff] %v222_v6  ;;  %225 = vst [vmem:[%s162_s28 + $0x38] sm:$0xff] %v224_v7 }
  0x17   : > { %227 = vst [vmem:[%s162_s28 + $0x40] sm:$0xff] %v226_v8 }
  0x18 PF: > { %233 = sbr.rel (!%p3689_p3) target bundleno = 34 (0x22), region = 58  ;;  %s235_s29 = sand.u32 (%p3689_p3), 1, %s3618_s13  }
  0x19   : > { %s2509_s30 = smul.u32 (%p3689_p3), 216, %s3626_s15 }
  0x1a   : > { %s3269_s4 = smul.u32 (%p3689_p3), 72, %s235_s29 }
  0x1b   : > { %s2415_s7 = scalar_lea.vmem (%p3689_p3), %s4777_s1, %s2509_s30 }
  0x1c   : > { %v2510_v9 = vld [vmem:[%s2415_s7 + $0x8] sm:$0xff] (%p3689_p3)  ;;  %v2511_v10 = vld [vmem:[%s2415_s7 + $0x20] sm:$0xff] (%p3689_p3)  ;;  %v2512_v11 = vld [vmem:[%s2415_s7 + $0x38] sm:$0xff] (%p3689_p3)  ;;  %s237_s8 = scalar_lea.vmem (%p3689_p3), [#allocation3], %s3269_s4 }
  0x1d   : > { %287 = vst [vmem:[%s237_s8] sm:$0xff] (%p3689_p3), %v2510_v9  ;;  %289 = vst [vmem:[%s237_s8 + $0x8] sm:$0xff] (%p3689_p3), %v2511_v10  ;;  %v2513_v12 = vld [vmem:[%s2415_s7 + $0x50] sm:$0xff] (%p3689_p3)  ;;  %v2514_v13 = vld [vmem:[%s2415_s7 + $0x68] sm:$0xff] (%p3689_p3) }
  0x1e   : > { %291 = vst [vmem:[%s237_s8 + $0x10] sm:$0xff] (%p3689_p3), %v2512_v11  ;;  %v2515_v14 = vld [vmem:[%s2415_s7 + $0x80] sm:$0xff] (%p3689_p3)  ;;  %293 = vst [vmem:[%s237_s8 + $0x18] sm:$0xff] (%p3689_p3), %v2513_v12  ;;  %v2516_v15 = vld [vmem:[%s2415_s7 + $0x98] sm:$0xff] (%p3689_p3) }
  0x1f   : > { %295 = vst [vmem:[%s237_s8 + $0x20] sm:$0xff] %v2514_v13  ;;  %297 = vst [vmem:[%s237_s8 + $0x28] sm:$0xff] %v2515_v14  ;;  %v2517_v16 = vld [vmem:[%s2415_s7 + $0xb0] sm:$0xff]  ;;  %v2518_v17 = vld [vmem:[%s2415_s7 + $0xc8] sm:$0xff] }
  0x20   : > { %299 = vst [vmem:[%s237_s8 + $0x30] sm:$0xff] %v2516_v15  ;;  %301 = vst [vmem:[%s237_s8 + $0x38] sm:$0xff] %v2517_v16 }
  0x21   : > { %303 = vst [vmem:[%s237_s8 + $0x40] sm:$0xff] %v2518_v17 }
  0x22 PF: > { %309 = sbr.rel (!%p3689_p3) target bundleno = 44 (0x2c), region = 96  ;;  %s311_s9 = sand.u32 (%p3689_p3), 1, %s3618_s13  }
  0x23   : > { %s2519_s10 = smul.u32 (%p3689_p3), 216, %s3626_s15 }
  0x24   : > { %s3270_s11 = smul.u32 (%p3689_p3), 72, %s311_s9 }
  0x25   : > { %s2422_s22 = scalar_lea.vmem (%p3689_p3), %s4778_s2, %s2519_s10 }
  0x26   : > { %v2520_v18 = vld [vmem:[%s2422_s22 + $0x10] sm:$0xff] (%p3689_p3)  ;;  %v2521_v19 = vld [vmem:[%s2422_s22 + $0x28] sm:$0xff] (%p3689_p3)  ;;  %v2522_v20 = vld [vmem:[%s2422_s22 + $0x40] sm:$0xff] (%p3689_p3)  ;;  %s313_s23 = scalar_lea.vmem (%p3689_p3), [#allocation4], %s3270_s11 }
  0x27   : > { %363 = vst [vmem:[%s313_s23] sm:$0xff] (%p3689_p3), %v2520_v18  ;;  %365 = vst [vmem:[%s313_s23 + $0x8] sm:$0xff] (%p3689_p3), %v2521_v19  ;;  %v2523_v21 = vld [vmem:[%s2422_s22 + $0x58] sm:$0xff] (%p3689_p3)  ;;  %v2524_v22 = vld [vmem:[%s2422_s22 + $0x70] sm:$0xff] (%p3689_p3) }
  0x28   : > { %367 = vst [vmem:[%s313_s23 + $0x10] sm:$0xff] (%p3689_p3), %v2522_v20  ;;  %v2525_v23 = vld [vmem:[%s2422_s22 + $0x88] sm:$0xff] (%p3689_p3)  ;;  %369 = vst [vmem:[%s313_s23 + $0x18] sm:$0xff] (%p3689_p3), %v2523_v21  ;;  %v2526_v24 = vld [vmem:[%s2422_s22 + $0xa0] sm:$0xff] (%p3689_p3) }
  0x29   : > { %371 = vst [vmem:[%s313_s23 + $0x20] sm:$0xff] %v2524_v22  ;;  %373 = vst [vmem:[%s313_s23 + $0x28] sm:$0xff] %v2525_v23  ;;  %v2527_v25 = vld [vmem:[%s2422_s22 + $0xb8] sm:$0xff]  ;;  %v2528_v26 = vld [vmem:[%s2422_s22 + $0xd0] sm:$0xff] }
  0x2a   : > { %375 = vst [vmem:[%s313_s23 + $0x30] sm:$0xff] %v2526_v24  ;;  %377 = vst [vmem:[%s313_s23 + $0x38] sm:$0xff] %v2527_v25 }
  0x2b   : > { %379 = vst [vmem:[%s313_s23 + $0x40] sm:$0xff] %v2528_v26 }
  0x2c PF: > { %p2529_p6 = scmp.ge.s32.totalorder %s3630_s16, 1  ;;  %p384_p7 = scmp.lt.s32.totalorder %s3630_s16, 5 }
  0x2e   : > { %p385_p8 = pnand %p2529_p6, %p384_p7 }
  0x2f   : > { %s391_s18 = sand.u32 (!%p385_p8), 1, %s3614_s12   ;;  %v3632_v27 = vmov (!%p385_p8), 0.0|0.0   ;;  %vm485_vm0 = vcmask (!%p385_p8), 261120   ;;  %vm3633_vm1 = vmmov (!%p385_p8), 0   ;;  %v3634_v28 = vmov (!%p385_p8), 0.0   ;;  %s3635_s26 = smov (!%p385_p8), 96  }
  0x30   : > { %388 = sbr.rel (%p385_p8) target bundleno = 1746 (0x6d2), region = 134  ;;  %3145 = vmatprep.subr.bf16.mxu0 (!%p385_p8), %v3632_v27  ;;  %2803 = vmatprep.mubr.msk.f32.mxu0 (!%p385_p8), %vm3633_vm1, %v3634_v28  ;;  %vm3739_vm2 = vmpackc.low (!%p385_p8), %vm485_vm0, %vm485_vm0  ;;  %vm650_vm3 = vcmask (!%p385_p8), 588800   ;;  %s3636_s28 = smov (!%p385_p8), 64   ;;  %vm2348_vm4 = vcmask (!%p385_p8), 523264   ;;  %vm2358_vm5 = vcmask (!%p385_p8), 785408  }
  0x31   : > { %s3725_s24 = smul.u32 (!%p385_p8), 72, %s391_s18  ;;  %3161 = vmatprep.subr.bf16.mxu1 (!%p385_p8), %v3632_v27  ;;  %2848 = vmatprep.mubr.msk.f32.mxu1 (!%p385_p8), %vm3633_vm1, %v3634_v28  ;;  %s3637_s29 = smov (!%p385_p8), 32  }
  0x32   : > { %p441_p9 = scmp.lt.s32.totalorder (!%p385_p8), %s3622_s14, 3 }
  0x33   : > { %s400_s25 = scalar_lea.vmem (!%p385_p8), [#allocation3], %s3725_s24  ;;  %s3776_s12 = scalar_lea.vmem (!%p385_p8), [#allocation2], %s3725_s24 }
  0x34   : > { %v3733_v29 = vld [vmem:[%s400_s25] sm:$0xff] (!%p385_p8)  ;;  %v3735_v30 = vld [vmem:[%s400_s25 + $0x8] sm:$0xff] (!%p385_p8)  ;;  %v3748_v33 = vld [vmem:[%s400_s25 + $0x10] sm:$0xff] (!%p385_p8)  ;;  %s3883_s27 = scalar_lea.vmem (!%p385_p8), [#allocation4], %s3725_s24 }
  0x35   : > { %v3146_v32 = vpack.c.bf16 (!%p385_p8), %v3735_v30, %v3733_v29  ;;  %v3750_v34 = vld [vmem:[%s400_s25 + $0x18] sm:$0xff] (!%p385_p8)  ;;  %v3757_v36 = vld [vmem:[%s400_s25 + $0x20] sm:$0xff] (!%p385_p8)  ;;  %v3759_v37 = vld [vmem:[%s400_s25 + $0x28] sm:$0xff] (!%p385_p8)  ;;  %v3878_v25 = vpack.i.bf16 (!%p385_p8), %v3735_v30, %v3733_v29 }
  0x36   : > { %v3150_v35 = vpack.c.bf16 (!%p385_p8), %v3750_v34, %v3748_v33  ;;  %v3154_v38 = vpack.c.bf16 (!%p385_p8), %v3759_v37, %v3757_v36  ;;  %v3766_v39 = vld [vmem:[%s400_s25 + $0x30] sm:$0xff] (!%p385_p8)  ;;  %v3768_v40 = vld [vmem:[%s400_s25 + $0x38] sm:$0xff] (!%p385_p8)  ;;  %v3779_v43 = vld [vmem:[%s400_s25 + $0x40] sm:$0xff] (!%p385_p8)  ;;  %v3872_v24 = vpack.i.bf16 (!%p385_p8), %v3750_v34, %v3748_v33 }
  0x37   : > { %3148 = vmatpush3.bf16.xpose.msk.msra.mxu0 %vm3739_vm2, %v3146_v32  ;;  %v3158_v41 = vpack.c.bf16 %v3768_v40, %v3766_v39  ;;  %v449_v42 = vld [vmem:[%s3776_s12] sm:$0xff]  ;;  %v450_v45 = vld [vmem:[%s3776_s12 + $0x8] sm:$0xff]  ;;  %v451_v47 = vld [vmem:[%s3776_s12 + $0x10] sm:$0xff]  ;;  %s4790_s14 = smov (!%p441_p9, %s3622_s14), 3 }
  0x38   : > { %3149 = vmatprep.subr.bf16.mxu0 %v3632_v27  ;;  %v3781_v44 = vmul.f32 0.17677669, %v449_v42  ;;  %v3789_v46 = vmul.f32 0.17677669, %v450_v45  ;;  %v3796_v48 = vmul.f32 0.17677669, %v451_v47 }
  0x39   : > { %v452_v49 = vld [vmem:[%s3776_s12 + $0x18] sm:$0xff]  ;;  %v453_v51 = vld [vmem:[%s3776_s12 + $0x20] sm:$0xff]  ;;  %v454_v53 = vld [vmem:[%s3776_s12 + $0x28] sm:$0xff]  ;;  %s3272_s30 = smul.u32 72, %s4790_s14 }
  0x3a   : > { %v3803_v50 = vmul.f32 0.17677669, %v452_v49  ;;  %v3810_v52 = vmul.f32 0.17677669, %v453_v51  ;;  %v3817_v54 = vmul.f32 0.17677669, %v454_v53 }
  0x3b   : > { %v455_v55 = vld [vmem:[%s3776_s12 + $0x30] sm:$0xff]  ;;  %v456_v57 = vld [vmem:[%s3776_s12 + $0x38] sm:$0xff]  ;;  %v457_v59 = vld [vmem:[%s3776_s12 + $0x40] sm:$0xff]  ;;  %s4716_s6 = scalar_lea.vmem %s4779_s3, %s3272_s30 }
  0x3c   : > { %v3824_v56 = vmul.f32 0.17677669, %v455_v55  ;;  %v3831_v58 = vmul.f32 0.17677669, %v456_v57  ;;  %v3838_v60 = vmul.f32 0.17677669, %v457_v59 }
  0x3d   : > { %v3886_v26 = vld [vmem:[%s3883_s27] sm:$0xff]  ;;  %v3889_v32 = vld [vmem:[%s3883_s27 + $0x8] sm:$0xff]  ;;  %v3894_v29 = vld [vmem:[%s3883_s27 + $0x10] sm:$0xff] }
  0x3e   : > { %v3162_v33 = vpack.c.bf16 %v3889_v32, %v3886_v26  ;;  %v3897_v30 = vld [vmem:[%s3883_s27 + $0x18] sm:$0xff] }
  0x3f   : > { %3152 = vmatpush3.bf16.xpose.msk.msra.mxu0 %vm3739_vm2, %v3150_v35  ;;  %v3165_v34 = vpack.c.bf16 %v3897_v30, %v3894_v29  ;;  %v3903_v35 = vld [vmem:[%s3883_s27 + $0x20] sm:$0xff] }
  0x40   : > { %3153 = vmatprep.subr.bf16.mxu0 %v3632_v27  ;;  %3163 = vmatpush3.bf16.msra.mxu1 %v3162_v33 }
  0x41   : > { %3164 = vmatprep.subr.bf16.mxu1 %v3632_v27 }
  0x44   : > { %3166 = vmatpush3.bf16.msra.mxu1 %v3165_v34  ;;  %v3334_v34 = vpack.i.bf16 %v3768_v40, %v3766_v39 }
  0x45   : > { %3167 = vmatprep.subr.bf16.mxu1 %v3632_v27 }
  0x47   : > { %3156 = vmatpush3.bf16.xpose.msk.msra.mxu0 %vm3739_vm2, %v3154_v38  ;;  %v3906_v38 = vld [vmem:[%s3883_s27 + $0x28] sm:$0xff] }
  0x48   : > { %3157 = vmatprep.subr.bf16.mxu0 %v3632_v27 }
  0x4f   : > { %3160 = vmatpush3.bf16.xpose.msk.msra.mxu0 %vm3739_vm2, %v3158_v41  ;;  %v3168_v41 = vpack.c.bf16 %v3906_v38, %v3903_v35 }
  0x50   : > { %2801 = vmatprep.subr.mxu0 %v3634_v28 }
  0x51   : > { %3169 = vmatpush3.bf16.msra.mxu1 %v3168_v41  ;;  %v3329_v41 = vpack.i.bf16 %v3759_v37, %v3757_v36 }
  0x52   : > { %3170 = vmatprep.subr.bf16.mxu1 %v3632_v27 }
  0x57   : > { %2802 = vmatpush3.xpose.msk.msra.mxu0 %vm485_vm0, %v3779_v43 }
  0x58   : > { %3189 = vmatprep.subr.bf16.mxu0 %v3632_v27 }
  0x5a   : > { %2804 = vmatmul.mubr.msk.f32.vlgmr.msra.gmra.mrb[0].mxu0 %vm485_vm0, %v3781_v44 }
  0x5b   : > { %2806 = vmatprep.mubr.msk.f32.mxu0 %vm3633_vm1, %v3634_v28 }
  0x5e   : > { %2807 = vmatmul.mubr.msk.f32.gmra.mrb[2].mxu0 %vm485_vm0, %v3789_v46 }
  0x5f   : > { %2809 = vmatprep.mubr.msk.f32.mxu0 %vm3633_vm1, %v3634_v28 }
  0x62   : > { %2810 = vmatmul.mubr.msk.f32.gmra.mrb[4].mxu0 %vm485_vm0, %v3796_v48 }
  0x63   : > { %2812 = vmatprep.mubr.msk.f32.mxu0 %vm3633_vm1, %v3634_v28 }
  0x66   : > { %2813 = vmatmul.mubr.msk.f32.gmra.mrb[6].mxu0 %vm485_vm0, %v3803_v50 }
  0x67   : > { %2815 = vmatprep.mubr.msk.f32.mxu0 %vm3633_vm1, %v3634_v28 }
  0x6a   : > { %2816 = vmatmul.mubr.msk.f32.gmra.mrb[8].mxu0 %vm485_vm0, %v3810_v52 }
  0x6b   : > { %2818 = vmatprep.mubr.msk.f32.mxu0 %vm3633_vm1, %v3634_v28 }
  0x6e   : > { %2819 = vmatmul.mubr.msk.f32.gmra.mrb[10].mxu0 %vm485_vm0, %v3817_v54 }
  0x6f   : > { %2821 = vmatprep.mubr.msk.f32.mxu0 %vm3633_vm1, %v3634_v28 }
  0x72   : > { %2822 = vmatmul.mubr.msk.f32.gmra.mrb[12].mxu0 %vm485_vm0, %v3824_v56 }
  0x73   : > { %2824 = vmatprep.mubr.msk.f32.mxu0 %vm3633_vm1, %v3634_v28 }
  0x76   : > { %2825 = vmatmul.mubr.msk.f32.gmra.mrb[14].mxu0 %vm485_vm0, %v3831_v58 }
  0x77   : > { %2827 = vmatprep.mubr.msk.f32.mxu0 %vm3633_vm1, %v3634_v28 }
  0x7a   : > { %2828 = vmatmul.mubr.msk.f32.gmra.mrb[16].mxu0 %vm485_vm0, %v3838_v60 }
  0x7b   : > { %2938 = vmatprep.mubr.msk.f32.mxu0 %vm3633_vm1, %v3634_v28 }
 0x12d   : > { %v606_v61 = vpop.f32.mrb[0].mxu0 }
 0x12e   : > { %v2805_v62 = vpop.f32.mrb[1].mxu0  ;;  %v651_v63 = vsel %vm650_vm3, %v606_v61, -inf }
 0x12f   : > { %652 = vmax.xlane.f32.xlu0 %v651_v63 }
 0x131   : > { %v611_v0 = vpop.f32.mrb[2].mxu0 }
 0x132   : > { %v2808_v1 = vpop.f32.mrb[3].mxu0  ;;  %v654_v2 = vsel %vm650_vm3, %v611_v0, -inf }
 0x133   : > { %655 = vmax.xlane.f32.xlu0 %v654_v2 }
 0x135   : > { %v616_v3 = vpop.f32.mrb[4].mxu0 }
 0x136   : > { %v2811_v4 = vpop.f32.mrb[5].mxu0  ;;  %v657_v5 = vsel %vm650_vm3, %v616_v3, -inf }
 0x137   : > { %658 = vmax.xlane.f32.xlu1 %v657_v5 }
 0x139   : > { %v621_v6 = vpop.f32.mrb[6].mxu0 }
 0x13a   : > { %v2814_v7 = vpop.f32.mrb[7].mxu0  ;;  %v660_v8 = vsel %vm650_vm3, %v621_v6, -inf }
 0x13b   : > { %661 = vmax.xlane.f32.xlu1 %v660_v8 }
 0x13d   : > { %v3850_v9 = vpop.f32.mrb[8].mxu0 }
 0x13e   : > { %v2817_v10 = vpop.f32.mrb[9].mxu0  ;;  %v663_v11 = vsel %vm650_vm3, %v3850_v9, -inf }
 0x13f   : > { %664 = vmax.xlane.f32.xlu0 %v663_v11 }
 0x141   : > { %v3854_v12 = vpop.f32.mrb[10].mxu0 }
 0x142   : > { %v666_v13 = vsel %vm650_vm3, %v3854_v12, -inf  ;;  %v2820_v14 = vpop.f32.mrb[11].mxu0 }
 0x143   : > { %667 = vmax.xlane.f32.xlu1 %v666_v13 }
 0x145   : > { %v3858_v15 = vpop.f32.mrb[12].mxu0 }
 0x146   : > { %v669_v16 = vsel %vm650_vm3, %v3858_v15, -inf  ;;  %v2823_v17 = vpop.f32.mrb[13].mxu0 }
 0x147   : > { %670 = vmax.xlane.f32.xlu0 %v669_v16  ;;  %v3931_v16 = vld [vmem:[%s3883_s27 + $0x30] sm:$0xff]  ;;  %v3934_v17 = vld [vmem:[%s3883_s27 + $0x38] sm:$0xff] }
 0x149   : > { %v3862_v18 = vpop.f32.mrb[14].mxu0 }
 0x14a   : > { %v672_v19 = vsel %vm650_vm3, %v3862_v18, -inf  ;;  %v2826_v20 = vpop.f32.mrb[15].mxu0 }
 0x14b   : > { %673 = vmax.xlane.f32.xlu1 %v672_v19  ;;  %v3171_v19 = vpack.c.bf16 %v3934_v17, %v3931_v16 }
 0x14d   : > { %v3866_v21 = vpop.f32.mrb[16].mxu0  ;;  %3172 = vmatpush3.bf16.msra.mxu1 %v3171_v19 }
 0x14e   : > { %v675_v22 = vsel %vm650_vm3, %v3866_v21, -inf  ;;  %v2829_v23 = vpop.f32.mrb[17].mxu0  ;;  %2846 = vmatprep.subr.mxu1 %v3634_v28 }
 0x14f   : > { %676 = vmax.xlane.f32.xlu0 %v675_v22  ;;  %v3946_v23 = vld [vmem:[%s3883_s27 + $0x40] sm:$0xff] }
 0x151   : > { %2847 = vmatpush3.msra.mxu1 %v3946_v23 }
 0x152   : > { %3173 = vmatprep.subr.bf16.mxu1 %v3632_v27 }
 0x15c   : > { %3325 = vrot.lane.b32.xlu1 %v3872_v24, %s3635_s26 }
 0x165   : > { %3320 = vrot.lane.b32.xlu0 %v3878_v25, %s3635_s26 }
 0x1bc   : > { %v653_v42 = vpop.xlane.xlu0 %652 }
 0x1bd   : > { %v678_v45 = vsub.f32 %v606_v61, %v653_v42 }
 0x1bf   : > { %v687_v47 = vmul.f32 1.442695, %v678_v45 }
 0x1c0   : > { %v656_v49 = vpop.xlane.xlu0 %655 }
 0x1c1   : > { %3439 = vpow2.f32 %v687_v47  ;;  %v679_v51 = vsub.f32 %v611_v0, %v656_v49 }
 0x1c3   : > { %v689_v53 = vmul.f32 1.442695, %v679_v51 }
 0x1c4   : > { %v659_v55 = vpop.xlane.xlu1 %658 }
 0x1c5   : > { %3441 = vpow2.f32 %v689_v53  ;;  %v680_v57 = vsub.f32 %v616_v3, %v659_v55 }
 0x1c7   : > { %v691_v59 = vmul.f32 1.442695, %v680_v57 }
 0x1c8   : > { %v662_v62 = vpop.xlane.xlu1 %661 }
 0x1c9   : > { %3443 = vpow2.f32 %v691_v59  ;;  %v681_v63 = vsub.f32 %v621_v6, %v662_v62 }
 0x1cb   : > { %v3912_v1 = vpop.eup %3439  ;;  %v693_v2 = vmul.f32 1.442695, %v681_v63 }
 0x1cc   : > { %v665_v4 = vpop.xlane.xlu0 %664  ;;  %v705_v5 = vsel %vm650_vm3, %v3912_v1, 0.0 }
 0x1cd   : > { %3445 = vpow2.f32 %v693_v2  ;;  %v682_v61 = vsub.f32 %v3850_v9, %v665_v4  ;;  %706 = vadd.xlane.f32.xlu1 %v705_v5 }
 0x1cf   : > { %v3917_v0 = vpop.eup %3441  ;;  %v695_v3 = vmul.f32 1.442695, %v682_v61 }
 0x1d0   : > { %v668_v7 = vpop.xlane.xlu1 %667  ;;  %v708_v6 = vsel %vm650_vm3, %v3917_v0, 0.0 }
 0x1d1   : > { %3447 = vpow2.f32 %v695_v3  ;;  %v683_v8 = vsub.f32 %v3854_v12, %v668_v7  ;;  %709 = vadd.xlane.f32.xlu0 %v708_v6 }
 0x1d3   : > { %v3922_v10 = vpop.eup %3443  ;;  %v697_v11 = vmul.f32 1.442695, %v683_v8 }
 0x1d4   : > { %v711_v9 = vsel %vm650_vm3, %v3922_v10, 0.0  ;;  %v671_v42 = vpop.xlane.xlu0 %670 }
 0x1d5   : > { %3449 = vpow2.f32 %v697_v11  ;;  %712 = vadd.xlane.f32.xlu1 %v711_v9  ;;  %v684_v39 = vsub.f32 %v3858_v15, %v671_v42 }
 0x1d7   : > { %v3926_v13 = vpop.eup %3445  ;;  %v699_v45 = vmul.f32 1.442695, %v684_v39 }
 0x1d8   : > { %v714_v14 = vsel %vm650_vm3, %v3926_v13, 0.0  ;;  %v674_v40 = vpop.xlane.xlu1 %673 }
 0x1d9   : > { %715 = vadd.xlane.f32.xlu0 %v714_v14  ;;  %v685_v47 = vsub.f32 %v3862_v18, %v674_v40  ;;  %3451 = vpow2.f32 %v699_v45 }
 0x1db   : > { %v3936_v12 = vpop.eup %3447  ;;  %v701_v36 = vmul.f32 1.442695, %v685_v47 }
 0x1dc   : > { %v717_v20 = vsel %vm650_vm3, %v3936_v12, 0.0  ;;  %v677_v49 = vpop.xlane.xlu0 %676 }
 0x1dd   : > { %718 = vadd.xlane.f32.xlu1 %v717_v20  ;;  %v686_v37 = vsub.f32 %v3866_v21, %v677_v49  ;;  %3453 = vpow2.f32 %v701_v36 }
 0x1df   : > { %v3943_v22 = vpop.eup %3449  ;;  %v703_v15 = vmul.f32 1.442695, %v686_v37 }
 0x1e0   : > { %v720_v33 = vsel %vm650_vm3, %v3943_v22, 0.0 }
 0x1e1   : > { %721 = vadd.xlane.f32.xlu0 %v720_v33  ;;  %3455 = vpow2.f32 %v703_v15 }
 0x1e3   : > { %v3974_v51 = vpop.eup %3451 }
 0x1e4   : > { %v723_v18 = vsel %vm650_vm3, %v3974_v51, 0.0 }
 0x1e7   : > { %v3980_v53 = vpop.eup %3453 }
 0x1e8   : > { %v726_v21 = vsel %vm650_vm3, %v3980_v53, 0.0 }
 0x1eb   : > { %v3986_v55 = vpop.eup %3455 }
 0x1ec   : > { %v729_v57 = vsel %vm650_vm3, %v3986_v55, 0.0 }
 0x1ee   : > { %3335 = vrot.lane.b32.xlu1 %v3334_v34, %s3635_s26 }
 0x1f2   : > { %3340 = vrot.lane.b32.xlu1 %v3878_v25, %s3636_s28 }
 0x1f7   : > { %3330 = vrot.lane.b32.xlu0 %v3329_v41, %s3635_s26 }
 0x1fb   : > { %921 = vrot.lane.b32.xlu0 %v3779_v43, %s3635_s26 }
 0x1ff   : > { %887 = vrot.lane.b32.xlu0 %v3781_v44, %s3635_s26 }
 0x203   : > { %3345 = vrot.lane.b32.xlu0 %v3872_v24, %s3636_s28 }
 0x207   : > { %893 = vrot.lane.b32.xlu0 %v3803_v50, %s3635_s26 }
 0x20b   : > { %895 = vrot.lane.b32.xlu0 %v3810_v52, %s3635_s26 }
 0x20f   : > { %3355 = vrot.lane.b32.xlu0 %v3334_v34, %s3636_s28 }
 0x213   : > { %901 = vrot.lane.b32.xlu0 %v3831_v58, %s3635_s26 }
 0x216   : > { %724 = vadd.xlane.f32.xlu1 %v723_v18 }
 0x217   : > { %1375 = vrot.lane.b32.xlu0 %v3779_v43, %s3636_s28 }
 0x21a   : > { %727 = vadd.xlane.f32.xlu1 %v726_v21 }
 0x21b   : > { %1341 = vrot.lane.b32.xlu0 %v3781_v44, %s3636_s28 }
 0x21e   : > { %730 = vadd.xlane.f32.xlu1 %v729_v57 }
 0x21f   : > { %3365 = vrot.lane.b32.xlu0 %v3872_v24, %s3637_s29 }
 0x223   : > { %1347 = vrot.lane.b32.xlu0 %v3803_v50, %s3636_s28 }
 0x227   : > { %1349 = vrot.lane.b32.xlu0 %v3810_v52, %s3636_s28 }
 0x22b   : > { %3375 = vrot.lane.b32.xlu0 %v3334_v34, %s3637_s29 }
 0x22f   : > { %889 = vrot.lane.b32.xlu1 %v3789_v46, %s3635_s26  ;;  %1355 = vrot.lane.b32.xlu0 %v3831_v58, %s3636_s28 }
 0x233   : > { %891 = vrot.lane.b32.xlu1 %v3796_v48, %s3635_s26  ;;  %1820 = vrot.lane.b32.xlu0 %v3779_v43, %s3637_s29  ;;  %v3326_v43 = vpop.permute.xlu1 %3325 }
 0x234   : > { %v3327_v61 = vunpack.i.l.bf16 %v3326_v43 }
 0x237   : > { %3350 = vrot.lane.b32.xlu1 %v3329_v41, %s3636_s28  ;;  %1788 = vrot.lane.b32.xlu0 %v3789_v46, %s3637_s29 }
 0x23b   : > { %897 = vrot.lane.b32.xlu1 %v3817_v54, %s3635_s26  ;;  %1792 = vrot.lane.b32.xlu0 %v3803_v50, %s3637_s29  ;;  %v3321_v50 = vpop.permute.xlu0 %3320 }
 0x23c   : > { %v3322_v59 = vunpack.i.l.bf16 %v3321_v50 }
 0x23f   : > { %899 = vrot.lane.b32.xlu1 %v3824_v56, %s3635_s26  ;;  %1796 = vrot.lane.b32.xlu0 %v3817_v54, %s3637_s29 }
 0x243   : > { %903 = vrot.lane.b32.xlu1 %v3838_v60, %s3635_s26  ;;  %1800 = vrot.lane.b32.xlu0 %v3831_v58, %s3637_s29 }
 0x247   : > { %3360 = vrot.lane.b32.xlu1 %v3878_v25, %s3637_s29  ;;  %v3323_v25 = vunpack.i.h.bf16 %v3321_v50 }
 0x249   : > { %v3174_v2 = vpack.c.bf16 %v3323_v25, %v3322_v59 }
 0x24b   : > { %1343 = vrot.lane.b32.xlu1 %v3789_v46, %s3636_s28 }
 0x24f   : > { %1345 = vrot.lane.b32.xlu1 %v3796_v48, %s3636_s28 }
 0x253   : > { %3370 = vrot.lane.b32.xlu1 %v3329_v41, %s3637_s29 }
 0x257   : > { %1351 = vrot.lane.b32.xlu1 %v3817_v54, %s3636_s28 }
 0x25a   : > { %v707_v24 = vpop.xlane.xlu1 %706 }
 0x25b   : > { %3457 = vrcp.f32 %v707_v24  ;;  %1353 = vrot.lane.b32.xlu1 %v3824_v56, %s3636_s28 }
 0x25e   : > { %v710_v58 = vpop.xlane.xlu0 %709 }
 0x25f   : > { %3459 = vrcp.f32 %v710_v58  ;;  %1357 = vrot.lane.b32.xlu1 %v3838_v60, %s3636_s28 }
 0x262   : > { %v713_v46 = vpop.xlane.xlu1 %712 }
 0x263   : > { %3461 = vrcp.f32 %v713_v46  ;;  %1786 = vrot.lane.b32.xlu1 %v3781_v44, %s3637_s29 }
 0x265   : > { %v3458_v62 = vpop.eup %3457 }
 0x266   : > { %v716_v54 = vpop.xlane.xlu0 %715  ;;  %v741_v63 = vmul.f32 %v3458_v62, %v3912_v1  ;;  %v3328_v1 = vunpack.i.h.bf16 %v3326_v43 }
 0x267   : > { %3463 = vrcp.f32 %v716_v54  ;;  %1790 = vrot.lane.b32.xlu1 %v3796_v48, %s3637_s29 }
 0x268   : > { %2849 = vmatmul.mubr.msk.f32.vlgmr.msra.gmra.mrb[0].mxu1 %vm650_vm3, %v741_v63  ;;  %v3178_v6 = vpack.c.bf16 %v3328_v1, %v3327_v61  ;;  %v3384_v61 = vpack.i.bf16 %v3897_v30, %v3894_v29  ;;  %v3394_v29 = vpack.i.bf16 %v3934_v17, %v3931_v16 }
 0x269   : > { %v3460_v4 = vpop.eup %3459  ;;  %3176 = vmatpush3.bf16.xpose.msk.msra.mxu1 %vm3739_vm2, %v3174_v2  ;;  %2851 = vmatprep.mubr.msk.f32.mxu1 %vm3633_vm1, %v3634_v28 }
 0x26a   : > { %v719_v5 = vpop.xlane.xlu1 %718  ;;  %v742_v44 = vmul.f32 %v3460_v4, %v3917_v0  ;;  %3177 = vmatprep.subr.bf16.mxu1 %v3632_v27 }
 0x26b   : > { %3465 = vrcp.f32 %v719_v5  ;;  %1794 = vrot.lane.b32.xlu1 %v3810_v52, %s3637_s29 }
 0x26c   : > { %2852 = vmatmul.mubr.msk.f32.gmra.mrb[2].mxu1 %vm650_vm3, %v742_v44 }
 0x26d   : > { %v3462_v48 = vpop.eup %3461  ;;  %2854 = vmatprep.mubr.msk.f32.mxu1 %vm3633_vm1, %v3634_v28 }
 0x26e   : > { %v722_v3 = vpop.xlane.xlu0 %721  ;;  %v743_v7 = vmul.f32 %v3462_v48, %v3922_v10  ;;  %v3336_v19 = vpop.permute.xlu1 %3335  ;;  %v3379_v48 = vpack.i.bf16 %v3889_v32, %v3886_v26 }
 0x26f   : > { %3467 = vrcp.f32 %v722_v3  ;;  %1798 = vrot.lane.b32.xlu1 %v3824_v56, %s3637_s29  ;;  %v3338_v20 = vunpack.i.h.bf16 %v3336_v19  ;;  %v3337_v33 = vunpack.i.l.bf16 %v3336_v19 }
 0x270   : > { %2855 = vmatmul.mubr.msk.f32.gmra.mrb[4].mxu1 %vm650_vm3, %v743_v7  ;;  %3380 = vrot.lane.b32.xlu0 %v3379_v48, %s3635_s26 }
 0x271   : > { %v3464_v0 = vpop.eup %3463  ;;  %3180 = vmatpush3.bf16.xpose.msk.msra.mxu1 %vm3739_vm2, %v3178_v6  ;;  %2857 = vmatprep.mubr.msk.f32.mxu1 %vm3633_vm1, %v3634_v28 }
 0x272   : > { %v3331_v52 = vpop.permute.xlu0 %3330  ;;  %v744_v8 = vmul.f32 %v3464_v0, %v3926_v13  ;;  %3181 = vmatprep.subr.bf16.mxu1 %v3632_v27  ;;  %v3389_v0 = vpack.i.bf16 %v3906_v38, %v3903_v35 }
 0x273   : > { %v3333_v10 = vunpack.i.h.bf16 %v3331_v52  ;;  %v3332_v11 = vunpack.i.l.bf16 %v3331_v52  ;;  %1802 = vrot.lane.b32.xlu1 %v3838_v60, %s3637_s29 }
 0x274   : > { %2858 = vmatmul.mubr.msk.f32.gmra.mrb[6].mxu1 %vm650_vm3, %v744_v8  ;;  %3395 = vrot.lane.b32.xlu0 %v3394_v29, %s3635_s26 }
 0x275   : > { %v3466_v56 = vpop.eup %3465  ;;  %v3182_v9 = vpack.c.bf16 %v3333_v10, %v3332_v11  ;;  %2860 = vmatprep.mubr.msk.f32.mxu1 %vm3633_vm1, %v3634_v28 }
 0x276   : > { %v745_v14 = vmul.f32 %v3466_v56, %v3936_v12  ;;  %v3186_v12 = vpack.c.bf16 %v3338_v20, %v3337_v33  ;;  %v922_v34 = vpop.permute.xlu0 %921 }
 0x277   : > { %3385 = vrot.lane.b32.xlu1 %v3384_v61, %s3635_s26 }
 0x278   : > { %2861 = vmatmul.mubr.msk.f32.gmra.mrb[8].mxu1 %vm650_vm3, %v745_v14  ;;  %3400 = vrot.lane.b32.xlu0 %v3379_v48, %s3636_s28 }
 0x279   : > { %v3468_v13 = vpop.eup %3467  ;;  %3184 = vmatpush3.bf16.xpose.msk.msra.mxu1 %vm3739_vm2, %v3182_v9  ;;  %2863 = vmatprep.mubr.msk.f32.mxu1 %vm3633_vm1, %v3634_v28 }
 0x27a   : > { %v746_v60 = vmul.f32 %v3468_v13, %v3943_v22  ;;  %3185 = vmatprep.subr.bf16.mxu1 %v3632_v27  ;;  %v3341_v22 = vpop.permute.xlu1 %3340  ;;  %v888_v36 = vpop.permute.xlu0 %887 }
 0x27b   : > { %v3343_v21 = vunpack.i.h.bf16 %v3341_v22  ;;  %3390 = vrot.lane.b32.xlu1 %v3389_v0, %s3635_s26 }
 0x27c   : > { %2864 = vmatmul.mubr.msk.f32.gmra.mrb[10].mxu1 %vm650_vm3, %v746_v60  ;;  %3415 = vrot.lane.b32.xlu0 %v3394_v29, %s3636_s28 }
 0x27d   : > { %2866 = vmatprep.mubr.msk.f32.mxu1 %vm3633_vm1, %v3634_v28 }
 0x27e   : > { %v3346_v57 = vpop.permute.xlu0 %3345 }
 0x27f   : > { %v3347_v24 = vunpack.i.l.bf16 %v3346_v57  ;;  %1193 = vrot.lane.b32.xlu1 %v3946_v23, %s3635_s26 }
 0x281   : > { %3188 = vmatpush3.bf16.xpose.msk.msra.mxu1 %vm3739_vm2, %v3186_v12 }
 0x282   : > { %2891 = vmatprep.subr.mxu1 %v3634_v28  ;;  %v894_v50 = vpop.permute.xlu0 %893 }
 0x283   : > { %3405 = vrot.lane.b32.xlu1 %v3384_v61, %s3636_s28 }
 0x286   : > { %v896_v25 = vpop.permute.xlu0 %895 }
 0x287   : > { %3410 = vrot.lane.b32.xlu1 %v3389_v0, %s3636_s28 }
 0x289   : > { %2892 = vmatpush3.xpose.msk.msra.mxu1 %vm485_vm0, %v922_v34 }
 0x28a   : > { %3201 = vmatprep.subr.bf16.mxu1 %v3632_v27  ;;  %v3356_v63 = vpop.permute.xlu0 %3355 }
 0x28b   : > { %v3358_v44 = vunpack.i.h.bf16 %v3356_v63  ;;  %v3357_v1 = vunpack.i.l.bf16 %v3356_v63  ;;  %1638 = vrot.lane.b32.xlu1 %v3946_v23, %s3636_s28 }
 0x28d   : > { %v3214_v7 = vpack.c.bf16 %v3358_v44, %v3357_v1 }
 0x28e   : > { %v902_v5 = vpop.permute.xlu0 %901 }
 0x292   : > { %v1376_v6 = vpop.permute.xlu0 %1375 }
 0x296   : > { %v1342_v32 = vpop.permute.xlu0 %1341 }
 0x29a   : > { %v3366_v17 = vpop.permute.xlu0 %3365 }
 0x29b   : > { %v3368_v8 = vunpack.i.h.bf16 %v3366_v17  ;;  %v3367_v10 = vunpack.i.l.bf16 %v3366_v17 }
 0x29d   : > { %v3234_v56 = vpack.c.bf16 %v3368_v8, %v3367_v10 }
 0x29e   : > { %v1348_v11 = vpop.permute.xlu0 %1347 }
 0x2a2   : > { %v1350_v14 = vpop.permute.xlu0 %1349 }
 0x2a3   : > { %v725_v41 = vpop.xlane.xlu1 %724 }
 0x2a4   : > { %3469 = vrcp.f32 %v725_v41 }
 0x2a6   : > { %v3376_v23 = vpop.permute.xlu0 %3375 }
 0x2a7   : > { %v728_v42 = vpop.xlane.xlu1 %727  ;;  %v3378_v33 = vunpack.i.h.bf16 %v3376_v23  ;;  %v3377_v12 = vunpack.i.l.bf16 %v3376_v23 }
 0x2a8   : > { %3471 = vrcp.f32 %v728_v42 }
 0x2a9   : > { %v3242_v34 = vpack.c.bf16 %v3378_v33, %v3377_v12 }
 0x2aa   : > { %v1356_v41 = vpop.permute.xlu0 %1355 }
 0x2ab   : > { %v731_v39 = vpop.xlane.xlu1 %730 }
 0x2ac   : > { %3473 = vrcp.f32 %v731_v39 }
 0x2ae   : > { %v3470_v40 = vpop.eup %3469  ;;  %v1821_v39 = vpop.permute.xlu0 %1820 }
 0x2af   : > { %v747_v45 = vmul.f32 %v3470_v40, %v3974_v51  ;;  %v890_v37 = vpop.permute.xlu1 %889  ;;  %v3342_v51 = vunpack.i.l.bf16 %v3341_v22 }
 0x2b1   : > { %2867 = vmatmul.mubr.msk.f32.gmra.mrb[12].mxu1 %vm650_vm3, %v747_v45 }
 0x2b2   : > { %v3472_v47 = vpop.eup %3471  ;;  %2869 = vmatprep.mubr.msk.f32.mxu1 %vm3633_vm1, %v3634_v28  ;;  %v1789_v31 = vpop.permute.xlu0 %1788 }
 0x2b3   : > { %v748_v49 = vmul.f32 %v3472_v47, %v3980_v53  ;;  %v892_v43 = vpop.permute.xlu1 %891  ;;  %v3202_v53 = vpack.c.bf16 %v3343_v21, %v3342_v51 }
 0x2b5   : > { %2870 = vmatmul.mubr.msk.f32.gmra.mrb[14].mxu1 %vm650_vm3, %v748_v49 }
 0x2b6   : > { %v3474_v15 = vpop.eup %3473  ;;  %2872 = vmatprep.mubr.msk.f32.mxu1 %vm3633_vm1, %v3634_v28  ;;  %v1793_v47 = vpop.permute.xlu0 %1792 }
 0x2b7   : > { %v749_v18 = vmul.f32 %v3474_v15, %v3986_v55  ;;  %v3348_v55 = vunpack.i.h.bf16 %v3346_v57  ;;  %v3351_v58 = vpop.permute.xlu1 %3350 }
 0x2b8   : > { %v3353_v62 = vunpack.i.h.bf16 %v3351_v58  ;;  %v3352_v54 = vunpack.i.l.bf16 %v3351_v58 }
 0x2b9   : > { %2873 = vmatmul.mubr.msk.f32.gmra.mrb[16].mxu1 %vm650_vm3, %v749_v18  ;;  %v3206_v46 = vpack.c.bf16 %v3348_v55, %v3347_v24 }
 0x2ba   : > { %2893 = vmatprep.mubr.msk.f32.mxu1 %vm3633_vm1, %v3634_v28  ;;  %v3210_v2 = vpack.c.bf16 %v3353_v62, %v3352_v54 }
 0x2bb   : > { %v898_v59 = vpop.permute.xlu1 %897 }
 0x2bd   : > { %2894 = vmatmul.mubr.msk.f32.vlgmr.msra.gmra.mrb[18].mxu1 %vm485_vm0, %v888_v36  ;;  %v1797_v36 = vpop.permute.xlu0 %1796 }
 0x2be   : > { %3204 = vmatpush3.bf16.xpose.msk.msra.mxu1 %vm3739_vm2, %v3202_v53  ;;  %2896 = vmatprep.mubr.msk.f32.mxu1 %vm3633_vm1, %v3634_v28 }
 0x2bf   : > { %3205 = vmatprep.subr.bf16.mxu1 %v3632_v27  ;;  %v900_v4 = vpop.permute.xlu1 %899 }
 0x2c1   : > { %2897 = vmatmul.mubr.msk.f32.gmra.mrb[20].mxu1 %vm485_vm0, %v890_v37  ;;  %v1801_v15 = vpop.permute.xlu0 %1800 }
 0x2c2   : > { %2899 = vmatprep.mubr.msk.f32.mxu1 %vm3633_vm1, %v3634_v28 }
 0x2c3   : > { %v904_v3 = vpop.permute.xlu1 %903 }
 0x2c5   : > { %2900 = vmatmul.mubr.msk.f32.gmra.mrb[22].mxu1 %vm485_vm0, %v892_v43 }
 0x2c6   : > { %3208 = vmatpush3.bf16.xpose.msk.msra.mxu1 %vm3739_vm2, %v3206_v46  ;;  %2902 = vmatprep.mubr.msk.f32.mxu1 %vm3633_vm1, %v3634_v28 }
 0x2c7   : > { %3209 = vmatprep.subr.bf16.mxu1 %v3632_v27  ;;  %v3361_v26 = vpop.permute.xlu1 %3360 }
 0x2c8   : > { %v3363_v30 = vunpack.i.h.bf16 %v3361_v26  ;;  %v3362_v35 = vunpack.i.l.bf16 %v3361_v26 }
 0x2c9   : > { %2903 = vmatmul.mubr.msk.f32.gmra.mrb[24].mxu1 %vm485_vm0, %v894_v50 }
 0x2ca   : > { %2905 = vmatprep.mubr.msk.f32.mxu1 %vm3633_vm1, %v3634_v28  ;;  %v3230_v16 = vpack.c.bf16 %v3363_v30, %v3362_v35 }
 0x2cb   : > { %v1344_v38 = vpop.permute.xlu1 %1343 }
 0x2cd   : > { %2906 = vmatmul.mubr.msk.f32.gmra.mrb[26].mxu1 %vm485_vm0, %v896_v25 }
 0x2ce   : > { %3212 = vmatpush3.bf16.xpose.msk.msra.mxu1 %vm3739_vm2, %v3210_v2  ;;  %2908 = vmatprep.mubr.msk.f32.mxu1 %vm3633_vm1, %v3634_v28 }
 0x2cf   : > { %3213 = vmatprep.subr.bf16.mxu1 %v3632_v27  ;;  %v1346_v52 = vpop.permute.xlu1 %1345 }
 0x2d1   : > { %2909 = vmatmul.mubr.msk.f32.gmra.mrb[28].mxu1 %vm485_vm0, %v898_v59 }
 0x2d2   : > { %2911 = vmatprep.mubr.msk.f32.mxu1 %vm3633_vm1, %v3634_v28 }
 0x2d3   : > { %v3371_v9 = vpop.permute.xlu1 %3370 }
 0x2d4   : > { %v3373_v19 = vunpack.i.h.bf16 %v3371_v9  ;;  %v3372_v13 = vunpack.i.l.bf16 %v3371_v9 }
 0x2d5   : > { %2912 = vmatmul.mubr.msk.f32.gmra.mrb[30].mxu1 %vm485_vm0, %v900_v4 }
 0x2d6   : > { %3216 = vmatpush3.bf16.xpose.msk.msra.mxu1 %vm3739_vm2, %v3214_v7  ;;  %2914 = vmatprep.mubr.msk.f32.mxu1 %vm3633_vm1, %v3634_v28  ;;  %v3238_v60 = vpack.c.bf16 %v3373_v19, %v3372_v13 }
 0x2d7   : > { %2981 = vmatprep.subr.mxu1 %v3634_v28  ;;  %v1352_v20 = vpop.permute.xlu1 %1351 }
 0x2d9   : > { %2915 = vmatmul.mubr.msk.f32.gmra.mrb[32].mxu1 %vm485_vm0, %v902_v5 }
 0x2da   : > { %2917 = vmatprep.mubr.msk.f32.mxu1 %vm3633_vm1, %v3634_v28 }
 0x2db   : > { %v1354_v22 = vpop.permute.xlu1 %1353 }
 0x2dd   : > { %2918 = vmatmul.mubr.msk.f32.gmra.mrb[34].mxu1 %vm485_vm0, %v904_v3 }
 0x2de   : > { %2982 = vmatpush3.xpose.msk.msra.mxu1 %vm485_vm0, %v1376_v6  ;;  %2983 = vmatprep.mubr.msk.f32.mxu1 %vm3633_vm1, %v3634_v28 }
 0x2df   : > { %3229 = vmatprep.subr.bf16.mxu1 %v3632_v27  ;;  %v1358_v42 = vpop.permute.xlu1 %1357 }
 0x2e1   : > { %2984 = vmatmul.mubr.msk.f32.vlgmr.msra.gmra.mrb[36].mxu1 %vm485_vm0, %v1342_v32 }
 0x2e2   : > { %3232 = vmatpush3.bf16.xpose.msk.msra.mxu1 %vm3739_vm2, %v3230_v16  ;;  %2986 = vmatprep.mubr.msk.f32.mxu1 %vm3633_vm1, %v3634_v28  ;;  %v3381_v62 = vpop.permute.xlu0 %3380 }
 0x2e3   : > { %3233 = vmatprep.subr.bf16.mxu1 %v3632_v27  ;;  %v1787_v40 = vpop.permute.xlu1 %1786  ;;  %v3383_v54 = vunpack.i.h.bf16 %v3381_v62  ;;  %v3382_v63 = vunpack.i.l.bf16 %v3381_v62 }
 0x2e5   : > { %2987 = vmatmul.mubr.msk.f32.gmra.mrb[38].mxu1 %vm485_vm0, %v1344_v38  ;;  %v3190_v2 = vpack.c.bf16 %v3383_v54, %v3382_v63 }
 0x2e6   : > { %2989 = vmatprep.mubr.msk.f32.mxu1 %vm3633_vm1, %v3634_v28  ;;  %v3396_v6 = vpop.permute.xlu0 %3395 }
 0x2e7   : > { %v1791_v45 = vpop.permute.xlu1 %1790  ;;  %3191 = vmatpush3.bf16.msra.mxu0 %v3190_v2  ;;  %v3398_v0 = vunpack.i.h.bf16 %v3396_v6  ;;  %v3397_v29 = vunpack.i.l.bf16 %v3396_v6 }
 0x2e8   : > { %3192 = vmatprep.subr.bf16.mxu0 %v3632_v27 }
 0x2e9   : > { %2990 = vmatmul.mubr.msk.f32.gmra.mrb[40].mxu1 %vm485_vm0, %v1346_v52  ;;  %v3199_v26 = vpack.c.bf16 %v3398_v0, %v3397_v29 }
 0x2ea   : > { %3236 = vmatpush3.bf16.xpose.msk.msra.mxu1 %vm3739_vm2, %v3234_v56  ;;  %2992 = vmatprep.mubr.msk.f32.mxu1 %vm3633_vm1, %v3634_v28 }
 0x2eb   : > { %3237 = vmatprep.subr.bf16.mxu1 %v3632_v27  ;;  %v1795_v49 = vpop.permute.xlu1 %1794 }
 0x2ed   : > { %2993 = vmatmul.mubr.msk.f32.gmra.mrb[42].mxu1 %vm485_vm0, %v1348_v11 }
 0x2ee   : > { %2995 = vmatprep.mubr.msk.f32.mxu1 %vm3633_vm1, %v3634_v28 }
 0x2ef   : > { %v1799_v37 = vpop.permute.xlu1 %1798 }
 0x2f1   : > { %2996 = vmatmul.mubr.msk.f32.gmra.mrb[44].mxu1 %vm485_vm0, %v1350_v14 }
 0x2f2   : > { %3240 = vmatpush3.bf16.xpose.msk.msra.mxu1 %vm3739_vm2, %v3238_v60  ;;  %2998 = vmatprep.mubr.msk.f32.mxu1 %vm3633_vm1, %v3634_v28 }
 0x2f3   : > { %3241 = vmatprep.subr.bf16.mxu1 %v3632_v27  ;;  %v1803_v18 = vpop.permute.xlu1 %1802 }
 0x2f5   : > { %2999 = vmatmul.mubr.msk.f32.gmra.mrb[46].mxu1 %vm485_vm0, %v1352_v20 }
 0x2f6   : > { %3001 = vmatprep.mubr.msk.f32.mxu1 %vm3633_vm1, %v3634_v28 }
 0x2f7   : > { %v3386_v4 = vpop.permute.xlu1 %3385 }
 0x2f8   : > { %v3388_v5 = vunpack.i.h.bf16 %v3386_v4  ;;  %v3387_v44 = vunpack.i.l.bf16 %v3386_v4 }
 0x2f9   : > { %3002 = vmatmul.mubr.msk.f32.gmra.mrb[48].mxu1 %vm485_vm0, %v1354_v22 }
 0x2fa   : > { %3244 = vmatpush3.bf16.xpose.msk.msra.mxu1 %vm3739_vm2, %v3242_v34  ;;  %3004 = vmatprep.mubr.msk.f32.mxu1 %vm3633_vm1, %v3634_v28  ;;  %v3193_v1 = vpack.c.bf16 %v3388_v5, %v3387_v44 }
 0x2fb   : > { %3071 = vmatprep.subr.mxu1 %v3634_v28  ;;  %v3391_v61 = vpop.permute.xlu1 %3390 }
 0x2fc   : > { %v3393_v48 = vunpack.i.h.bf16 %v3391_v61  ;;  %v3392_v3 = vunpack.i.l.bf16 %v3391_v61  ;;  %3194 = vmatpush3.bf16.msra.mxu0 %v3193_v1 }
 0x2fd   : > { %3005 = vmatmul.mubr.msk.f32.gmra.mrb[50].mxu1 %vm485_vm0, %v1356_v41  ;;  %3195 = vmatprep.subr.bf16.mxu0 %v3632_v27 }
 0x2fe   : > { %3007 = vmatprep.mubr.msk.f32.mxu1 %vm3633_vm1, %v3634_v28  ;;  %v3196_v7 = vpack.c.bf16 %v3393_v48, %v3392_v3 }
 0x2ff   : > { %v1194_v32 = vpop.permute.xlu1 %1193 }
 0x300   : > { %3197 = vmatpush3.bf16.msra.mxu0 %v3196_v7 }
 0x301   : > { %3008 = vmatmul.mubr.msk.f32.gmra.mrb[52].mxu1 %vm485_vm0, %v1358_v42  ;;  %3198 = vmatprep.subr.bf16.mxu0 %v3632_v27 }
 0x302   : > { %3072 = vmatpush3.xpose.msk.msra.mxu1 %vm485_vm0, %v1821_v39  ;;  %3073 = vmatprep.mubr.msk.f32.mxu1 %vm3633_vm1, %v3634_v28 }
 0x303   : > { %3257 = vmatprep.subr.bf16.mxu1 %v3632_v27 }
 0x304   : > { %3200 = vmatpush3.bf16.msra.mxu0 %v3199_v26 }
 0x305   : > { %3074 = vmatmul.mubr.msk.f32.vlgmr.msra.gmra.mrb[54].mxu1 %vm485_vm0, %v1787_v40  ;;  %2936 = vmatprep.subr.mxu0 %v3634_v28 }
 0x306   : > { %3076 = vmatprep.mubr.msk.f32.mxu1 %vm3633_vm1, %v3634_v28 }
 0x308   : > { %2937 = vmatpush3.msra.mxu0 %v1194_v32 }
 0x309   : > { %3077 = vmatmul.mubr.msk.f32.gmra.mrb[56].mxu1 %vm485_vm0, %v1789_v31  ;;  %3217 = vmatprep.subr.bf16.mxu0 %v3632_v27 }
 0x30a   : > { %3079 = vmatprep.mubr.msk.f32.mxu1 %vm3633_vm1, %v3634_v28 }
 0x30d   : > { %3080 = vmatmul.mubr.msk.f32.gmra.mrb[58].mxu1 %vm485_vm0, %v1791_v45 }
 0x30e   : > { %3082 = vmatprep.mubr.msk.f32.mxu1 %vm3633_vm1, %v3634_v28 }
 0x311   : > { %3083 = vmatmul.mubr.msk.f32.gmra.mrb[60].mxu1 %vm485_vm0, %v1793_v47 }
 0x312   : > { %3085 = vmatprep.mubr.msk.f32.mxu1 %vm3633_vm1, %v3634_v28 }
 0x315   : > { %3086 = vmatmul.mubr.msk.f32.gmra.mrb[62].mxu1 %vm485_vm0, %v1795_v49 }
 0x316   : > { %3088 = vmatprep.mubr.msk.f32.mxu1 %vm3633_vm1, %v3634_v28 }
 0x319   : > { %3089 = vmatmul.mubr.msk.f32.gmra.mrb[64].mxu1 %vm485_vm0, %v1797_v36 }
 0x31a   : > { %3091 = vmatprep.mubr.msk.f32.mxu1 %vm3633_vm1, %v3634_v28 }
 0x31d   : > { %3092 = vmatmul.mubr.msk.f32.gmra.mrb[66].mxu1 %vm485_vm0, %v1799_v37 }
 0x31e   : > { %3094 = vmatprep.mubr.msk.f32.mxu1 %vm3633_vm1, %v3634_v28 }
 0x321   : > { %3095 = vmatmul.mubr.msk.f32.gmra.mrb[68].mxu1 %vm485_vm0, %v1801_v15 }
 0x322   : > { %3097 = vmatprep.mubr.msk.f32.mxu1 %vm3633_vm1, %v3634_v28 }
 0x325   : > { %3098 = vmatmul.mubr.msk.f32.gmra.mrb[70].mxu1 %vm485_vm0, %v1803_v18 }
 0x326   : > { %3139 = vmatprep.mubr.msk.f32.mxu1 %vm3633_vm1, %v3634_v28 }
 0x33b   : > { %v4224_v21 = vpop.f32.mrb[0].mxu1 }
 0x33c   : > { %v2850_v51 = vpop.f32.mrb[1].mxu1 }
 0x33f   : > { %v4226_v57 = vpop.f32.mrb[2].mxu1 }
 0x340   : > { %v2853_v43 = vpop.f32.mrb[3].mxu1 }
 0x343   : > { %v4228_v53 = vpop.f32.mrb[4].mxu1 }
 0x344   : > { %v2856_v50 = vpop.f32.mrb[5].mxu1 }
 0x347   : > { %v4230_v55 = vpop.f32.mrb[6].mxu1 }
 0x348   : > { %v2859_v24 = vpop.f32.mrb[7].mxu1 }
 0x34b   : > { %v4232_v58 = vpop.f32.mrb[8].mxu1 }
 0x34c   : > { %v2862_v46 = vpop.f32.mrb[9].mxu1 }
 0x34f   : > { %v4234_v25 = vpop.f32.mrb[10].mxu1 }
 0x350   : > { %v2865_v59 = vpop.f32.mrb[11].mxu1 }
 0x384   : > { %v4241_v30 = vpop.f32.mrb[12].mxu1 }
 0x385   : > { %v2868_v35 = vpop.f32.mrb[13].mxu1 }
 0x388   : > { %v4243_v38 = vpop.f32.mrb[14].mxu1 }
 0x389   : > { %v2871_v16 = vpop.f32.mrb[15].mxu1 }
 0x38c   : > { %v4245_v17 = vpop.f32.mrb[16].mxu1 }
 0x38d   : > { %v2874_v52 = vpop.f32.mrb[17].mxu1 }
 0x390   : > { %v4247_v8 = vpop.f32.mrb[18].mxu1 }
 0x391   : > { %v2895_v10 = vpop.f32.mrb[19].mxu1  ;;  %v1069_v11 = vsel %vm650_vm3, %v4247_v8, -inf }
 0x392   : > { %1070 = vmax.xlane.f32.xlu0 %v1069_v11 }
 0x394   : > { %v4251_v56 = vpop.f32.mrb[20].mxu1 }
 0x395   : > { %v2898_v9 = vpop.f32.mrb[21].mxu1  ;;  %v1072_v14 = vsel %vm650_vm3, %v4251_v56, -inf }
 0x396   : > { %1073 = vmax.xlane.f32.xlu1 %v1072_v14 }
 0x398   : > { %v4255_v19 = vpop.f32.mrb[22].mxu1 }
 0x399   : > { %v2901_v13 = vpop.f32.mrb[23].mxu1  ;;  %v1075_v60 = vsel %vm650_vm3, %v4255_v19, -inf }
 0x39a   : > { %1076 = vmax.xlane.f32.xlu0 %v1075_v60 }
 0x39c   : > { %v4259_v23 = vpop.f32.mrb[24].mxu1 }
 0x39d   : > { %v2904_v20 = vpop.f32.mrb[25].mxu1  ;;  %v1078_v33 = vsel %vm650_vm3, %v4259_v23, -inf }
 0x39e   : > { %1079 = vmax.xlane.f32.xlu0 %v1078_v33 }
 0x3a0   : > { %v4263_v12 = vpop.f32.mrb[26].mxu1 }
 0x3a1   : > { %v1081_v34 = vsel %vm650_vm3, %v4263_v12, -inf  ;;  %v2907_v22 = vpop.f32.mrb[27].mxu1 }
 0x3a2   : > { %1082 = vmax.xlane.f32.xlu0 %v1081_v34 }
 0x3a4   : > { %v4267_v41 = vpop.f32.mrb[28].mxu1 }
 0x3a5   : > { %v1084_v42 = vsel %vm650_vm3, %v4267_v41, -inf  ;;  %v2910_v39 = vpop.f32.mrb[29].mxu1 }
 0x3a6   : > { %1085 = vmax.xlane.f32.xlu1 %v1084_v42 }
 0x3a8   : > { %v4271_v40 = vpop.f32.mrb[30].mxu1 }
 0x3a9   : > { %v1087_v31 = vsel %vm650_vm3, %v4271_v40, -inf  ;;  %v2913_v45 = vpop.f32.mrb[31].mxu1 }
 0x3aa   : > { %1088 = vmax.xlane.f32.xlu0 %v1087_v31 }
 0x3ac   : > { %v4275_v47 = vpop.f32.mrb[32].mxu1 }
 0x3ad   : > { %v1090_v49 = vsel %vm650_vm3, %v4275_v47, -inf  ;;  %v2916_v36 = vpop.f32.mrb[33].mxu1 }
 0x3ae   : > { %1091 = vmax.xlane.f32.xlu1 %v1090_v49 }
 0x3b0   : > { %v4279_v37 = vpop.f32.mrb[34].mxu1 }
 0x3b1   : > { %v1093_v15 = vsel %vm650_vm3, %v4279_v37, -inf  ;;  %v2919_v18 = vpop.f32.mrb[35].mxu1 }
 0x3b2   : > { %1094 = vmax.xlane.f32.xlu0 %v1093_v15 }
 0x3b4   : > { %v4283_v51 = vpop.f32.mrb[36].mxu1 }
 0x3b5   : > { %v1523_v43 = vsel %vm650_vm3, %v4283_v51, -inf  ;;  %v2985_v50 = vpop.f32.mrb[37].mxu1 }
 0x3b6   : > { %1524 = vmax.xlane.f32.xlu1 %v1523_v43 }
 0x3b8   : > { %v4287_v24 = vpop.f32.mrb[38].mxu1 }
 0x3b9   : > { %v1526_v46 = vsel %vm650_vm3, %v4287_v24, -inf  ;;  %v2988_v59 = vpop.f32.mrb[39].mxu1 }
 0x3ba   : > { %1527 = vmax.xlane.f32.xlu0 %v1526_v46 }
 0x3bc   : > { %v4291_v62 = vpop.f32.mrb[40].mxu1 }
 0x3bd   : > { %v1529_v54 = vsel %vm650_vm3, %v4291_v62, -inf  ;;  %v2991_v63 = vpop.f32.mrb[41].mxu1 }
 0x3be   : > { %1530 = vmax.xlane.f32.xlu1 %v1529_v54 }
 0x3c0   : > { %v4295_v2 = vpop.f32.mrb[42].mxu1 }
 0x3c1   : > { %v1532_v4 = vsel %vm650_vm3, %v4295_v2, -inf  ;;  %v2994_v5 = vpop.f32.mrb[43].mxu1 }
 0x3c2   : > { %1533 = vmax.xlane.f32.xlu0 %v1532_v4 }
 0x3c4   : > { %v4299_v44 = vpop.f32.mrb[44].mxu1 }
 0x3c5   : > { %v1535_v1 = vsel %vm650_vm3, %v4299_v44, -inf  ;;  %v2997_v61 = vpop.f32.mrb[45].mxu1 }
 0x3c6   : > { %1536 = vmax.xlane.f32.xlu1 %v1535_v1 }
 0x3c8   : > { %v4303_v48 = vpop.f32.mrb[46].mxu1 }
 0x3c9   : > { %v1538_v3 = vsel %vm650_vm3, %v4303_v48, -inf  ;;  %v3000_v7 = vpop.f32.mrb[47].mxu1 }
 0x3ca   : > { %1539 = vmax.xlane.f32.xlu0 %v1538_v3  ;;  %v4355_v3 = vpop.permute.xlu1 %3405  ;;  %v4357_v7 = vpop.permute.xlu0 %3400 }
 0x3cc   : > { %v4307_v6 = vpop.f32.mrb[48].mxu1 }
 0x3cd   : > { %v1541_v0 = vsel %vm650_vm3, %v4307_v6, -inf  ;;  %v3003_v29 = vpop.f32.mrb[49].mxu1 }
 0x3ce   : > { %1542 = vmax.xlane.f32.xlu1 %v1541_v0  ;;  %v4359_v0 = vpop.permute.xlu1 %3410  ;;  %v4361_v29 = vpop.permute.xlu0 %3415 }
 0x3d0   : > { %v4311_v26 = vpop.f32.mrb[50].mxu1 }
 0x3d1   : > { %v1544_v32 = vsel %vm650_vm3, %v4311_v26, -inf  ;;  %v3006_v35 = vpop.f32.mrb[51].mxu1 }
 0x3d2   : > { %1545 = vmax.xlane.f32.xlu0 %v1544_v32  ;;  %v4363_v32 = vpop.permute.xlu1 %1638 }
 0x3d4   : > { %v4315_v16 = vpop.f32.mrb[52].mxu1 }
 0x3d5   : > { %v1547_v52 = vsel %vm650_vm3, %v4315_v16, -inf  ;;  %v3009_v10 = vpop.f32.mrb[53].mxu1 }
 0x3d6   : > { %1548 = vmax.xlane.f32.xlu1 %v1547_v52 }
 0x3d8   : > { %v4319_v11 = vpop.f32.mrb[54].mxu1 }
 0x3d9   : > { %v1968_v9 = vsel %vm650_vm3, %v4319_v11, -inf  ;;  %v3075_v14 = vpop.f32.mrb[55].mxu1 }
 0x3da   : > { %1969 = vmax.xlane.f32.xlu0 %v1968_v9 }
 0x3dc   : > { %v4323_v13 = vpop.f32.mrb[56].mxu1 }
 0x3dd   : > { %v1971_v60 = vsel %vm650_vm3, %v4323_v13, -inf  ;;  %v3078_v20 = vpop.f32.mrb[57].mxu1 }
 0x3de   : > { %1972 = vmax.xlane.f32.xlu1 %v1971_v60 }
 0x3e0   : > { %v4327_v33 = vpop.f32.mrb[58].mxu1 }
 0x3e1   : > { %v1974_v34 = vsel %vm650_vm3, %v4327_v33, -inf  ;;  %v3081_v22 = vpop.f32.mrb[59].mxu1 }
 0x3e2   : > { %1975 = vmax.xlane.f32.xlu0 %v1974_v34 }
 0x3e4   : > { %v4331_v42 = vpop.f32.mrb[60].mxu1 }
 0x3e5   : > { %v1977_v39 = vsel %vm650_vm3, %v4331_v42, -inf  ;;  %v3084_v31 = vpop.f32.mrb[61].mxu1 }
 0x3e6   : > { %1978 = vmax.xlane.f32.xlu1 %v1977_v39 }
 0x3e8   : > { %v4335_v45 = vpop.f32.mrb[62].mxu1 }
 0x3e9   : > { %v1980_v49 = vsel %vm650_vm3, %v4335_v45, -inf  ;;  %v3087_v36 = vpop.f32.mrb[63].mxu1 }
 0x3ea   : > { %1981 = vmax.xlane.f32.xlu1 %v1980_v49 }
 0x3ec   : > { %v4339_v15 = vpop.f32.mrb[64].mxu1 }
 0x3ed   : > { %v1983_v18 = vsel %vm650_vm3, %v4339_v15, -inf  ;;  %v3090_v43 = vpop.f32.mrb[65].mxu1 }
 0x3ee   : > { %1984 = vmax.xlane.f32.xlu1 %v1983_v18 }
 0x3f0   : > { %v4343_v50 = vpop.f32.mrb[66].mxu1 }
 0x3f1   : > { %v1986_v46 = vsel %vm650_vm3, %v4343_v50, -inf  ;;  %v3093_v59 = vpop.f32.mrb[67].mxu1 }
 0x3f2   : > { %1987 = vmax.xlane.f32.xlu1 %v1986_v46 }
 0x3f4   : > { %v4347_v54 = vpop.f32.mrb[68].mxu1 }
 0x3f5   : > { %v1989_v63 = vsel %vm650_vm3, %v4347_v54, -inf  ;;  %v3096_v4 = vpop.f32.mrb[69].mxu1 }
 0x3f6   : > { %1990 = vmax.xlane.f32.xlu0 %v1989_v63 }
 0x3f8   : > { %v4351_v5 = vpop.f32.mrb[70].mxu1 }
 0x3f9   : > { %v1992_v1 = vsel %vm650_vm3, %v4351_v5, -inf  ;;  %v3099_v61 = vpop.f32.mrb[71].mxu1 }
 0x3fa   : > { %1993 = vmax.xlane.f32.xlu1 %v1992_v1  ;;  %v3583_v61 = vld [vmem:[%s3883_s27 + $0x10] sm:$0xff] }
 0x41f   : > { %v1071_v35 = vpop.xlane.xlu0 %1070 }
 0x420   : > { %v1096_v52 = vsub.f32 %v4247_v8, %v1071_v35  ;;  %v3584_v35 = vld [vmem:[%s3883_s27 + $0x18] sm:$0xff] }
 0x422   : > { %v1105_v10 = vmul.f32 1.442695, %v1096_v52  ;;  %v3424_v52 = vpack.i.bf16 %v3584_v35, %v3583_v61 }
 0x423   : > { %v1074_v9 = vpop.xlane.xlu1 %1073 }
 0x424   : > { %3475 = vpow2.f32 %v1105_v10  ;;  %v1097_v14 = vsub.f32 %v4251_v56, %v1074_v9  ;;  %v3585_v10 = vld [vmem:[%s3883_s27] sm:$0xff]  ;;  %v3586_v9 = vld [vmem:[%s3883_s27 + $0x8] sm:$0xff] }
 0x426   : > { %v1107_v60 = vmul.f32 1.442695, %v1097_v14  ;;  %v3419_v14 = vpack.i.bf16 %v3586_v9, %v3585_v10 }
 0x427   : > { %v1077_v20 = vpop.xlane.xlu0 %1076 }
 0x428   : > { %3477 = vpow2.f32 %v1107_v60  ;;  %v1098_v34 = vsub.f32 %v4255_v19, %v1077_v20 }
 0x42a   : > { %v1109_v22 = vmul.f32 1.442695, %v1098_v34 }
 0x42b   : > { %v1080_v39 = vpop.xlane.xlu0 %1079 }
 0x42c   : > { %3479 = vpow2.f32 %v1109_v22  ;;  %v1099_v31 = vsub.f32 %v4259_v23, %v1080_v39 }
 0x42e   : > { %v4369_v49 = vpop.eup %3475  ;;  %v1111_v36 = vmul.f32 1.442695, %v1099_v31 }
 0x42f   : > { %v1083_v18 = vpop.xlane.xlu0 %1082  ;;  %v1123_v8 = vsel %vm650_vm3, %v4369_v49, 0.0 }
 0x430   : > { %3481 = vpow2.f32 %v1111_v36  ;;  %v1100_v56 = vsub.f32 %v4263_v12, %v1083_v18  ;;  %1124 = vadd.xlane.f32.xlu0 %v1123_v8 }
 0x432   : > { %v4374_v43 = vpop.eup %3477  ;;  %v1113_v19 = vmul.f32 1.442695, %v1100_v56 }
 0x433   : > { %v1126_v46 = vsel %vm650_vm3, %v4374_v43, 0.0  ;;  %v1086_v60 = vpop.xlane.xlu1 %1085 }
 0x434   : > { %3483 = vpow2.f32 %v1113_v19  ;;  %1127 = vadd.xlane.f32.xlu0 %v1126_v46  ;;  %v1101_v20 = vsub.f32 %v4267_v41, %v1086_v60 }
 0x436   : > { %v4378_v23 = vpop.eup %3479  ;;  %v1115_v31 = vmul.f32 1.442695, %v1101_v20 }
 0x437   : > { %v1129_v59 = vsel %vm650_vm3, %v4378_v23, 0.0  ;;  %v1089_v34 = vpop.xlane.xlu0 %1088 }
 0x438   : > { %1130 = vadd.xlane.f32.xlu1 %v1129_v59  ;;  %v1102_v39 = vsub.f32 %v4271_v40, %v1089_v34  ;;  %3485 = vpow2.f32 %v1115_v31 }
 0x43a   : > { %v4382_v12 = vpop.eup %3481  ;;  %v1117_v56 = vmul.f32 1.442695, %v1102_v39 }
 0x43b   : > { %v1132_v63 = vsel %vm650_vm3, %v4382_v12, 0.0  ;;  %v1092_v22 = vpop.xlane.xlu1 %1091 }
 0x43c   : > { %1133 = vadd.xlane.f32.xlu1 %v1132_v63  ;;  %v1103_v36 = vsub.f32 %v4275_v47, %v1092_v22  ;;  %3487 = vpow2.f32 %v1117_v56 }
 0x43e   : > { %v4386_v4 = vpop.eup %3483  ;;  %v1119_v19 = vmul.f32 1.442695, %v1103_v36 }
 0x43f   : > { %v1135_v1 = vsel %vm650_vm3, %v4386_v4, 0.0  ;;  %v4399_v18 = vpop.xlane.xlu0 %1094 }
 0x440   : > { %1136 = vadd.xlane.f32.xlu0 %v1135_v1  ;;  %3489 = vpow2.f32 %v1119_v19 }
 0x442   : > { %v4408_v10 = vpop.eup %3485 }
 0x443   : > { %v1525_v8 = vpop.xlane.xlu1 %1524  ;;  %v1138_v20 = vsel %vm650_vm3, %v4408_v10, 0.0 }
 0x444   : > { %v1550_v46 = vsub.f32 %v4283_v51, %v1525_v8 }
 0x446   : > { %v1559_v41 = vmul.f32 1.442695, %v1550_v46  ;;  %v4413_v60 = vpop.eup %3487 }
 0x447   : > { %v1528_v59 = vpop.xlane.xlu0 %1527 }
 0x448   : > { %v1551_v1 = vsub.f32 %v4287_v24, %v1528_v59  ;;  %3491 = vpow2.f32 %v1559_v41 }
 0x44a   : > { %v1561_v47 = vmul.f32 1.442695, %v1551_v1  ;;  %v4417_v34 = vpop.eup %3489 }
 0x44b   : > { %v1531_v63 = vpop.xlane.xlu1 %1530  ;;  %v1144_v36 = vsel %vm650_vm3, %v4417_v34, 0.0 }
 0x44c   : > { %v1552_v35 = vsub.f32 %v4291_v62, %v1531_v63  ;;  %3493 = vpow2.f32 %v1561_v47 }
 0x44d   : > { %3425 = vrot.lane.b32.xlu1 %v3424_v52, %s3637_s29 }
 0x44e   : > { %v1563_v51 = vmul.f32 1.442695, %v1552_v35 }
 0x44f   : > { %v4403_v61 = vpop.xlane.xlu0 %1533 }
 0x450   : > { %3495 = vpow2.f32 %v1563_v51 }
 0x452   : > { %v4426_v8 = vpop.eup %3491 }
 0x453   : > { %v1537_v40 = vpop.xlane.xlu1 %1536  ;;  %v1577_v59 = vsel %vm650_vm3, %v4426_v8, 0.0 }
 0x456   : > { %3420 = vrot.lane.b32.xlu0 %v3419_v14, %s3637_s29  ;;  %v1554_v14 = vsub.f32 %v4299_v44, %v1537_v40  ;;  %v1141_v44 = vsel %vm650_vm3, %v4413_v60, 0.0 }
 0x457   : > { %v4406_v52 = vpop.xlane.xlu0 %1539 }
 0x458   : > { %v1567_v22 = vmul.f32 1.442695, %v1554_v14 }
 0x45a   : > { %3497 = vpow2.f32 %v1567_v22  ;;  %v3587_v22 = vld [vmem:[%s3883_s27 + $0x20] sm:$0xff] }
 0x45b   : > { %v4410_v9 = vpop.xlane.xlu1 %1542 }
 0x45f   : > { %v1546_v24 = vpop.xlane.xlu0 %1545 }
 0x460   : > { %v1557_v39 = vsub.f32 %v4311_v26, %v1546_v24  ;;  %v4431_v26 = vpop.eup %3493 }
 0x461   : > { %v1580_v47 = vsel %vm650_vm3, %v4431_v26, 0.0  ;;  %v4438_v35 = vpop.eup %3495 }
 0x462   : > { %v1573_v19 = vmul.f32 1.442695, %v1557_v39  ;;  %v1583_v24 = vsel %vm650_vm3, %v4438_v35, 0.0 }
 0x463   : > { %v4419_v62 = vpop.xlane.xlu1 %1548 }
 0x464   : > { %3499 = vpow2.f32 %v1573_v19 }
 0x467   : > { %v1970_v31 = vpop.xlane.xlu0 %1969 }
 0x468   : > { %v1995_v46 = vsub.f32 %v4319_v11, %v1970_v31 }
 0x46a   : > { %v2004_v41 = vmul.f32 1.442695, %v1995_v46 }
 0x46b   : > { %v1973_v56 = vpop.xlane.xlu1 %1972 }
 0x46c   : > { %v1996_v1 = vsub.f32 %v4323_v13, %v1973_v56  ;;  %3501 = vpow2.f32 %v2004_v41  ;;  %v3588_v13 = vld [vmem:[%s3883_s27 + $0x28] sm:$0xff] }
 0x46d   : > { %v3429_v39 = vpack.i.bf16 %v3588_v13, %v3587_v22  ;;  %v1553_v22 = vsub.f32 %v4295_v2, %v4403_v61  ;;  %v1556_v2 = vsub.f32 %v4307_v6, %v4410_v9 }
 0x46e   : > { %v2006_v11 = vmul.f32 1.442695, %v1996_v1 }
 0x46f   : > { %v1976_v40 = vpop.xlane.xlu0 %1975  ;;  %v1571_v61 = vmul.f32 1.442695, %v1556_v2 }
 0x470   : > { %v1997_v51 = vsub.f32 %v4327_v33, %v1976_v40  ;;  %3503 = vpow2.f32 %v2006_v11 }
 0x471   : > { %1139 = vadd.xlane.f32.xlu1 %v1138_v20  ;;  %v4443_v20 = vpop.eup %3497 }
 0x472   : > { %v2008_v31 = vmul.f32 1.442695, %v1997_v51  ;;  %v1589_v56 = vsel %vm650_vm3, %v4443_v20, 0.0  ;;  %v4450_v19 = vpop.eup %3499 }
 0x473   : > { %v4433_v63 = vpop.xlane.xlu1 %1978 }
 0x474   : > { %3505 = vpow2.f32 %v2008_v31  ;;  %v1565_v31 = vmul.f32 1.442695, %v1553_v22 }
 0x475   : > { %1145 = vadd.xlane.f32.xlu0 %v1144_v36  ;;  %1142 = vadd.xlane.f32.xlu1 %v1141_v44 }
 0x476   : > { %v4456_v41 = vpop.eup %3501 }
 0x477   : > { %v1982_v14 = vpop.xlane.xlu1 %1981  ;;  %v2022_v1 = vsel %vm650_vm3, %v4456_v41, 0.0 }
 0x478   : > { %v1999_v36 = vsub.f32 %v4335_v45, %v1982_v14 }
 0x479   : > { %1578 = vadd.xlane.f32.xlu0 %v1577_v59  ;;  %v1598_v59 = vsel %vm650_vm3, %v4450_v19, 0.0 }
 0x47a   : > { %v2012_v33 = vmul.f32 1.442695, %v1999_v36  ;;  %v4460_v40 = vpop.eup %3503 }
 0x47c   : > { %3507 = vpow2.f32 %v2012_v33  ;;  %v1985_v33 = vpop.xlane.xlu1 %1984 }
 0x47d   : > { %1581 = vadd.xlane.f32.xlu0 %v1580_v47  ;;  %v2025_v47 = vsel %vm650_vm3, %v4460_v40, 0.0 }
 0x47e   : > { %v4464_v11 = vpop.eup %3505 }
 0x47f   : > { %v2028_v51 = vsel %vm650_vm3, %v4464_v11, 0.0 }
 0x480   : > { %v1988_v9 = vpop.xlane.xlu1 %1987 }
 0x481   : > { %1584 = vadd.xlane.f32.xlu0 %v1583_v24 }
 0x483   : > { %v1991_v44 = vpop.xlane.xlu0 %1990 }
 0x484   : > { %v2002_v46 = vsub.f32 %v4347_v54, %v1991_v44  ;;  %v1104_v54 = vsub.f32 %v4279_v37, %v4399_v18  ;;  %v1555_v37 = vsub.f32 %v4303_v48, %v4406_v52  ;;  %v1558_v44 = vsub.f32 %v4315_v16, %v4419_v62 }
 0x485   : > { %1590 = vadd.xlane.f32.xlu0 %v1589_v56  ;;  %v1998_v52 = vsub.f32 %v4331_v42, %v4433_v63  ;;  %v2000_v16 = vsub.f32 %v4339_v15, %v1985_v33 }
 0x486   : > { %3430 = vrot.lane.b32.xlu1 %v3429_v39, %s3637_s29  ;;  %v2018_v45 = vmul.f32 1.442695, %v2002_v46  ;;  %v4470_v14 = vpop.eup %3507  ;;  %v1121_v24 = vmul.f32 1.442695, %v1104_v54  ;;  %v1569_v36 = vmul.f32 1.442695, %v1555_v37  ;;  %v2001_v54 = vsub.f32 %v4343_v50, %v1988_v9 }
 0x487   : > { %v2034_v13 = vsel %vm650_vm3, %v4470_v14, 0.0  ;;  %v1575_v48 = vmul.f32 1.442695, %v1558_v44  ;;  %v2010_v6 = vmul.f32 1.442695, %v1998_v52  ;;  %v3402_v9 = vunpack.i.l.bf16 %v4357_v7 }
 0x488   : > { %3509 = vpow2.f32 %v2018_v45  ;;  %v2014_v63 = vmul.f32 1.442695, %v2000_v16  ;;  %v2016_v15 = vmul.f32 1.442695, %v2001_v54  ;;  %v3403_v16 = vunpack.i.h.bf16 %v4357_v7 }
 0x489   : > { %1599 = vadd.xlane.f32.xlu0 %v1598_v59  ;;  %3511 = vpow2.f32 %v1121_v24  ;;  %v3408_v54 = vunpack.i.h.bf16 %v4355_v3 }
 0x48a   : > { %3513 = vpow2.f32 %v1565_v31 }
 0x48b   : > { %3515 = vpow2.f32 %v1569_v36 }
 0x48c   : > { %3517 = vpow2.f32 %v1571_v61 }
 0x48d   : > { %2023 = vadd.xlane.f32.xlu0 %v2022_v1  ;;  %3519 = vpow2.f32 %v1575_v48  ;;  %v3589_v1 = vld [vmem:[%s3883_s27 + $0x30] sm:$0xff] }
 0x48e   : > { %3521 = vpow2.f32 %v2010_v6 }
 0x48f   : > { %3523 = vpow2.f32 %v2014_v63  ;;  %v3218_v63 = vpack.c.bf16 %v3403_v16, %v3402_v9 }
 0x490   : > { %3525 = vpow2.f32 %v2016_v15 }
 0x491   : > { %2026 = vadd.xlane.f32.xlu0 %v2025_v47  ;;  %v3590_v47 = vld [vmem:[%s3883_s27 + $0x38] sm:$0xff] }
 0x492   : > { %v4476_v39 = vpop.eup %3509  ;;  %v3434_v42 = vpack.i.bf16 %v3590_v47, %v3589_v1 }
 0x493   : > { %v2043_v18 = vsel %vm650_vm3, %v4476_v39, 0.0  ;;  %v4486_v56 = vpop.eup %3511 }
 0x494   : > { %v1147_v46 = vsel %vm650_vm3, %v4486_v56, 0.0  ;;  %v4492_v59 = vpop.eup %3513 }
 0x495   : > { %2029 = vadd.xlane.f32.xlu0 %v2028_v51  ;;  %v1586_v62 = vsel %vm650_vm3, %v4492_v59, 0.0  ;;  %v4497_v45 = vpop.eup %3515  ;;  %v1994_v51 = vpop.xlane.xlu1 %1993 }
 0x496   : > { %v1592_v24 = vsel %vm650_vm3, %v4497_v45, 0.0  ;;  %v4504_v22 = vpop.eup %3517 }
 0x497   : > { %v1595_v31 = vsel %vm650_vm3, %v4504_v22, 0.0  ;;  %v4510_v37 = vpop.eup %3519 }
 0x498   : > { %v4514_v36 = vpop.eup %3521 }
 0x499   : > { %2035 = vadd.xlane.f32.xlu0 %v2034_v13  ;;  %v2003_v13 = vsub.f32 %v4351_v5, %v1994_v51  ;;  %v2031_v61 = vsel %vm650_vm3, %v4514_v36, 0.0  ;;  %v4518_v5 = vpop.eup %3523  ;;  %v3407_v51 = vunpack.i.l.bf16 %v4355_v3 }
 0x49a   : > { %v2037_v33 = vsel %vm650_vm3, %v4518_v5, 0.0  ;;  %v4522_v48 = vpop.eup %3525 }
 0x49b   : > { %v2020_v50 = vmul.f32 1.442695, %v2003_v13  ;;  %v3221_v15 = vpack.c.bf16 %v3408_v54, %v3407_v51  ;;  %v3413_v13 = vunpack.i.h.bf16 %v4359_v0 }
 0x49d   : > { %2044 = vadd.xlane.f32.xlu0 %v2043_v18  ;;  %v1601_v18 = vsel %vm650_vm3, %v4510_v37, 0.0  ;;  %3527 = vpow2.f32 %v2020_v50  ;;  %v3418_v50 = vunpack.i.h.bf16 %v4361_v29 }
 0x4a7   : > { %v4526_v6 = vpop.eup %3527 }
 0x4aa   : > { %1148 = vadd.xlane.f32.xlu1 %v1147_v46  ;;  %v2040_v46 = vsel %vm650_vm3, %v4522_v48, 0.0 }
 0x4ae   : > { %1587 = vadd.xlane.f32.xlu1 %v1586_v62 }
 0x4b2   : > { %1593 = vadd.xlane.f32.xlu1 %v1592_v24 }
 0x4b3   : > { %3435 = vrot.lane.b32.xlu0 %v3434_v42, %s3637_s29  ;;  %v2046_v42 = vsel %vm650_vm3, %v4526_v6, 0.0 }
 0x4b6   : > { %1596 = vadd.xlane.f32.xlu1 %v1595_v31  ;;  %v3412_v31 = vunpack.i.l.bf16 %v4359_v0 }
 0x4ba   : > { %1602 = vadd.xlane.f32.xlu1 %v1601_v18 }
 0x4bd   : > { %v1125_v2 = vpop.xlane.xlu0 %1124 }
 0x4be   : > { %3529 = vrcp.f32 %v1125_v2  ;;  %2032 = vadd.xlane.f32.xlu1 %v2031_v61  ;;  %v3417_v61 = vunpack.i.l.bf16 %v4361_v29 }
 0x4c0   : > { %v3227_v29 = vpack.c.bf16 %v3418_v50, %v3417_v61 }
 0x4c1   : > { %v1128_v44 = vpop.xlane.xlu0 %1127 }
 0x4c2   : > { %3531 = vrcp.f32 %v1128_v44  ;;  %2038 = vadd.xlane.f32.xlu1 %v2037_v33  ;;  %v3224_v44 = vpack.c.bf16 %v3413_v13, %v3412_v31 }
 0x4c5   : > { %v1131_v52 = vpop.xlane.xlu1 %1130 }
 0x4c6   : > { %3533 = vrcp.f32 %v1131_v52  ;;  %2041 = vadd.xlane.f32.xlu1 %v2040_v46 }
 0x4c8   : > { %v3530_v62 = vpop.eup %3529 }
 0x4c9   : > { %v1159_v1 = vmul.f32 %v3530_v62, %v4369_v49  ;;  %v1134_v47 = vpop.xlane.xlu1 %1133 }
 0x4ca   : > { %3535 = vrcp.f32 %v1134_v47  ;;  %2047 = vadd.xlane.f32.xlu1 %v2046_v42 }
 0x4cb   : > { %2939 = vmatmul.mubr.msk.f32.vlgmr.msra.gmra.mrb[18].mxu0 %vm650_vm3, %v1159_v1 }
 0x4cc   : > { %v3532_v24 = vpop.eup %3531  ;;  %3219 = vmatpush3.bf16.msra.mxu0 %v3218_v63  ;;  %2941 = vmatprep.mubr.msk.f32.mxu0 %vm3633_vm1, %v3634_v28 }
 0x4cd   : > { %v1137_v7 = vpop.xlane.xlu0 %1136  ;;  %3220 = vmatprep.subr.bf16.mxu0 %v3632_v27  ;;  %v1160_v49 = vmul.f32 %v3532_v24, %v4374_v43  ;;  %v3426_v18 = vpop.permute.xlu1 %3425 }
 0x4ce   : > { %3537 = vrcp.f32 %v1137_v7  ;;  %v3428_v46 = vunpack.i.h.bf16 %v3426_v18  ;;  %v3427_v16 = vunpack.i.l.bf16 %v3426_v18 }
 0x4cf   : > { %2942 = vmatmul.mubr.msk.f32.gmra.mrb[20].mxu0 %vm650_vm3, %v1160_v49 }
 0x4d0   : > { %v3534_v3 = vpop.eup %3533  ;;  %3222 = vmatpush3.bf16.msra.mxu0 %v3221_v15  ;;  %2944 = vmatprep.mubr.msk.f32.mxu0 %vm3633_vm1, %v3634_v28  ;;  %v4559_v1 = vpack.c.bf16 %v3428_v46, %v3427_v16 }
 0x4d1   : > { %v3421_v2 = vpop.permute.xlu0 %3420  ;;  %3223 = vmatprep.subr.bf16.mxu0 %v3632_v27  ;;  %v1161_v43 = vmul.f32 %v3534_v3, %v4378_v23 }
 0x4d2   : > { %v3423_v0 = vunpack.i.h.bf16 %v3421_v2  ;;  %v3422_v33 = vunpack.i.l.bf16 %v3421_v2 }
 0x4d3   : > { %2945 = vmatmul.mubr.msk.f32.gmra.mrb[22].mxu0 %vm650_vm3, %v1161_v43 }
 0x4d4   : > { %v3536_v52 = vpop.eup %3535  ;;  %v4550_v9 = vpack.c.bf16 %v3423_v0, %v3422_v33  ;;  %3225 = vmatpush3.bf16.msra.mxu0 %v3224_v44  ;;  %2947 = vmatprep.mubr.msk.f32.mxu0 %vm3633_vm1, %v3634_v28 }
 0x4d5   : > { %3226 = vmatprep.subr.bf16.mxu0 %v3632_v27  ;;  %v1162_v23 = vmul.f32 %v3536_v52, %v4382_v12  ;;  %v3591_v12 = vld [vmem:[%s3883_s27 + $0x40] sm:$0xff] }
 0x4d6   : > { %3262 = vmatpush3.bf16.msra.mxu1 %v4550_v9 }
 0x4d7   : > { %2948 = vmatmul.mubr.msk.f32.gmra.mrb[24].mxu0 %vm650_vm3, %v1162_v23  ;;  %3258 = vmatprep.subr.bf16.mxu1 %v3632_v27 }
 0x4d8   : > { %v3538_v62 = vpop.eup %3537  ;;  %3228 = vmatpush3.bf16.msra.mxu0 %v3227_v29  ;;  %2950 = vmatprep.mubr.msk.f32.mxu0 %vm3633_vm1, %v3634_v28 }
 0x4d9   : > { %3026 = vmatprep.subr.mxu0 %v3634_v28  ;;  %v1163_v47 = vmul.f32 %v3538_v62, %v4386_v4 }
 0x4da   : > { %3263 = vmatpush3.bf16.msra.mxu1 %v4559_v1 }
 0x4db   : > { %2951 = vmatmul.mubr.msk.f32.gmra.mrb[26].mxu0 %vm650_vm3, %v1163_v47  ;;  %2083 = vrot.lane.b32.xlu1 %v3591_v12, %s3637_s29 }
 0x4dc   : > { %3027 = vmatpush3.msra.mxu0 %v4363_v32  ;;  %3259 = vmatprep.subr.bf16.mxu1 %v3632_v27 }
 0x4dd   : > { %2953 = vmatprep.mubr.msk.f32.mxu0 %vm3633_vm1, %v3634_v28  ;;  %3245 = vmatprep.subr.bf16.mxu0 %v3632_v27 }
 0x4fe   : > { %v1140_v42 = vpop.xlane.xlu1 %1139 }
 0x4ff   : > { %3539 = vrcp.f32 %v1140_v42 }
 0x502   : > { %v1146_v63 = vpop.xlane.xlu0 %1145  ;;  %v1143_v4 = vpop.xlane.xlu1 %1142 }
 0x503   : > { %3541 = vrcp.f32 %v1143_v4 }
 0x504   : > { %3543 = vrcp.f32 %v1146_v63 }
 0x506   : > { %v1579_v54 = vpop.xlane.xlu0 %1578  ;;  %v3431_v51 = vpop.permute.xlu1 %3430 }
 0x507   : > { %v3433_v24 = vunpack.i.h.bf16 %v3431_v51  ;;  %v3432_v7 = vunpack.i.l.bf16 %v3431_v51 }
 0x509   : > { %v3540_v49 = vpop.eup %3539  ;;  %v4574_v15 = vpack.c.bf16 %v3433_v24, %v3432_v7 }
 0x50a   : > { %v1582_v32 = vpop.xlane.xlu0 %1581  ;;  %v1164_v13 = vmul.f32 %v3540_v49, %v4408_v10 }
 0x50b   : > { %3264 = vmatpush3.bf16.msra.mxu1 %v4574_v15 }
 0x50c   : > { %2954 = vmatmul.mubr.msk.f32.gmra.mrb[28].mxu0 %vm650_vm3, %v1164_v13  ;;  %3260 = vmatprep.subr.bf16.mxu1 %v3632_v27 }
 0x50d   : > { %2956 = vmatprep.mubr.msk.f32.mxu0 %vm3633_vm1, %v3634_v28  ;;  %v3542_v31 = vpop.eup %3541 }
 0x50e   : > { %v1585_v3 = vpop.xlane.xlu0 %1584  ;;  %v1165_v50 = vmul.f32 %v3542_v31, %v4413_v60  ;;  %v3544_v18 = vpop.eup %3543 }
 0x50f   : > { %v1166_v10 = vmul.f32 %v3544_v18, %v4417_v34 }
 0x510   : > { %2957 = vmatmul.mubr.msk.f32.gmra.mrb[30].mxu0 %vm650_vm3, %v1165_v50 }
 0x511   : > { %2959 = vmatprep.mubr.msk.f32.mxu0 %vm3633_vm1, %v3634_v28 }
 0x512   : > { %v1591_v2 = vpop.xlane.xlu0 %1590 }
 0x514   : > { %2960 = vmatmul.mubr.msk.f32.gmra.mrb[32].mxu0 %vm650_vm3, %v1166_v10 }
 0x515   : > { %2962 = vmatprep.mubr.msk.f32.mxu0 %vm3633_vm1, %v3634_v28 }
 0x516   : > { %v1600_v43 = vpop.xlane.xlu0 %1599 }
 0x51a   : > { %v4590_v61 = vpop.xlane.xlu0 %2023 }
 0x51e   : > { %v4592_v44 = vpop.xlane.xlu0 %2026 }
 0x522   : > { %v4594_v60 = vpop.xlane.xlu0 %2029 }
 0x526   : > { %v4596_v0 = vpop.xlane.xlu0 %2035 }
 0x52a   : > { %v2045_v33 = vpop.xlane.xlu0 %2044 }
 0x52e   : > { %v3436_v52 = vpop.permute.xlu0 %3435 }
 0x52f   : > { %v3438_v46 = vunpack.i.h.bf16 %v3436_v52  ;;  %v3437_v16 = vunpack.i.l.bf16 %v3436_v52 }
 0x531   : > { %v3255_v23 = vpack.c.bf16 %v3438_v46, %v3437_v16 }
 0x533   : > { %3265 = vmatpush3.bf16.msra.mxu1 %v3255_v23 }
 0x534   : > { %3261 = vmatprep.subr.mxu1 %v3634_v28 }
 0x537   : > { %v1149_v34 = vpop.xlane.xlu1 %1148 }
 0x538   : > { %3545 = vrcp.f32 %v1149_v34 }
 0x539   : > { %3547 = vrcp.f32 %v1579_v54 }
 0x53a   : > { %3549 = vrcp.f32 %v1582_v32 }
 0x53b   : > { %v1588_v29 = vpop.xlane.xlu1 %1587  ;;  %3551 = vrcp.f32 %v1585_v3 }
 0x53c   : > { %3553 = vrcp.f32 %v1588_v29 }
 0x53d   : > { %3555 = vrcp.f32 %v1591_v2 }
 0x53e   : > { %3557 = vrcp.f32 %v2045_v33 }
 0x53f   : > { %v1594_v62 = vpop.xlane.xlu1 %1593 }
 0x540   : > { %3559 = vrcp.f32 %v1594_v62 }
 0x542   : > { %v3546_v47 = vpop.eup %3545 }
 0x543   : > { %v1597_v12 = vpop.xlane.xlu1 %1596  ;;  %v1167_v42 = vmul.f32 %v3546_v47, %v4486_v56  ;;  %v3548_v63 = vpop.eup %3547 }
 0x544   : > { %v1613_v4 = vmul.f32 %v3548_v63, %v4426_v8  ;;  %v3550_v24 = vpop.eup %3549  ;;  %3561 = vrcp.f32 %v1597_v12 }
 0x545   : > { %2963 = vmatmul.mubr.msk.f32.gmra.mrb[34].mxu0 %vm650_vm3, %v1167_v42  ;;  %v1614_v54 = vmul.f32 %v3550_v24, %v4431_v26  ;;  %v3552_v7 = vpop.eup %3551  ;;  %3563 = vrcp.f32 %v1600_v43 }
 0x546   : > { %3028 = vmatprep.mubr.msk.f32.mxu0 %vm3633_vm1, %v3634_v28  ;;  %v3554_v49 = vpop.eup %3553 }
 0x547   : > { %v1603_v51 = vpop.xlane.xlu1 %1602  ;;  %v3556_v32 = vpop.eup %3555 }
 0x549   : > { %3029 = vmatmul.mubr.msk.f32.vlgmr.msra.gmra.mrb[36].mxu0 %vm650_vm3, %v1613_v4 }
 0x54a   : > { %3247 = vmatpush3.bf16.msra.mxu0 %v4550_v9  ;;  %3031 = vmatprep.mubr.msk.f32.mxu0 %vm3633_vm1, %v3634_v28  ;;  %v1615_v9 = vmul.f32 %v3552_v7, %v4438_v35  ;;  %v3558_v35 = vpop.eup %3557 }
 0x54b   : > { %v2033_v56 = vpop.xlane.xlu1 %2032  ;;  %3248 = vmatprep.subr.bf16.mxu0 %v3632_v27  ;;  %v3560_v31 = vpop.eup %3559 }
 0x54c   : > { %v1618_v3 = vmul.f32 %v3560_v31, %v4497_v45 }
 0x54d   : > { %3032 = vmatmul.mubr.msk.f32.gmra.mrb[38].mxu0 %vm650_vm3, %v1614_v54 }
 0x54e   : > { %3250 = vmatpush3.bf16.msra.mxu0 %v4559_v1  ;;  %3034 = vmatprep.mubr.msk.f32.mxu0 %vm3633_vm1, %v3634_v28  ;;  %v1616_v1 = vmul.f32 %v3554_v49, %v4492_v59  ;;  %v3562_v50 = vpop.eup %3561 }
 0x54f   : > { %v2039_v8 = vpop.xlane.xlu1 %2038  ;;  %3251 = vmatprep.subr.bf16.mxu0 %v3632_v27 }
 0x551   : > { %3035 = vmatmul.mubr.msk.f32.gmra.mrb[40].mxu0 %vm650_vm3, %v1615_v9 }
 0x552   : > { %3253 = vmatpush3.bf16.msra.mxu0 %v4574_v15  ;;  %3037 = vmatprep.mubr.msk.f32.mxu0 %vm3633_vm1, %v3634_v28  ;;  %v1617_v15 = vmul.f32 %v3556_v32, %v4443_v20  ;;  %v1619_v20 = vmul.f32 %v3562_v50, %v4504_v22 }
 0x553   : > { %v2042_v26 = vpop.xlane.xlu1 %2041  ;;  %3254 = vmatprep.subr.bf16.mxu0 %v3632_v27  ;;  %v2065_v27 = vmul.f32 %v3558_v35, %v4476_v39  ;;  %v3564_v39 = vpop.eup %3563 }
 0x554   : > { %v1620_v18 = vmul.f32 %v3564_v39, %v4450_v19 }
 0x555   : > { %3038 = vmatmul.mubr.msk.f32.gmra.mrb[42].mxu0 %vm650_vm3, %v1616_v1 }
 0x556   : > { %3040 = vmatprep.mubr.msk.f32.mxu0 %vm3633_vm1, %v3634_v28  ;;  %3256 = vmatpush3.bf16.msra.mxu0 %v3255_v23 }
 0x557   : > { %v2048_v13 = vpop.xlane.xlu1 %2047  ;;  %3116 = vmatprep.subr.mxu0 %v3634_v28 }
 0x558   : > { %3565 = vrcp.f32 %v2048_v13 }
 0x559   : > { %3041 = vmatmul.mubr.msk.f32.gmra.mrb[44].mxu0 %vm650_vm3, %v1617_v15  ;;  %3567 = vrcp.f32 %v1603_v51 }
 0x55a   : > { %3043 = vmatprep.mubr.msk.f32.mxu0 %vm3633_vm1, %v3634_v28  ;;  %3569 = vrcp.f32 %v4590_v61 }
 0x55b   : > { %v2084_v59 = vpop.permute.xlu1 %2083  ;;  %3571 = vrcp.f32 %v4592_v44 }
 0x55c   : > { %3266 = vmatpush3.msra.mxu1 %v2084_v59  ;;  %3117 = vmatpush3.msra.mxu0 %v2084_v59  ;;  %3573 = vrcp.f32 %v4594_v60 }
 0x55d   : > { %3044 = vmatmul.mubr.msk.f32.gmra.mrb[46].mxu0 %vm650_vm3, %v1618_v3  ;;  %3140 = vmatmul.mubr.msk.f32.vlgmr.msra.gmra.mrb[72].mxu1 %vm650_vm3, %v2065_v27  ;;  %3575 = vrcp.f32 %v2033_v56 }
 0x55e   : > { %3046 = vmatprep.mubr.msk.f32.mxu0 %vm3633_vm1, %v3634_v28  ;;  %3142 = vmatprep.mubr.msk.f32.mxu1 %vm3633_vm1, %v3634_v28  ;;  %3577 = vrcp.f32 %v4596_v0 }
 0x55f   : > { %3579 = vrcp.f32 %v2039_v8 }
 0x560   : > { %3581 = vrcp.f32 %v2042_v26 }
 0x561   : > { %3047 = vmatmul.mubr.msk.f32.gmra.mrb[48].mxu0 %vm650_vm3, %v1619_v20 }
 0x562   : > { %v3566_v45 = vpop.eup %3565  ;;  %3049 = vmatprep.mubr.msk.f32.mxu0 %vm3633_vm1, %v3634_v28 }
 0x563   : > { %v2066_v2 = vmul.f32 %v3566_v45, %v4526_v6  ;;  %v3568_v10 = vpop.eup %3567 }
 0x564   : > { %v1621_v22 = vmul.f32 %v3568_v10, %v4510_v37  ;;  %v3570_v43 = vpop.eup %3569 }
 0x565   : > { %3050 = vmatmul.mubr.msk.f32.gmra.mrb[50].mxu0 %vm650_vm3, %v1620_v18  ;;  %3143 = vmatmul.mubr.msk.f32.gmra.mrb[74].mxu1 %vm650_vm3, %v2066_v2  ;;  %v2058_v19 = vmul.f32 %v3570_v43, %v4456_v41  ;;  %v3572_v6 = vpop.eup %3571 }
 0x566   : > { %3052 = vmatprep.mubr.msk.f32.mxu0 %vm3633_vm1, %v3634_v28  ;;  %v2059_v61 = vmul.f32 %v3572_v6, %v4460_v40  ;;  %v3574_v37 = vpop.eup %3573 }
 0x567   : > { %v2060_v44 = vmul.f32 %v3574_v37, %v4464_v11  ;;  %v3576_v41 = vpop.eup %3575 }
 0x568   : > { %v2061_v60 = vmul.f32 %v3576_v41, %v4514_v36  ;;  %v3578_v0 = vpop.eup %3577 }
 0x569   : > { %3053 = vmatmul.mubr.msk.f32.gmra.mrb[52].mxu0 %vm650_vm3, %v1621_v22  ;;  %v2062_v40 = vmul.f32 %v3578_v0, %v4470_v14  ;;  %v3580_v33 = vpop.eup %3579 }
 0x56a   : > { %3118 = vmatprep.mubr.msk.f32.mxu0 %vm3633_vm1, %v3634_v28  ;;  %v2063_v11 = vmul.f32 %v3580_v33, %v4518_v5  ;;  %v3582_v52 = vpop.eup %3581 }
 0x56b   : > { %v2064_v36 = vmul.f32 %v3582_v52, %v4522_v48 }
 0x56d   : > { %3119 = vmatmul.mubr.msk.f32.vlgmr.msra.gmra.mrb[54].mxu0 %vm650_vm3, %v2058_v19 }
 0x56e   : > { %3121 = vmatprep.mubr.msk.f32.mxu0 %vm3633_vm1, %v3634_v28 }
 0x571   : > { %3122 = vmatmul.mubr.msk.f32.gmra.mrb[56].mxu0 %vm650_vm3, %v2059_v61 }
 0x572   : > { %3124 = vmatprep.mubr.msk.f32.mxu0 %vm3633_vm1, %v3634_v28 }
 0x575   : > { %3125 = vmatmul.mubr.msk.f32.gmra.mrb[58].mxu0 %vm650_vm3, %v2060_v44 }
 0x576   : > { %3127 = vmatprep.mubr.msk.f32.mxu0 %vm3633_vm1, %v3634_v28 }
 0x579   : > { %3128 = vmatmul.mubr.msk.f32.gmra.mrb[60].mxu0 %vm650_vm3, %v2061_v60 }
 0x57a   : > { %3130 = vmatprep.mubr.msk.f32.mxu0 %vm3633_vm1, %v3634_v28 }
 0x57d   : > { %3131 = vmatmul.mubr.msk.f32.gmra.mrb[62].mxu0 %vm650_vm3, %v2062_v40 }
 0x57e   : > { %3133 = vmatprep.mubr.msk.f32.mxu0 %vm3633_vm1, %v3634_v28 }
 0x581   : > { %3134 = vmatmul.mubr.msk.f32.gmra.mrb[64].mxu0 %vm650_vm3, %v2063_v11 }
 0x582   : > { %3136 = vmatprep.mubr.msk.f32.mxu0 %vm3633_vm1, %v3634_v28 }
 0x585   : > { %3137 = vmatmul.mubr.msk.f32.gmra.mrb[66].mxu0 %vm650_vm3, %v2064_v36 }
 0x59e   : > { %v1297_v46 = vpop.f32.mrb[18].mxu0 }
 0x59f   : > { %2240 = vrot.lane.b32.xlu0 %v1297_v46, %s3637_s29  ;;  %v2940_v14 = vpop.f32.mrb[19].mxu0 }
 0x5a2   : > { %v1302_v16 = vpop.f32.mrb[20].mxu0 }
 0x5a3   : > { %2242 = vrot.lane.b32.xlu0 %v1302_v16, %s3637_s29  ;;  %v2943_v23 = vpop.f32.mrb[21].mxu0 }
 0x5a6   : > { %v1307_v34 = vpop.f32.mrb[22].mxu0 }
 0x5a7   : > { %2244 = vrot.lane.b32.xlu0 %v1307_v34, %s3637_s29  ;;  %v2946_v5 = vpop.f32.mrb[23].mxu0 }
 0x5aa   : > { %v1312_v29 = vpop.f32.mrb[24].mxu0 }
 0x5ab   : > { %2246 = vrot.lane.b32.xlu0 %v1312_v29, %s3637_s29  ;;  %v2949_v28 = vpop.f32.mrb[25].mxu0 }
 0x5ae   : > { %v1317_v62 = vpop.f32.mrb[26].mxu0 }
 0x5af   : > { %2248 = vrot.lane.b32.xlu1 %v1317_v62, %s3637_s29  ;;  %v2952_v48 = vpop.f32.mrb[27].mxu0 }
 0x5df   : > { %v1322_v47 = vpop.f32.mrb[28].mxu0 }
 0x5e0   : > { %2250 = vrot.lane.b32.xlu0 %v1322_v47, %s3637_s29  ;;  %v2955_v12 = vpop.f32.mrb[29].mxu0 }
 0x5e3   : > { %v1327_v42 = vpop.f32.mrb[30].mxu0 }
 0x5e4   : > { %2252 = vrot.lane.b32.xlu1 %v1327_v42, %s3637_s29  ;;  %v2958_v63 = vpop.f32.mrb[31].mxu0 }
 0x5e7   : > { %v1332_v4 = vpop.f32.mrb[32].mxu0 }
 0x5e8   : > { %2254 = vrot.lane.b32.xlu0 %v1332_v4, %s3637_s29  ;;  %v2961_v51 = vpop.f32.mrb[33].mxu0 }
 0x611   : > { %v2241_v36 = vpop.permute.xlu0 %2240 }
 0x615   : > { %v2243_v46 = vpop.permute.xlu0 %2242 }
 0x618   : > { %v1337_v24 = vpop.f32.mrb[34].mxu0 }
 0x619   : > { %2256 = vrot.lane.b32.xlu1 %v1337_v24, %s3637_s29  ;;  %v2964_v56 = vpop.f32.mrb[35].mxu0  ;;  %v2245_v14 = vpop.permute.xlu0 %2244  ;;  %v2339_v24 = vsel %vm485_vm0, %v4224_v21, %v2241_v36 }
 0x61c   : > { %v1742_v54 = vpop.f32.mrb[36].mxu0 }
 0x61d   : > { %2276 = vrot.lane.b32.xlu0 %v1742_v54, %s3636_s28  ;;  %v3030_v7 = vpop.f32.mrb[37].mxu0  ;;  %v2247_v16 = vpop.permute.xlu0 %2246 }
 0x620   : > { %v1747_v8 = vpop.f32.mrb[38].mxu0 }
 0x621   : > { %2278 = vrot.lane.b32.xlu1 %v1747_v8, %s3636_s28  ;;  %v3033_v9 = vpop.f32.mrb[39].mxu0  ;;  %v2249_v23 = vpop.permute.xlu1 %2248 }
 0x622   : > { %v2340_v9 = vsel %vm485_vm0, %v4226_v57, %v2243_v46  ;;  %v2342_v57 = vsel %vm485_vm0, %v4230_v55, %v2247_v16 }
 0x624   : > { %v1752_v49 = vpop.f32.mrb[40].mxu0 }
 0x625   : > { %2280 = vrot.lane.b32.xlu0 %v1752_v49, %s3636_s28  ;;  %v3036_v26 = vpop.f32.mrb[41].mxu0 }
 0x628   : > { %v1757_v1 = vpop.f32.mrb[42].mxu0 }
 0x629   : > { %2282 = vrot.lane.b32.xlu1 %v1757_v1, %s3636_s28  ;;  %v3039_v32 = vpop.f32.mrb[43].mxu0  ;;  %v2341_v1 = vsel %vm485_vm0, %v4228_v53, %v2245_v14 }
 0x62c   : > { %v1762_v35 = vpop.f32.mrb[44].mxu0 }
 0x62d   : > { %2284 = vrot.lane.b32.xlu0 %v1762_v35, %s3636_s28  ;;  %v3042_v13 = vpop.f32.mrb[45].mxu0 }
 0x630   : > { %v1767_v15 = vpop.f32.mrb[46].mxu0  ;;  %v2222_v31 = vpop.f32.mrb[72].mxu1 }
 0x631   : > { %v3141_v27 = vpop.f32.mrb[73].mxu1  ;;  %2286 = vrot.lane.b32.xlu1 %v1767_v15, %s3636_s28  ;;  %v3045_v59 = vpop.f32.mrb[47].mxu0 }
 0x632   : > { %v2343_v59 = vsel %vm485_vm0, %v4232_v58, %v2249_v23 }
 0x634   : > { %v1772_v3 = vpop.f32.mrb[48].mxu0 }
 0x635   : > { %2288 = vrot.lane.b32.xlu0 %v1772_v3, %s3636_s28  ;;  %v3048_v50 = vpop.f32.mrb[49].mxu0 }
 0x638   : > { %v1777_v20 = vpop.f32.mrb[50].mxu0  ;;  %v2227_v39 = vpop.f32.mrb[74].mxu1 }
 0x639   : > { %v3144_v45 = vpop.f32.mrb[75].mxu1  ;;  %2290 = vrot.lane.b32.xlu1 %v1777_v20, %s3636_s28  ;;  %v3051_v18 = vpop.f32.mrb[51].mxu0 }
 0x63c   : > { %v1782_v2 = vpop.f32.mrb[52].mxu0 }
 0x63d   : > { %2292 = vrot.lane.b32.xlu0 %v1782_v2, %s3636_s28  ;;  %v3054_v10 = vpop.f32.mrb[53].mxu0 }
 0x640   : > { %v2187_v22 = vpop.f32.mrb[54].mxu0 }
 0x641   : > { %2312 = vrot.lane.b32.xlu1 %v2187_v22, %s3635_s26  ;;  %v3120_v43 = vpop.f32.mrb[55].mxu0 }
 0x644   : > { %v2192_v19 = vpop.f32.mrb[56].mxu0 }
 0x645   : > { %2314 = vrot.lane.b32.xlu0 %v2192_v19, %s3635_s26  ;;  %v3123_v6 = vpop.f32.mrb[57].mxu0 }
 0x648   : > { %v2197_v61 = vpop.f32.mrb[58].mxu0 }
 0x649   : > { %2316 = vrot.lane.b32.xlu1 %v2197_v61, %s3635_s26  ;;  %v3126_v37 = vpop.f32.mrb[59].mxu0 }
 0x64c   : > { %v2202_v44 = vpop.f32.mrb[60].mxu0 }
 0x64d   : > { %2318 = vrot.lane.b32.xlu0 %v2202_v44, %s3635_s26  ;;  %v3129_v41 = vpop.f32.mrb[61].mxu0 }
 0x650   : > { %v2207_v60 = vpop.f32.mrb[62].mxu0 }
 0x651   : > { %2320 = vrot.lane.b32.xlu1 %v2207_v60, %s3635_s26  ;;  %v3132_v0 = vpop.f32.mrb[63].mxu0 }
 0x652   : > { %v2251_v34 = vpop.permute.xlu0 %2250 }
 0x653   : > { %v2344_v55 = vsel %vm485_vm0, %v4234_v25, %v2251_v34 }
 0x654   : > { %v2212_v40 = vpop.f32.mrb[64].mxu0 }
 0x655   : > { %2322 = vrot.lane.b32.xlu0 %v2212_v40, %s3635_s26  ;;  %v3135_v33 = vpop.f32.mrb[65].mxu0 }
 0x656   : > { %v2253_v5 = vpop.permute.xlu1 %2252 }
 0x657   : > { %v2345_v58 = vsel %vm485_vm0, %v4241_v30, %v2253_v5 }
 0x658   : > { %v2217_v11 = vpop.f32.mrb[66].mxu0 }
 0x659   : > { %2326 = vrot.lane.b32.xlu0 %v2222_v31, %s3635_s26  ;;  %2324 = vrot.lane.b32.xlu1 %v2217_v11, %s3635_s26  ;;  %v3138_v52 = vpop.f32.mrb[67].mxu0 }
 0x65a   : > { %v2255_v29 = vpop.permute.xlu0 %2254 }
 0x65b   : > { %v2346_v18 = vsel %vm485_vm0, %v4243_v38, %v2255_v29 }
 0x65d   : > { %2328 = vrot.lane.b32.xlu1 %v2227_v39, %s3635_s26 }
 0x68b   : > { %v2257_v28 = vpop.permute.xlu1 %2256 }
 0x68c   : > { %v2347_v6 = vsel %vm485_vm0, %v4245_v17, %v2257_v28 }
 0x68f   : > { %v2277_v62 = vpop.permute.xlu0 %2276 }
 0x690   : > { %v2349_v56 = vsel %vm2348_vm4, %v2339_v24, %v2277_v62 }
 0x693   : > { %v2279_v48 = vpop.permute.xlu1 %2278 }
 0x694   : > { %v2350_v21 = vsel %vm2348_vm4, %v2340_v9, %v2279_v48 }
 0x697   : > { %v2281_v47 = vpop.permute.xlu0 %2280 }
 0x698   : > { %v2351_v32 = vsel %vm2348_vm4, %v2341_v1, %v2281_v47 }
 0x69b   : > { %v2283_v12 = vpop.permute.xlu1 %2282 }
 0x69c   : > { %v2352_v15 = vsel %vm2348_vm4, %v2342_v57, %v2283_v12 }
 0x69f   : > { %v2285_v42 = vpop.permute.xlu0 %2284 }
 0x6a0   : > { %v2353_v53 = vsel %vm2348_vm4, %v2343_v59, %v2285_v42 }
 0x6a3   : > { %v2287_v63 = vpop.permute.xlu1 %2286 }
 0x6a4   : > { %v2354_v20 = vsel %vm2348_vm4, %v2344_v55, %v2287_v63 }
 0x6a7   : > { %v2289_v4 = vpop.permute.xlu0 %2288 }
 0x6a8   : > { %v2355_v2 = vsel %vm2348_vm4, %v2345_v58, %v2289_v4 }
 0x6ab   : > { %v2291_v51 = vpop.permute.xlu1 %2290 }
 0x6ac   : > { %v2356_v10 = vsel %vm2348_vm4, %v2346_v18, %v2291_v51 }
 0x6af   : > { %v2293_v54 = vpop.permute.xlu0 %2292 }
 0x6b0   : > { %v2357_v30 = vsel %vm2348_vm4, %v2347_v6, %v2293_v54 }
 0x6b3   : > { %v2313_v7 = vpop.permute.xlu1 %2312 }
 0x6b4   : > { %v2359_v8 = vsel %vm2358_vm5, %v2349_v56, %v2313_v7 }
 0x6b5   : > { %2368 = vst [vmem:[%s4716_s6] sm:$0xff] %v2359_v8 }
 0x6b7   : > { %v2315_v49 = vpop.permute.xlu0 %2314 }
 0x6b8   : > { %v2360_v26 = vsel %vm2358_vm5, %v2350_v21, %v2315_v49 }
 0x6b9   : > { %2369 = vst [vmem:[%s4716_s6 + $0x8] sm:$0xff] %v2360_v26 }
 0x6bb   : > { %v2317_v35 = vpop.permute.xlu1 %2316 }
 0x6bc   : > { %v2361_v13 = vsel %vm2358_vm5, %v2351_v32, %v2317_v35 }
 0x6bd   : > { %2370 = vst [vmem:[%s4716_s6 + $0x10] sm:$0xff] %v2361_v13 }
 0x6bf   : > { %v2319_v31 = vpop.permute.xlu0 %2318 }
 0x6c0   : > { %v2362_v27 = vsel %vm2358_vm5, %v2352_v15, %v2319_v31 }
 0x6c1   : > { %2371 = vst [vmem:[%s4716_s6 + $0x18] sm:$0xff] %v2362_v27 }
 0x6c3   : > { %v2321_v3 = vpop.permute.xlu1 %2320 }
 0x6c4   : > { %v2363_v50 = vsel %vm2358_vm5, %v2353_v53, %v2321_v3 }
 0x6c5   : > { %2372 = vst [vmem:[%s4716_s6 + $0x20] sm:$0xff] %v2363_v50 }
 0x6c7   : > { %v2323_v39 = vpop.permute.xlu0 %2322 }
 0x6c8   : > { %v2364_v45 = vsel %vm2358_vm5, %v2354_v20, %v2323_v39 }
 0x6c9   : > { %2373 = vst [vmem:[%s4716_s6 + $0x28] sm:$0xff] %v2364_v45 }
 0x6cb   : > { %v2327_v22 = vpop.permute.xlu0 %2326  ;;  %v2325_v43 = vpop.permute.xlu1 %2324 }
 0x6cc   : > { %v2366_v25 = vsel %vm2358_vm5, %v2356_v10, %v2327_v22  ;;  %v2365_v19 = vsel %vm2358_vm5, %v2355_v2, %v2325_v43 }
 0x6cd   : > { %2375 = vst [vmem:[%s4716_s6 + $0x38] sm:$0xff] %v2366_v25  ;;  %2374 = vst [vmem:[%s4716_s6 + $0x30] sm:$0xff] %v2365_v19 }
 0x6cf   : > { %v2329_v61 = vpop.permute.xlu1 %2328 }
 0x6d0   : > { %v2367_v38 = vsel %vm2358_vm5, %v2357_v30, %v2329_v61 }
 0x6d1   : > { %2376 = vst [vmem:[%s4716_s6 + $0x40] sm:$0xff] %v2367_v38 }
 0x6d2 PF: > { %s13_s16 = sadd.s32 1, %s3630_s16   ;;  %s4783_s12 = smov %s3618_s13 }
 0x6d3   : > { %p10_p10 = scmp.ge.s32.totalorder %s13_s16, 6   ;;  %s4784_s13 = smov %s3697_s21 }
 0x6d4   : > { %s4785_s14 = smov %s3626_s15  ;;  %s4786_s15 = smov %s4788_s17 }
 0x6d5   :  { %12 = sbr.rel (!%p10_p10) target bundleno = 3 (0x3), region = 197 }

// kernel: conformer_forward.13
= control target key start
LH: loop header
LB: loop body
LE: loop exit
PB: predicated region body
PF: predicated region fallthrough
CT: control target
= control target key end

     0   :  { %s2563_s18 = smov 0   ;;  %s2565_s19 = smov 0   ;;  %s4092_s0 = inlined_call_operand.vmem [shape: f32[1,288,128], index: 0, kind: input, shape index: {}]   ;;  %s4093_s1 = inlined_call_operand.vmem [shape: f32[1,128,256], index: 1, kind: input, shape index: {}]   ;;  %s4094_s2 = inlined_call_operand.vmem [shape: f32[1,128], index: 2, kind: input, shape index: {}]   ;;  %s4095_s3 = inlined_call_operand.vmem [shape: f32[1,128], index: 3, kind: input, shape index: {}]   ;;  %s4096_s4 = inlined_call_operand.vmem [shape: f32[1,256], index: 4, kind: input, shape index: {}]   ;;  %s4097_s5 = inlined_call_operand.vmem [shape: f32[1,288,256], index: 5, kind: output, shape index: {}]  }
   0x1   :  { %s2567_s20 = smov 0   ;;  %s2569_s21 = smov 0  }
   0x2   :  { %s2571_s22 = smov 0  }
   0x3 LB: > { %s2047_s23 = sadd.s32 4294967295, %s2498_s22   ;;  %s30_s24 = sadd.s32 1, %s2494_s21  ;;  %s2498_s22 = sphi %s2571_s22, %s15_s22   ;;  %s2494_s21 = sphi %s2569_s21, %s4119_s21   ;;  %s2490_s20 = sphi %s2567_s20, %s4118_s20   ;;  %s2486_s19 = sphi %s2565_s19, %s4117_s19   ;;  %s2482_s18 = sphi %s2563_s18, %s4116_s18  }
   0x4   : > { %p32_p0 = scmp.ge.s32.totalorder %s30_s24, 2  ;;  %s165_s25 = sadd.s32 1, %s2486_s19 }
   0x5   : > { %p175_p1 = scmp.ne.s32.totalorder %s2486_s19, %s2482_s18  ;;  %p176_p2 = scmp.eq.s32.totalorder %s2047_s23, 1 }
   0x6   : > { %s4121_s24 = smov (%p32_p0, %s30_s24), 0  ;;  %p2053_p4 = scmp.ge.s32.totalorder %s2498_s22, 1 }
   0x7   : > { %p2595_p3 = por %p176_p2, %p175_p1  ;;  %s159_s27 = ssub.s32 %s2494_s21, %s4121_s24 }
   0x8   : > { %p240_p5 = scmp.lt.s32.totalorder %s2498_s22, 3  ;;  %p163_p6 = scmp.eq.s32.totalorder %s159_s27, 0 }
   0xa   : > { %p241_p7 = pnand %p2053_p4, %p240_p5 }
   0xb   : > { %s2604_s28 = scalar_select %p163_p6, %s2486_s19, %s165_s25  }
   0xc   : > { %244 = sbr.rel (%p241_p7) target bundleno = 804 (0x324), region = 40 }
  0x13   : > { %s2607_s29 = sshll.u32 %s2490_s20, 5  ;;  %v776_v32 = vld [vmem:[%s4093_s1 + $0x8] sm:$0xff]  ;;  %v778_v33 = vld [vmem:[%s4093_s1 + $0x18] sm:$0xff]  ;;  %v775_v34 = vld [vmem:[%s4093_s1] sm:$0xff]  ;;  %s277_s16 = sand.u32 1, %s2482_s18  }
  0x14   : > { %p285_p8 = scmp.lt.s32.totalorder %s2607_s29, 35  ;;  %v2083_v35 = vpack.c.bf16 %v778_v33, %v776_v32  ;;  %v777_v36 = vld [vmem:[%s4093_s1 + $0x10] sm:$0xff]  ;;  %v780_v37 = vld [vmem:[%s4093_s1 + $0x28] sm:$0xff]  ;;  %v782_v38 = vld [vmem:[%s4093_s1 + $0x38] sm:$0xff]  ;;  %s3246_s18 = sshll.u32 %s277_s16, 9 }
  0x15   : > { %v2085_v39 = vpack.c.bf16 %v777_v36, %v775_v34  ;;  %v2087_v40 = vpack.c.bf16 %v782_v38, %v780_v37  ;;  %v779_v41 = vld [vmem:[%s4093_s1 + $0x20] sm:$0xff]  ;;  %v781_v42 = vld [vmem:[%s4093_s1 + $0x30] sm:$0xff]  ;;  %v784_v43 = vld [vmem:[%s4093_s1 + $0x48] sm:$0xff]  ;;  %s3276_s17 = scalar_lea.vmem [#allocation2], %s3246_s18   ;;  %s1725_s23 = ssub.s32 (%p2595_p3), 36, %s2607_s29 }
  0x16   : > { %s286_s30 = scalar_select %p285_p8, %s2607_s29, 35  ;;  %2084 = vmatprep.subr.bf16.mxu0 %v2083_v35  ;;  %2115 = vmatprep.subr.bf16.mxu1 %v2083_v35  ;;  %v786_v44 = vld [vmem:[%s4093_s1 + $0x58] sm:$0xff]  ;;  %v2089_v45 = vpack.c.bf16 %v781_v42, %v779_v41  ;;  %v783_v47 = vld [vmem:[%s4093_s1 + $0x40] sm:$0xff]  ;;  %v785_v48 = vld [vmem:[%s4093_s1 + $0x50] sm:$0xff] }
  0x17   : > { %2086 = vmatpush1.bf16.msra.mxu0 %v2085_v39  ;;  %2123 = vmatpush1.bf16.msra.mxu1 %v2085_v39  ;;  %v2091_v46 = vpack.c.bf16 %v786_v44, %v784_v43  ;;  %v2093_v49 = vpack.c.bf16 %v785_v48, %v783_v47  ;;  %v788_v48 = vld [vmem:[%s4093_s1 + $0x68] sm:$0xff]  ;;  %s2080_s25 = sshll.u32 (%p2595_p3), %s2490_s20, 9  ;;  %p1726_p9 = scmp.lt.s32.totalorder (%p2595_p3), %s1725_s23, 32 }
  0x18   : > { %s2056_s6 = sshll.u32 %s286_s30, 3  ;;  %2088 = vmatprep.subr.bf16.mxu0 %v2087_v40  ;;  %2116 = vmatprep.subr.bf16.mxu1 %v2087_v40 }
  0x19   : > { %s2614_s9 = scalar_lea.vmem %s4092_s0, %s2056_s6  ;;  %s3884_s6 = scalar_lea.vmem (%p2595_p3), %s4097_s5, %s2080_s25  }
  0x1a   : > { %v2617_v0 = vld [vmem:[%s2614_s9] sm:$0xff]  ;;  %v2620_v1 = vld [vmem:[%s2614_s9 + $0x8] sm:$0xff]  ;;  %v2633_v4 = vld [vmem:[%s2614_s9 + $0x10] sm:$0xff] }
  0x1b   : > { %344 = vadd.xlane.f32.xlu0 %v2617_v0  ;;  %346 = vadd.xlane.f32.xlu1 %v2620_v1  ;;  %v2625_v2 = vld [vmem:[%s2614_s9 + $0x80] sm:$0xff]  ;;  %v2628_v3 = vld [vmem:[%s2614_s9 + $0x88] sm:$0xff]  ;;  %v2636_v5 = vld [vmem:[%s2614_s9 + $0x90] sm:$0xff] }
  0x1c   : > { %v2641_v6 = vld [vmem:[%s2614_s9 + $0x18] sm:$0xff]  ;;  %v2649_v8 = vld [vmem:[%s2614_s9 + $0x20] sm:$0xff]  ;;  %v2657_v10 = vld [vmem:[%s2614_s9 + $0x28] sm:$0xff]  ;;  %2090 = vmatpush1.bf16.msra.mxu0 %v2089_v45  ;;  %2124 = vmatpush1.bf16.msra.mxu1 %v2089_v45 }
  0x1d   : > { %v2644_v7 = vld [vmem:[%s2614_s9 + $0x98] sm:$0xff]  ;;  %v2652_v9 = vld [vmem:[%s2614_s9 + $0xa0] sm:$0xff]  ;;  %v2660_v11 = vld [vmem:[%s2614_s9 + $0xa8] sm:$0xff]  ;;  %2092 = vmatprep.subr.bf16.mxu0 %v2091_v46  ;;  %2117 = vmatprep.subr.bf16.mxu1 %v2091_v46 }
  0x1e   : > { %v2665_v12 = vld [vmem:[%s2614_s9 + $0x30] sm:$0xff]  ;;  %v2673_v14 = vld [vmem:[%s2614_s9 + $0x38] sm:$0xff]  ;;  %v2681_v16 = vld [vmem:[%s2614_s9 + $0x40] sm:$0xff] }
  0x1f   : > { %376 = vadd.xlane.f32.xlu0 %v2625_v2  ;;  %378 = vadd.xlane.f32.xlu1 %v2628_v3  ;;  %v2668_v13 = vld [vmem:[%s2614_s9 + $0xb0] sm:$0xff]  ;;  %v2676_v15 = vld [vmem:[%s2614_s9 + $0xb8] sm:$0xff]  ;;  %v2684_v17 = vld [vmem:[%s2614_s9 + $0xc0] sm:$0xff] }
  0x20   : > { %v2689_v18 = vld [vmem:[%s2614_s9 + $0x48] sm:$0xff]  ;;  %v2697_v20 = vld [vmem:[%s2614_s9 + $0x50] sm:$0xff]  ;;  %v2705_v22 = vld [vmem:[%s2614_s9 + $0x58] sm:$0xff]  ;;  %2094 = vmatpush1.bf16.msra.mxu0 %v2093_v49  ;;  %2125 = vmatpush1.bf16.msra.mxu1 %v2093_v49 }
  0x21   : > { %v2692_v19 = vld [vmem:[%s2614_s9 + $0xc8] sm:$0xff]  ;;  %v2700_v21 = vld [vmem:[%s2614_s9 + $0xd0] sm:$0xff]  ;;  %v2708_v23 = vld [vmem:[%s2614_s9 + $0xd8] sm:$0xff] }
  0x22   : > { %v2713_v24 = vld [vmem:[%s2614_s9 + $0x60] sm:$0xff]  ;;  %v2721_v26 = vld [vmem:[%s2614_s9 + $0x68] sm:$0xff]  ;;  %v2729_v28 = vld [vmem:[%s2614_s9 + $0x70] sm:$0xff] }
  0x23   : > { %348 = vadd.xlane.f32.xlu0 %v2633_v4  ;;  %380 = vadd.xlane.f32.xlu1 %v2636_v5  ;;  %v2716_v25 = vld [vmem:[%s2614_s9 + $0xe0] sm:$0xff]  ;;  %v2724_v27 = vld [vmem:[%s2614_s9 + $0xe8] sm:$0xff]  ;;  %v2732_v29 = vld [vmem:[%s2614_s9 + $0xf0] sm:$0xff] }
  0x24   : > { %v2737_v30 = vld [vmem:[%s2614_s9 + $0x78] sm:$0xff] }
  0x25   : > { %v2740_v31 = vld [vmem:[%s2614_s9 + $0xf8] sm:$0xff] }
  0x26   : > { %v790_v49 = vld [vmem:[%s4093_s1 + $0x78] sm:$0xff] }
  0x27   : > { %350 = vadd.xlane.f32.xlu0 %v2641_v6  ;;  %382 = vadd.xlane.f32.xlu1 %v2644_v7 }
  0x2b   : > { %352 = vadd.xlane.f32.xlu0 %v2649_v8  ;;  %384 = vadd.xlane.f32.xlu1 %v2652_v9 }
  0x2f   : > { %354 = vadd.xlane.f32.xlu0 %v2657_v10  ;;  %386 = vadd.xlane.f32.xlu1 %v2660_v11 }
  0x33   : > { %356 = vadd.xlane.f32.xlu0 %v2665_v12  ;;  %388 = vadd.xlane.f32.xlu1 %v2668_v13 }
  0x37   : > { %358 = vadd.xlane.f32.xlu0 %v2673_v14  ;;  %390 = vadd.xlane.f32.xlu1 %v2676_v15 }
  0x3b   : > { %360 = vadd.xlane.f32.xlu0 %v2681_v16  ;;  %392 = vadd.xlane.f32.xlu1 %v2684_v17 }
  0x3f   : > { %362 = vadd.xlane.f32.xlu0 %v2689_v18  ;;  %394 = vadd.xlane.f32.xlu1 %v2692_v19 }
  0x43   : > { %364 = vadd.xlane.f32.xlu0 %v2697_v20  ;;  %396 = vadd.xlane.f32.xlu1 %v2700_v21 }
  0x47   : > { %366 = vadd.xlane.f32.xlu0 %v2705_v22  ;;  %398 = vadd.xlane.f32.xlu1 %v2708_v23 }
  0x4b   : > { %368 = vadd.xlane.f32.xlu0 %v2713_v24  ;;  %400 = vadd.xlane.f32.xlu1 %v2716_v25 }
  0x4f   : > { %370 = vadd.xlane.f32.xlu0 %v2721_v26  ;;  %402 = vadd.xlane.f32.xlu1 %v2724_v27 }
  0x53   : > { %372 = vadd.xlane.f32.xlu0 %v2729_v28  ;;  %404 = vadd.xlane.f32.xlu1 %v2732_v29 }
  0x57   : > { %374 = vadd.xlane.f32.xlu0 %v2737_v30  ;;  %406 = vadd.xlane.f32.xlu1 %v2740_v31 }
  0xa8   : > { %v345_v50 = vpop.xlane.xlu0 %344  ;;  %v347_v51 = vpop.xlane.xlu1 %346 }
  0xa9   : > { %v409_v52 = vmul.f32 0.0078125, %v345_v50  ;;  %v410_v53 = vmul.f32 0.0078125, %v347_v51 }
  0xab   : > { %v2781_v54 = vsub.f32 %v2617_v0, %v409_v52  ;;  %v2784_v55 = vsub.f32 %v2620_v1, %v410_v53  ;;  %v787_v52 = vld [vmem:[%s4093_s1 + $0x60] sm:$0xff] }
  0xac   : > { %v377_v56 = vpop.xlane.xlu0 %376  ;;  %v379_v57 = vpop.xlane.xlu1 %378 }
  0xad   : > { %v425_v58 = vmul.f32 0.0078125, %v377_v56  ;;  %v473_v59 = vmul.f32 %v2781_v54, %v2781_v54  ;;  %v426_v60 = vmul.f32 0.0078125, %v379_v57  ;;  %v474_v63 = vmul.f32 %v2784_v55, %v2784_v55 }
  0xaf   : > { %v2789_v61 = vsub.f32 %v2625_v2, %v425_v58  ;;  %505 = vadd.xlane.f32.xlu0 %v473_v59  ;;  %v2792_v62 = vsub.f32 %v2628_v3, %v426_v60 }
  0xb0   : > { %v349_v0 = vpop.xlane.xlu0 %348  ;;  %v381_v1 = vpop.xlane.xlu1 %380 }
  0xb1   : > { %v411_v32 = vmul.f32 0.0078125, %v349_v0  ;;  %v489_v33 = vmul.f32 %v2789_v61, %v2789_v61  ;;  %v427_v34 = vmul.f32 0.0078125, %v381_v1  ;;  %v490_v3 = vmul.f32 %v2792_v62, %v2792_v62 }
  0xb3   : > { %v2799_v35 = vsub.f32 %v2633_v4, %v411_v32  ;;  %507 = vadd.xlane.f32.xlu0 %v474_v63  ;;  %537 = vadd.xlane.f32.xlu1 %v489_v33  ;;  %v2802_v2 = vsub.f32 %v2636_v5, %v427_v34  ;;  %v792_v32 = vld [vmem:[%s4093_s1 + $0x88] sm:$0xff] }
  0xb4   : > { %v351_v36 = vpop.xlane.xlu0 %350  ;;  %v383_v37 = vpop.xlane.xlu1 %382 }
  0xb5   : > { %v412_v38 = vmul.f32 0.0078125, %v351_v36  ;;  %v475_v39 = vmul.f32 %v2799_v35, %v2799_v35  ;;  %v428_v40 = vmul.f32 0.0078125, %v383_v37  ;;  %v491_v5 = vmul.f32 %v2802_v2, %v2802_v2  ;;  %v793_v36 = vld [vmem:[%s4093_s1 + $0x90] sm:$0xff] }
  0xb7   : > { %v2809_v41 = vsub.f32 %v2641_v6, %v412_v38  ;;  %539 = vadd.xlane.f32.xlu1 %v490_v3  ;;  %509 = vadd.xlane.f32.xlu0 %v475_v39  ;;  %v2812_v4 = vsub.f32 %v2644_v7, %v428_v40  ;;  %v791_v3 = vld [vmem:[%s4093_s1 + $0x80] sm:$0xff] }
  0xb8   : > { %v353_v42 = vpop.xlane.xlu0 %352  ;;  %v385_v43 = vpop.xlane.xlu1 %384  ;;  %v2101_v38 = vpack.c.bf16 %v793_v36, %v791_v3  ;;  %v804_v36 = vld [vmem:[%s4093_s1 + $0xe8] sm:$0xff] }
  0xb9   : > { %v413_v44 = vmul.f32 0.0078125, %v353_v42  ;;  %v476_v45 = vmul.f32 %v2809_v41, %v2809_v41  ;;  %v429_v46 = vmul.f32 0.0078125, %v385_v43  ;;  %v492_v7 = vmul.f32 %v2812_v4, %v2812_v4 }
  0xbb   : > { %v2819_v47 = vsub.f32 %v2649_v8, %v413_v44  ;;  %541 = vadd.xlane.f32.xlu1 %v491_v5  ;;  %511 = vadd.xlane.f32.xlu0 %v476_v45  ;;  %v2822_v6 = vsub.f32 %v2652_v9, %v429_v46  ;;  %v2095_v8 = vpack.c.bf16 %v790_v49, %v788_v48  ;;  %v789_v9 = vld [vmem:[%s4093_s1 + $0x70] sm:$0xff]  ;;  %v796_v44 = vld [vmem:[%s4093_s1 + $0xa8] sm:$0xff] }
  0xbc   : > { %v355_v50 = vpop.xlane.xlu0 %354  ;;  %v387_v51 = vpop.xlane.xlu1 %386  ;;  %v2097_v58 = vpack.c.bf16 %v789_v9, %v787_v52  ;;  %v797_v48 = vld [vmem:[%s4093_s1 + $0xb0] sm:$0xff] }
  0xbd   : > { %v414_v53 = vmul.f32 0.0078125, %v355_v50  ;;  %v477_v56 = vmul.f32 %v2819_v47, %v2819_v47  ;;  %v430_v57 = vmul.f32 0.0078125, %v387_v51  ;;  %2096 = vmatprep.subr.bf16.mxu0 %v2095_v8  ;;  %2118 = vmatprep.subr.bf16.mxu1 %v2095_v8  ;;  %v493_v63 = vmul.f32 %v2822_v6, %v2822_v6 }
  0xbe   : > { %2098 = vmatpush1.bf16.msra.mxu0 %v2097_v58  ;;  %2126 = vmatpush1.bf16.msra.mxu1 %v2097_v58 }
  0xbf   : > { %v2841_v59 = vsub.f32 %v2657_v10, %v414_v53  ;;  %543 = vadd.xlane.f32.xlu1 %v492_v7  ;;  %513 = vadd.xlane.f32.xlu0 %v477_v56  ;;  %v2844_v60 = vsub.f32 %v2660_v11, %v430_v57  ;;  %v794_v10 = vld [vmem:[%s4093_s1 + $0x98] sm:$0xff]  ;;  %v795_v7 = vld [vmem:[%s4093_s1 + $0xa0] sm:$0xff]  ;;  %v800_v56 = vld [vmem:[%s4093_s1 + $0xc8] sm:$0xff] }
  0xc0   : > { %v357_v0 = vpop.xlane.xlu0 %356  ;;  %v389_v1 = vpop.xlane.xlu1 %388  ;;  %v2099_v37 = vpack.c.bf16 %v794_v10, %v792_v32  ;;  %v2105_v50 = vpack.c.bf16 %v797_v48, %v795_v7 }
  0xc1   : > { %v415_v33 = vmul.f32 0.0078125, %v357_v0  ;;  %v478_v11 = vmul.f32 %v2841_v59, %v2841_v59  ;;  %v431_v34 = vmul.f32 0.0078125, %v389_v1  ;;  %v494_v5 = vmul.f32 %v2844_v60, %v2844_v60  ;;  %v801_v0 = vld [vmem:[%s4093_s1 + $0xd0] sm:$0xff] }
  0xc2   : > { %2100 = vmatprep.subr.bf16.mxu0 %v2099_v37  ;;  %2119 = vmatprep.subr.bf16.mxu1 %v2099_v37 }
  0xc3   : > { %v2863_v39 = vsub.f32 %v2665_v12, %v415_v33  ;;  %545 = vadd.xlane.f32.xlu1 %v493_v63  ;;  %515 = vadd.xlane.f32.xlu0 %v478_v11  ;;  %v2866_v40 = vsub.f32 %v2668_v13, %v431_v34  ;;  %v798_v12 = vld [vmem:[%s4093_s1 + $0xb8] sm:$0xff]  ;;  %v799_v63 = vld [vmem:[%s4093_s1 + $0xc0] sm:$0xff] }
  0xc4   : > { %v359_v42 = vpop.xlane.xlu0 %358  ;;  %v391_v43 = vpop.xlane.xlu1 %390  ;;  %2102 = vmatpush1.bf16.msra.mxu0 %v2101_v38  ;;  %2127 = vmatpush1.bf16.msra.mxu1 %v2101_v38  ;;  %v2103_v49 = vpack.c.bf16 %v798_v12, %v796_v44  ;;  %v2109_v32 = vpack.c.bf16 %v801_v0, %v799_v63 }
  0xc5   : > { %v416_v45 = vmul.f32 0.0078125, %v359_v42  ;;  %v479_v13 = vmul.f32 %v2863_v39, %v2863_v39  ;;  %v432_v46 = vmul.f32 0.0078125, %v391_v43  ;;  %v495_v52 = vmul.f32 %v2866_v40, %v2866_v40  ;;  %v805_v42 = vld [vmem:[%s4093_s1 + $0xf0] sm:$0xff] }
  0xc6   : > { %2104 = vmatprep.subr.bf16.mxu0 %v2103_v49  ;;  %2120 = vmatprep.subr.bf16.mxu1 %v2103_v49 }
  0xc7   : > { %v2885_v51 = vsub.f32 %v2673_v14, %v416_v45  ;;  %547 = vadd.xlane.f32.xlu1 %v494_v5  ;;  %517 = vadd.xlane.f32.xlu0 %v479_v13  ;;  %v2888_v8 = vsub.f32 %v2676_v15, %v432_v46  ;;  %v802_v14 = vld [vmem:[%s4093_s1 + $0xd8] sm:$0xff]  ;;  %v803_v5 = vld [vmem:[%s4093_s1 + $0xe0] sm:$0xff] }
  0xc8   : > { %v361_v9 = vpop.xlane.xlu0 %360  ;;  %v393_v53 = vpop.xlane.xlu1 %392  ;;  %2106 = vmatpush1.bf16.msra.mxu0 %v2105_v50  ;;  %2128 = vmatpush1.bf16.msra.mxu1 %v2105_v50  ;;  %v2107_v1 = vpack.c.bf16 %v802_v14, %v800_v56  ;;  %v2113_v44 = vpack.c.bf16 %v805_v42, %v803_v5  ;;  %v2532_v56 = vmov 0.0  }
  0xc9   : > { %v417_v57 = vmul.f32 0.0078125, %v361_v9  ;;  %v480_v15 = vmul.f32 %v2885_v51, %v2885_v51  ;;  %v433_v58 = vmul.f32 0.0078125, %v393_v53  ;;  %v496_v11 = vmul.f32 %v2888_v8, %v2888_v8  ;;  %883 = vmatprep.mubr.f32.mxu0 %v2532_v56  ;;  %979 = vmatprep.mubr.f32.mxu1 %v2532_v56 }
  0xca   : > { %2108 = vmatprep.subr.bf16.mxu0 %v2107_v1  ;;  %2121 = vmatprep.subr.bf16.mxu1 %v2107_v1 }
  0xcb   : > { %v2907_v10 = vsub.f32 %v2681_v16, %v417_v57  ;;  %549 = vadd.xlane.f32.xlu1 %v495_v52  ;;  %519 = vadd.xlane.f32.xlu0 %v480_v15  ;;  %v2910_v33 = vsub.f32 %v2684_v17, %v433_v58  ;;  %v806_v16 = vld [vmem:[%s4093_s1 + $0xf8] sm:$0xff] }
  0xcc   : > { %v363_v34 = vpop.xlane.xlu0 %362  ;;  %v395_v3 = vpop.xlane.xlu1 %394  ;;  %2110 = vmatpush1.bf16.msra.mxu0 %v2109_v32  ;;  %2129 = vmatpush1.bf16.msra.mxu1 %v2109_v32  ;;  %v2111_v43 = vpack.c.bf16 %v806_v16, %v804_v36 }
  0xcd   : > { %v418_v37 = vmul.f32 0.0078125, %v363_v34  ;;  %v481_v17 = vmul.f32 %v2907_v10, %v2907_v10  ;;  %v434_v38 = vmul.f32 0.0078125, %v395_v3  ;;  %v497_v13 = vmul.f32 %v2910_v33, %v2910_v33 }
  0xce   : > { %2112 = vmatprep.subr.bf16.mxu0 %v2111_v43  ;;  %2122 = vmatprep.subr.bf16.mxu1 %v2111_v43 }
  0xcf   : > { %v2929_v12 = vsub.f32 %v2689_v18, %v418_v37  ;;  %551 = vadd.xlane.f32.xlu1 %v496_v11  ;;  %521 = vadd.xlane.f32.xlu0 %v481_v17  ;;  %v2932_v45 = vsub.f32 %v2692_v19, %v434_v38 }
  0xd0   : > { %v365_v46 = vpop.xlane.xlu0 %364  ;;  %v397_v7 = vpop.xlane.xlu1 %396  ;;  %2114 = vmatpush1.bf16.msra.mxu0 %v2113_v44  ;;  %2130 = vmatpush1.bf16.msra.mxu1 %v2113_v44 }
  0xd1   : > { %v419_v48 = vmul.f32 0.0078125, %v365_v46  ;;  %v482_v49 = vmul.f32 %v2929_v12, %v2929_v12  ;;  %v435_v50 = vmul.f32 0.0078125, %v397_v7  ;;  %v498_v52 = vmul.f32 %v2932_v45, %v2932_v45 }
  0xd3   : > { %v2939_v18 = vsub.f32 %v2697_v20, %v419_v48  ;;  %553 = vadd.xlane.f32.xlu1 %v497_v13  ;;  %523 = vadd.xlane.f32.xlu0 %v482_v49  ;;  %v2942_v19 = vsub.f32 %v2700_v21, %v435_v50 }
  0xd4   : > { %v367_v9 = vpop.xlane.xlu0 %366  ;;  %v399_v53 = vpop.xlane.xlu1 %398 }
  0xd5   : > { %v420_v14 = vmul.f32 0.0078125, %v367_v9  ;;  %v483_v20 = vmul.f32 %v2939_v18, %v2939_v18  ;;  %v436_v57 = vmul.f32 0.0078125, %v399_v53  ;;  %v499_v58 = vmul.f32 %v2942_v19, %v2942_v19 }
  0xd7   : > { %v2951_v15 = vsub.f32 %v2705_v22, %v420_v14  ;;  %555 = vadd.xlane.f32.xlu1 %v498_v52  ;;  %525 = vadd.xlane.f32.xlu0 %v483_v20  ;;  %v2954_v21 = vsub.f32 %v2708_v23, %v436_v57 }
  0xd8   : > { %v369_v63 = vpop.xlane.xlu0 %368  ;;  %v401_v0 = vpop.xlane.xlu1 %400 }
  0xd9   : > { %v421_v1 = vmul.f32 0.0078125, %v369_v63  ;;  %v484_v32 = vmul.f32 %v2951_v15, %v2951_v15  ;;  %v437_v11 = vmul.f32 0.0078125, %v401_v0  ;;  %v500_v23 = vmul.f32 %v2954_v21, %v2954_v21 }
  0xdb   : > { %v2961_v34 = vsub.f32 %v2713_v24, %v421_v1  ;;  %557 = vadd.xlane.f32.xlu1 %v499_v58  ;;  %527 = vadd.xlane.f32.xlu0 %v484_v32  ;;  %v2964_v22 = vsub.f32 %v2716_v25, %v437_v11 }
  0xdc   : > { %v371_v3 = vpop.xlane.xlu0 %370  ;;  %v403_v36 = vpop.xlane.xlu1 %402 }
  0xdd   : > { %v422_v16 = vmul.f32 0.0078125, %v371_v3  ;;  %v485_v37 = vmul.f32 %v2961_v34, %v2961_v34  ;;  %v438_v17 = vmul.f32 0.0078125, %v403_v36  ;;  %v501_v25 = vmul.f32 %v2964_v22, %v2964_v22 }
  0xdf   : > { %v2971_v38 = vsub.f32 %v2721_v26, %v422_v16  ;;  %559 = vadd.xlane.f32.xlu1 %v500_v23  ;;  %529 = vadd.xlane.f32.xlu0 %v485_v37  ;;  %v2974_v24 = vsub.f32 %v2724_v27, %v438_v17 }
  0xe0   : > { %v373_v5 = vpop.xlane.xlu0 %372  ;;  %v405_v42 = vpop.xlane.xlu1 %404 }
  0xe1   : > { %v423_v43 = vmul.f32 0.0078125, %v373_v5  ;;  %v486_v44 = vmul.f32 %v2971_v38, %v2971_v38  ;;  %v439_v13 = vmul.f32 0.0078125, %v405_v42  ;;  %v502_v27 = vmul.f32 %v2974_v24, %v2974_v24 }
  0xe3   : > { %v2981_v46 = vsub.f32 %v2729_v28, %v423_v43  ;;  %561 = vadd.xlane.f32.xlu1 %v501_v25  ;;  %531 = vadd.xlane.f32.xlu0 %v486_v44  ;;  %v2984_v26 = vsub.f32 %v2732_v29, %v439_v13 }
  0xe4   : > { %v375_v7 = vpop.xlane.xlu0 %374  ;;  %v407_v48 = vpop.xlane.xlu1 %406 }
  0xe5   : > { %v424_v49 = vmul.f32 0.0078125, %v375_v7  ;;  %v487_v50 = vmul.f32 %v2981_v46, %v2981_v46  ;;  %v440_v52 = vmul.f32 0.0078125, %v407_v48  ;;  %v503_v29 = vmul.f32 %v2984_v26, %v2984_v26 }
  0xe7   : > { %v2991_v9 = vsub.f32 %v2737_v30, %v424_v49  ;;  %563 = vadd.xlane.f32.xlu1 %v502_v27  ;;  %533 = vadd.xlane.f32.xlu0 %v487_v50  ;;  %v2994_v28 = vsub.f32 %v2740_v31, %v440_v52  ;;  %v3005_v27 = vld [vmem:[%s4094_s2] ss:$0 sm:$0xff] }
  0xe9   : > { %v488_v53 = vmul.f32 %v2991_v9, %v2991_v9  ;;  %v504_v14 = vmul.f32 %v2994_v28, %v2994_v28 }
  0xeb   : > { %565 = vadd.xlane.f32.xlu1 %v503_v29  ;;  %535 = vadd.xlane.f32.xlu0 %v488_v53  ;;  %v3011_v29 = vld [vmem:[%s4095_s3] ss:$0 sm:$0xff] }
  0xef   : > { %567 = vadd.xlane.f32.xlu1 %v504_v14 }
 0x13c   : > { %v506_v20 = vpop.xlane.xlu0 %505 }
 0x13d   : > { %v569_v30 = vmul.f32 0.0078125, %v506_v20 }
 0x13f   : > { %v601_v57 = vadd.f32 1e-06, %v569_v30 }
 0x140   : > { %v538_v58 = vpop.xlane.xlu1 %537  ;;  %v508_v63 = vpop.xlane.xlu0 %507 }
 0x141   : > { %2236 = vrsqrt.f32 %v601_v57  ;;  %v585_v31 = vmul.f32 0.0078125, %v538_v58  ;;  %v570_v0 = vmul.f32 0.0078125, %v508_v63 }
 0x143   : > { %v617_v1 = vadd.f32 1e-06, %v585_v31  ;;  %v602_v32 = vadd.f32 1e-06, %v570_v0 }
 0x144   : > { %v540_v11 = vpop.xlane.xlu1 %539  ;;  %v510_v23 = vpop.xlane.xlu0 %509 }
 0x145   : > { %2238 = vrsqrt.f32 %v617_v1  ;;  %v586_v3 = vmul.f32 0.0078125, %v540_v11  ;;  %v571_v36 = vmul.f32 0.0078125, %v510_v23 }
 0x146   : > { %2240 = vrsqrt.f32 %v602_v32 }
 0x147   : > { %v618_v16 = vadd.f32 1e-06, %v586_v3  ;;  %v603_v37 = vadd.f32 1e-06, %v571_v36 }
 0x148   : > { %v542_v17 = vpop.xlane.xlu1 %541  ;;  %v512_v25 = vpop.xlane.xlu0 %511 }
 0x149   : > { %2242 = vrsqrt.f32 %v618_v16  ;;  %v587_v5 = vmul.f32 0.0078125, %v542_v17  ;;  %v572_v42 = vmul.f32 0.0078125, %v512_v25 }
 0x14a   : > { %2244 = vrsqrt.f32 %v603_v37 }
 0x14b   : > { %v2237_v43 = vpop.eup %2236  ;;  %v619_v44 = vadd.f32 1e-06, %v587_v5  ;;  %v604_v13 = vadd.f32 1e-06, %v572_v42 }
 0x14c   : > { %v544_v7 = vpop.xlane.xlu1 %543  ;;  %v514_v48 = vpop.xlane.xlu0 %513  ;;  %v665_v49 = vmul.f32 %v2237_v43, %v2781_v54 }
 0x14d   : > { %2246 = vrsqrt.f32 %v619_v44  ;;  %v588_v50 = vmul.f32 0.0078125, %v544_v7  ;;  %v573_v52 = vmul.f32 0.0078125, %v514_v48 }
 0x14e   : > { %2248 = vrsqrt.f32 %v604_v13  ;;  %v704_v53 = vmul.f32 %v3005_v27, %v665_v49 }
 0x14f   : > { %v2239_v14 = vpop.eup %2238  ;;  %v620_v20 = vadd.f32 1e-06, %v588_v50  ;;  %v605_v30 = vadd.f32 1e-06, %v573_v52 }
 0x150   : > { %v2241_v57 = vpop.eup %2240  ;;  %v546_v58 = vpop.xlane.xlu1 %545  ;;  %v743_v31 = vadd.f32 %v3011_v29, %v704_v53  ;;  %v681_v54 = vmul.f32 %v2239_v14, %v2789_v61 }
 0x151   : > { %v516_v63 = vpop.xlane.xlu0 %515  ;;  %2250 = vrsqrt.f32 %v620_v20  ;;  %v589_v0 = vmul.f32 0.0078125, %v546_v58  ;;  %v666_v32 = vmul.f32 %v2241_v57, %v2784_v55 }
 0x152   : > { %v574_v1 = vmul.f32 0.0078125, %v516_v63  ;;  %2252 = vrsqrt.f32 %v605_v30  ;;  %884 = vmatmul.mubr.f32.vlgmr.msra.gmra.mrb[0].mxu0 %v743_v31  ;;  %v720_v11 = vmul.f32 %v3005_v27, %v681_v54 }
 0x153   : > { %v2243_v23 = vpop.eup %2242  ;;  %v621_v3 = vadd.f32 1e-06, %v589_v0  ;;  %889 = vmatprep.mubr.f32.mxu0 %v2532_v56  ;;  %v705_v16 = vmul.f32 %v3005_v27, %v666_v32 }
 0x154   : > { %v606_v36 = vadd.f32 1e-06, %v574_v1  ;;  %v2245_v37 = vpop.eup %2244  ;;  %v548_v17 = vpop.xlane.xlu1 %547  ;;  %v759_v61 = vadd.f32 %v3011_v29, %v720_v11  ;;  %v682_v5 = vmul.f32 %v2243_v23, %v2792_v62 }
 0x155   : > { %v518_v25 = vpop.xlane.xlu0 %517  ;;  %2254 = vrsqrt.f32 %v621_v3  ;;  %v590_v55 = vmul.f32 0.0078125, %v548_v17  ;;  %v744_v43 = vadd.f32 %v3011_v29, %v705_v16  ;;  %v667_v44 = vmul.f32 %v2245_v37, %v2799_v35 }
 0x156   : > { %v575_v42 = vmul.f32 0.0078125, %v518_v25  ;;  %2256 = vrsqrt.f32 %v606_v36  ;;  %980 = vmatmul.mubr.f32.vlgmr.msra.gmra.mrb[0].mxu1 %v759_v61  ;;  %v721_v13 = vmul.f32 %v3005_v27, %v682_v5 }
 0x157   : > { %v2247_v7 = vpop.eup %2246  ;;  %v622_v48 = vadd.f32 1e-06, %v590_v55  ;;  %890 = vmatmul.mubr.f32.gmra.mrb[2].mxu0 %v744_v43  ;;  %985 = vmatprep.mubr.f32.mxu1 %v2532_v56  ;;  %v706_v53 = vmul.f32 %v3005_v27, %v667_v44 }
 0x158   : > { %v607_v49 = vadd.f32 1e-06, %v575_v42  ;;  %v2249_v50 = vpop.eup %2248  ;;  %v550_v52 = vpop.xlane.xlu1 %549  ;;  %895 = vmatprep.mubr.f32.mxu0 %v2532_v56  ;;  %v760_v14 = vadd.f32 %v3011_v29, %v721_v13  ;;  %v683_v20 = vmul.f32 %v2247_v7, %v2802_v2 }
 0x159   : > { %v520_v62 = vpop.xlane.xlu0 %519  ;;  %2258 = vrsqrt.f32 %v622_v48  ;;  %v591_v35 = vmul.f32 0.0078125, %v550_v52  ;;  %v668_v57 = vmul.f32 %v2249_v50, %v2809_v41  ;;  %v745_v58 = vadd.f32 %v3011_v29, %v706_v53 }
 0x15a   : > { %v576_v30 = vmul.f32 0.0078125, %v520_v62  ;;  %2260 = vrsqrt.f32 %v607_v49  ;;  %986 = vmatmul.mubr.f32.gmra.mrb[2].mxu1 %v760_v14  ;;  %v722_v63 = vmul.f32 %v3005_v27, %v683_v20 }
 0x15b   : > { %v2251_v31 = vpop.eup %2250  ;;  %v623_v54 = vadd.f32 1e-06, %v591_v35  ;;  %991 = vmatprep.mubr.f32.mxu1 %v2532_v56  ;;  %v707_v1 = vmul.f32 %v3005_v27, %v668_v57  ;;  %896 = vmatmul.mubr.f32.gmra.mrb[4].mxu0 %v745_v58 }
 0x15c   : > { %v608_v0 = vadd.f32 1e-06, %v576_v30  ;;  %v2253_v32 = vpop.eup %2252  ;;  %v552_v2 = vpop.xlane.xlu1 %551  ;;  %v761_v23 = vadd.f32 %v3011_v29, %v722_v63  ;;  %v684_v41 = vmul.f32 %v2251_v31, %v2812_v4  ;;  %901 = vmatprep.mubr.f32.mxu0 %v2532_v56 }
 0x15d   : > { %v522_v11 = vpop.xlane.xlu0 %521  ;;  %2262 = vrsqrt.f32 %v623_v54  ;;  %v592_v3 = vmul.f32 0.0078125, %v552_v2  ;;  %v746_v16 = vadd.f32 %v3011_v29, %v707_v1  ;;  %v669_v37 = vmul.f32 %v2253_v32, %v2819_v47 }
 0x15e   : > { %v577_v36 = vmul.f32 0.0078125, %v522_v11  ;;  %2264 = vrsqrt.f32 %v608_v0  ;;  %992 = vmatmul.mubr.f32.gmra.mrb[4].mxu1 %v761_v23  ;;  %v723_v17 = vmul.f32 %v3005_v27, %v684_v41 }
 0x15f   : > { %v2255_v25 = vpop.eup %2254  ;;  %v624_v61 = vadd.f32 1e-06, %v592_v3  ;;  %997 = vmatprep.mubr.f32.mxu1 %v2532_v56  ;;  %902 = vmatmul.mubr.f32.gmra.mrb[6].mxu0 %v746_v16  ;;  %v708_v43 = vmul.f32 %v3005_v27, %v669_v37 }
 0x160   : > { %v609_v5 = vadd.f32 1e-06, %v577_v36  ;;  %v2257_v55 = vpop.eup %2256  ;;  %v554_v4 = vpop.xlane.xlu1 %553  ;;  %v762_v44 = vadd.f32 %v3011_v29, %v723_v17  ;;  %v685_v13 = vmul.f32 %v2255_v25, %v2822_v6  ;;  %907 = vmatprep.mubr.f32.mxu0 %v2532_v56 }
 0x161   : > { %v524_v42 = vpop.xlane.xlu0 %523  ;;  %2266 = vrsqrt.f32 %v624_v61  ;;  %v593_v7 = vmul.f32 0.0078125, %v554_v4  ;;  %v670_v48 = vmul.f32 %v2257_v55, %v2841_v59  ;;  %v747_v49 = vadd.f32 %v3011_v29, %v708_v43 }
 0x162   : > { %v578_v47 = vmul.f32 0.0078125, %v524_v42  ;;  %2268 = vrsqrt.f32 %v609_v5  ;;  %998 = vmatmul.mubr.f32.gmra.mrb[6].mxu1 %v762_v44  ;;  %v724_v50 = vmul.f32 %v3005_v27, %v685_v13 }
 0x163   : > { %v2259_v52 = vpop.eup %2258  ;;  %v625_v62 = vadd.f32 1e-06, %v593_v7  ;;  %1003 = vmatprep.mubr.f32.mxu1 %v2532_v56  ;;  %v709_v6 = vmul.f32 %v3005_v27, %v670_v48  ;;  %908 = vmatmul.mubr.f32.gmra.mrb[8].mxu0 %v747_v49 }
 0x164   : > { %v610_v53 = vadd.f32 1e-06, %v578_v47  ;;  %v2261_v14 = vpop.eup %2260  ;;  %v556_v20 = vpop.xlane.xlu1 %555  ;;  %v763_v30 = vadd.f32 %v3011_v29, %v724_v50  ;;  %v686_v59 = vmul.f32 %v2259_v52, %v2844_v60  ;;  %913 = vmatprep.mubr.f32.mxu0 %v2532_v56 }
 0x165   : > { %v526_v35 = vpop.xlane.xlu0 %525  ;;  %2270 = vrsqrt.f32 %v625_v62  ;;  %v594_v57 = vmul.f32 0.0078125, %v556_v20  ;;  %v748_v63 = vadd.f32 %v3011_v29, %v709_v6  ;;  %v671_v31 = vmul.f32 %v2261_v14, %v2863_v39 }
 0x166   : > { %v579_v58 = vmul.f32 0.0078125, %v526_v35  ;;  %2272 = vrsqrt.f32 %v610_v53  ;;  %1004 = vmatmul.mubr.f32.gmra.mrb[8].mxu1 %v763_v30  ;;  %v725_v54 = vmul.f32 %v3005_v27, %v686_v59 }
 0x167   : > { %v2263_v0 = vpop.eup %2262  ;;  %v626_v1 = vadd.f32 1e-06, %v594_v57  ;;  %1009 = vmatprep.mubr.f32.mxu1 %v2532_v56  ;;  %914 = vmatmul.mubr.f32.gmra.mrb[10].mxu0 %v748_v63  ;;  %v710_v23 = vmul.f32 %v3005_v27, %v671_v31 }
 0x168   : > { %v611_v32 = vadd.f32 1e-06, %v579_v58  ;;  %v2265_v2 = vpop.eup %2264  ;;  %v558_v60 = vpop.xlane.xlu1 %557  ;;  %v764_v41 = vadd.f32 %v3011_v29, %v725_v54  ;;  %v687_v3 = vmul.f32 %v2263_v0, %v2866_v40  ;;  %919 = vmatprep.mubr.f32.mxu0 %v2532_v56 }
 0x169   : > { %v528_v11 = vpop.xlane.xlu0 %527  ;;  %2274 = vrsqrt.f32 %v626_v1  ;;  %v595_v36 = vmul.f32 0.0078125, %v558_v60  ;;  %v672_v16 = vmul.f32 %v2265_v2, %v2885_v51  ;;  %v749_v37 = vadd.f32 %v3011_v29, %v710_v23 }
 0x16a   : > { %v580_v39 = vmul.f32 0.0078125, %v528_v11  ;;  %2276 = vrsqrt.f32 %v611_v32  ;;  %1010 = vmatmul.mubr.f32.gmra.mrb[10].mxu1 %v764_v41  ;;  %v726_v17 = vmul.f32 %v3005_v27, %v687_v3 }
 0x16b   : > { %v2267_v25 = vpop.eup %2266  ;;  %v627_v61 = vadd.f32 1e-06, %v595_v36  ;;  %1015 = vmatprep.mubr.f32.mxu1 %v2532_v56  ;;  %v711_v40 = vmul.f32 %v3005_v27, %v672_v16  ;;  %920 = vmatmul.mubr.f32.gmra.mrb[12].mxu0 %v749_v37 }
 0x16c   : > { %v612_v5 = vadd.f32 1e-06, %v580_v39  ;;  %v2269_v55 = vpop.eup %2268  ;;  %v560_v4 = vpop.xlane.xlu1 %559  ;;  %v765_v43 = vadd.f32 %v3011_v29, %v726_v17  ;;  %v688_v51 = vmul.f32 %v2267_v25, %v2888_v8  ;;  %925 = vmatprep.mubr.f32.mxu0 %v2532_v56 }
 0x16d   : > { %v530_v42 = vpop.xlane.xlu0 %529  ;;  %2278 = vrsqrt.f32 %v627_v61  ;;  %v596_v44 = vmul.f32 0.0078125, %v560_v4  ;;  %v750_v7 = vadd.f32 %v3011_v29, %v711_v40  ;;  %v673_v47 = vmul.f32 %v2269_v55, %v2907_v10 }
 0x16e   : > { %v581_v13 = vmul.f32 0.0078125, %v530_v42  ;;  %2280 = vrsqrt.f32 %v612_v5  ;;  %1016 = vmatmul.mubr.f32.gmra.mrb[12].mxu1 %v765_v43  ;;  %v727_v48 = vmul.f32 %v3005_v27, %v688_v51 }
 0x16f   : > { %v2271_v49 = vpop.eup %2270  ;;  %v628_v50 = vadd.f32 1e-06, %v596_v44  ;;  %1021 = vmatprep.mubr.f32.mxu1 %v2532_v56  ;;  %926 = vmatmul.mubr.f32.gmra.mrb[14].mxu0 %v750_v7  ;;  %v712_v6 = vmul.f32 %v3005_v27, %v673_v47 }
 0x170   : > { %v613_v52 = vadd.f32 1e-06, %v581_v13  ;;  %v2273_v62 = vpop.eup %2272  ;;  %v562_v8 = vpop.xlane.xlu1 %561  ;;  %v766_v14 = vadd.f32 %v3011_v29, %v727_v48  ;;  %v689_v20 = vmul.f32 %v2271_v49, %v2910_v33  ;;  %931 = vmatprep.mubr.f32.mxu0 %v2532_v56 }
 0x171   : > { %v532_v53 = vpop.xlane.xlu0 %531  ;;  %2282 = vrsqrt.f32 %v628_v50  ;;  %v597_v35 = vmul.f32 0.0078125, %v562_v8  ;;  %v674_v30 = vmul.f32 %v2273_v62, %v2929_v12  ;;  %v751_v59 = vadd.f32 %v3011_v29, %v712_v6 }
 0x172   : > { %v582_v10 = vmul.f32 0.0078125, %v532_v53  ;;  %2284 = vrsqrt.f32 %v613_v52  ;;  %1022 = vmatmul.mubr.f32.gmra.mrb[14].mxu1 %v766_v14  ;;  %v728_v57 = vmul.f32 %v3005_v27, %v689_v20 }
 0x173   : > { %v2275_v58 = vpop.eup %2274  ;;  %v629_v63 = vadd.f32 1e-06, %v597_v35  ;;  %1027 = vmatprep.mubr.f32.mxu1 %v2532_v56  ;;  %v713_v33 = vmul.f32 %v3005_v27, %v674_v30  ;;  %932 = vmatmul.mubr.f32.gmra.mrb[16].mxu0 %v751_v59 }
 0x174   : > { %v614_v31 = vadd.f32 1e-06, %v582_v10  ;;  %v2277_v54 = vpop.eup %2276  ;;  %v564_v0 = vpop.xlane.xlu1 %563  ;;  %v767_v32 = vadd.f32 %v3011_v29, %v728_v57  ;;  %v690_v12 = vmul.f32 %v2275_v58, %v2932_v45  ;;  %937 = vmatprep.mubr.f32.mxu0 %v2532_v56 }
 0x175   : > { %v534_v1 = vpop.xlane.xlu0 %533  ;;  %2286 = vrsqrt.f32 %v629_v63  ;;  %v598_v2 = vmul.f32 0.0078125, %v564_v0  ;;  %v752_v11 = vadd.f32 %v3011_v29, %v713_v33  ;;  %v675_v23 = vmul.f32 %v2277_v54, %v2939_v18 }
 0x176   : > { %v583_v60 = vmul.f32 0.0078125, %v534_v1  ;;  %2288 = vrsqrt.f32 %v614_v31  ;;  %1028 = vmatmul.mubr.f32.gmra.mrb[16].mxu1 %v767_v32  ;;  %v729_v41 = vmul.f32 %v3005_v27, %v690_v12 }
 0x177   : > { %v2279_v3 = vpop.eup %2278  ;;  %v630_v36 = vadd.f32 1e-06, %v598_v2  ;;  %1033 = vmatprep.mubr.f32.mxu1 %v2532_v56  ;;  %938 = vmatmul.mubr.f32.gmra.mrb[18].mxu0 %v752_v11  ;;  %v714_v17 = vmul.f32 %v3005_v27, %v675_v23  ;;  %v809_v23 = vlaneseq }
 0x178   : > { %v615_v39 = vadd.f32 1e-06, %v583_v60  ;;  %v2281_v16 = vpop.eup %2280  ;;  %v566_v45 = vpop.xlane.xlu1 %565  ;;  %v768_v25 = vadd.f32 %v3011_v29, %v729_v41  ;;  %v691_v61 = vmul.f32 %v2279_v3, %v2942_v19  ;;  %943 = vmatprep.mubr.f32.mxu0 %v2532_v56 }
 0x179   : > { %v536_v37 = vpop.xlane.xlu0 %535  ;;  %2290 = vrsqrt.f32 %v630_v36  ;;  %v599_v5 = vmul.f32 0.0078125, %v566_v45  ;;  %v676_v40 = vmul.f32 %v2281_v16, %v2951_v15  ;;  %v753_v55 = vadd.f32 %v3011_v29, %v714_v17 }
 0x17a   : > { %v584_v18 = vmul.f32 0.0078125, %v536_v37  ;;  %2292 = vrsqrt.f32 %v615_v39  ;;  %1034 = vmatmul.mubr.f32.gmra.mrb[18].mxu1 %v768_v25  ;;  %v730_v4 = vmul.f32 %v3005_v27, %v691_v61  ;;  %v810_v41 = vshrl.u32 %v809_v23, 7 }
 0x17b   : > { %v2283_v42 = vpop.eup %2282  ;;  %v631_v43 = vadd.f32 1e-06, %v599_v5  ;;  %1039 = vmatprep.mubr.f32.mxu1 %v2532_v56  ;;  %v715_v19 = vmul.f32 %v3005_v27, %v676_v40  ;;  %944 = vmatmul.mubr.f32.gmra.mrb[20].mxu0 %v753_v55 }
 0x17c   : > { %v616_v51 = vadd.f32 1e-06, %v584_v18  ;;  %v2285_v44 = vpop.eup %2284  ;;  %v568_v13 = vpop.xlane.xlu1 %567  ;;  %v769_v7 = vadd.f32 %v3011_v29, %v730_v4  ;;  %v692_v15 = vmul.f32 %v2283_v42, %v2954_v21  ;;  %949 = vmatprep.mubr.f32.mxu0 %v2532_v56  ;;  %v811_v3 = vsub.s32 0, %v810_v41 }
 0x17d   : > { %2294 = vrsqrt.f32 %v631_v43  ;;  %v600_v47 = vmul.f32 0.0078125, %v568_v13  ;;  %v754_v48 = vadd.f32 %v3011_v29, %v715_v19  ;;  %v677_v49 = vmul.f32 %v2285_v44, %v2961_v34 }
 0x17e   : > { %2296 = vrsqrt.f32 %v616_v51  ;;  %1040 = vmatmul.mubr.f32.gmra.mrb[20].mxu1 %v769_v7  ;;  %v731_v50 = vmul.f32 %v3005_v27, %v692_v15  ;;  %v815_v36 = vsub.s32 1, %v810_v41 }
 0x17f   : > { %v2287_v52 = vpop.eup %2286  ;;  %v632_v62 = vadd.f32 1e-06, %v600_v47  ;;  %1045 = vmatprep.mubr.f32.mxu1 %v2532_v56  ;;  %v716_v8 = vmul.f32 %v3005_v27, %v677_v49  ;;  %950 = vmatmul.mubr.f32.gmra.mrb[22].mxu0 %v754_v48 }
 0x180   : > { %v2289_v53 = vpop.eup %2288  ;;  %v770_v21 = vadd.f32 %v3011_v29, %v731_v50  ;;  %v693_v6 = vmul.f32 %v2287_v52, %v2964_v22  ;;  %955 = vmatprep.mubr.f32.mxu0 %v2532_v56 }
 0x181   : > { %2298 = vrsqrt.f32 %v632_v62  ;;  %v755_v34 = vadd.f32 %v3011_v29, %v716_v8  ;;  %v678_v14 = vmul.f32 %v2289_v53, %v2971_v38 }
 0x182   : > { %1046 = vmatmul.mubr.f32.gmra.mrb[22].mxu1 %v770_v21  ;;  %v732_v20 = vmul.f32 %v3005_v27, %v693_v6 }
 0x183   : > { %v2291_v35 = vpop.eup %2290  ;;  %1051 = vmatprep.mubr.f32.mxu1 %v2532_v56  ;;  %v717_v10 = vmul.f32 %v3005_v27, %v678_v14  ;;  %956 = vmatmul.mubr.f32.gmra.mrb[24].mxu0 %v755_v34 }
 0x184   : > { %v2293_v30 = vpop.eup %2292  ;;  %v771_v59 = vadd.f32 %v3011_v29, %v732_v20  ;;  %v694_v22 = vmul.f32 %v2291_v35, %v2974_v24  ;;  %961 = vmatprep.mubr.f32.mxu0 %v2532_v56 }
 0x185   : > { %v756_v57 = vadd.f32 %v3011_v29, %v717_v10  ;;  %v679_v38 = vmul.f32 %v2293_v30, %v2981_v46 }
 0x186   : > { %1052 = vmatmul.mubr.f32.gmra.mrb[24].mxu1 %v771_v59  ;;  %v733_v58 = vmul.f32 %v3005_v27, %v694_v22 }
 0x187   : > { %v2295_v63 = vpop.eup %2294  ;;  %1057 = vmatprep.mubr.f32.mxu1 %v2532_v56  ;;  %v718_v31 = vmul.f32 %v3005_v27, %v679_v38  ;;  %962 = vmatmul.mubr.f32.gmra.mrb[26].mxu0 %v756_v57 }
 0x188   : > { %v2297_v33 = vpop.eup %2296  ;;  %v772_v54 = vadd.f32 %v3011_v29, %v733_v58  ;;  %v695_v24 = vmul.f32 %v2295_v63, %v2984_v26  ;;  %967 = vmatprep.mubr.f32.mxu0 %v2532_v56 }
 0x189   : > { %v757_v0 = vadd.f32 %v3011_v29, %v718_v31  ;;  %v680_v46 = vmul.f32 %v2297_v33, %v2991_v9 }
 0x18a   : > { %1058 = vmatmul.mubr.f32.gmra.mrb[26].mxu1 %v772_v54  ;;  %v734_v1 = vmul.f32 %v3005_v27, %v695_v24 }
 0x18b   : > { %v2299_v32 = vpop.eup %2298  ;;  %1063 = vmatprep.mubr.f32.mxu1 %v2532_v56  ;;  %v719_v12 = vmul.f32 %v3005_v27, %v680_v46  ;;  %968 = vmatmul.mubr.f32.gmra.mrb[28].mxu0 %v757_v0 }
 0x18c   : > { %v773_v2 = vadd.f32 %v3011_v29, %v734_v1  ;;  %v696_v60 = vmul.f32 %v2299_v32, %v2994_v28  ;;  %973 = vmatprep.mubr.f32.mxu0 %v2532_v56  ;;  %v807_v28 = vld [vmem:[%s4096_s4] sm:$0x3] }
 0x18d   : > { %v758_v26 = vadd.f32 %v3011_v29, %v719_v12  ;;  %v3141_v39 = vrot.slane %v807_v28, %v811_v3  ;;  %v3143_v16 = vrot.slane %v807_v28, %v815_v36 }
 0x18e   : > { %1064 = vmatmul.mubr.f32.gmra.mrb[28].mxu1 %v773_v2  ;;  %v735_v9 = vmul.f32 %v3005_v27, %v696_v60 }
 0x18f   : > { %1069 = vmatprep.mubr.f32.mxu1 %v2532_v56  ;;  %974 = vmatmul.mubr.f32.gmra.mrb[30].mxu0 %v758_v26 }
 0x190   : > { %v774_v11 = vadd.f32 %v3011_v29, %v735_v9 }
 0x192   : > { %1070 = vmatmul.mubr.f32.gmra.mrb[30].mxu1 %v774_v11 }
 0x225   : > { %v885_v45 = vpop.f32.mrb[0].mxu0 }
 0x226   : > { %v3146_v27 = vadd.f32 %v885_v45, %v3141_v39  ;;  %v887_v56 = vpop.f32.mrb[1].mxu0 }
 0x227   : > { %v3149_v29 = vadd.f32 %v887_v56, %v3143_v16 }
 0x228   : > { %v1076_v37 = vmul.f32 %v3146_v27, %v3146_v27 }
 0x229   : > { %v1077_v17 = vmul.f32 %v3149_v29, %v3149_v29  ;;  %v981_v25 = vpop.f32.mrb[0].mxu1 }
 0x22a   : > { %v1140_v61 = vmul.f32 %v1076_v37, %v3146_v27  ;;  %v891_v5 = vpop.f32.mrb[2].mxu0  ;;  %v3157_v18 = vadd.f32 %v981_v25, %v3141_v39  ;;  %v983_v40 = vpop.f32.mrb[1].mxu1 }
 0x22b   : > { %v1141_v55 = vmul.f32 %v1077_v17, %v3149_v29  ;;  %v3161_v4 = vadd.f32 %v891_v5, %v3141_v39  ;;  %v893_v42 = vpop.f32.mrb[3].mxu0  ;;  %v3164_v43 = vadd.f32 %v983_v40, %v3143_v16 }
 0x22c   : > { %v1204_v51 = vmul.f32 0.044715, %v1140_v61  ;;  %v1108_v19 = vmul.f32 %v3157_v18, %v3157_v18  ;;  %v3169_v44 = vadd.f32 %v893_v42, %v3143_v16 }
 0x22d   : > { %v1205_v13 = vmul.f32 0.044715, %v1141_v55  ;;  %v1078_v7 = vmul.f32 %v3161_v4, %v3161_v4  ;;  %v1109_v15 = vmul.f32 %v3164_v43, %v3164_v43  ;;  %v987_v47 = vpop.f32.mrb[2].mxu1 }
 0x22e   : > { %v1268_v48 = vadd.f32 %v1204_v51, %v3146_v27  ;;  %v1172_v49 = vmul.f32 %v1108_v19, %v3157_v18  ;;  %v1079_v50 = vmul.f32 %v3169_v44, %v3169_v44  ;;  %v3180_v52 = vadd.f32 %v987_v47, %v3141_v39  ;;  %v989_v62 = vpop.f32.mrb[3].mxu1  ;;  %v897_v6 = vpop.f32.mrb[4].mxu0 }
 0x22f   : > { %v1269_v8 = vadd.f32 %v1205_v13, %v3149_v29  ;;  %v1142_v53 = vmul.f32 %v1078_v7, %v3161_v4  ;;  %v1173_v21 = vmul.f32 %v1109_v15, %v3164_v43  ;;  %v3186_v34 = vadd.f32 %v989_v62, %v3143_v16  ;;  %v899_v30 = vpop.f32.mrb[5].mxu0 }
 0x230   : > { %v1332_v14 = vmul.f32 0.7978846, %v1268_v48  ;;  %v1236_v20 = vmul.f32 0.044715, %v1172_v49  ;;  %v1143_v35 = vmul.f32 %v1079_v50, %v3169_v44  ;;  %v3190_v10 = vadd.f32 %v897_v6, %v3141_v39 }
 0x231   : > { %v1333_v59 = vmul.f32 0.7978846, %v1269_v8  ;;  %v1206_v22 = vmul.f32 0.044715, %v1142_v53  ;;  %v1237_v57 = vmul.f32 0.044715, %v1173_v21  ;;  %v1110_v38 = vmul.f32 %v3180_v52, %v3180_v52 }
 0x232   : > { %2300 = vtanh.f32 %v1332_v14  ;;  %v1300_v58 = vadd.f32 %v1236_v20, %v3157_v18  ;;  %v1207_v63 = vmul.f32 0.044715, %v1143_v35  ;;  %v1080_v31 = vmul.f32 %v3190_v10, %v3190_v10  ;;  %v993_v33 = vpop.f32.mrb[4].mxu1  ;;  %v903_v46 = vpop.f32.mrb[6].mxu0 }
 0x233   : > { %2302 = vtanh.f32 %v1333_v59  ;;  %v1270_v54 = vadd.f32 %v1206_v22, %v3161_v4  ;;  %v1301_v24 = vadd.f32 %v1237_v57, %v3164_v43  ;;  %v1174_v0 = vmul.f32 %v1110_v38, %v3180_v52  ;;  %v995_v1 = vpop.f32.mrb[5].mxu1  ;;  %v905_v26 = vpop.f32.mrb[7].mxu0 }
 0x234   : > { %v1364_v32 = vmul.f32 0.7978846, %v1300_v58  ;;  %v1271_v12 = vadd.f32 %v1207_v63, %v3169_v44  ;;  %v1144_v2 = vmul.f32 %v1080_v31, %v3190_v10  ;;  %v3203_v60 = vadd.f32 %v899_v30, %v3143_v16 }
 0x235   : > { %v1334_v9 = vmul.f32 0.7978846, %v1270_v54  ;;  %v1365_v11 = vmul.f32 0.7978846, %v1301_v24  ;;  %v1238_v23 = vmul.f32 0.044715, %v1174_v0  ;;  %v1111_v41 = vmul.f32 %v3186_v34, %v3186_v34 }
 0x236   : > { %2304 = vtanh.f32 %v1364_v32  ;;  %v1335_v3 = vmul.f32 0.7978846, %v1271_v12  ;;  %v1208_v28 = vmul.f32 0.044715, %v1144_v2  ;;  %v1081_v36 = vmul.f32 %v3203_v60, %v3203_v60  ;;  %v3209_v45 = vpop.f32.mrb[6].mxu1  ;;  %v3216_v25 = vpop.f32.mrb[8].mxu0 }
 0x237   : > { %2306 = vtanh.f32 %v1334_v9  ;;  %v1302_v56 = vadd.f32 %v1238_v23, %v3180_v52  ;;  %v1175_v37 = vmul.f32 %v1111_v41, %v3186_v34  ;;  %v3214_v17 = vadd.f32 %v903_v46, %v3141_v39  ;;  %v3218_v61 = vpop.f32.mrb[7].mxu1  ;;  %v3225_v42 = vpop.f32.mrb[9].mxu0 }
 0x238   : > { %2308 = vtanh.f32 %v1335_v3  ;;  %v1272_v5 = vadd.f32 %v1208_v28, %v3190_v10  ;;  %v1145_v40 = vmul.f32 %v1081_v36, %v3203_v60  ;;  %v3223_v55 = vadd.f32 %v993_v33, %v3141_v39 }
 0x239   : > { %2310 = vtanh.f32 %v1365_v11  ;;  %v1366_v51 = vmul.f32 0.7978846, %v1302_v56  ;;  %v1239_v19 = vmul.f32 0.044715, %v1175_v37  ;;  %v1082_v13 = vmul.f32 %v3214_v17, %v3214_v17  ;;  %v3230_v7 = vpop.f32.mrb[8].mxu1 }
 0x23a   : > { %v1336_v15 = vmul.f32 0.7978846, %v1272_v5  ;;  %v1209_v47 = vmul.f32 0.044715, %v1145_v40  ;;  %v1112_v48 = vmul.f32 %v3223_v55, %v3223_v55  ;;  %v3235_v49 = vadd.f32 %v905_v26, %v3143_v16  ;;  %v3237_v50 = vpop.f32.mrb[9].mxu1  ;;  %v3244_v21 = vpop.f32.mrb[10].mxu0 }
 0x23b   : > { %2312 = vtanh.f32 %v1366_v51  ;;  %v1303_v62 = vadd.f32 %v1239_v19, %v3186_v34  ;;  %v1146_v8 = vmul.f32 %v1082_v13, %v3214_v17  ;;  %v3242_v53 = vadd.f32 %v995_v1, %v3143_v16  ;;  %v3252_v30 = vpop.f32.mrb[11].mxu0 }
 0x23c   : > { %v2301_v6 = vpop.eup %2300  ;;  %2314 = vtanh.f32 %v1336_v15  ;;  %v1273_v14 = vadd.f32 %v1209_v47, %v3203_v60  ;;  %v1176_v20 = vmul.f32 %v1112_v48, %v3223_v55  ;;  %v1083_v35 = vmul.f32 %v3235_v49, %v3235_v49 }
 0x23d   : > { %v2303_v59 = vpop.eup %2302  ;;  %v1460_v22 = vadd.f32 1.0, %v2301_v6  ;;  %v1367_v57 = vmul.f32 0.7978846, %v1303_v62  ;;  %v1210_v38 = vmul.f32 0.044715, %v1146_v8  ;;  %v1113_v58 = vmul.f32 %v3242_v53, %v3242_v53  ;;  %v3256_v63 = vpop.f32.mrb[10].mxu1 }
 0x23e   : > { %v1461_v31 = vadd.f32 1.0, %v2303_v59  ;;  %v1337_v33 = vmul.f32 0.7978846, %v1273_v14  ;;  %v1240_v54 = vmul.f32 0.044715, %v1176_v20  ;;  %v1147_v24 = vmul.f32 %v1083_v35, %v3235_v49  ;;  %v3259_v0 = vpop.f32.mrb[11].mxu1 }
 0x23f   : > { %v1524_v46 = vmul.f32 0.5, %v1460_v22  ;;  %2316 = vtanh.f32 %v1367_v57  ;;  %v1274_v1 = vadd.f32 %v1210_v38, %v3214_v17  ;;  %v1177_v32 = vmul.f32 %v1113_v58, %v3242_v53  ;;  %v3263_v12 = vpop.f32.mrb[12].mxu0 }
 0x240   : > { %v2305_v2 = vpop.eup %2304  ;;  %v1525_v26 = vmul.f32 0.5, %v1461_v31  ;;  %2318 = vtanh.f32 %v1337_v33  ;;  %v1304_v9 = vadd.f32 %v1240_v54, %v3223_v55  ;;  %v1211_v11 = vmul.f32 0.044715, %v1147_v24  ;;  %v3266_v23 = vpop.f32.mrb[13].mxu0 }
 0x241   : > { %v2307_v41 = vpop.eup %2306  ;;  %v1588_v3 = vmul.f32 %v1524_v46, %v3146_v27  ;;  %v1492_v28 = vadd.f32 1.0, %v2305_v2  ;;  %v1338_v36 = vmul.f32 0.7978846, %v1274_v1  ;;  %v1241_v56 = vmul.f32 0.044715, %v1177_v32  ;;  %v3269_v37 = vpop.f32.mrb[12].mxu1 }
 0x242   : > { %v2309_v5 = vpop.eup %2308  ;;  %v1589_v40 = vmul.f32 %v1525_v26, %v3149_v29  ;;  %v1462_v51 = vadd.f32 1.0, %v2307_v41  ;;  %v1368_v19 = vmul.f32 0.7978846, %v1304_v9  ;;  %v1275_v13 = vadd.f32 %v1211_v11, %v3235_v49  ;;  %v3273_v15 = vpop.f32.mrb[13].mxu1 }
 0x243   : > { %v2311_v47 = vpop.eup %2310  ;;  %1652 = vst [vmem:[%s3276_s17] sm:$0xff] %v1588_v3  ;;  %v1556_v27 = vmul.f32 0.5, %v1492_v28  ;;  %v1463_v48 = vadd.f32 1.0, %v2309_v5  ;;  %2320 = vtanh.f32 %v1338_v36  ;;  %v1305_v62 = vadd.f32 %v1241_v56, %v3242_v53  ;;  %v3280_v8 = vpop.f32.mrb[14].mxu0 }
 0x244   : > { %1653 = vst [vmem:[%s3276_s17 + $0x8] sm:$0xff] %v1589_v40  ;;  %v1526_v29 = vmul.f32 0.5, %v1462_v51  ;;  %v1493_v6 = vadd.f32 1.0, %v2311_v47  ;;  %2322 = vtanh.f32 %v1368_v19  ;;  %v1339_v14 = vmul.f32 0.7978846, %v1275_v13  ;;  %v3283_v20 = vpop.f32.mrb[15].mxu0 }
 0x245   : > { %v2313_v35 = vpop.eup %2312  ;;  %v1620_v59 = vmul.f32 %v1556_v27, %v3157_v18  ;;  %v1527_v22 = vmul.f32 0.5, %v1463_v48  ;;  %v1369_v57 = vmul.f32 0.7978846, %v1305_v62  ;;  %v3288_v38 = vadd.f32 %v3216_v25, %v3141_v39  ;;  %v3290_v58 = vpop.f32.mrb[14].mxu1 }
 0x246   : > { %v2315_v31 = vpop.eup %2314  ;;  %v1590_v33 = vmul.f32 %v1526_v29, %v3161_v4  ;;  %v1557_v54 = vmul.f32 0.5, %v1493_v6  ;;  %v1494_v24 = vadd.f32 1.0, %v2313_v35  ;;  %2324 = vtanh.f32 %v1339_v14  ;;  %v3293_v46 = vpop.f32.mrb[15].mxu1 }
 0x247   : > { %1684 = vst [vmem:[%s3276_s17 + $0x100] sm:$0xff] %v1620_v59  ;;  %v1591_v18 = vmul.f32 %v1527_v22, %v3169_v44  ;;  %v1464_v1 = vadd.f32 1.0, %v2315_v31  ;;  %2326 = vtanh.f32 %v1369_v57  ;;  %v1084_v25 = vmul.f32 %v3288_v38, %v3288_v38  ;;  %v3299_v32 = vpop.f32.mrb[16].mxu0 }
 0x248   : > { %1654 = vst [vmem:[%s3276_s17 + $0x10] sm:$0xff] %v1590_v33  ;;  %v1621_v4 = vmul.f32 %v1557_v54, %v3164_v43  ;;  %v1558_v2 = vmul.f32 0.5, %v1494_v24  ;;  %v3305_v26 = vadd.f32 %v3209_v45, %v3141_v39  ;;  %v3309_v9 = vadd.f32 %v3225_v42, %v3143_v16  ;;  %v3311_v44 = vpop.f32.mrb[17].mxu0 }
 0x249   : > { %v2317_v11 = vpop.eup %2316  ;;  %1655 = vst [vmem:[%s3276_s17 + $0x18] sm:$0xff] %v1591_v18  ;;  %v1528_v41 = vmul.f32 0.5, %v1464_v1  ;;  %v1148_v3 = vmul.f32 %v1084_v25, %v3288_v38  ;;  %v3317_v43 = vadd.f32 %v3218_v61, %v3143_v16  ;;  %v3321_v45 = vadd.f32 %v3244_v21, %v3141_v39  ;;  %v3323_v28 = vpop.f32.mrb[16].mxu1 }
 0x24a   : > { %v2319_v42 = vpop.eup %2318  ;;  %1685 = vst [vmem:[%s3276_s17 + $0x108] sm:$0xff] %v1621_v4  ;;  %v1622_v36 = vmul.f32 %v1558_v2, %v3180_v52  ;;  %v1495_v56 = vadd.f32 1.0, %v2317_v11  ;;  %v1114_v5 = vmul.f32 %v3305_v26, %v3305_v26  ;;  %v1085_v40 = vmul.f32 %v3309_v9, %v3309_v9  ;;  %v3331_v61 = vpop.f32.mrb[17].mxu1 }
 0x24b   : > { %v1592_v51 = vmul.f32 %v1528_v41, %v3190_v10  ;;  %v1465_v21 = vadd.f32 1.0, %v2319_v42  ;;  %v1212_v19 = vmul.f32 0.044715, %v1148_v3  ;;  %v1115_v13 = vmul.f32 %v3317_v43, %v3317_v43  ;;  %v3336_v47 = vpop.f32.mrb[18].mxu0 }
 0x24c   : > { %1686 = vst [vmem:[%s3276_s17 + $0x110] sm:$0xff] %v1622_v36  ;;  %v1559_v52 = vmul.f32 0.5, %v1495_v56  ;;  %v1178_v27 = vmul.f32 %v1114_v5, %v3305_v26  ;;  %v1149_v48 = vmul.f32 %v1085_v40, %v3309_v9  ;;  %v1086_v62 = vmul.f32 %v3321_v45, %v3321_v45  ;;  %v3343_v29 = vpop.f32.mrb[19].mxu0 }
 0x24d   : > { %v2321_v6 = vpop.eup %2320  ;;  %1656 = vst [vmem:[%s3276_s17 + $0x20] sm:$0xff] %v1592_v51  ;;  %v1529_v10 = vmul.f32 0.5, %v1465_v21  ;;  %v1276_v14 = vadd.f32 %v1212_v19, %v3288_v38  ;;  %v1179_v35 = vmul.f32 %v1115_v13, %v3317_v43  ;;  %v3350_v59 = vadd.f32 %v3230_v7, %v3141_v39  ;;  %v3352_v22 = vpop.f32.mrb[18].mxu1 }
 0x24e   : > { %v2323_v57 = vpop.eup %2322  ;;  %v1623_v31 = vmul.f32 %v1559_v52, %v3186_v34  ;;  %v1466_v33 = vadd.f32 1.0, %v2321_v6  ;;  %v1242_v54 = vmul.f32 0.044715, %v1178_v27  ;;  %v1213_v24 = vmul.f32 0.044715, %v1149_v48  ;;  %v3355_v18 = vpop.f32.mrb[19].mxu1 }
 0x24f   : > { %v1593_v1 = vmul.f32 %v1529_v10, %v3203_v60  ;;  %v1496_v25 = vadd.f32 1.0, %v2323_v57  ;;  %v1340_v4 = vmul.f32 0.7978846, %v1276_v14  ;;  %v1243_v2 = vmul.f32 0.044715, %v1179_v35  ;;  %v3358_v11 = vpop.f32.mrb[20].mxu0 }
 0x250   : > { %v2325_v7 = vpop.eup %2324  ;;  %1687 = vst [vmem:[%s3276_s17 + $0x118] sm:$0xff] %v1623_v31  ;;  %v1530_v41 = vmul.f32 0.5, %v1466_v33  ;;  %v1306_v3 = vadd.f32 %v1242_v54, %v3305_v26  ;;  %v1277_v34 = vadd.f32 %v1213_v24, %v3309_v9  ;;  %v1150_v42 = vmul.f32 %v1086_v62, %v3321_v45  ;;  %v3364_v36 = vpop.f32.mrb[21].mxu0 }
 0x251   : > { %v2327_v56 = vpop.eup %2326  ;;  %1657 = vst [vmem:[%s3276_s17 + $0x28] sm:$0xff] %v1593_v1  ;;  %v1560_v60 = vmul.f32 0.5, %v1496_v25  ;;  %v1467_v5 = vadd.f32 1.0, %v2325_v7  ;;  %2328 = vtanh.f32 %v1340_v4  ;;  %v1307_v40 = vadd.f32 %v1243_v2, %v3317_v43  ;;  %v3368_v51 = vpop.f32.mrb[20].mxu1 }
 0x252   : > { %v1594_v21 = vmul.f32 %v1530_v41, %v3214_v17  ;;  %v1497_v19 = vadd.f32 1.0, %v2327_v56  ;;  %v1370_v13 = vmul.f32 0.7978846, %v1306_v3  ;;  %v1341_v52 = vmul.f32 0.7978846, %v1277_v34  ;;  %v3371_v27 = vpop.f32.mrb[21].mxu1 }
 0x253   : > { %v1624_v48 = vmul.f32 %v1560_v60, %v3223_v55  ;;  %v1531_v62 = vmul.f32 0.5, %v1467_v5  ;;  %v1371_v6 = vmul.f32 0.7978846, %v1307_v40  ;;  %v1214_v10 = vmul.f32 0.044715, %v1150_v42  ;;  %v3374_v14 = vpop.f32.mrb[22].mxu0 }
 0x254   : > { %1658 = vst [vmem:[%s3276_s17 + $0x30] sm:$0xff] %v1594_v21  ;;  %v1561_v35 = vmul.f32 0.5, %v1497_v19  ;;  %2330 = vtanh.f32 %v1370_v13  ;;  %v1116_v17 = vmul.f32 %v3350_v59, %v3350_v59  ;;  %v3381_v57 = vadd.f32 %v3252_v30, %v3143_v16  ;;  %v3383_v31 = vpop.f32.mrb[23].mxu0 }
 0x255   : > { %1688 = vst [vmem:[%s3276_s17 + $0x120] sm:$0xff] %v1624_v48  ;;  %v1595_v55 = vmul.f32 %v1531_v62, %v3235_v49  ;;  %2332 = vtanh.f32 %v1341_v52  ;;  %v1278_v33 = vadd.f32 %v1214_v10, %v3321_v45  ;;  %v3390_v54 = vadd.f32 %v3237_v50, %v3143_v16  ;;  %v3392_v24 = vpop.f32.mrb[22].mxu1 }
 0x256   : > { %v1625_v1 = vmul.f32 %v1561_v35, %v3242_v53  ;;  %2334 = vtanh.f32 %v1371_v6  ;;  %v1180_v30 = vmul.f32 %v1116_v17, %v3350_v59  ;;  %v1087_v25 = vmul.f32 %v3381_v57, %v3381_v57  ;;  %v3398_v4 = vpop.f32.mrb[23].mxu1  ;;  %v3411_v7 = vpop.f32.mrb[24].mxu0 }
 0x257   : > { %1659 = vst [vmem:[%s3276_s17 + $0x38] sm:$0xff] %v1595_v55  ;;  %v1342_v49 = vmul.f32 0.7978846, %v1278_v33  ;;  %v1117_v2 = vmul.f32 %v3390_v54, %v3390_v54  ;;  %v3405_v50 = vadd.f32 %v3263_v12, %v3141_v39  ;;  %v3409_v53 = vadd.f32 %v3256_v63, %v3141_v39  ;;  %v3423_v12 = vpop.f32.mrb[25].mxu0 }
 0x258   : > { %1689 = vst [vmem:[%s3276_s17 + $0x128] sm:$0xff] %v1625_v1  ;;  %v1244_v41 = vmul.f32 0.044715, %v1180_v30  ;;  %v1151_v3 = vmul.f32 %v1087_v25, %v3381_v57  ;;  %v3417_v34 = vadd.f32 %v3266_v23, %v3143_v16  ;;  %v3421_v42 = vadd.f32 %v3259_v0, %v3143_v16 }
 0x259   : > { %2336 = vtanh.f32 %v1342_v49  ;;  %v1181_v63 = vmul.f32 %v1117_v2, %v3390_v54  ;;  %v1088_v56 = vmul.f32 %v3405_v50, %v3405_v50  ;;  %v1118_v60 = vmul.f32 %v3409_v53, %v3409_v53  ;;  %v3430_v5 = vpop.f32.mrb[24].mxu1 }
 0x25a   : > { %v1308_v23 = vadd.f32 %v1244_v41, %v3350_v59  ;;  %v1215_v40 = vmul.f32 0.044715, %v1151_v3  ;;  %v1089_v0 = vmul.f32 %v3417_v34, %v3417_v34  ;;  %v1119_v21 = vmul.f32 %v3421_v42, %v3421_v42  ;;  %v3437_v19 = vpop.f32.mrb[25].mxu1  ;;  %v3445_v10 = vpop.f32.mrb[26].mxu0 }
 0x25b   : > { %v2329_v13 = vpop.eup %2328  ;;  %v1245_v52 = vmul.f32 0.044715, %v1181_v63  ;;  %v1152_v48 = vmul.f32 %v1088_v56, %v3405_v50  ;;  %v1182_v62 = vmul.f32 %v1118_v60, %v3409_v53  ;;  %v3443_v6 = vadd.f32 %v3280_v8, %v3141_v39  ;;  %v3449_v1 = vpop.f32.mrb[27].mxu0 }
 0x25c   : > { %v1468_v35 = vadd.f32 1.0, %v2329_v13  ;;  %v1372_v17 = vmul.f32 0.7978846, %v1308_v23  ;;  %v1279_v55 = vadd.f32 %v1215_v40, %v3381_v57  ;;  %v1153_v33 = vmul.f32 %v1089_v0, %v3417_v34 }
 0x25d   : > { %v1309_v30 = vadd.f32 %v1245_v52, %v3390_v54  ;;  %v1216_v25 = vmul.f32 0.044715, %v1152_v48  ;;  %v1246_v49 = vmul.f32 0.044715, %v1182_v62  ;;  %v1183_v2 = vmul.f32 %v1119_v21, %v3421_v42  ;;  %v3453_v41 = vpop.f32.mrb[26].mxu1 }
 0x25e   : > { %4099 = vst [vmem:[#allocation3_spill] sm:$0xff] %v3453_v41  ;;  %v2331_v8 = vpop.eup %2330  ;;  %v1532_v3 = vmul.f32 0.5, %v1468_v35  ;;  %2338 = vtanh.f32 %v1372_v17  ;;  %v1343_v63 = vmul.f32 0.7978846, %v1279_v55  ;;  %v1217_v56 = vmul.f32 0.044715, %v1153_v33 }
 0x25f   : > { %v3455_v60 = vpop.f32.mrb[27].mxu1  ;;  %v2333_v23 = vpop.eup %2332  ;;  %v1498_v40 = vadd.f32 1.0, %v2331_v8  ;;  %v1373_v0 = vmul.f32 0.7978846, %v1309_v30  ;;  %v1280_v13 = vadd.f32 %v1216_v25, %v3405_v50  ;;  %v1310_v52 = vadd.f32 %v1246_v49, %v3409_v53 }
 0x260   : > { %4100 = vst [vmem:[#allocation4_spill] sm:$0xff] %v3455_v60  ;;  %v3459_v48 = vpop.f32.mrb[28].mxu0  ;;  %v2335_v21 = vpop.eup %2334  ;;  %v1596_v62 = vmul.f32 %v1532_v3, %v3288_v38  ;;  %v1469_v41 = vadd.f32 1.0, %v2333_v23  ;;  %2340 = vtanh.f32 %v1343_v63  ;;  %v1281_v35 = vadd.f32 %v1217_v56, %v3417_v34 }
 0x261   : > { %v3463_v17 = vpop.f32.mrb[29].mxu0  ;;  %v1562_v55 = vmul.f32 0.5, %v1498_v40  ;;  %v1499_v33 = vadd.f32 1.0, %v2335_v21  ;;  %2342 = vtanh.f32 %v1373_v0  ;;  %v1344_v8 = vmul.f32 0.7978846, %v1280_v13  ;;  %v3465_v30 = vpop.f32.mrb[28].mxu1 }
 0x262   : > { %1660 = vst [vmem:[%s3276_s17 + $0x40] sm:$0xff] %v1596_v62  ;;  %v1533_v25 = vmul.f32 0.5, %v1469_v41  ;;  %v1374_v49 = vmul.f32 0.7978846, %v1310_v52  ;;  %v1345_v60 = vmul.f32 0.7978846, %v1281_v35  ;;  %v1090_v38 = vmul.f32 %v3443_v6, %v3443_v6 }
 0x263   : > { %v3470_v3 = vpop.f32.mrb[29].mxu1  ;;  %v2337_v63 = vpop.eup %2336  ;;  %v1626_v56 = vmul.f32 %v1562_v55, %v3305_v26  ;;  %v1563_v23 = vmul.f32 0.5, %v1499_v33  ;;  %2344 = vtanh.f32 %v1344_v8  ;;  %v1247_v40 = vmul.f32 0.044715, %v1183_v2 }
 0x264   : > { %4101 = vst [vmem:[#allocation5_spill] sm:$0xff] %v3470_v3  ;;  %v3473_v0 = vpop.f32.mrb[30].mxu0  ;;  %v1597_v13 = vmul.f32 %v1533_v25, %v3309_v9  ;;  %v1470_v41 = vadd.f32 1.0, %v2337_v63  ;;  %2346 = vtanh.f32 %v1374_v49  ;;  %v1154_v52 = vmul.f32 %v1090_v38, %v3443_v6 }
 0x265   : > { %v3477_v21 = vpop.f32.mrb[31].mxu0  ;;  %1690 = vst [vmem:[%s3276_s17 + $0x130] sm:$0xff] %v1626_v56  ;;  %v1627_v62 = vmul.f32 %v1563_v23, %v3317_v43  ;;  %2348 = vtanh.f32 %v1345_v60  ;;  %v1311_v26 = vadd.f32 %v1247_v40, %v3421_v42  ;;  %v3484_v2 = vadd.f32 %v3269_v37, %v3141_v39  ;;  %v3486_v35 = vpop.f32.mrb[30].mxu1 }
 0x266   : > { %4102 = vst [vmem:[#allocation6_spill] sm:$0xff] %v3477_v21  ;;  %4103 = vst [vmem:[#allocation7_spill] sm:$0xff] %v3486_v35  ;;  %v1534_v9 = vmul.f32 0.5, %v1470_v41  ;;  %v1218_v55 = vmul.f32 0.044715, %v1154_v52  ;;  %v3491_v33 = vadd.f32 %v3283_v20, %v3143_v16  ;;  %v3495_v8 = vadd.f32 %v3273_v15, %v3143_v16  ;;  %v3497_v43 = vpop.f32.mrb[31].mxu1 }
 0x267   : > { %1661 = vst [vmem:[%s3276_s17 + $0x48] sm:$0xff] %v1597_v13  ;;  %4104 = vst [vmem:[#allocation8_spill] sm:$0xff] %v3497_v43  ;;  %v1375_v60 = vmul.f32 0.7978846, %v1311_v26  ;;  %v1120_v37 = vmul.f32 %v3484_v2, %v3484_v2  ;;  %v3504_v25 = vadd.f32 %v3299_v32, %v3141_v39  ;;  %v3508_v20 = vadd.f32 %v3290_v58, %v3141_v39 }
 0x268   : > { %1691 = vst [vmem:[%s3276_s17 + $0x138] sm:$0xff] %v1627_v62  ;;  %v2339_v49 = vpop.eup %2338  ;;  %v1598_v15 = vmul.f32 %v1534_v9, %v3321_v45  ;;  %v1282_v38 = vadd.f32 %v1218_v55, %v3443_v6  ;;  %v1091_v63 = vmul.f32 %v3491_v33, %v3491_v33  ;;  %v1121_v56 = vmul.f32 %v3495_v8, %v3495_v8 }
 0x269   : > { %v1500_v23 = vadd.f32 1.0, %v2339_v49  ;;  %2350 = vtanh.f32 %v1375_v60  ;;  %v1184_v32 = vmul.f32 %v1120_v37, %v3484_v2  ;;  %v1092_v40 = vmul.f32 %v3504_v25, %v3504_v25 }
 0x26a   : > { %v2341_v58 = vpop.eup %2340  ;;  %1662 = vst [vmem:[%s3276_s17 + $0x50] sm:$0xff] %v1598_v15  ;;  %v1346_v13 = vmul.f32 0.7978846, %v1282_v38  ;;  %v1155_v45 = vmul.f32 %v1091_v63, %v3491_v33  ;;  %v1185_v41 = vmul.f32 %v1121_v56, %v3495_v8  ;;  %v1122_v52 = vmul.f32 %v3508_v20, %v3508_v20 }
 0x26b   : > { %v2343_v62 = vpop.eup %2342  ;;  %v1564_v26 = vmul.f32 0.5, %v1500_v23  ;;  %v1471_v9 = vadd.f32 1.0, %v2341_v58  ;;  %v1248_v55 = vmul.f32 0.044715, %v1184_v32  ;;  %v1156_v60 = vmul.f32 %v1092_v40, %v3504_v25 }
 0x26c   : > { %v1501_v37 = vadd.f32 1.0, %v2343_v62  ;;  %2352 = vtanh.f32 %v1346_v13  ;;  %v1219_v49 = vmul.f32 0.044715, %v1155_v45  ;;  %v1249_v43 = vmul.f32 0.044715, %v1185_v41 }
 0x26d   : > { %v2345_v15 = vpop.eup %2344  ;;  %v1628_v38 = vmul.f32 %v1564_v26, %v3350_v59  ;;  %v1535_v63 = vmul.f32 0.5, %v1471_v9  ;;  %v1312_v56 = vadd.f32 %v1248_v55, %v3484_v2  ;;  %v1220_v35 = vmul.f32 0.044715, %v1156_v60 }
 0x26e   : > { %v2347_v3 = vpop.eup %2346  ;;  %v1565_v21 = vmul.f32 0.5, %v1501_v37  ;;  %v1472_v23 = vadd.f32 1.0, %v2345_v15  ;;  %v1283_v32 = vadd.f32 %v1219_v49, %v3491_v33  ;;  %v1313_v40 = vadd.f32 %v1249_v43, %v3495_v8 }
 0x26f   : > { %v2349_v58 = vpop.eup %2348  ;;  %1692 = vst [vmem:[%s3276_s17 + $0x140] sm:$0xff] %v1628_v38  ;;  %v1599_v13 = vmul.f32 %v1535_v63, %v3381_v57  ;;  %v1502_v45 = vadd.f32 1.0, %v2347_v3  ;;  %v1376_v41 = vmul.f32 0.7978846, %v1312_v56  ;;  %v1284_v59 = vadd.f32 %v1220_v35, %v3504_v25 }
 0x270   : > { %v1629_v62 = vmul.f32 %v1565_v21, %v3390_v54  ;;  %v1536_v26 = vmul.f32 0.5, %v1472_v23  ;;  %v1473_v9 = vadd.f32 1.0, %v2349_v58  ;;  %v1347_v55 = vmul.f32 0.7978846, %v1283_v32 }
 0x271   : > { %1663 = vst [vmem:[%s3276_s17 + $0x58] sm:$0xff] %v1599_v13  ;;  %v1566_v60 = vmul.f32 0.5, %v1502_v45  ;;  %2354 = vtanh.f32 %v1376_v41  ;;  %v1377_v37 = vmul.f32 0.7978846, %v1313_v40  ;;  %v1348_v43 = vmul.f32 0.7978846, %v1284_v59 }
 0x272   : > { %1693 = vst [vmem:[%s3276_s17 + $0x148] sm:$0xff] %v1629_v62  ;;  %v1600_v49 = vmul.f32 %v1536_v26, %v3405_v50  ;;  %v1537_v57 = vmul.f32 0.5, %v1473_v9  ;;  %2356 = vtanh.f32 %v1347_v55  ;;  %v1186_v3 = vmul.f32 %v1122_v52, %v3508_v20 }
 0x273   : > { %v2351_v35 = vpop.eup %2350  ;;  %v1630_v54 = vmul.f32 %v1566_v60, %v3409_v53  ;;  %2358 = vtanh.f32 %v1377_v37  ;;  %v3540_v21 = vadd.f32 %v3311_v44, %v3143_v16  ;;  %v3544_v15 = vadd.f32 %v3293_v46, %v3143_v16 }
 0x274   : > { %1664 = vst [vmem:[%s3276_s17 + $0x60] sm:$0xff] %v1600_v49  ;;  %v1601_v50 = vmul.f32 %v1537_v57, %v3417_v34  ;;  %v1503_v38 = vadd.f32 1.0, %v2351_v35  ;;  %2360 = vtanh.f32 %v1348_v43  ;;  %v1250_v63 = vmul.f32 0.044715, %v1186_v3 }
 0x275   : > { %1694 = vst [vmem:[%s3276_s17 + $0x150] sm:$0xff] %v1630_v54  ;;  %v1093_v52 = vmul.f32 %v3540_v21, %v3540_v21  ;;  %v1123_v53 = vmul.f32 %v3544_v15, %v3544_v15  ;;  %v3555_v44 = vadd.f32 %v3336_v47, %v3141_v39  ;;  %v3559_v46 = vadd.f32 %v3323_v28, %v3141_v39 }
 0x276   : > { %v2353_v56 = vpop.eup %2352  ;;  %1665 = vst [vmem:[%s3276_s17 + $0x68] sm:$0xff] %v1601_v50  ;;  %v1567_v34 = vmul.f32 0.5, %v1503_v38  ;;  %v1314_v23 = vadd.f32 %v1250_v63, %v3508_v20  ;;  %v3565_v32 = vadd.f32 %v3343_v29, %v3143_v16  ;;  %v3569_v40 = vadd.f32 %v3331_v61, %v3143_v16 }
 0x277   : > { %v1474_v47 = vadd.f32 1.0, %v2353_v56  ;;  %v1157_v58 = vmul.f32 %v1093_v52, %v3540_v21  ;;  %v1187_v28 = vmul.f32 %v1123_v53, %v3544_v15  ;;  %v1094_v13 = vmul.f32 %v3555_v44, %v3555_v44 }
 0x278   : > { %v1631_v45 = vmul.f32 %v1567_v34, %v3421_v42  ;;  %v1378_v41 = vmul.f32 0.7978846, %v1314_v23  ;;  %v1124_v59 = vmul.f32 %v3559_v46, %v3559_v46  ;;  %v1095_v29 = vmul.f32 %v3565_v32, %v3565_v32 }
 0x279   : > { %v1538_v62 = vmul.f32 0.5, %v1474_v47  ;;  %v1221_v61 = vmul.f32 0.044715, %v1157_v58  ;;  %v1251_v26 = vmul.f32 0.044715, %v1187_v28  ;;  %v1158_v9 = vmul.f32 %v1094_v13, %v3555_v44 }
 0x27a   : > { %1695 = vst [vmem:[%s3276_s17 + $0x158] sm:$0xff] %v1631_v45  ;;  %2362 = vtanh.f32 %v1378_v41  ;;  %v1188_v55 = vmul.f32 %v1124_v59, %v3559_v46  ;;  %v1159_v60 = vmul.f32 %v1095_v29, %v3565_v32  ;;  %v1125_v42 = vmul.f32 %v3569_v40, %v3569_v40 }
 0x27b   : > { %v2355_v37 = vpop.eup %2354  ;;  %v1602_v43 = vmul.f32 %v1538_v62, %v3443_v6  ;;  %v1285_v49 = vadd.f32 %v1221_v61, %v3540_v21  ;;  %v1315_v57 = vadd.f32 %v1251_v26, %v3544_v15  ;;  %v1222_v3 = vmul.f32 0.044715, %v1158_v9 }
 0x27c   : > { %v2357_v35 = vpop.eup %2356  ;;  %v1504_v54 = vadd.f32 1.0, %v2355_v37  ;;  %v1252_v50 = vmul.f32 0.044715, %v1188_v55  ;;  %v1223_v38 = vmul.f32 0.044715, %v1159_v60  ;;  %v1189_v63 = vmul.f32 %v1125_v42, %v3569_v40 }
 0x27d   : > { %v2359_v52 = vpop.eup %2358  ;;  %1666 = vst [vmem:[%s3276_s17 + $0x70] sm:$0xff] %v1602_v43  ;;  %v1475_v53 = vadd.f32 1.0, %v2357_v35  ;;  %v1349_v56 = vmul.f32 0.7978846, %v1285_v49  ;;  %v1379_v34 = vmul.f32 0.7978846, %v1315_v57  ;;  %v1286_v23 = vadd.f32 %v1222_v3, %v3555_v44 }
 0x27e   : > { %v2361_v47 = vpop.eup %2360  ;;  %v1568_v6 = vmul.f32 0.5, %v1504_v54  ;;  %v1505_v58 = vadd.f32 1.0, %v2359_v52  ;;  %v1316_v28 = vadd.f32 %v1252_v50, %v3559_v46  ;;  %v1287_v13 = vadd.f32 %v1223_v38, %v3565_v32 }
 0x27f   : > { %v1539_v45 = vmul.f32 0.5, %v1475_v53  ;;  %v1476_v41 = vadd.f32 1.0, %v2361_v47  ;;  %2364 = vtanh.f32 %v1349_v56  ;;  %v1350_v59 = vmul.f32 0.7978846, %v1286_v23 }
 0x280   : > { %v1632_v29 = vmul.f32 %v1568_v6, %v3484_v2  ;;  %v1569_v62 = vmul.f32 0.5, %v1505_v58  ;;  %2366 = vtanh.f32 %v1379_v34  ;;  %v1380_v61 = vmul.f32 0.7978846, %v1316_v28 }
 0x281   : > { %v1603_v26 = vmul.f32 %v1539_v45, %v3491_v33  ;;  %v1540_v9 = vmul.f32 0.5, %v1476_v41  ;;  %2368 = vtanh.f32 %v1350_v59  ;;  %v1351_v55 = vmul.f32 0.7978846, %v1287_v13 }
 0x282   : > { %1696 = vst [vmem:[%s3276_s17 + $0x160] sm:$0xff] %v1632_v29  ;;  %v1633_v60 = vmul.f32 %v1569_v62, %v3495_v8  ;;  %2370 = vtanh.f32 %v1380_v61  ;;  %v1253_v42 = vmul.f32 0.044715, %v1189_v63  ;;  %v3600_v37 = vadd.f32 %v3358_v11, %v3141_v39 }
 0x283   : > { %1667 = vst [vmem:[%s3276_s17 + $0x78] sm:$0xff] %v1603_v26  ;;  %v1604_v2 = vmul.f32 %v1540_v9, %v3504_v25  ;;  %2372 = vtanh.f32 %v1351_v55  ;;  %v3606_v33 = vadd.f32 %v3352_v22, %v3141_v39  ;;  %v3610_v43 = vadd.f32 %v3364_v36, %v3143_v16 }
 0x284   : > { %v2363_v49 = vpop.eup %2362  ;;  %1697 = vst [vmem:[%s3276_s17 + $0x168] sm:$0xff] %v1633_v60  ;;  %v1317_v8 = vadd.f32 %v1253_v42, %v3569_v40  ;;  %v1096_v11 = vmul.f32 %v3600_v37, %v3600_v37  ;;  %v3618_v57 = vadd.f32 %v3355_v18, %v3143_v16  ;;  %v3622_v25 = vadd.f32 %v3374_v14, %v3141_v39 }
 0x285   : > { %1668 = vst [vmem:[%s3276_s17 + $0x80] sm:$0xff] %v1604_v2  ;;  %v1506_v22 = vadd.f32 1.0, %v2363_v49  ;;  %v1126_v36 = vmul.f32 %v3606_v33, %v3606_v33  ;;  %v1097_v3 = vmul.f32 %v3610_v43, %v3610_v43  ;;  %v3631_v35 = vadd.f32 %v3368_v51, %v3141_v39 }
 0x286   : > { %v1381_v54 = vmul.f32 0.7978846, %v1317_v8  ;;  %v1160_v18 = vmul.f32 %v1096_v11, %v3600_v37  ;;  %v1127_v50 = vmul.f32 %v3618_v57, %v3618_v57  ;;  %v1098_v14 = vmul.f32 %v3622_v25, %v3622_v25 }
 0x287   : > { %v1570_v38 = vmul.f32 0.5, %v1506_v22  ;;  %v1190_v63 = vmul.f32 %v1126_v36, %v3606_v33  ;;  %v1161_v52 = vmul.f32 %v1097_v3, %v3610_v43  ;;  %v1128_v53 = vmul.f32 %v3631_v35, %v3631_v35 }
 0x288   : > { %2374 = vtanh.f32 %v1381_v54  ;;  %v1224_v51 = vmul.f32 0.044715, %v1160_v18  ;;  %v1191_v56 = vmul.f32 %v1127_v50, %v3618_v57  ;;  %v1162_v34 = vmul.f32 %v1098_v14, %v3622_v25 }
 0x289   : > { %v2365_v23 = vpop.eup %2364  ;;  %v1634_v47 = vmul.f32 %v1570_v38, %v3508_v20  ;;  %v1254_v6 = vmul.f32 0.044715, %v1190_v63  ;;  %v1225_v58 = vmul.f32 0.044715, %v1161_v52  ;;  %v1192_v28 = vmul.f32 %v1128_v53, %v3631_v35 }
 0x28a   : > { %v2367_v13 = vpop.eup %2366  ;;  %v1477_v45 = vadd.f32 1.0, %v2365_v23  ;;  %v1288_v41 = vadd.f32 %v1224_v51, %v3600_v37  ;;  %v1255_v59 = vmul.f32 0.044715, %v1191_v56  ;;  %v1226_v29 = vmul.f32 0.044715, %v1162_v34 }
 0x28b   : > { %v2369_v62 = vpop.eup %2368  ;;  %1698 = vst [vmem:[%s3276_s17 + $0x170] sm:$0xff] %v1634_v47  ;;  %v1507_v61 = vadd.f32 1.0, %v2367_v13  ;;  %v1318_v26 = vadd.f32 %v1254_v6, %v3606_v33  ;;  %v1289_v9 = vadd.f32 %v1225_v58, %v3610_v43  ;;  %v1256_v55 = vmul.f32 0.044715, %v1192_v28 }
 0x28c   : > { %v2371_v60 = vpop.eup %2370  ;;  %v1541_v20 = vmul.f32 0.5, %v1477_v45  ;;  %v1478_v42 = vadd.f32 1.0, %v2369_v62  ;;  %v1352_v2 = vmul.f32 0.7978846, %v1288_v41  ;;  %v1319_v49 = vadd.f32 %v1255_v59, %v3618_v57 }
 0x28d   : > { %v2373_v8 = vpop.eup %2372  ;;  %v1571_v11 = vmul.f32 0.5, %v1507_v61  ;;  %v1508_v22 = vadd.f32 1.0, %v2371_v60  ;;  %v1382_v36 = vmul.f32 0.7978846, %v1318_v26  ;;  %v1353_v3 = vmul.f32 0.7978846, %v1289_v9 }
 0x28e   : > { %v1605_v54 = vmul.f32 %v1541_v20, %v3540_v21  ;;  %v1542_v18 = vmul.f32 0.5, %v1478_v42  ;;  %v1479_v50 = vadd.f32 1.0, %v2373_v8  ;;  %2376 = vtanh.f32 %v1352_v2 }
 0x28f   : > { %v1635_v14 = vmul.f32 %v1571_v11, %v3544_v15  ;;  %v1572_v38 = vmul.f32 0.5, %v1508_v22  ;;  %2378 = vtanh.f32 %v1382_v36  ;;  %v1383_v63 = vmul.f32 0.7978846, %v1319_v49 }
 0x290   : > { %1669 = vst [vmem:[%s3276_s17 + $0x88] sm:$0xff] %v1605_v54  ;;  %v1606_v52 = vmul.f32 %v1542_v18, %v3555_v44  ;;  %v1543_v53 = vmul.f32 0.5, %v1479_v50  ;;  %2380 = vtanh.f32 %v1353_v3  ;;  %v1290_v51 = vadd.f32 %v1226_v29, %v3622_v25 }
 0x291   : > { %1699 = vst [vmem:[%s3276_s17 + $0x178] sm:$0xff] %v1635_v14  ;;  %v1636_v21 = vmul.f32 %v1572_v38, %v3559_v46  ;;  %2382 = vtanh.f32 %v1383_v63  ;;  %v1320_v56 = vadd.f32 %v1256_v55, %v3631_v35  ;;  %v3661_v15 = vadd.f32 %v3383_v31, %v3143_v16 }
 0x292   : > { %v2375_v34 = vpop.eup %2374  ;;  %1670 = vst [vmem:[%s3276_s17 + $0x90] sm:$0xff] %v1606_v52  ;;  %v1607_v23 = vmul.f32 %v1543_v53, %v3565_v32  ;;  %v1354_v44 = vmul.f32 0.7978846, %v1290_v51  ;;  %v3667_v47 = vadd.f32 %v3371_v27, %v3143_v16  ;;  %v3671_v6 = vadd.f32 %v3411_v7, %v3141_v39 }
 0x293   : > { %1700 = vst [vmem:[%s3276_s17 + $0x180] sm:$0xff] %v1636_v21  ;;  %v1509_v46 = vadd.f32 1.0, %v2375_v34  ;;  %v1384_v58 = vmul.f32 0.7978846, %v1320_v56  ;;  %v1099_v31 = vmul.f32 %v3661_v15, %v3661_v15  ;;  %v3678_v28 = vadd.f32 %v3392_v24, %v3141_v39 }
 0x294   : > { %1671 = vst [vmem:[%s3276_s17 + $0x98] sm:$0xff] %v1607_v23  ;;  %2384 = vtanh.f32 %v1354_v44  ;;  %v1129_v27 = vmul.f32 %v3667_v47, %v3667_v47  ;;  %v1100_v32 = vmul.f32 %v3671_v6, %v3671_v6  ;;  %v3687_v7 = vadd.f32 %v3423_v12, %v3143_v16 }
 0x295   : > { %v1573_v13 = vmul.f32 0.5, %v1509_v46  ;;  %2386 = vtanh.f32 %v1384_v58  ;;  %v1163_v45 = vmul.f32 %v1099_v31, %v3661_v15  ;;  %v1130_v24 = vmul.f32 %v3678_v28, %v3678_v28 }
 0x296   : > { %v1193_v41 = vmul.f32 %v1129_v27, %v3667_v47  ;;  %v1164_v59 = vmul.f32 %v1100_v32, %v3671_v6  ;;  %v1101_v29 = vmul.f32 %v3687_v7, %v3687_v7  ;;  %v3698_v62 = vadd.f32 %v3398_v4, %v3143_v16 }
 0x297   : > { %v1637_v12 = vmul.f32 %v1573_v13, %v3569_v40  ;;  %v1227_v61 = vmul.f32 0.044715, %v1163_v45  ;;  %v1194_v26 = vmul.f32 %v1130_v24, %v3678_v28  ;;  %v3704_v9 = vadd.f32 %v3445_v10, %v3141_v39 }
 0x298   : > { %v2377_v55 = vpop.eup %2376  ;;  %v1257_v60 = vmul.f32 0.044715, %v1193_v41  ;;  %v1228_v20 = vmul.f32 0.044715, %v1164_v59  ;;  %v1165_v42 = vmul.f32 %v1101_v29, %v3687_v7  ;;  %v1131_v2 = vmul.f32 %v3698_v62, %v3698_v62 }
 0x299   : > { %v2379_v49 = vpop.eup %2378  ;;  %1701 = vst [vmem:[%s3276_s17 + $0x188] sm:$0xff] %v1637_v12  ;;  %v1480_v4 = vadd.f32 1.0, %v2377_v55  ;;  %v1291_v40 = vadd.f32 %v1227_v61, %v3661_v15  ;;  %v1258_v8 = vmul.f32 0.044715, %v1194_v26  ;;  %v1102_v11 = vmul.f32 %v3704_v9, %v3704_v9 }
 0x29a   : > { %v2381_v22 = vpop.eup %2380  ;;  %v1510_v10 = vadd.f32 1.0, %v2379_v49  ;;  %v1321_v36 = vadd.f32 %v1257_v60, %v3667_v47  ;;  %v1292_v3 = vadd.f32 %v1228_v20, %v3671_v6  ;;  %v1229_v54 = vmul.f32 0.044715, %v1165_v42 }
 0x29b   : > { %v2383_v18 = vpop.eup %2382  ;;  %v1544_v50 = vmul.f32 0.5, %v1480_v4  ;;  %v1481_v14 = vadd.f32 1.0, %v2381_v22  ;;  %v1355_v38 = vmul.f32 0.7978846, %v1291_v40  ;;  %v1322_v63 = vadd.f32 %v1258_v8, %v3678_v28  ;;  %v4105_v4 = vld [vmem:[#allocation3_spill] sm:$0xff] }
 0x29c   : > { %v1574_v52 = vmul.f32 0.5, %v1510_v10  ;;  %v1511_v53 = vadd.f32 1.0, %v2383_v18  ;;  %v1385_v51 = vmul.f32 0.7978846, %v1321_v36  ;;  %v1356_v21 = vmul.f32 0.7978846, %v1292_v3 }
 0x29d   : > { %v1608_v56 = vmul.f32 %v1544_v50, %v3600_v37  ;;  %v1545_v34 = vmul.f32 0.5, %v1481_v14  ;;  %2388 = vtanh.f32 %v1355_v38  ;;  %v1386_v23 = vmul.f32 0.7978846, %v1322_v63 }
 0x29e   : > { %v2385_v44 = vpop.eup %2384  ;;  %v1638_v46 = vmul.f32 %v1574_v52, %v3606_v33  ;;  %v1575_v58 = vmul.f32 0.5, %v1511_v53  ;;  %2390 = vtanh.f32 %v1385_v51  ;;  %v1293_v31 = vadd.f32 %v1229_v54, %v3687_v7 }
 0x29f   : > { %v2387_v27 = vpop.eup %2386  ;;  %1672 = vst [vmem:[%s3276_s17 + $0xa0] sm:$0xff] %v1608_v56  ;;  %v1609_v32 = vmul.f32 %v1545_v34, %v3610_v43  ;;  %v1482_v13 = vadd.f32 1.0, %v2385_v44  ;;  %2392 = vtanh.f32 %v1356_v21  ;;  %v1195_v37 = vmul.f32 %v1131_v2, %v3698_v62 }
 0x2a0   : > { %1702 = vst [vmem:[%s3276_s17 + $0x190] sm:$0xff] %v1638_v46  ;;  %v1639_v45 = vmul.f32 %v1575_v58, %v3618_v57  ;;  %v1512_v24 = vadd.f32 1.0, %v2387_v27  ;;  %2394 = vtanh.f32 %v1386_v23  ;;  %v1357_v41 = vmul.f32 0.7978846, %v1293_v31 }
 0x2a1   : > { %1673 = vst [vmem:[%s3276_s17 + $0xa8] sm:$0xff] %v1609_v32  ;;  %v1546_v33 = vmul.f32 0.5, %v1482_v13  ;;  %v1259_v59 = vmul.f32 0.044715, %v1195_v37  ;;  %v1166_v29 = vmul.f32 %v1102_v11, %v3704_v9  ;;  %v3728_v12 = vadd.f32 %v3430_v5, %v3141_v39 }
 0x2a2   : > { %1703 = vst [vmem:[%s3276_s17 + $0x198] sm:$0xff] %v1639_v45  ;;  %v1576_v43 = vmul.f32 0.5, %v1512_v24  ;;  %2396 = vtanh.f32 %v1357_v41  ;;  %v3733_v57 = vadd.f32 %v3449_v1, %v3143_v16  ;;  %v3737_v61 = vadd.f32 %v3437_v19, %v3143_v16 }
 0x2a3   : > { %v1610_v26 = vmul.f32 %v1546_v33, %v3622_v25  ;;  %v1323_v55 = vadd.f32 %v1259_v59, %v3698_v62  ;;  %v1230_v60 = vmul.f32 0.044715, %v1166_v29  ;;  %v1132_v5 = vmul.f32 %v3728_v12, %v3728_v12 }
 0x2a4   : > { %v1640_v20 = vmul.f32 %v1576_v43, %v3631_v35  ;;  %v1103_v42 = vmul.f32 %v3733_v57, %v3733_v57  ;;  %v1133_v1 = vmul.f32 %v3737_v61, %v3737_v61  ;;  %v3750_v19 = vadd.f32 %v3459_v48, %v3141_v39 }
 0x2a5   : > { %1674 = vst [vmem:[%s3276_s17 + $0xb0] sm:$0xff] %v1610_v26  ;;  %v1387_v25 = vmul.f32 0.7978846, %v1323_v55  ;;  %v1294_v2 = vadd.f32 %v1230_v60, %v3704_v9  ;;  %v1196_v49 = vmul.f32 %v1132_v5, %v3728_v12  ;;  %v3757_v40 = vadd.f32 %v4105_v4, %v3141_v39  ;;  %v4106_v5 = vld [vmem:[#allocation4_spill] sm:$0xff] }
 0x2a6   : > { %1704 = vst [vmem:[%s3276_s17 + $0x1a0] sm:$0xff] %v1640_v20  ;;  %v1167_v35 = vmul.f32 %v1103_v42, %v3733_v57  ;;  %v1197_v8 = vmul.f32 %v1133_v1, %v3737_v61  ;;  %v1104_v11 = vmul.f32 %v3750_v19, %v3750_v19  ;;  %v3766_v48 = vadd.f32 %v3463_v17, %v3143_v16 }
 0x2a7   : > { %v2389_v22 = vpop.eup %2388  ;;  %2398 = vtanh.f32 %v1387_v25  ;;  %v1358_v10 = vmul.f32 0.7978846, %v1294_v2  ;;  %v1260_v36 = vmul.f32 0.044715, %v1196_v49  ;;  %v1134_v3 = vmul.f32 %v3757_v40, %v3757_v40  ;;  %v4107_v2 = vld [vmem:[#allocation6_spill] sm:$0xff] }
 0x2a8   : > { %v2391_v54 = vpop.eup %2390  ;;  %v1483_v18 = vadd.f32 1.0, %v2389_v22  ;;  %v1231_v50 = vmul.f32 0.044715, %v1167_v35  ;;  %v1261_v14 = vmul.f32 0.044715, %v1197_v8  ;;  %v1168_v38 = vmul.f32 %v1104_v11, %v3750_v19 }
 0x2a9   : > { %v2393_v63 = vpop.eup %2392  ;;  %v1513_v52 = vadd.f32 1.0, %v2391_v54  ;;  %2400 = vtanh.f32 %v1358_v10  ;;  %v1324_v53 = vadd.f32 %v1260_v36, %v3728_v12  ;;  %v1198_v17 = vmul.f32 %v1134_v3, %v3757_v40 }
 0x2aa   : > { %v2395_v51 = vpop.eup %2394  ;;  %v1547_v21 = vmul.f32 0.5, %v1483_v18  ;;  %v1484_v56 = vadd.f32 1.0, %v2393_v63  ;;  %v1295_v34 = vadd.f32 %v1231_v50, %v3733_v57  ;;  %v1325_v23 = vadd.f32 %v1261_v14, %v3737_v61 }
 0x2ab   : > { %v1577_v44 = vmul.f32 0.5, %v1513_v52  ;;  %v1514_v46 = vadd.f32 1.0, %v2395_v51  ;;  %v1388_v58 = vmul.f32 0.7978846, %v1324_v53  ;;  %v1232_v31 = vmul.f32 0.044715, %v1168_v38 }
 0x2ac   : > { %v2397_v27 = vpop.eup %2396  ;;  %v1611_v32 = vmul.f32 %v1547_v21, %v3661_v15  ;;  %v1548_v13 = vmul.f32 0.5, %v1484_v56  ;;  %v1359_v37 = vmul.f32 0.7978846, %v1295_v34  ;;  %v1389_v45 = vmul.f32 0.7978846, %v1325_v23  ;;  %v4108_v53 = vld [vmem:[#allocation5_spill] sm:$0xff] }
 0x2ad   : > { %v1641_v24 = vmul.f32 %v1577_v44, %v3667_v47  ;;  %v1578_v41 = vmul.f32 0.5, %v1514_v46  ;;  %v1485_v33 = vadd.f32 1.0, %v2397_v27  ;;  %2402 = vtanh.f32 %v1388_v58  ;;  %v4109_v23 = vld [vmem:[#allocation7_spill] sm:$0xff] }
 0x2ae   : > { %1675 = vst [vmem:[%s3276_s17 + $0xb8] sm:$0xff] %v1611_v32  ;;  %v1612_v59 = vmul.f32 %v1548_v13, %v3671_v6  ;;  %2404 = vtanh.f32 %v1359_v37  ;;  %v1296_v29 = vadd.f32 %v1232_v31, %v3750_v19  ;;  %v1262_v43 = vmul.f32 0.044715, %v1198_v17 }
 0x2af   : > { %1705 = vst [vmem:[%s3276_s17 + $0x1a8] sm:$0xff] %v1641_v24  ;;  %v1642_v15 = vmul.f32 %v1578_v41, %v3678_v28  ;;  %v1549_v26 = vmul.f32 0.5, %v1485_v33  ;;  %2406 = vtanh.f32 %v1389_v45  ;;  %v1105_v55 = vmul.f32 %v3766_v48, %v3766_v48 }
 0x2b0   : > { %1676 = vst [vmem:[%s3276_s17 + $0xc0] sm:$0xff] %v1612_v59  ;;  %v1360_v47 = vmul.f32 0.7978846, %v1296_v29  ;;  %v1326_v60 = vadd.f32 %v1262_v43, %v3757_v40  ;;  %v3788_v6 = vadd.f32 %v4106_v5, %v3143_v16  ;;  %v3792_v20 = vadd.f32 %v3473_v0, %v3141_v39 }
 0x2b1   : > { %v2399_v42 = vpop.eup %2398  ;;  %1706 = vst [vmem:[%s3276_s17 + $0x1b0] sm:$0xff] %v1642_v15  ;;  %v1613_v28 = vmul.f32 %v1549_v26, %v3687_v7  ;;  %v1169_v1 = vmul.f32 %v1105_v55, %v3766_v48  ;;  %v3799_v25 = vadd.f32 %v3465_v30, %v3141_v39  ;;  %v3803_v49 = vadd.f32 %v4107_v2, %v3143_v16 }
 0x2b2   : > { %v1515_v4 = vadd.f32 1.0, %v2399_v42  ;;  %2408 = vtanh.f32 %v1360_v47  ;;  %v1390_v35 = vmul.f32 0.7978846, %v1326_v60  ;;  %v1135_v0 = vmul.f32 %v3788_v6, %v3788_v6 }
 0x2b3   : > { %v2401_v8 = vpop.eup %2400  ;;  %1677 = vst [vmem:[%s3276_s17 + $0xc8] sm:$0xff] %v1613_v28  ;;  %v1233_v11 = vmul.f32 0.044715, %v1169_v1  ;;  %v1106_v7 = vmul.f32 %v3792_v20, %v3792_v20  ;;  %v1136_v30 = vmul.f32 %v3799_v25, %v3799_v25  ;;  %v1107_v22 = vmul.f32 %v3803_v49, %v3803_v49 }
 0x2b4   : > { %v1579_v10 = vmul.f32 0.5, %v1515_v4  ;;  %v1486_v36 = vadd.f32 1.0, %v2401_v8  ;;  %2410 = vtanh.f32 %v1390_v35  ;;  %v1199_v3 = vmul.f32 %v1135_v0, %v3788_v6 }
 0x2b5   : > { %v1297_v54 = vadd.f32 %v1233_v11, %v3766_v48  ;;  %v1170_v18 = vmul.f32 %v1106_v7, %v3792_v20  ;;  %v1200_v50 = vmul.f32 %v1136_v30, %v3799_v25  ;;  %v1171_v14 = vmul.f32 %v1107_v22, %v3803_v49 }
 0x2b6   : > { %v1643_v38 = vmul.f32 %v1579_v10, %v3698_v62  ;;  %v1550_v63 = vmul.f32 0.5, %v1486_v36  ;;  %v1263_v52 = vmul.f32 0.044715, %v1199_v3  ;;  %v3822_v17 = vadd.f32 %v4108_v53, %v3143_v16 }
 0x2b7   : > { %v2403_v51 = vpop.eup %2402  ;;  %v1361_v21 = vmul.f32 0.7978846, %v1297_v54  ;;  %v1234_v56 = vmul.f32 0.044715, %v1170_v18  ;;  %v1264_v34 = vmul.f32 0.044715, %v1200_v50  ;;  %v3826_v44 = vadd.f32 %v4109_v23, %v3141_v39 }
 0x2b8   : > { %v2405_v46 = vpop.eup %2404  ;;  %1707 = vst [vmem:[%s3276_s17 + $0x1b8] sm:$0xff] %v1643_v38  ;;  %v1614_v58 = vmul.f32 %v1550_v63, %v3704_v9  ;;  %v1516_v62 = vadd.f32 1.0, %v2403_v51  ;;  %v1327_v31 = vadd.f32 %v1263_v52, %v3788_v6  ;;  %v1235_v27 = vmul.f32 0.044715, %v1171_v14 }
 0x2b9   : > { %v2407_v32 = vpop.eup %2406  ;;  %v1487_v13 = vadd.f32 1.0, %v2405_v46  ;;  %2412 = vtanh.f32 %v1361_v21  ;;  %v1298_v37 = vadd.f32 %v1234_v56, %v3792_v20  ;;  %v1328_v45 = vadd.f32 %v1264_v34, %v3799_v25 }
 0x2ba   : > { %1678 = vst [vmem:[%s3276_s17 + $0xd0] sm:$0xff] %v1614_v58  ;;  %v1580_v24 = vmul.f32 0.5, %v1516_v62  ;;  %v1517_v41 = vadd.f32 1.0, %v2407_v32  ;;  %v1391_v39 = vmul.f32 0.7978846, %v1327_v31  ;;  %v1299_v33 = vadd.f32 %v1235_v27, %v3803_v49 }
 0x2bb   : > { %v1551_v59 = vmul.f32 0.5, %v1487_v13  ;;  %v1362_v9 = vmul.f32 0.7978846, %v1298_v37  ;;  %v1392_v29 = vmul.f32 0.7978846, %v1328_v45  ;;  %v1137_v43 = vmul.f32 %v3822_v17, %v3822_v17 }
 0x2bc   : > { %v2409_v15 = vpop.eup %2408  ;;  %v1644_v26 = vmul.f32 %v1580_v24, %v3728_v12  ;;  %v1581_v55 = vmul.f32 0.5, %v1517_v41  ;;  %2414 = vtanh.f32 %v1391_v39  ;;  %v1363_v47 = vmul.f32 0.7978846, %v1299_v33  ;;  %v4110_v12 = vld [vmem:[#allocation8_spill] sm:$0xff] }
 0x2bd   : > { %v1615_v60 = vmul.f32 %v1551_v59, %v3733_v57  ;;  %v1488_v5 = vadd.f32 1.0, %v2409_v15  ;;  %2416 = vtanh.f32 %v1362_v9  ;;  %v1201_v42 = vmul.f32 %v1137_v43, %v3822_v17 }
 0x2be   : > { %v2411_v28 = vpop.eup %2410  ;;  %1708 = vst [vmem:[%s3276_s17 + $0x1c0] sm:$0xff] %v1644_v26  ;;  %v1645_v1 = vmul.f32 %v1581_v55, %v3737_v61  ;;  %2418 = vtanh.f32 %v1392_v29  ;;  %v1138_v2 = vmul.f32 %v3826_v44, %v3826_v44  ;;  %v3846_v4 = vadd.f32 %v4110_v12, %v3143_v16 }
 0x2bf   : > { %1679 = vst [vmem:[%s3276_s17 + $0xd8] sm:$0xff] %v1615_v60  ;;  %v1552_v35 = vmul.f32 0.5, %v1488_v5  ;;  %v1518_v57 = vadd.f32 1.0, %v2411_v28  ;;  %2420 = vtanh.f32 %v1363_v47  ;;  %v1265_v0 = vmul.f32 0.044715, %v1201_v42 }
 0x2c0   : > { %1709 = vst [vmem:[%s3276_s17 + $0x1c8] sm:$0xff] %v1645_v1  ;;  %v1202_v8 = vmul.f32 %v1138_v2, %v3826_v44  ;;  %v1139_v61 = vmul.f32 %v3846_v4, %v3846_v4 }
 0x2c1   : > { %v1616_v11 = vmul.f32 %v1552_v35, %v3750_v19  ;;  %v1582_v7 = vmul.f32 0.5, %v1518_v57  ;;  %v1329_v30 = vadd.f32 %v1265_v0, %v3822_v17 }
 0x2c2   : > { %v1266_v22 = vmul.f32 0.044715, %v1202_v8  ;;  %v1203_v16 = vmul.f32 %v1139_v61, %v3846_v4 }
 0x2c3   : > { %v2413_v10 = vpop.eup %2412  ;;  %1680 = vst [vmem:[%s3276_s17 + $0xe0] sm:$0xff] %v1616_v11  ;;  %v1646_v36 = vmul.f32 %v1582_v7, %v3757_v40  ;;  %v1393_v3 = vmul.f32 0.7978846, %v1329_v30 }
 0x2c4   : > { %v1489_v54 = vadd.f32 1.0, %v2413_v10  ;;  %v1330_v18 = vadd.f32 %v1266_v22, %v3826_v44  ;;  %v1267_v50 = vmul.f32 0.044715, %v1203_v16 }
 0x2c5   : > { %1710 = vst [vmem:[%s3276_s17 + $0x1d0] sm:$0xff] %v1646_v36  ;;  %2422 = vtanh.f32 %v1393_v3 }
 0x2c6   : > { %v2415_v14 = vpop.eup %2414  ;;  %v1553_v19 = vmul.f32 0.5, %v1489_v54  ;;  %v1394_v38 = vmul.f32 0.7978846, %v1330_v18  ;;  %v1331_v63 = vadd.f32 %v1267_v50, %v3846_v4 }
 0x2c7   : > { %v2417_v52 = vpop.eup %2416  ;;  %v1519_v53 = vadd.f32 1.0, %v2415_v14 }
 0x2c8   : > { %v2419_v51 = vpop.eup %2418  ;;  %v1617_v21 = vmul.f32 %v1553_v19, %v3766_v48  ;;  %v1490_v40 = vadd.f32 1.0, %v2417_v52  ;;  %2424 = vtanh.f32 %v1394_v38  ;;  %v1395_v56 = vmul.f32 0.7978846, %v1331_v63 }
 0x2c9   : > { %v2421_v34 = vpop.eup %2420  ;;  %v1583_v23 = vmul.f32 0.5, %v1519_v53  ;;  %v1520_v46 = vadd.f32 1.0, %v2419_v51 }
 0x2ca   : > { %1681 = vst [vmem:[%s3276_s17 + $0xe8] sm:$0xff] %v1617_v21  ;;  %v1554_v58 = vmul.f32 0.5, %v1490_v40  ;;  %v1491_v62 = vadd.f32 1.0, %v2421_v34  ;;  %2426 = vtanh.f32 %v1395_v56 }
 0x2cb   : > { %v1647_v31 = vmul.f32 %v1583_v23, %v3788_v6  ;;  %v1584_v27 = vmul.f32 0.5, %v1520_v46 }
 0x2cc   : > { %v1618_v32 = vmul.f32 %v1554_v58, %v3792_v20  ;;  %v1555_v13 = vmul.f32 0.5, %v1491_v62 }
 0x2cd   : > { %1711 = vst [vmem:[%s3276_s17 + $0x1d8] sm:$0xff] %v1647_v31  ;;  %v1648_v48 = vmul.f32 %v1584_v27, %v3799_v25 }
 0x2ce   : > { %1682 = vst [vmem:[%s3276_s17 + $0xf0] sm:$0xff] %v1618_v32  ;;  %v1619_v37 = vmul.f32 %v1555_v13, %v3803_v49 }
 0x2cf   : > { %v2423_v45 = vpop.eup %2422  ;;  %1712 = vst [vmem:[%s3276_s17 + $0x1e0] sm:$0xff] %v1648_v48 }
 0x2d0   : > { %1683 = vst [vmem:[%s3276_s17 + $0xf8] sm:$0xff] %v1619_v37  ;;  %v1521_v24 = vadd.f32 1.0, %v2423_v45 }
 0x2d2   : > { %v2425_v41 = vpop.eup %2424  ;;  %v1585_v39 = vmul.f32 0.5, %v1521_v24 }
 0x2d3   : > { %v1522_v6 = vadd.f32 1.0, %v2425_v41 }
 0x2d4   : > { %v2427_v33 = vpop.eup %2426  ;;  %v1649_v20 = vmul.f32 %v1585_v39, %v3822_v17 }
 0x2d5   : > { %v1586_v59 = vmul.f32 0.5, %v1522_v6  ;;  %v1523_v9 = vadd.f32 1.0, %v2427_v33  ;;  %1722 = sbr.rel (!%p2595_p3) target bundleno = 804 (0x324), region = 44 }
 0x2d6   : > { %1713 = vst [vmem:[%s3276_s17 + $0x1e8] sm:$0xff] %v1649_v20 }
 0x2d7   : > { %v1650_v25 = vmul.f32 %v1586_v59, %v3826_v44  ;;  %v1587_v29 = vmul.f32 0.5, %v1523_v9 }
 0x2d9   : > { %1714 = vst [vmem:[%s3276_s17 + $0x1f0] sm:$0xff] %v1650_v25  ;;  %v1651_v49 = vmul.f32 %v1587_v29, %v3846_v4 }
 0x2db   : > { %1715 = vst [vmem:[%s3276_s17 + $0x1f8] sm:$0xff] %v1651_v49 }
 0x2dc   : > { %s4123_s23 = smov (!%p1726_p9, %s1725_s23), 32 }
 0x2dd   : > { %s2078_s7 = sshll.u32 %s4123_s23, 8 }
 0x2de   : > { %p2066_p10 = scmp.eq.s32.totalorder %s2078_s7, 0 }
 0x2df   : > { %s3890_s8 = sshrl.u32 (!%p2066_p10), %s4123_s23, 5 }
 0x2e0   : > { %1739 = sbr.rel (%p2066_p10) target bundleno = 804 (0x324), region = 48  ;;  %p2067_p11 = scmp.le.s32.totalorder (!%p2066_p10), %s3890_s8, 0 }
 0x2e7   : > { %1974 = sbr.rel (%p2067_p11) target bundleno = 783 (0x30f), region = 102  ;;  %s4111_s20 = smov (!%p2067_p11), %s3884_s6 }
 0x2e8   : > { %s4112_s26 = smov (!%p2067_p11), %s3276_s17  ;;  %s3899_s29 = smov (!%p2067_p11), 0  }
 0x2e9   : > { %s3901_s9 = smov (!%p2067_p11), 0  }
 0x2ee LB: >> { %v1752_v17 = vld [vmem:[%s2506_s26] sm:$0xff]  ;;  %v1754_v44 = vld [vmem:[%s2506_s26 + $0x10] sm:$0xff]  ;;  %s1880_s10 = sadd.s32 1, %s2510_s29  ;;  %v1816_v19 = vld [vmem:[%s2506_s26 + $0x8] sm:$0xff]  ;;  %s1746_s9 = sadd.s32 1, %s2514_s9   ;;  %s2514_s9 = sphi %s3901_s9, %s1746_s9   ;;  %s2510_s29 = sphi %s3899_s29, %s4115_s29   ;;  %s2506_s26 = sphi %s4112_s26, %s4114_s26   ;;  %s2502_s20 = sphi %s4111_s20, %s4113_s20  }
 0x2ef   : >> { %v1756_v43 = vld [vmem:[%s2506_s26 + $0x20] sm:$0xff]  ;;  %1753 = vst [vmem:[%s2502_s20] sm:$0xff] %v1752_v17  ;;  %1755 = vst [vmem:[%s2502_s20 + $0x10] sm:$0xff] %v1754_v44  ;;  %v1758_v15 = vld [vmem:[%s2506_s26 + $0x30] sm:$0xff]  ;;  %p1881_p12 = scmp.ge.s32.totalorder %s1880_s10, %s3890_s8  ;;  %p1745_p13 = scmp.ge.s32.totalorder %s1746_s9, %s3890_s8 }
 0x2f0   : >> { %1757 = vst [vmem:[%s2502_s20 + $0x20] sm:$0xff] %v1756_v43  ;;  %v1760_v26 = vld [vmem:[%s2506_s26 + $0x40] sm:$0xff]  ;;  %v1762_v55 = vld [vmem:[%s2506_s26 + $0x50] sm:$0xff]  ;;  %1759 = vst [vmem:[%s2502_s20 + $0x30] sm:$0xff] %v1758_v15 }
 0x2f1   : >> { %1761 = vst [vmem:[%s2502_s20 + $0x40] sm:$0xff] %v1760_v26  ;;  %1763 = vst [vmem:[%s2502_s20 + $0x50] sm:$0xff] %v1762_v55  ;;  %v1764_v47 = vld [vmem:[%s2506_s26 + $0x60] sm:$0xff]  ;;  %v1766_v60 = vld [vmem:[%s2506_s26 + $0x70] sm:$0xff]  ;;  %s4125_s10 = smov (%p1881_p12, %s1880_s10), 0 }
 0x2f2   : >> { %v1768_v5 = vld [vmem:[%s2506_s26 + $0x80] sm:$0xff]  ;;  %1765 = vst [vmem:[%s2502_s20 + $0x60] sm:$0xff] %v1764_v47  ;;  %1767 = vst [vmem:[%s2502_s20 + $0x70] sm:$0xff] %v1766_v60  ;;  %v1770_v42 = vld [vmem:[%s2506_s26 + $0x90] sm:$0xff]  ;;  %s2068_s11 = sshll.u32 %s4125_s10, 9  ;;  %s4115_s29 = smov %s4125_s10 }
 0x2f3   : >> { %1769 = vst [vmem:[%s2502_s20 + $0x80] sm:$0xff] %v1768_v5  ;;  %v1772_v28 = vld [vmem:[%s2506_s26 + $0xa0] sm:$0xff]  ;;  %v1774_v1 = vld [vmem:[%s2506_s26 + $0xb0] sm:$0xff]  ;;  %1771 = vst [vmem:[%s2502_s20 + $0x90] sm:$0xff] %v1770_v42  ;;  %s3957_s12 = scalar_lea.vmem %s3276_s17, %s2068_s11 [#allocation2]   ;;  %s3960_s13 = scalar_lea.vmem %s3884_s6, %s2068_s11  }
 0x2f4   : >> { %1773 = vst [vmem:[%s2502_s20 + $0xa0] sm:$0xff] %v1772_v28  ;;  %1775 = vst [vmem:[%s2502_s20 + $0xb0] sm:$0xff] %v1774_v1  ;;  %v1776_v2 = vld [vmem:[%s2506_s26 + $0xc0] sm:$0xff]  ;;  %v1778_v12 = vld [vmem:[%s2506_s26 + $0xd0] sm:$0xff] }
 0x2f5   : >> { %v1780_v4 = vld [vmem:[%s2506_s26 + $0xe0] sm:$0xff]  ;;  %1777 = vst [vmem:[%s2502_s20 + $0xc0] sm:$0xff] %v1776_v2  ;;  %1779 = vst [vmem:[%s2502_s20 + $0xd0] sm:$0xff] %v1778_v12  ;;  %v1782_v35 = vld [vmem:[%s2506_s26 + $0xf0] sm:$0xff] }
 0x2f6   : >> { %1781 = vst [vmem:[%s2502_s20 + $0xe0] sm:$0xff] %v1780_v4  ;;  %v1784_v57 = vld [vmem:[%s2506_s26 + $0x100] sm:$0xff]  ;;  %v1786_v0 = vld [vmem:[%s2506_s26 + $0x110] sm:$0xff]  ;;  %1783 = vst [vmem:[%s2502_s20 + $0xf0] sm:$0xff] %v1782_v35 }
 0x2f7   : >> { %1785 = vst [vmem:[%s2502_s20 + $0x100] sm:$0xff] %v1784_v57  ;;  %1787 = vst [vmem:[%s2502_s20 + $0x110] sm:$0xff] %v1786_v0  ;;  %v1788_v8 = vld [vmem:[%s2506_s26 + $0x120] sm:$0xff]  ;;  %v1790_v61 = vld [vmem:[%s2506_s26 + $0x130] sm:$0xff] }
 0x2f8   : >> { %v1792_v11 = vld [vmem:[%s2506_s26 + $0x140] sm:$0xff]  ;;  %1789 = vst [vmem:[%s2502_s20 + $0x120] sm:$0xff] %v1788_v8  ;;  %1791 = vst [vmem:[%s2502_s20 + $0x130] sm:$0xff] %v1790_v61  ;;  %v1794_v7 = vld [vmem:[%s2506_s26 + $0x150] sm:$0xff] }
 0x2f9   : >> { %1793 = vst [vmem:[%s2502_s20 + $0x140] sm:$0xff] %v1792_v11  ;;  %v1796_v30 = vld [vmem:[%s2506_s26 + $0x160] sm:$0xff]  ;;  %v1798_v22 = vld [vmem:[%s2506_s26 + $0x170] sm:$0xff]  ;;  %1795 = vst [vmem:[%s2502_s20 + $0x150] sm:$0xff] %v1794_v7 }
 0x2fa   : >> { %1797 = vst [vmem:[%s2502_s20 + $0x160] sm:$0xff] %v1796_v30  ;;  %1799 = vst [vmem:[%s2502_s20 + $0x170] sm:$0xff] %v1798_v22  ;;  %v1800_v16 = vld [vmem:[%s2506_s26 + $0x180] sm:$0xff]  ;;  %v1802_v10 = vld [vmem:[%s2506_s26 + $0x190] sm:$0xff] }
 0x2fb   : >> { %v1804_v36 = vld [vmem:[%s2506_s26 + $0x1a0] sm:$0xff]  ;;  %1801 = vst [vmem:[%s2502_s20 + $0x180] sm:$0xff] %v1800_v16  ;;  %1803 = vst [vmem:[%s2502_s20 + $0x190] sm:$0xff] %v1802_v10  ;;  %v1806_v3 = vld [vmem:[%s2506_s26 + $0x1b0] sm:$0xff] }
 0x2fc   : >> { %1805 = vst [vmem:[%s2502_s20 + $0x1a0] sm:$0xff] %v1804_v36  ;;  %v1808_v54 = vld [vmem:[%s2506_s26 + $0x1c0] sm:$0xff]  ;;  %v1810_v18 = vld [vmem:[%s2506_s26 + $0x1d0] sm:$0xff]  ;;  %1807 = vst [vmem:[%s2502_s20 + $0x1b0] sm:$0xff] %v1806_v3 }
 0x2fd   : >> { %1809 = vst [vmem:[%s2502_s20 + $0x1c0] sm:$0xff] %v1808_v54  ;;  %1811 = vst [vmem:[%s2502_s20 + $0x1d0] sm:$0xff] %v1810_v18  ;;  %v1812_v50 = vld [vmem:[%s2506_s26 + $0x1e0] sm:$0xff]  ;;  %v1814_v14 = vld [vmem:[%s2506_s26 + $0x1f0] sm:$0xff] }
 0x2fe   : >> { %1813 = vst [vmem:[%s2502_s20 + $0x1e0] sm:$0xff] %v1812_v50  ;;  %1815 = vst [vmem:[%s2502_s20 + $0x1f0] sm:$0xff] %v1814_v14  ;;  %v1818_v38 = vld [vmem:[%s2506_s26 + $0x18] sm:$0xff]  ;;  %v1820_v63 = vld [vmem:[%s2506_s26 + $0x28] sm:$0xff] }
 0x2ff   : >> { %1817 = vst [vmem:[%s2502_s20 + $0x8] sm:$0xff] %v1816_v19  ;;  %v1822_v52 = vld [vmem:[%s2506_s26 + $0x38] sm:$0xff]  ;;  %1819 = vst [vmem:[%s2502_s20 + $0x18] sm:$0xff] %v1818_v38  ;;  %v1824_v53 = vld [vmem:[%s2506_s26 + $0x48] sm:$0xff] }
 0x300   : >> { %1821 = vst [vmem:[%s2502_s20 + $0x28] sm:$0xff] %v1820_v63  ;;  %1823 = vst [vmem:[%s2502_s20 + $0x38] sm:$0xff] %v1822_v52  ;;  %v1826_v51 = vld [vmem:[%s2506_s26 + $0x58] sm:$0xff]  ;;  %v1828_v21 = vld [vmem:[%s2506_s26 + $0x68] sm:$0xff] }
 0x301   : >> { %1825 = vst [vmem:[%s2502_s20 + $0x48] sm:$0xff] %v1824_v53  ;;  %1827 = vst [vmem:[%s2502_s20 + $0x58] sm:$0xff] %v1826_v51  ;;  %v1830_v40 = vld [vmem:[%s2506_s26 + $0x78] sm:$0xff]  ;;  %v1832_v56 = vld [vmem:[%s2506_s26 + $0x88] sm:$0xff] }
 0x302   : >> { %1829 = vst [vmem:[%s2502_s20 + $0x68] sm:$0xff] %v1828_v21  ;;  %v1834_v34 = vld [vmem:[%s2506_s26 + $0x98] sm:$0xff]  ;;  %1831 = vst [vmem:[%s2502_s20 + $0x78] sm:$0xff] %v1830_v40  ;;  %v1836_v23 = vld [vmem:[%s2506_s26 + $0xa8] sm:$0xff] }
 0x303   : >> { %1833 = vst [vmem:[%s2502_s20 + $0x88] sm:$0xff] %v1832_v56  ;;  %1835 = vst [vmem:[%s2502_s20 + $0x98] sm:$0xff] %v1834_v34  ;;  %v1838_v46 = vld [vmem:[%s2506_s26 + $0xb8] sm:$0xff]  ;;  %v1840_v58 = vld [vmem:[%s2506_s26 + $0xc8] sm:$0xff] }
 0x304   : >> { %1837 = vst [vmem:[%s2502_s20 + $0xa8] sm:$0xff] %v1836_v23  ;;  %1839 = vst [vmem:[%s2502_s20 + $0xb8] sm:$0xff] %v1838_v46  ;;  %v1842_v62 = vld [vmem:[%s2506_s26 + $0xd8] sm:$0xff]  ;;  %v1844_v31 = vld [vmem:[%s2506_s26 + $0xe8] sm:$0xff] }
 0x305   : >> { %1841 = vst [vmem:[%s2502_s20 + $0xc8] sm:$0xff] %v1840_v58  ;;  %v1846_v27 = vld [vmem:[%s2506_s26 + $0xf8] sm:$0xff]  ;;  %1843 = vst [vmem:[%s2502_s20 + $0xd8] sm:$0xff] %v1842_v62  ;;  %v1848_v32 = vld [vmem:[%s2506_s26 + $0x108] sm:$0xff] }
 0x306   : >> { %1845 = vst [vmem:[%s2502_s20 + $0xe8] sm:$0xff] %v1844_v31  ;;  %1847 = vst [vmem:[%s2502_s20 + $0xf8] sm:$0xff] %v1846_v27  ;;  %v1850_v13 = vld [vmem:[%s2506_s26 + $0x118] sm:$0xff]  ;;  %v1852_v48 = vld [vmem:[%s2506_s26 + $0x128] sm:$0xff] }
 0x307   : >> { %1849 = vst [vmem:[%s2502_s20 + $0x108] sm:$0xff] %v1848_v32  ;;  %1851 = vst [vmem:[%s2502_s20 + $0x118] sm:$0xff] %v1850_v13  ;;  %v1854_v37 = vld [vmem:[%s2506_s26 + $0x138] sm:$0xff]  ;;  %v1856_v45 = vld [vmem:[%s2506_s26 + $0x148] sm:$0xff] }
 0x308   : >> { %1853 = vst [vmem:[%s2502_s20 + $0x128] sm:$0xff] %v1852_v48  ;;  %v1858_v24 = vld [vmem:[%s2506_s26 + $0x158] sm:$0xff]  ;;  %1855 = vst [vmem:[%s2502_s20 + $0x138] sm:$0xff] %v1854_v37  ;;  %v1860_v41 = vld [vmem:[%s2506_s26 + $0x168] sm:$0xff]  ;;  %1748 = sbr.rel (!%p1745_p13) target bundleno = 750 (0x2ee), region = 108 }
 0x309   : >> { %1857 = vst [vmem:[%s2502_s20 + $0x148] sm:$0xff] %v1856_v45  ;;  %1859 = vst [vmem:[%s2502_s20 + $0x158] sm:$0xff] %v1858_v24  ;;  %v1862_v39 = vld [vmem:[%s2506_s26 + $0x178] sm:$0xff]  ;;  %v1864_v6 = vld [vmem:[%s2506_s26 + $0x188] sm:$0xff] }
 0x30a   : >> { %1861 = vst [vmem:[%s2502_s20 + $0x168] sm:$0xff] %v1860_v41  ;;  %1863 = vst [vmem:[%s2502_s20 + $0x178] sm:$0xff] %v1862_v39  ;;  %v1866_v33 = vld [vmem:[%s2506_s26 + $0x198] sm:$0xff]  ;;  %v1868_v20 = vld [vmem:[%s2506_s26 + $0x1a8] sm:$0xff] }
 0x30b   : >> { %1865 = vst [vmem:[%s2502_s20 + $0x188] sm:$0xff] %v1864_v6  ;;  %v1870_v59 = vld [vmem:[%s2506_s26 + $0x1b8] sm:$0xff]  ;;  %1867 = vst [vmem:[%s2502_s20 + $0x198] sm:$0xff] %v1866_v33  ;;  %v1872_v9 = vld [vmem:[%s2506_s26 + $0x1c8] sm:$0xff] }
 0x30c   : >> { %1869 = vst [vmem:[%s2502_s20 + $0x1a8] sm:$0xff] %v1868_v20  ;;  %1871 = vst [vmem:[%s2502_s20 + $0x1b8] sm:$0xff] %v1870_v59  ;;  %v1874_v25 = vld [vmem:[%s2506_s26 + $0x1d8] sm:$0xff]  ;;  %v1876_v29 = vld [vmem:[%s2506_s26 + $0x1e8] sm:$0xff] }
 0x30d   : >> { %1873 = vst [vmem:[%s2502_s20 + $0x1c8] sm:$0xff] %v1872_v9  ;;  %1875 = vst [vmem:[%s2502_s20 + $0x1d8] sm:$0xff] %v1874_v25  ;;  %v1878_v49 = vld [vmem:[%s2506_s26 + $0x1f8] sm:$0xff]  ;;  %s4114_s26 = smov %s3957_s12 }
 0x30e   : >> { %1877 = vst [vmem:[%s2502_s20 + $0x1e8] sm:$0xff] %v1876_v29  ;;  %1879 = vst [vmem:[%s2502_s20 + $0x1f8] sm:$0xff] %v1878_v49  ;;  %s4113_s20 = smov %s3960_s13 }
 0x30f PF: > { %s4065_s14 = sand.u32 31, %s4123_s23   ;;  %s2081_s15 = sshll.u32 %s3890_s8, 9 }
 0x310   : > { %s4069_s16 = scalar_lea.vmem %s3276_s17, %s2081_s15 [#allocation2]   ;;  %s1893_s18 = scalar_lea.vmem %s3884_s6, %s2081_s15  }
 0x311   : > { %p2073_p0 = scmp.le.s32.totalorder %s4065_s14, 0 }
 0x312   : > { %s2516_s25 = smov (!%p2073_p0), %s1893_s18   ;;  %s2520_s27 = smov (!%p2073_p0), %s4069_s16  }
 0x313   : > { %1988 = sbr.rel (%p2073_p0) target bundleno = 804 (0x324), region = 113  ;;  %s2524_s30 = smov (!%p2073_p0), 0  }
 0x314   : > { %s2528_s7 = smov (!%p2073_p0), 0  }
 0x31a LB: >> { %v1903_v17 = vld [vmem:[%s2522_s27] sm:$0xff]  ;;  %v1905_v44 = vld [vmem:[%s2522_s27 + $0x8] sm:$0xff]  ;;  %s1907_s17 = sadd.s32 1, %s2526_s30  ;;  %s1897_s7 = sadd.s32 1, %s2530_s7   ;;  %s2530_s7 = sphi %s2528_s7, %s1897_s7   ;;  %s2526_s30 = sphi %s2524_s30, %s2525_s30   ;;  %s2522_s27 = sphi %s2520_s27, %s1912_s27   ;;  %s2518_s25 = sphi %s2516_s25, %s1913_s25  }
 0x31b   : >> { %1904 = vst [vmem:[%s2518_s25] sm:$0xff] %v1903_v17  ;;  %1906 = vst [vmem:[%s2518_s25 + $0x8] sm:$0xff] %v1905_v44  ;;  %p1908_p1 = scmp.ge.s32.totalorder %s1907_s17, %s4065_s14  ;;  %p1896_p2 = scmp.ge.s32.totalorder %s1897_s7, %s4065_s14 }
 0x31d   : >> { %s4127_s17 = smov (%p1908_p1, %s1907_s17), 0  ;;  %1899 = sbr.rel (!%p1896_p2) target bundleno = 794 (0x31a), region = 119 }
 0x31e   : >> { %s2074_s23 = sshll.u32 %s4127_s17, 4  ;;  %s2525_s30 = smov %s4127_s17  }
 0x31f   : >> { %s1912_s27 = scalar_lea.vmem %s4069_s16, %s2074_s23 [#allocation2]   ;;  %s1913_s25 = scalar_lea.vmem %s1893_s18, %s2074_s23  }
 0x324 PF: > { %s15_s22 = sadd.s32 1, %s2498_s22   ;;  %s4116_s18 = smov %s2486_s19 }
 0x325   : > { %p12_p3 = scmp.ge.s32.totalorder %s15_s22, 4   ;;  %s4117_s19 = smov %s2604_s28 }
 0x326   : > { %s4118_s20 = smov %s2494_s21  ;;  %s4119_s21 = smov %s4121_s24 }
 0x327   :  { %14 = sbr.rel (!%p12_p3) target bundleno = 3 (0x3), region = 130 }

// kernel: conformer_forward.14
= control target key start
LH: loop header
LB: loop body
LE: loop exit
PB: predicated region body
PF: predicated region fallthrough
CT: control target
= control target key end

     0   :  { %s1527_s15 = smov 0   ;;  %s1529_s16 = smov 0   ;;  %s2029_s0 = inlined_call_operand.vmem [shape: f32[1,288,256], index: 0, kind: input, shape index: {}]   ;;  %s2030_s1 = inlined_call_operand.vmem [shape: f32[1,256,128], index: 1, kind: input, shape index: {}]   ;;  %s2031_s2 = inlined_call_operand.vmem [shape: f32[1,128], index: 2, kind: input, shape index: {}]   ;;  %s2032_s3 = inlined_call_operand.vmem [shape: f32[1,288,128], index: 3, kind: input, shape index: {}]   ;;  %s2033_s4 = inlined_call_operand.vmem [shape: f32[1,288,128], index: 4, kind: output, shape index: {}]  }
   0x1   :  { %s1531_s17 = smov 0   ;;  %s1533_s18 = smov 0  }
   0x2   :  { %s1535_s19 = smov 0  }
   0x3 LB: > { %s1177_s20 = sadd.s32 4294967295, %s1467_s19   ;;  %s29_s21 = sadd.s32 1, %s1463_s18  ;;  %s1467_s19 = sphi %s1535_s19, %s14_s19   ;;  %s1463_s18 = sphi %s1533_s18, %s2043_s18   ;;  %s1459_s17 = sphi %s1531_s17, %s2042_s17   ;;  %s1455_s16 = sphi %s1529_s16, %s2041_s16   ;;  %s1451_s15 = sphi %s1527_s15, %s2040_s15  }
   0x4   : > { %p31_p0 = scmp.ge.s32.totalorder %s29_s21, 2  ;;  %s152_s22 = sadd.s32 1, %s1455_s16 }
   0x5   : > { %p162_p1 = scmp.ne.s32.totalorder %s1455_s16, %s1451_s15  ;;  %p163_p2 = scmp.eq.s32.totalorder %s1177_s20, 1 }
   0x6   : > { %s2045_s21 = smov (%p31_p0, %s29_s21), 0  ;;  %p1183_p4 = scmp.ge.s32.totalorder %s1467_s19, 1 }
   0x7   : > { %p1559_p3 = por %p163_p2, %p162_p1  ;;  %s146_s24 = ssub.s32 %s1463_s18, %s2045_s21 }
   0x8   : > { %p244_p5 = scmp.lt.s32.totalorder %s1467_s19, 3  ;;  %p150_p6 = scmp.eq.s32.totalorder %s146_s24, 0 }
   0xa   : > { %p245_p7 = pnand %p1183_p4, %p244_p5 }
   0xb   : > { %s1568_s25 = scalar_select %p150_p6, %s1455_s16, %s152_s22  }
   0xc   : > { %248 = sbr.rel (%p245_p7) target bundleno = 411 (0x19b), region = 36  ;;  %v412_v0 = vld [vmem:[%s2030_s1] sm:$0xff] (!%p245_p7)  ;;  %v413_v1 = vld [vmem:[%s2030_s1 + $0x8] sm:$0xff] (!%p245_p7)  ;;  %v414_v2 = vld [vmem:[%s2030_s1 + $0x10] sm:$0xff] (!%p245_p7)  ;;  %s1580_s6 = sshll.u32 (!%p245_p7), %s1459_s17, 5  ;;  %v1501_v3 = vmov (!%p245_p7), 0.0|0.0  }
   0xd   : > { %1212 = vmatprep.subr.bf16.mxu0 (!%p245_p7), %v1501_v3  ;;  %1260 = vmatprep.subr.bf16.mxu1 (!%p245_p7), %v1501_v3  ;;  %v1213_v4 = vpack.c.bf16 (!%p245_p7), %v413_v1, %v412_v0  ;;  %v415_v5 = vld [vmem:[%s2030_s1 + $0x18] sm:$0xff] (!%p245_p7)  ;;  %p304_p8 = scmp.lt.s32.totalorder (!%p245_p7), %s1580_s6, 35  ;;  %v416_v7 = vld [vmem:[%s2030_s1 + $0x20] sm:$0xff] (!%p245_p7)  ;;  %v417_v8 = vld [vmem:[%s2030_s1 + $0x28] sm:$0xff] (!%p245_p7)  ;;  %s295_s10 = sand.u32 (!%p245_p7), 1, %s1451_s15  }
   0xe   : > { %v1216_v6 = vpack.c.bf16 (!%p245_p7), %v415_v5, %v414_v2  ;;  %v1219_v9 = vpack.c.bf16 (!%p245_p7), %v417_v8, %v416_v7  ;;  %v418_v10 = vld [vmem:[%s2030_s1 + $0x30] sm:$0xff] (!%p245_p7)  ;;  %v419_v11 = vld [vmem:[%s2030_s1 + $0x38] sm:$0xff] (!%p245_p7)  ;;  %v420_v15 = vld [vmem:[%s2030_s1 + $0x40] sm:$0xff] (!%p245_p7)  ;;  %s1184_s22 = sshll.u32 (!%p245_p7), %s295_s10, 8 }
   0xf   : > { %1214 = vmatpush1.bf16.msra.mxu0 (!%p245_p7), %v1213_v4  ;;  %1276 = vmatpush1.bf16.msra.mxu1 (!%p245_p7), %v1213_v4  ;;  %v1222_v13 = vpack.c.bf16 (!%p245_p7), %v419_v11, %v418_v10  ;;  %v421_v16 = vld [vmem:[%s2030_s1 + $0x48] sm:$0xff] (!%p245_p7)  ;;  %v422_v18 = vld [vmem:[%s2030_s1 + $0x50] sm:$0xff] (!%p245_p7)  ;;  %v423_v19 = vld [vmem:[%s2030_s1 + $0x58] sm:$0xff] (!%p245_p7)  ;;  %s1793_s15 = scalar_lea.vmem (!%p245_p7), [#allocation2], %s1184_s22  }
  0x10   : > { %1215 = vmatprep.subr.bf16.mxu0 (!%p245_p7), %v1501_v3  ;;  %1261 = vmatprep.subr.bf16.mxu1 (!%p245_p7), %v1501_v3  ;;  %v1225_v17 = vpack.c.bf16 (!%p245_p7), %v421_v16, %v420_v15  ;;  %v1228_v20 = vpack.c.bf16 (!%p245_p7), %v423_v19, %v422_v18  ;;  %v424_v21 = vld [vmem:[%s2030_s1 + $0x60] sm:$0xff] (!%p245_p7)  ;;  %v425_v22 = vld [vmem:[%s2030_s1 + $0x68] sm:$0xff] (!%p245_p7)  ;;  %v426_v24 = vld [vmem:[%s2030_s1 + $0x70] sm:$0xff] (!%p245_p7) }
  0x11   : > { %v1231_v23 = vpack.c.bf16 (!%p245_p7), %v425_v22, %v424_v21  ;;  %v427_v25 = vld [vmem:[%s2030_s1 + $0x78] sm:$0xff] (!%p245_p7)  ;;  %v428_v27 = vld [vmem:[%s2030_s1 + $0x80] sm:$0xff] (!%p245_p7)  ;;  %v429_v28 = vld [vmem:[%s2030_s1 + $0x88] sm:$0xff] (!%p245_p7) }
  0x12   : > { %v1234_v26 = vpack.c.bf16 (!%p245_p7), %v427_v25, %v426_v24  ;;  %v1237_v29 = vpack.c.bf16 (!%p245_p7), %v429_v28, %v428_v27  ;;  %v430_v30 = vld [vmem:[%s2030_s1 + $0x90] sm:$0xff] (!%p245_p7)  ;;  %v431_v31 = vld [vmem:[%s2030_s1 + $0x98] sm:$0xff] (!%p245_p7)  ;;  %v432_v33 = vld [vmem:[%s2030_s1 + $0xa0] sm:$0xff] (!%p245_p7) }
  0x13   : > { %s1589_s9 = scalar_select %p304_p8, %s1580_s6, 35  ;;  %1217 = vmatpush1.bf16.msra.mxu0 %v1216_v6  ;;  %1277 = vmatpush1.bf16.msra.mxu1 %v1216_v6  ;;  %v1240_v32 = vpack.c.bf16 %v431_v31, %v430_v30  ;;  %v433_v34 = vld [vmem:[%s2030_s1 + $0xa8] sm:$0xff]  ;;  %v434_v36 = vld [vmem:[%s2030_s1 + $0xb0] sm:$0xff]  ;;  %v435_v37 = vld [vmem:[%s2030_s1 + $0xb8] sm:$0xff] }
  0x14   : > { %1218 = vmatprep.subr.bf16.mxu0 %v1501_v3  ;;  %1262 = vmatprep.subr.bf16.mxu1 %v1501_v3  ;;  %v1243_v35 = vpack.c.bf16 %v433_v34, %v432_v33  ;;  %v1246_v38 = vpack.c.bf16 %v435_v37, %v434_v36  ;;  %v436_v39 = vld [vmem:[%s2030_s1 + $0xc0] sm:$0xff]  ;;  %v437_v40 = vld [vmem:[%s2030_s1 + $0xc8] sm:$0xff]  ;;  %v438_v42 = vld [vmem:[%s2030_s1 + $0xd0] sm:$0xff] }
  0x15   : > { %s1208_s14 = sshll.u32 %s1589_s9, 4  ;;  %v1249_v41 = vpack.c.bf16 %v437_v40, %v436_v39  ;;  %v439_v43 = vld [vmem:[%s2030_s1 + $0xd8] sm:$0xff]  ;;  %v440_v45 = vld [vmem:[%s2030_s1 + $0xe0] sm:$0xff]  ;;  %v441_v46 = vld [vmem:[%s2030_s1 + $0xe8] sm:$0xff]  ;;  %s1189_s8 = sshll.u32 %s1589_s9, 3 }
  0x16   : > { %s1603_s24 = scalar_lea.vmem %s2029_s0, %s1208_s14  ;;  %v1252_v44 = vpack.c.bf16 %v439_v43, %v438_v42  ;;  %v1255_v47 = vpack.c.bf16 %v441_v46, %v440_v45  ;;  %v442_v48 = vld [vmem:[%s2030_s1 + $0xf0] sm:$0xff]  ;;  %v443_v49 = vld [vmem:[%s2030_s1 + $0xf8] sm:$0xff]  ;;  %s1780_s13 = scalar_lea.vmem %s2032_s3, %s1189_s8 }
  0x17   : > { %v349_v12 = vld [vmem:[%s1603_s24 + $0x8] sm:$0xff]  ;;  %1220 = vmatpush1.bf16.msra.mxu0 %v1219_v9  ;;  %1278 = vmatpush1.bf16.msra.mxu1 %v1219_v9  ;;  %v1258_v50 = vpack.c.bf16 %v443_v49, %v442_v48  ;;  %v348_v51 = vld [vmem:[%s1603_s24] sm:$0xff]  ;;  %v351_v53 = vld [vmem:[%s1603_s24 + $0x18] sm:$0xff]  ;;  %s780_s9 = ssub.s32 (%p1559_p3), 36, %s1580_s6 }
  0x18   : > { %v381_v14 = vld [vmem:[%s1603_s24 + $0x108] sm:$0xff]  ;;  %1221 = vmatprep.subr.bf16.mxu0 %v1501_v3  ;;  %1263 = vmatprep.subr.bf16.mxu1 %v1501_v3  ;;  %v380_v52 = vld [vmem:[%s1603_s24 + $0x100] sm:$0xff]  ;;  %v383_v54 = vld [vmem:[%s1603_s24 + $0x118] sm:$0xff]  ;;  %p781_p9 = scmp.lt.s32.totalorder (%p1559_p3), %s780_s9, 32 }
  0x19   : > { %515 = vmatprep.mubr.f32.mxu0 %v349_v12  ;;  %595 = vmatprep.mubr.f32.mxu1 %v381_v14  ;;  %v350_v55 = vld [vmem:[%s1603_s24 + $0x10] sm:$0xff]  ;;  %v353_v57 = vld [vmem:[%s1603_s24 + $0x28] sm:$0xff]  ;;  %v352_v59 = vld [vmem:[%s1603_s24 + $0x20] sm:$0xff] }
  0x1a   : > { %v382_v56 = vld [vmem:[%s1603_s24 + $0x110] sm:$0xff]  ;;  %v385_v58 = vld [vmem:[%s1603_s24 + $0x128] sm:$0xff]  ;;  %v384_v60 = vld [vmem:[%s1603_s24 + $0x120] sm:$0xff] }
  0x1b   : > { %1223 = vmatpush1.bf16.msra.mxu0 %v1222_v13  ;;  %1279 = vmatpush1.bf16.msra.mxu1 %v1222_v13  ;;  %v355_v61 = vld [vmem:[%s1603_s24 + $0x38] sm:$0xff]  ;;  %v354_v63 = vld [vmem:[%s1603_s24 + $0x30] sm:$0xff]  ;;  %v357_v1 = vld [vmem:[%s1603_s24 + $0x48] sm:$0xff] }
  0x1c   : > { %1224 = vmatprep.subr.bf16.mxu0 %v1501_v3  ;;  %1264 = vmatprep.subr.bf16.mxu1 %v1501_v3  ;;  %v387_v62 = vld [vmem:[%s1603_s24 + $0x138] sm:$0xff]  ;;  %v386_v0 = vld [vmem:[%s1603_s24 + $0x130] sm:$0xff]  ;;  %v389_v2 = vld [vmem:[%s1603_s24 + $0x148] sm:$0xff] }
  0x1d   : > { %v388_v4 = vld [vmem:[%s1603_s24 + $0x140] sm:$0xff]  ;;  %v359_v5 = vld [vmem:[%s1603_s24 + $0x58] sm:$0xff]  ;;  %v358_v7 = vld [vmem:[%s1603_s24 + $0x50] sm:$0xff] }
  0x1e   : > { %v391_v6 = vld [vmem:[%s1603_s24 + $0x158] sm:$0xff]  ;;  %v390_v8 = vld [vmem:[%s1603_s24 + $0x150] sm:$0xff]  ;;  %v361_v9 = vld [vmem:[%s1603_s24 + $0x68] sm:$0xff] }
  0x1f   : > { %1226 = vmatpush1.bf16.msra.mxu0 %v1225_v17  ;;  %1280 = vmatpush1.bf16.msra.mxu1 %v1225_v17  ;;  %v393_v10 = vld [vmem:[%s1603_s24 + $0x168] sm:$0xff]  ;;  %v360_v11 = vld [vmem:[%s1603_s24 + $0x60] sm:$0xff]  ;;  %v363_v13 = vld [vmem:[%s1603_s24 + $0x78] sm:$0xff] }
  0x20   : > { %1227 = vmatprep.subr.bf16.mxu0 %v1501_v3  ;;  %1265 = vmatprep.subr.bf16.mxu1 %v1501_v3  ;;  %v392_v12 = vld [vmem:[%s1603_s24 + $0x160] sm:$0xff]  ;;  %v395_v14 = vld [vmem:[%s1603_s24 + $0x178] sm:$0xff]  ;;  %v362_v15 = vld [vmem:[%s1603_s24 + $0x70] sm:$0xff] }
  0x21   : > { %v394_v16 = vld [vmem:[%s1603_s24 + $0x170] sm:$0xff]  ;;  %v365_v17 = vld [vmem:[%s1603_s24 + $0x88] sm:$0xff]  ;;  %v364_v19 = vld [vmem:[%s1603_s24 + $0x80] sm:$0xff] }
  0x22   : > { %v397_v18 = vld [vmem:[%s1603_s24 + $0x188] sm:$0xff]  ;;  %v367_v21 = vld [vmem:[%s1603_s24 + $0x98] sm:$0xff]  ;;  %v398_v24 = vld [vmem:[%s1603_s24 + $0x190] sm:$0xff] }
  0x23   : > { %1229 = vmatpush1.bf16.msra.mxu0 %v1228_v20  ;;  %1281 = vmatpush1.bf16.msra.mxu1 %v1228_v20  ;;  %v396_v20 = vld [vmem:[%s1603_s24 + $0x180] sm:$0xff]  ;;  %v399_v22 = vld [vmem:[%s1603_s24 + $0x198] sm:$0xff]  ;;  %v369_v25 = vld [vmem:[%s1603_s24 + $0xa8] sm:$0xff] }
  0x24   : > { %1230 = vmatprep.subr.bf16.mxu0 %v1501_v3  ;;  %1266 = vmatprep.subr.bf16.mxu1 %v1501_v3  ;;  %v368_v27 = vld [vmem:[%s1603_s24 + $0xa0] sm:$0xff]  ;;  %v403_v30 = vld [vmem:[%s1603_s24 + $0x1b8] sm:$0xff]  ;;  %v370_v31 = vld [vmem:[%s1603_s24 + $0xb0] sm:$0xff] }
  0x25   : > { %v400_v28 = vld [vmem:[%s1603_s24 + $0x1a0] sm:$0xff]  ;;  %v373_v33 = vld [vmem:[%s1603_s24 + $0xc8] sm:$0xff]  ;;  %v375_v37 = vld [vmem:[%s1603_s24 + $0xd8] sm:$0xff] }
  0x26   : > { %v405_v34 = vld [vmem:[%s1603_s24 + $0x1c8] sm:$0xff]  ;;  %v404_v36 = vld [vmem:[%s1603_s24 + $0x1c0] sm:$0xff]  ;;  %v374_v39 = vld [vmem:[%s1603_s24 + $0xd0] sm:$0xff] }
  0x27   : > { %1232 = vmatpush1.bf16.msra.mxu0 %v1231_v23  ;;  %1282 = vmatpush1.bf16.msra.mxu1 %v1231_v23  ;;  %v366_v23 = vld [vmem:[%s1603_s24 + $0x90] sm:$0xff]  ;;  %v409_v42 = vld [vmem:[%s1603_s24 + $0x1e8] sm:$0xff]  ;;  %v376_v43 = vld [vmem:[%s1603_s24 + $0xe0] sm:$0xff] }
  0x28   : > { %1233 = vmatprep.subr.bf16.mxu0 %v1501_v3  ;;  %1267 = vmatprep.subr.bf16.mxu1 %v1501_v3  ;;  %v406_v40 = vld [vmem:[%s1603_s24 + $0x1d0] sm:$0xff]  ;;  %v379_v45 = vld [vmem:[%s1603_s24 + $0xf8] sm:$0xff]  ;;  %v1785_v49 = vld [vmem:[%s2031_s2] ss:$0 sm:$0xff] }
  0x29   : > { %v411_v46 = vld [vmem:[%s1603_s24 + $0x1f8] sm:$0xff]  ;;  %v410_v48 = vld [vmem:[%s1603_s24 + $0x1f0] sm:$0xff] }
  0x2b   : > { %1235 = vmatpush1.bf16.msra.mxu0 %v1234_v26  ;;  %1283 = vmatpush1.bf16.msra.mxu1 %v1234_v26  ;;  %v401_v26 = vld [vmem:[%s1603_s24 + $0x1a8] sm:$0xff] }
  0x2c   : > { %1236 = vmatprep.subr.bf16.mxu0 %v1501_v3  ;;  %1268 = vmatprep.subr.bf16.mxu1 %v1501_v3 }
  0x2f   : > { %1238 = vmatpush1.bf16.msra.mxu0 %v1237_v29  ;;  %1284 = vmatpush1.bf16.msra.mxu1 %v1237_v29  ;;  %v371_v29 = vld [vmem:[%s1603_s24 + $0xb8] sm:$0xff] }
  0x30   : > { %1239 = vmatprep.subr.bf16.mxu0 %v1501_v3  ;;  %1269 = vmatprep.subr.bf16.mxu1 %v1501_v3 }
  0x33   : > { %1241 = vmatpush1.bf16.msra.mxu0 %v1240_v32  ;;  %1285 = vmatpush1.bf16.msra.mxu1 %v1240_v32  ;;  %v402_v32 = vld [vmem:[%s1603_s24 + $0x1b0] sm:$0xff] }
  0x34   : > { %1242 = vmatprep.subr.bf16.mxu0 %v1501_v3  ;;  %1270 = vmatprep.subr.bf16.mxu1 %v1501_v3 }
  0x37   : > { %1244 = vmatpush1.bf16.msra.mxu0 %v1243_v35  ;;  %1286 = vmatpush1.bf16.msra.mxu1 %v1243_v35  ;;  %v372_v35 = vld [vmem:[%s1603_s24 + $0xc0] sm:$0xff] }
  0x38   : > { %1245 = vmatprep.subr.bf16.mxu0 %v1501_v3  ;;  %1271 = vmatprep.subr.bf16.mxu1 %v1501_v3 }
  0x3b   : > { %1247 = vmatpush1.bf16.msra.mxu0 %v1246_v38  ;;  %1287 = vmatpush1.bf16.msra.mxu1 %v1246_v38  ;;  %v407_v38 = vld [vmem:[%s1603_s24 + $0x1d8] sm:$0xff] }
  0x3c   : > { %1248 = vmatprep.subr.bf16.mxu0 %v1501_v3  ;;  %1272 = vmatprep.subr.bf16.mxu1 %v1501_v3 }
  0x3f   : > { %1250 = vmatpush1.bf16.msra.mxu0 %v1249_v41  ;;  %1288 = vmatpush1.bf16.msra.mxu1 %v1249_v41  ;;  %v377_v41 = vld [vmem:[%s1603_s24 + $0xe8] sm:$0xff] }
  0x40   : > { %1251 = vmatprep.subr.bf16.mxu0 %v1501_v3  ;;  %1273 = vmatprep.subr.bf16.mxu1 %v1501_v3 }
  0x43   : > { %1253 = vmatpush1.bf16.msra.mxu0 %v1252_v44  ;;  %1289 = vmatpush1.bf16.msra.mxu1 %v1252_v44  ;;  %v408_v44 = vld [vmem:[%s1603_s24 + $0x1e0] sm:$0xff] }
  0x44   : > { %1254 = vmatprep.subr.bf16.mxu0 %v1501_v3  ;;  %1274 = vmatprep.subr.bf16.mxu1 %v1501_v3 }
  0x47   : > { %1256 = vmatpush1.bf16.msra.mxu0 %v1255_v47  ;;  %1290 = vmatpush1.bf16.msra.mxu1 %v1255_v47  ;;  %v378_v47 = vld [vmem:[%s1603_s24 + $0xf0] sm:$0xff] }
  0x48   : > { %1257 = vmatprep.subr.bf16.mxu0 %v1501_v3  ;;  %1275 = vmatprep.subr.bf16.mxu1 %v1501_v3  ;;  %v356_v3 = vld [vmem:[%s1603_s24 + $0x40] sm:$0xff]  ;;  %s1209_s24 = sshll.u32 (%p1559_p3), %s1459_s17, 8 }
  0x49   : > { %s1892_s28 = scalar_lea.vmem (%p1559_p3), %s2033_s4, %s1209_s24  }
  0x4b   : > { %1259 = vmatpush1.bf16.msra.mxu0 %v1258_v50  ;;  %1291 = vmatpush1.bf16.msra.mxu1 %v1258_v50 }
  0x4e   : > { %516 = vmatmul.mubr.f32.vlgmr.msra.gmra.mrb[0].mxu0 %v348_v51  ;;  %596 = vmatmul.mubr.f32.vlgmr.msra.gmra.mrb[0].mxu1 %v380_v52  ;;  %v676_v51 = vld [vmem:[%s1780_s13] sm:$0xff] }
  0x4f   : > { %520 = vmatprep.mubr.f32.mxu0 %v351_v53  ;;  %600 = vmatprep.mubr.f32.mxu1 %v383_v54  ;;  %v692_v53 = vld [vmem:[%s1780_s13 + $0x80] sm:$0xff] }
  0x52   : > { %521 = vmatmul.mubr.f32.gmra.mrb[2].mxu0 %v350_v55  ;;  %601 = vmatmul.mubr.f32.gmra.mrb[2].mxu1 %v382_v56 }
  0x53   : > { %525 = vmatprep.mubr.f32.mxu0 %v353_v57  ;;  %605 = vmatprep.mubr.f32.mxu1 %v385_v58 }
  0x56   : > { %526 = vmatmul.mubr.f32.gmra.mrb[4].mxu0 %v352_v59  ;;  %606 = vmatmul.mubr.f32.gmra.mrb[4].mxu1 %v384_v60 }
  0x57   : > { %530 = vmatprep.mubr.f32.mxu0 %v355_v61  ;;  %610 = vmatprep.mubr.f32.mxu1 %v387_v62  ;;  %v677_v61 = vld [vmem:[%s1780_s13 + $0x8] sm:$0xff] }
  0x5a   : > { %531 = vmatmul.mubr.f32.gmra.mrb[6].mxu0 %v354_v63  ;;  %611 = vmatmul.mubr.f32.gmra.mrb[6].mxu1 %v386_v0  ;;  %v693_v63 = vld [vmem:[%s1780_s13 + $0x88] sm:$0xff] }
  0x5b   : > { %535 = vmatprep.mubr.f32.mxu0 %v357_v1  ;;  %615 = vmatprep.mubr.f32.mxu1 %v389_v2 }
  0x5e   : > { %536 = vmatmul.mubr.f32.gmra.mrb[8].mxu0 %v356_v3  ;;  %616 = vmatmul.mubr.f32.gmra.mrb[8].mxu1 %v388_v4 }
  0x5f   : > { %540 = vmatprep.mubr.f32.mxu0 %v359_v5  ;;  %620 = vmatprep.mubr.f32.mxu1 %v391_v6 }
  0x62   : > { %541 = vmatmul.mubr.f32.gmra.mrb[10].mxu0 %v358_v7  ;;  %621 = vmatmul.mubr.f32.gmra.mrb[10].mxu1 %v390_v8  ;;  %v678_v7 = vld [vmem:[%s1780_s13 + $0x10] sm:$0xff] }
  0x63   : > { %545 = vmatprep.mubr.f32.mxu0 %v361_v9  ;;  %625 = vmatprep.mubr.f32.mxu1 %v393_v10  ;;  %v694_v9 = vld [vmem:[%s1780_s13 + $0x90] sm:$0xff] }
  0x66   : > { %546 = vmatmul.mubr.f32.gmra.mrb[12].mxu0 %v360_v11  ;;  %626 = vmatmul.mubr.f32.gmra.mrb[12].mxu1 %v392_v12 }
  0x67   : > { %550 = vmatprep.mubr.f32.mxu0 %v363_v13  ;;  %630 = vmatprep.mubr.f32.mxu1 %v395_v14 }
  0x6a   : > { %551 = vmatmul.mubr.f32.gmra.mrb[14].mxu0 %v362_v15  ;;  %631 = vmatmul.mubr.f32.gmra.mrb[14].mxu1 %v394_v16 }
  0x6b   : > { %555 = vmatprep.mubr.f32.mxu0 %v365_v17  ;;  %635 = vmatprep.mubr.f32.mxu1 %v397_v18  ;;  %v679_v17 = vld [vmem:[%s1780_s13 + $0x18] sm:$0xff] }
  0x6e   : > { %556 = vmatmul.mubr.f32.gmra.mrb[16].mxu0 %v364_v19  ;;  %636 = vmatmul.mubr.f32.gmra.mrb[16].mxu1 %v396_v20  ;;  %v695_v19 = vld [vmem:[%s1780_s13 + $0x98] sm:$0xff] }
  0x6f   : > { %560 = vmatprep.mubr.f32.mxu0 %v367_v21  ;;  %640 = vmatprep.mubr.f32.mxu1 %v399_v22 }
  0x72   : > { %561 = vmatmul.mubr.f32.gmra.mrb[18].mxu0 %v366_v23  ;;  %641 = vmatmul.mubr.f32.gmra.mrb[18].mxu1 %v398_v24 }
  0x73   : > { %565 = vmatprep.mubr.f32.mxu0 %v369_v25  ;;  %645 = vmatprep.mubr.f32.mxu1 %v401_v26 }
  0x76   : > { %566 = vmatmul.mubr.f32.gmra.mrb[20].mxu0 %v368_v27  ;;  %646 = vmatmul.mubr.f32.gmra.mrb[20].mxu1 %v400_v28  ;;  %v680_v27 = vld [vmem:[%s1780_s13 + $0x20] sm:$0xff] }
  0x77   : > { %570 = vmatprep.mubr.f32.mxu0 %v371_v29  ;;  %650 = vmatprep.mubr.f32.mxu1 %v403_v30  ;;  %v696_v29 = vld [vmem:[%s1780_s13 + $0xa0] sm:$0xff] }
  0x7a   : > { %571 = vmatmul.mubr.f32.gmra.mrb[22].mxu0 %v370_v31  ;;  %651 = vmatmul.mubr.f32.gmra.mrb[22].mxu1 %v402_v32 }
  0x7b   : > { %575 = vmatprep.mubr.f32.mxu0 %v373_v33  ;;  %655 = vmatprep.mubr.f32.mxu1 %v405_v34 }
  0x7e   : > { %576 = vmatmul.mubr.f32.gmra.mrb[24].mxu0 %v372_v35  ;;  %656 = vmatmul.mubr.f32.gmra.mrb[24].mxu1 %v404_v36 }
  0x7f   : > { %580 = vmatprep.mubr.f32.mxu0 %v375_v37  ;;  %660 = vmatprep.mubr.f32.mxu1 %v407_v38  ;;  %v681_v37 = vld [vmem:[%s1780_s13 + $0x28] sm:$0xff] }
  0x82   : > { %581 = vmatmul.mubr.f32.gmra.mrb[26].mxu0 %v374_v39  ;;  %661 = vmatmul.mubr.f32.gmra.mrb[26].mxu1 %v406_v40  ;;  %v697_v39 = vld [vmem:[%s1780_s13 + $0xa8] sm:$0xff] }
  0x83   : > { %585 = vmatprep.mubr.f32.mxu0 %v377_v41  ;;  %665 = vmatprep.mubr.f32.mxu1 %v409_v42 }
  0x86   : > { %586 = vmatmul.mubr.f32.gmra.mrb[28].mxu0 %v376_v43  ;;  %666 = vmatmul.mubr.f32.gmra.mrb[28].mxu1 %v408_v44 }
  0x87   : > { %590 = vmatprep.mubr.f32.mxu0 %v379_v45  ;;  %670 = vmatprep.mubr.f32.mxu1 %v411_v46 }
  0x8a   : > { %591 = vmatmul.mubr.f32.gmra.mrb[30].mxu0 %v378_v47  ;;  %671 = vmatmul.mubr.f32.gmra.mrb[30].mxu1 %v410_v48  ;;  %v682_v47 = vld [vmem:[%s1780_s13 + $0x30] sm:$0xff] }
 0x121   : > { %v517_v50 = vpop.f32.mrb[0].mxu0  ;;  %v597_v52 = vpop.f32.mrb[0].mxu1 }
 0x122   : > { %v518_v54 = vadd.f32 %v1785_v49, %v517_v50  ;;  %v598_v55 = vadd.f32 %v1785_v49, %v597_v52  ;;  %v519_v56 = vpop.f32.mrb[1].mxu0  ;;  %v599_v57 = vpop.f32.mrb[1].mxu1  ;;  %v698_v50 = vld [vmem:[%s1780_s13 + $0xb0] sm:$0xff] }
 0x124   : > { %v708_v58 = vadd.f32 %v676_v51, %v518_v54  ;;  %v724_v59 = vadd.f32 %v692_v53, %v598_v55 }
 0x125   : > { %v522_v60 = vpop.f32.mrb[2].mxu0  ;;  %v602_v62 = vpop.f32.mrb[2].mxu1 }
 0x126   : > { %740 = vst [vmem:[%s1793_s15] sm:$0xff] %v708_v58  ;;  %756 = vst [vmem:[%s1793_s15 + $0x80] sm:$0xff] %v724_v59  ;;  %v523_v0 = vadd.f32 %v1785_v49, %v522_v60  ;;  %v603_v1 = vadd.f32 %v1785_v49, %v602_v62  ;;  %v524_v2 = vpop.f32.mrb[3].mxu0  ;;  %v604_v3 = vpop.f32.mrb[3].mxu1  ;;  %v683_v58 = vld [vmem:[%s1780_s13 + $0x38] sm:$0xff] }
 0x127   : > { %v699_v60 = vld [vmem:[%s1780_s13 + $0xb8] sm:$0xff] }
 0x128   : > { %v709_v4 = vadd.f32 %v677_v61, %v523_v0  ;;  %v725_v5 = vadd.f32 %v693_v63, %v603_v1 }
 0x129   : > { %v527_v6 = vpop.f32.mrb[4].mxu0  ;;  %v607_v8 = vpop.f32.mrb[4].mxu1 }
 0x12a   : > { %741 = vst [vmem:[%s1793_s15 + $0x8] sm:$0xff] %v709_v4  ;;  %757 = vst [vmem:[%s1793_s15 + $0x88] sm:$0xff] %v725_v5  ;;  %v528_v10 = vadd.f32 %v1785_v49, %v527_v6  ;;  %v608_v11 = vadd.f32 %v1785_v49, %v607_v8  ;;  %v529_v12 = vpop.f32.mrb[5].mxu0  ;;  %v609_v13 = vpop.f32.mrb[5].mxu1  ;;  %v684_v4 = vld [vmem:[%s1780_s13 + $0x40] sm:$0xff] }
 0x12b   : > { %v700_v6 = vld [vmem:[%s1780_s13 + $0xc0] sm:$0xff] }
 0x12c   : > { %v710_v14 = vadd.f32 %v678_v7, %v528_v10  ;;  %v726_v15 = vadd.f32 %v694_v9, %v608_v11 }
 0x12d   : > { %v532_v16 = vpop.f32.mrb[6].mxu0  ;;  %v612_v18 = vpop.f32.mrb[6].mxu1 }
 0x12e   : > { %742 = vst [vmem:[%s1793_s15 + $0x10] sm:$0xff] %v710_v14  ;;  %758 = vst [vmem:[%s1793_s15 + $0x90] sm:$0xff] %v726_v15  ;;  %v533_v20 = vadd.f32 %v1785_v49, %v532_v16  ;;  %v613_v21 = vadd.f32 %v1785_v49, %v612_v18  ;;  %v534_v22 = vpop.f32.mrb[7].mxu0  ;;  %v614_v23 = vpop.f32.mrb[7].mxu1  ;;  %v685_v14 = vld [vmem:[%s1780_s13 + $0x48] sm:$0xff] }
 0x12f   : > { %v701_v16 = vld [vmem:[%s1780_s13 + $0xc8] sm:$0xff] }
 0x130   : > { %v711_v24 = vadd.f32 %v679_v17, %v533_v20  ;;  %v727_v25 = vadd.f32 %v695_v19, %v613_v21 }
 0x131   : > { %v537_v26 = vpop.f32.mrb[8].mxu0  ;;  %v617_v28 = vpop.f32.mrb[8].mxu1 }
 0x132   : > { %743 = vst [vmem:[%s1793_s15 + $0x18] sm:$0xff] %v711_v24  ;;  %759 = vst [vmem:[%s1793_s15 + $0x98] sm:$0xff] %v727_v25  ;;  %v538_v30 = vadd.f32 %v1785_v49, %v537_v26  ;;  %v618_v31 = vadd.f32 %v1785_v49, %v617_v28  ;;  %v539_v32 = vpop.f32.mrb[9].mxu0  ;;  %v619_v33 = vpop.f32.mrb[9].mxu1  ;;  %v686_v24 = vld [vmem:[%s1780_s13 + $0x50] sm:$0xff] }
 0x133   : > { %v702_v26 = vld [vmem:[%s1780_s13 + $0xd0] sm:$0xff] }
 0x134   : > { %v712_v34 = vadd.f32 %v680_v27, %v538_v30  ;;  %v728_v35 = vadd.f32 %v696_v29, %v618_v31 }
 0x135   : > { %v542_v36 = vpop.f32.mrb[10].mxu0  ;;  %v622_v38 = vpop.f32.mrb[10].mxu1 }
 0x136   : > { %744 = vst [vmem:[%s1793_s15 + $0x20] sm:$0xff] %v712_v34  ;;  %760 = vst [vmem:[%s1793_s15 + $0xa0] sm:$0xff] %v728_v35  ;;  %v543_v40 = vadd.f32 %v1785_v49, %v542_v36  ;;  %v623_v41 = vadd.f32 %v1785_v49, %v622_v38  ;;  %v544_v42 = vpop.f32.mrb[11].mxu0  ;;  %v624_v43 = vpop.f32.mrb[11].mxu1  ;;  %v687_v34 = vld [vmem:[%s1780_s13 + $0x58] sm:$0xff] }
 0x137   : > { %v703_v36 = vld [vmem:[%s1780_s13 + $0xd8] sm:$0xff] }
 0x138   : > { %v713_v44 = vadd.f32 %v681_v37, %v543_v40  ;;  %v729_v45 = vadd.f32 %v697_v39, %v623_v41 }
 0x139   : > { %v547_v46 = vpop.f32.mrb[12].mxu0  ;;  %v627_v48 = vpop.f32.mrb[12].mxu1 }
 0x13a   : > { %745 = vst [vmem:[%s1793_s15 + $0x28] sm:$0xff] %v713_v44  ;;  %761 = vst [vmem:[%s1793_s15 + $0xa8] sm:$0xff] %v729_v45  ;;  %v548_v51 = vadd.f32 %v1785_v49, %v547_v46  ;;  %v628_v52 = vadd.f32 %v1785_v49, %v627_v48  ;;  %v549_v53 = vpop.f32.mrb[13].mxu0  ;;  %v629_v54 = vpop.f32.mrb[13].mxu1  ;;  %v688_v44 = vld [vmem:[%s1780_s13 + $0x60] sm:$0xff] }
 0x13b   : > { %v704_v46 = vld [vmem:[%s1780_s13 + $0xe0] sm:$0xff] }
 0x13c   : > { %v714_v55 = vadd.f32 %v682_v47, %v548_v51  ;;  %v730_v56 = vadd.f32 %v698_v50, %v628_v52 }
 0x13d   : > { %v552_v57 = vpop.f32.mrb[14].mxu0  ;;  %v632_v59 = vpop.f32.mrb[14].mxu1 }
 0x13e   : > { %746 = vst [vmem:[%s1793_s15 + $0x30] sm:$0xff] %v714_v55  ;;  %762 = vst [vmem:[%s1793_s15 + $0xb0] sm:$0xff] %v730_v56  ;;  %v553_v61 = vadd.f32 %v1785_v49, %v552_v57  ;;  %v633_v62 = vadd.f32 %v1785_v49, %v632_v59  ;;  %v554_v63 = vpop.f32.mrb[15].mxu0  ;;  %v634_v0 = vpop.f32.mrb[15].mxu1  ;;  %v689_v55 = vld [vmem:[%s1780_s13 + $0x68] sm:$0xff] }
 0x13f   : > { %v705_v57 = vld [vmem:[%s1780_s13 + $0xe8] sm:$0xff] }
 0x140   : > { %v715_v1 = vadd.f32 %v683_v58, %v553_v61  ;;  %v731_v2 = vadd.f32 %v699_v60, %v633_v62 }
 0x141   : > { %v557_v3 = vpop.f32.mrb[16].mxu0  ;;  %v637_v5 = vpop.f32.mrb[16].mxu1 }
 0x142   : > { %747 = vst [vmem:[%s1793_s15 + $0x38] sm:$0xff] %v715_v1  ;;  %763 = vst [vmem:[%s1793_s15 + $0xb8] sm:$0xff] %v731_v2  ;;  %v558_v7 = vadd.f32 %v1785_v49, %v557_v3  ;;  %v638_v8 = vadd.f32 %v1785_v49, %v637_v5  ;;  %v559_v9 = vpop.f32.mrb[17].mxu0  ;;  %v639_v10 = vpop.f32.mrb[17].mxu1  ;;  %v690_v1 = vld [vmem:[%s1780_s13 + $0x70] sm:$0xff] }
 0x143   : > { %v706_v3 = vld [vmem:[%s1780_s13 + $0xf0] sm:$0xff] }
 0x144   : > { %v716_v11 = vadd.f32 %v684_v4, %v558_v7  ;;  %v732_v12 = vadd.f32 %v700_v6, %v638_v8 }
 0x145   : > { %v562_v13 = vpop.f32.mrb[18].mxu0  ;;  %v642_v15 = vpop.f32.mrb[18].mxu1 }
 0x146   : > { %748 = vst [vmem:[%s1793_s15 + $0x40] sm:$0xff] %v716_v11  ;;  %764 = vst [vmem:[%s1793_s15 + $0xc0] sm:$0xff] %v732_v12  ;;  %v563_v17 = vadd.f32 %v1785_v49, %v562_v13  ;;  %v643_v18 = vadd.f32 %v1785_v49, %v642_v15  ;;  %v564_v19 = vpop.f32.mrb[19].mxu0  ;;  %v644_v20 = vpop.f32.mrb[19].mxu1  ;;  %v691_v11 = vld [vmem:[%s1780_s13 + $0x78] sm:$0xff] }
 0x147   : > { %v707_v13 = vld [vmem:[%s1780_s13 + $0xf8] sm:$0xff] }
 0x148   : > { %v717_v21 = vadd.f32 %v685_v14, %v563_v17  ;;  %v733_v22 = vadd.f32 %v701_v16, %v643_v18 }
 0x149   : > { %v567_v23 = vpop.f32.mrb[20].mxu0  ;;  %v647_v25 = vpop.f32.mrb[20].mxu1 }
 0x14a   : > { %749 = vst [vmem:[%s1793_s15 + $0x48] sm:$0xff] %v717_v21  ;;  %765 = vst [vmem:[%s1793_s15 + $0xc8] sm:$0xff] %v733_v22  ;;  %v568_v27 = vadd.f32 %v1785_v49, %v567_v23  ;;  %v648_v28 = vadd.f32 %v1785_v49, %v647_v25  ;;  %v569_v29 = vpop.f32.mrb[21].mxu0  ;;  %v649_v30 = vpop.f32.mrb[21].mxu1 }
 0x14c   : > { %v718_v31 = vadd.f32 %v686_v24, %v568_v27  ;;  %v734_v32 = vadd.f32 %v702_v26, %v648_v28 }
 0x14d   : > { %v572_v33 = vpop.f32.mrb[22].mxu0  ;;  %v652_v35 = vpop.f32.mrb[22].mxu1 }
 0x14e   : > { %750 = vst [vmem:[%s1793_s15 + $0x50] sm:$0xff] %v718_v31  ;;  %766 = vst [vmem:[%s1793_s15 + $0xd0] sm:$0xff] %v734_v32  ;;  %v573_v37 = vadd.f32 %v1785_v49, %v572_v33  ;;  %v653_v38 = vadd.f32 %v1785_v49, %v652_v35  ;;  %v574_v39 = vpop.f32.mrb[23].mxu0  ;;  %v654_v40 = vpop.f32.mrb[23].mxu1 }
 0x150   : > { %v719_v41 = vadd.f32 %v687_v34, %v573_v37  ;;  %v735_v42 = vadd.f32 %v703_v36, %v653_v38 }
 0x151   : > { %v577_v43 = vpop.f32.mrb[24].mxu0  ;;  %v657_v45 = vpop.f32.mrb[24].mxu1 }
 0x152   : > { %751 = vst [vmem:[%s1793_s15 + $0x58] sm:$0xff] %v719_v41  ;;  %767 = vst [vmem:[%s1793_s15 + $0xd8] sm:$0xff] %v735_v42  ;;  %v578_v47 = vadd.f32 %v1785_v49, %v577_v43  ;;  %v658_v48 = vadd.f32 %v1785_v49, %v657_v45  ;;  %v579_v50 = vpop.f32.mrb[25].mxu0  ;;  %v659_v51 = vpop.f32.mrb[25].mxu1 }
 0x154   : > { %v720_v52 = vadd.f32 %v688_v44, %v578_v47  ;;  %v736_v53 = vadd.f32 %v704_v46, %v658_v48 }
 0x155   : > { %v582_v54 = vpop.f32.mrb[26].mxu0  ;;  %v662_v56 = vpop.f32.mrb[26].mxu1 }
 0x156   : > { %752 = vst [vmem:[%s1793_s15 + $0x60] sm:$0xff] %v720_v52  ;;  %768 = vst [vmem:[%s1793_s15 + $0xe0] sm:$0xff] %v736_v53  ;;  %v583_v58 = vadd.f32 %v1785_v49, %v582_v54  ;;  %v663_v59 = vadd.f32 %v1785_v49, %v662_v56  ;;  %v584_v60 = vpop.f32.mrb[27].mxu0  ;;  %v664_v61 = vpop.f32.mrb[27].mxu1 }
 0x158   : > { %v721_v62 = vadd.f32 %v689_v55, %v583_v58  ;;  %v737_v63 = vadd.f32 %v705_v57, %v663_v59 }
 0x159   : > { %v587_v0 = vpop.f32.mrb[28].mxu0  ;;  %v667_v2 = vpop.f32.mrb[28].mxu1 }
 0x15a   : > { %753 = vst [vmem:[%s1793_s15 + $0x68] sm:$0xff] %v721_v62  ;;  %769 = vst [vmem:[%s1793_s15 + $0xe8] sm:$0xff] %v737_v63  ;;  %v588_v4 = vadd.f32 %v1785_v49, %v587_v0  ;;  %v668_v5 = vadd.f32 %v1785_v49, %v667_v2  ;;  %v589_v6 = vpop.f32.mrb[29].mxu0  ;;  %v669_v7 = vpop.f32.mrb[29].mxu1 }
 0x15c   : > { %v722_v8 = vadd.f32 %v690_v1, %v588_v4  ;;  %v738_v9 = vadd.f32 %v706_v3, %v668_v5  ;;  %778 = sbr.rel (!%p1559_p3) target bundleno = 411 (0x19b), region = 40 }
 0x15d   : > { %v592_v10 = vpop.f32.mrb[30].mxu0  ;;  %v672_v12 = vpop.f32.mrb[30].mxu1 }
 0x15e   : > { %754 = vst [vmem:[%s1793_s15 + $0x70] sm:$0xff] %v722_v8  ;;  %770 = vst [vmem:[%s1793_s15 + $0xf0] sm:$0xff] %v738_v9  ;;  %v593_v14 = vadd.f32 %v1785_v49, %v592_v10  ;;  %v673_v15 = vadd.f32 %v1785_v49, %v672_v12  ;;  %v594_v16 = vpop.f32.mrb[31].mxu0  ;;  %v674_v17 = vpop.f32.mrb[31].mxu1 }
 0x160   : > { %v723_v18 = vadd.f32 %v691_v11, %v593_v14  ;;  %v739_v19 = vadd.f32 %v707_v13, %v673_v15 }
 0x162   : > { %755 = vst [vmem:[%s1793_s15 + $0x78] sm:$0xff] %v723_v18  ;;  %771 = vst [vmem:[%s1793_s15 + $0xf8] sm:$0xff] %v739_v19 }
 0x163   : > { %s2047_s9 = smov (!%p781_p9, %s780_s9), 32 }
 0x164   : > { %s1193_s29 = sshll.u32 %s2047_s9, 7 }
 0x165   : > { %p1196_p10 = scmp.eq.s32.totalorder %s1193_s29, 0 }
 0x166   : > { %s1898_s30 = sshrl.u32 (!%p1196_p10), %s2047_s9, 5 }
 0x167   : > { %792 = sbr.rel (%p1196_p10) target bundleno = 411 (0x19b), region = 44  ;;  %p1197_p11 = scmp.le.s32.totalorder (!%p1196_p10), %s1898_s30, 0 }
 0x16e   : > { %1098 = sbr.rel (%p1197_p11) target bundleno = 390 (0x186), region = 129  ;;  %s2035_s17 = smov (!%p1197_p11), %s1892_s28 }
 0x16f   : > { %s2036_s23 = smov (!%p1197_p11), %s1793_s15  ;;  %s1907_s6 = smov (!%p1197_p11), 0  }
 0x170   : > { %s1909_s5 = smov (!%p1197_p11), 0  }
 0x175 LB: >> { %v916_v49 = vld [vmem:[%s1475_s23] sm:$0xff]  ;;  %v918_v20 = vld [vmem:[%s1475_s23 + $0x8] sm:$0xff]  ;;  %v920_v21 = vld [vmem:[%s1475_s23 + $0x10] sm:$0xff]  ;;  %s980_s7 = sadd.s32 1, %s1479_s6  ;;  %s910_s5 = sadd.s32 1, %s1483_s5   ;;  %s1483_s5 = sphi %s1909_s5, %s910_s5   ;;  %s1479_s6 = sphi %s1907_s6, %s2039_s6   ;;  %s1475_s23 = sphi %s2036_s23, %s2038_s23   ;;  %s1471_s17 = sphi %s2035_s17, %s2037_s17  }
 0x176   : >> { %917 = vst [vmem:[%s1471_s17] sm:$0xff] %v916_v49  ;;  %919 = vst [vmem:[%s1471_s17 + $0x8] sm:$0xff] %v918_v20  ;;  %v922_v22 = vld [vmem:[%s1475_s23 + $0x18] sm:$0xff]  ;;  %v924_v23 = vld [vmem:[%s1475_s23 + $0x20] sm:$0xff]  ;;  %p981_p12 = scmp.ge.s32.totalorder %s980_s7, %s1898_s30  ;;  %p909_p13 = scmp.ge.s32.totalorder %s910_s5, %s1898_s30 }
 0x177   : >> { %921 = vst [vmem:[%s1471_s17 + $0x10] sm:$0xff] %v920_v21  ;;  %v926_v24 = vld [vmem:[%s1475_s23 + $0x28] sm:$0xff]  ;;  %923 = vst [vmem:[%s1471_s17 + $0x18] sm:$0xff] %v922_v22  ;;  %v928_v25 = vld [vmem:[%s1475_s23 + $0x30] sm:$0xff] }
 0x178   : >> { %925 = vst [vmem:[%s1471_s17 + $0x20] sm:$0xff] %v924_v23  ;;  %927 = vst [vmem:[%s1471_s17 + $0x28] sm:$0xff] %v926_v24  ;;  %v930_v26 = vld [vmem:[%s1475_s23 + $0x38] sm:$0xff]  ;;  %v932_v27 = vld [vmem:[%s1475_s23 + $0x40] sm:$0xff]  ;;  %s2049_s7 = smov (%p981_p12, %s980_s7), 0 }
 0x179   : >> { %929 = vst [vmem:[%s1471_s17 + $0x30] sm:$0xff] %v928_v25  ;;  %931 = vst [vmem:[%s1471_s17 + $0x38] sm:$0xff] %v930_v26  ;;  %v934_v28 = vld [vmem:[%s1475_s23 + $0x48] sm:$0xff]  ;;  %v936_v29 = vld [vmem:[%s1475_s23 + $0x50] sm:$0xff]  ;;  %s1198_s8 = sshll.u32 %s2049_s7, 8  ;;  %s2039_s6 = smov %s2049_s7 }
 0x17a   : >> { %933 = vst [vmem:[%s1471_s17 + $0x40] sm:$0xff] %v932_v27  ;;  %v938_v30 = vld [vmem:[%s1475_s23 + $0x58] sm:$0xff]  ;;  %935 = vst [vmem:[%s1471_s17 + $0x48] sm:$0xff] %v934_v28  ;;  %v940_v31 = vld [vmem:[%s1475_s23 + $0x60] sm:$0xff]  ;;  %s1965_s10 = scalar_lea.vmem %s1793_s15, %s1198_s8 [#allocation2]   ;;  %s986_s11 = scalar_lea.vmem %s1892_s28, %s1198_s8  }
 0x17b   : >> { %937 = vst [vmem:[%s1471_s17 + $0x50] sm:$0xff] %v936_v29  ;;  %939 = vst [vmem:[%s1471_s17 + $0x58] sm:$0xff] %v938_v30  ;;  %v942_v32 = vld [vmem:[%s1475_s23 + $0x68] sm:$0xff]  ;;  %v944_v33 = vld [vmem:[%s1475_s23 + $0x70] sm:$0xff] }
 0x17c   : >> { %941 = vst [vmem:[%s1471_s17 + $0x60] sm:$0xff] %v940_v31  ;;  %943 = vst [vmem:[%s1471_s17 + $0x68] sm:$0xff] %v942_v32  ;;  %v946_v34 = vld [vmem:[%s1475_s23 + $0x78] sm:$0xff]  ;;  %v948_v35 = vld [vmem:[%s1475_s23 + $0x80] sm:$0xff] }
 0x17d   : >> { %945 = vst [vmem:[%s1471_s17 + $0x70] sm:$0xff] %v944_v33  ;;  %v950_v36 = vld [vmem:[%s1475_s23 + $0x88] sm:$0xff]  ;;  %947 = vst [vmem:[%s1471_s17 + $0x78] sm:$0xff] %v946_v34  ;;  %v952_v37 = vld [vmem:[%s1475_s23 + $0x90] sm:$0xff] }
 0x17e   : >> { %949 = vst [vmem:[%s1471_s17 + $0x80] sm:$0xff] %v948_v35  ;;  %951 = vst [vmem:[%s1471_s17 + $0x88] sm:$0xff] %v950_v36  ;;  %v954_v38 = vld [vmem:[%s1475_s23 + $0x98] sm:$0xff]  ;;  %v956_v39 = vld [vmem:[%s1475_s23 + $0xa0] sm:$0xff] }
 0x17f   : >> { %953 = vst [vmem:[%s1471_s17 + $0x90] sm:$0xff] %v952_v37  ;;  %955 = vst [vmem:[%s1471_s17 + $0x98] sm:$0xff] %v954_v38  ;;  %v958_v40 = vld [vmem:[%s1475_s23 + $0xa8] sm:$0xff]  ;;  %v960_v41 = vld [vmem:[%s1475_s23 + $0xb0] sm:$0xff]  ;;  %912 = sbr.rel (!%p909_p13) target bundleno = 373 (0x175), region = 135 }
 0x180   : >> { %957 = vst [vmem:[%s1471_s17 + $0xa0] sm:$0xff] %v956_v39  ;;  %v962_v42 = vld [vmem:[%s1475_s23 + $0xb8] sm:$0xff]  ;;  %959 = vst [vmem:[%s1471_s17 + $0xa8] sm:$0xff] %v958_v40  ;;  %v964_v43 = vld [vmem:[%s1475_s23 + $0xc0] sm:$0xff] }
 0x181   : >> { %961 = vst [vmem:[%s1471_s17 + $0xb0] sm:$0xff] %v960_v41  ;;  %963 = vst [vmem:[%s1471_s17 + $0xb8] sm:$0xff] %v962_v42  ;;  %v966_v44 = vld [vmem:[%s1475_s23 + $0xc8] sm:$0xff]  ;;  %v968_v45 = vld [vmem:[%s1475_s23 + $0xd0] sm:$0xff] }
 0x182   : >> { %965 = vst [vmem:[%s1471_s17 + $0xc0] sm:$0xff] %v964_v43  ;;  %967 = vst [vmem:[%s1471_s17 + $0xc8] sm:$0xff] %v966_v44  ;;  %v970_v46 = vld [vmem:[%s1475_s23 + $0xd8] sm:$0xff]  ;;  %v972_v47 = vld [vmem:[%s1475_s23 + $0xe0] sm:$0xff] }
 0x183   : >> { %969 = vst [vmem:[%s1471_s17 + $0xd0] sm:$0xff] %v968_v45  ;;  %v974_v48 = vld [vmem:[%s1475_s23 + $0xe8] sm:$0xff]  ;;  %971 = vst [vmem:[%s1471_s17 + $0xd8] sm:$0xff] %v970_v46  ;;  %v976_v50 = vld [vmem:[%s1475_s23 + $0xf0] sm:$0xff] }
 0x184   : >> { %973 = vst [vmem:[%s1471_s17 + $0xe0] sm:$0xff] %v972_v47  ;;  %975 = vst [vmem:[%s1471_s17 + $0xe8] sm:$0xff] %v974_v48  ;;  %v978_v51 = vld [vmem:[%s1475_s23 + $0xf8] sm:$0xff]  ;;  %s2038_s23 = smov %s1965_s10 }
 0x185   : >> { %977 = vst [vmem:[%s1471_s17 + $0xf0] sm:$0xff] %v976_v50  ;;  %979 = vst [vmem:[%s1471_s17 + $0xf8] sm:$0xff] %v978_v51  ;;  %s2037_s17 = smov %s986_s11 }
 0x186 PF: > { %s2006_s12 = sand.u32 31, %s2047_s9   ;;  %s1210_s13 = sshll.u32 %s1898_s30, 8 }
 0x187   : > { %s991_s14 = scalar_lea.vmem %s1793_s15, %s1210_s13 [#allocation2]   ;;  %s993_s20 = scalar_lea.vmem %s1892_s28, %s1210_s13  }
 0x188   : > { %p1203_p0 = scmp.le.s32.totalorder %s2006_s12, 0 }
 0x189   : > { %s1485_s22 = smov (!%p1203_p0), %s993_s20   ;;  %s1489_s24 = smov (!%p1203_p0), %s991_s14  }
 0x18a   : > { %1112 = sbr.rel (%p1203_p0) target bundleno = 411 (0x19b), region = 140  ;;  %s1493_s26 = smov (!%p1203_p0), 0  }
 0x18b   : > { %s1497_s27 = smov (!%p1203_p0), 0  }
 0x191 LB: >> { %v1003_v52 = vld [vmem:[%s1491_s24] sm:$0xff]  ;;  %s1005_s9 = sadd.s32 1, %s1495_s26  ;;  %s997_s27 = sadd.s32 1, %s1499_s27   ;;  %s1499_s27 = sphi %s1497_s27, %s997_s27   ;;  %s1495_s26 = sphi %s1493_s26, %s1494_s26   ;;  %s1491_s24 = sphi %s1489_s24, %s1010_s24   ;;  %s1487_s22 = sphi %s1485_s22, %s1011_s22  }
 0x192   : >> { %1004 = vst [vmem:[%s1487_s22] sm:$0xff] %v1003_v52  ;;  %p1006_p1 = scmp.ge.s32.totalorder %s1005_s9, %s2006_s12  ;;  %p996_p2 = scmp.ge.s32.totalorder %s997_s27, %s2006_s12 }
 0x194   : >> { %s2051_s9 = smov (%p1006_p1, %s1005_s9), 0  ;;  %999 = sbr.rel (!%p996_p2) target bundleno = 401 (0x191), region = 146 }
 0x195   : >> { %s1204_s15 = sshll.u32 %s2051_s9, 3  ;;  %s1494_s26 = smov %s2051_s9  }
 0x196   : >> { %s1010_s24 = scalar_lea.vmem %s991_s14, %s1204_s15 [#allocation2]   ;;  %s1011_s22 = scalar_lea.vmem %s993_s20, %s1204_s15  }
 0x19b PF: > { %s14_s19 = sadd.s32 1, %s1467_s19   ;;  %s2040_s15 = smov %s1455_s16 }
 0x19c   : > { %p11_p3 = scmp.ge.s32.totalorder %s14_s19, 4   ;;  %s2041_s16 = smov %s1568_s25 }
 0x19d   : > { %s2042_s17 = smov %s1463_s18  ;;  %s2043_s18 = smov %s2045_s21 }
 0x19e   :  { %13 = sbr.rel (!%p11_p3) target bundleno = 3 (0x3), region = 157 }

// kernel: conformer_forward.19
= control target key start
LH: loop header
LB: loop body
LE: loop exit
PB: predicated region body
PF: predicated region fallthrough
CT: control target
= control target key end

     0   :  { %9 = vsyncpa [#allocation3], 0  ;;  %s1635_s0 = inlined_call_operand.vmem [shape: f32[1,288,256], index: 0, kind: input, shape index: {}]   ;;  %s1636_s1 = inlined_call_operand.vmem [shape: f32[1,256,128], index: 1, kind: input, shape index: {}]   ;;  %s1637_s2 = inlined_call_operand.vmem [shape: f32[1,128], index: 2, kind: input, shape index: {}]   ;;  %s1638_s3 = inlined_call_operand.vmem [shape: f32[1,288,128], index: 3, kind: input, shape index: {}]   ;;  %s1639_s4 = inlined_call_operand.hbm [shape: f32[1,288,128], index: 4, kind: output, shape index: {}]  }
   0x1   :  { %11 = vsyncpa [#allocation3 + $0x1], 0  ;;  %s1195_s15 = smov 0   ;;  %s1197_s16 = smov 0  }
   0x2   :  { %s1199_s17 = smov 0   ;;  %s1201_s18 = smov 0  }
   0x3   :  { %s1203_s19 = smov 0   ;;  %s1205_s20 = smov 0  }
   0x4 LB: > { %s924_s21 = sadd.s32 4294967295, %s1164_s20   ;;  %s925_s22 = sadd.s32 4294967294, %s1164_s20   ;;  %s1164_s20 = sphi %s1205_s20, %s17_s20   ;;  %s1160_s19 = sphi %s1203_s19, %s1646_s19   ;;  %s1156_s18 = sphi %s1201_s18, %s1645_s18   ;;  %s1152_s17 = sphi %s1199_s17, %s1644_s17   ;;  %s1148_s16 = sphi %s1197_s16, %s1643_s16   ;;  %s1144_s15 = sphi %s1195_s15, %s1642_s15  }
   0x5   : > { %s32_s23 = sadd.s32 1, %s1160_s19  ;;  %s155_s24 = sadd.s32 1, %s1152_s17 }
   0x6   : > { %p34_p0 = scmp.ge.s32.totalorder %s32_s23, 2  ;;  %p165_p1 = scmp.ne.s32.totalorder %s1152_s17, %s1148_s16 }
   0x7   : > { %p166_p2 = scmp.eq.s32.totalorder %s924_s21, 1  ;;  %p171_p3 = scmp.ne.s32.totalorder %s1148_s16, %s1144_s15 }
   0x8   : > { %s1648_s23 = smov (%p34_p0, %s32_s23), 0  ;;  %p172_p5 = scmp.eq.s32.totalorder %s925_s22, 1 }
   0x9   : > { %p1235_p4 = por %p166_p2, %p165_p1  ;;  %s149_s26 = ssub.s32 %s1160_s19, %s1648_s23 }
   0xa   : > { %p930_p6 = scmp.ge.s32.totalorder %s1164_s20, 1  ;;  %p153_p7 = scmp.eq.s32.totalorder %s149_s26, 0 }
   0xb   : > { %p1242_p8 = por %p172_p5, %p171_p3  ;;  %p247_p9 = scmp.lt.s32.totalorder %s1164_s20, 3 }
   0xc   : > { %s1248_s28 = scalar_select %p153_p7, %s1152_s17, %s155_s24  }
   0xd   : > { %p248_p10 = pnand %p930_p6, %p247_p9 }
   0xe   : > { %v416_v0 = vld [vmem:[%s1636_s1] sm:$0xff] (!%p248_p10)  ;;  %v417_v1 = vld [vmem:[%s1636_s1 + $0x8] sm:$0xff] (!%p248_p10)  ;;  %v418_v2 = vld [vmem:[%s1636_s1 + $0x10] sm:$0xff] (!%p248_p10)  ;;  %s1260_s9 = sshll.u32 (!%p248_p10), %s1156_s18, 5  ;;  %v1166_v3 = vmov (!%p248_p10), 0.0|0.0   ;;  %s299_s5 = sand.u32 (!%p248_p10), 1, %s1148_s16  }
   0xf   : > { %251 = sbr.rel (%p248_p10) target bundleno = 385 (0x181), region = 36  ;;  %949 = vmatprep.subr.bf16.mxu0 (!%p248_p10), %v1166_v3  ;;  %997 = vmatprep.subr.bf16.mxu1 (!%p248_p10), %v1166_v3  ;;  %v950_v4 = vpack.c.bf16 (!%p248_p10), %v417_v1, %v416_v0  ;;  %v419_v5 = vld [vmem:[%s1636_s1 + $0x18] sm:$0xff] (!%p248_p10)  ;;  %p308_p11 = scmp.lt.s32.totalorder (!%p248_p10), %s1260_s9, 35  ;;  %v420_v7 = vld [vmem:[%s1636_s1 + $0x20] sm:$0xff] (!%p248_p10)  ;;  %v421_v8 = vld [vmem:[%s1636_s1 + $0x28] sm:$0xff] (!%p248_p10) }
  0x10   : > { %v953_v6 = vpack.c.bf16 (!%p248_p10), %v419_v5, %v418_v2  ;;  %v956_v9 = vpack.c.bf16 (!%p248_p10), %v421_v8, %v420_v7  ;;  %v422_v10 = vld [vmem:[%s1636_s1 + $0x30] sm:$0xff] (!%p248_p10)  ;;  %v423_v11 = vld [vmem:[%s1636_s1 + $0x38] sm:$0xff] (!%p248_p10)  ;;  %v424_v15 = vld [vmem:[%s1636_s1 + $0x40] sm:$0xff] (!%p248_p10)  ;;  %s1569_s14 = scalar_lea.sflag (!%p248_p10), [#allocation3], %s299_s5 }
  0x11   : > { %951 = vmatpush1.bf16.msra.mxu0 (!%p248_p10), %v950_v4  ;;  %1013 = vmatpush1.bf16.msra.mxu1 (!%p248_p10), %v950_v4  ;;  %v959_v13 = vpack.c.bf16 (!%p248_p10), %v423_v11, %v422_v10  ;;  %v425_v16 = vld [vmem:[%s1636_s1 + $0x48] sm:$0xff] (!%p248_p10)  ;;  %v426_v18 = vld [vmem:[%s1636_s1 + $0x50] sm:$0xff] (!%p248_p10)  ;;  %v427_v19 = vld [vmem:[%s1636_s1 + $0x58] sm:$0xff] (!%p248_p10) }
  0x12   : > { %952 = vmatprep.subr.bf16.mxu0 (!%p248_p10), %v1166_v3  ;;  %998 = vmatprep.subr.bf16.mxu1 (!%p248_p10), %v1166_v3  ;;  %v962_v17 = vpack.c.bf16 (!%p248_p10), %v425_v16, %v424_v15  ;;  %v965_v20 = vpack.c.bf16 (!%p248_p10), %v427_v19, %v426_v18  ;;  %v428_v21 = vld [vmem:[%s1636_s1 + $0x60] sm:$0xff] (!%p248_p10)  ;;  %v429_v22 = vld [vmem:[%s1636_s1 + $0x68] sm:$0xff] (!%p248_p10)  ;;  %v430_v24 = vld [vmem:[%s1636_s1 + $0x70] sm:$0xff] (!%p248_p10) }
  0x13   : > { %v968_v23 = vpack.c.bf16 (!%p248_p10), %v429_v22, %v428_v21  ;;  %v431_v25 = vld [vmem:[%s1636_s1 + $0x78] sm:$0xff] (!%p248_p10)  ;;  %v432_v27 = vld [vmem:[%s1636_s1 + $0x80] sm:$0xff] (!%p248_p10)  ;;  %v433_v28 = vld [vmem:[%s1636_s1 + $0x88] sm:$0xff] (!%p248_p10) }
  0x14   : > { %v971_v26 = vpack.c.bf16 (!%p248_p10), %v431_v25, %v430_v24  ;;  %v974_v29 = vpack.c.bf16 (!%p248_p10), %v433_v28, %v432_v27  ;;  %v434_v30 = vld [vmem:[%s1636_s1 + $0x90] sm:$0xff] (!%p248_p10)  ;;  %v435_v31 = vld [vmem:[%s1636_s1 + $0x98] sm:$0xff] (!%p248_p10)  ;;  %v436_v33 = vld [vmem:[%s1636_s1 + $0xa0] sm:$0xff] (!%p248_p10) }
  0x15   : > { %954 = vmatpush1.bf16.msra.mxu0 (!%p248_p10), %v953_v6  ;;  %1014 = vmatpush1.bf16.msra.mxu1 (!%p248_p10), %v953_v6  ;;  %v977_v32 = vpack.c.bf16 (!%p248_p10), %v435_v31, %v434_v30  ;;  %v437_v34 = vld [vmem:[%s1636_s1 + $0xa8] sm:$0xff] (!%p248_p10)  ;;  %v438_v36 = vld [vmem:[%s1636_s1 + $0xb0] sm:$0xff] (!%p248_p10)  ;;  %v439_v37 = vld [vmem:[%s1636_s1 + $0xb8] sm:$0xff] (!%p248_p10) }
  0x16   : > { %s1269_s12 = scalar_select %p308_p11, %s1260_s9, 35  ;;  %955 = vmatprep.subr.bf16.mxu0 %v1166_v3  ;;  %999 = vmatprep.subr.bf16.mxu1 %v1166_v3  ;;  %v980_v35 = vpack.c.bf16 %v437_v34, %v436_v33  ;;  %v983_v38 = vpack.c.bf16 %v439_v37, %v438_v36  ;;  %v440_v39 = vld [vmem:[%s1636_s1 + $0xc0] sm:$0xff]  ;;  %v441_v40 = vld [vmem:[%s1636_s1 + $0xc8] sm:$0xff]  ;;  %v442_v42 = vld [vmem:[%s1636_s1 + $0xd0] sm:$0xff] }
  0x17   : > { %v986_v41 = vpack.c.bf16 %v441_v40, %v440_v39  ;;  %v443_v43 = vld [vmem:[%s1636_s1 + $0xd8] sm:$0xff]  ;;  %v444_v45 = vld [vmem:[%s1636_s1 + $0xe0] sm:$0xff]  ;;  %v445_v46 = vld [vmem:[%s1636_s1 + $0xe8] sm:$0xff]  ;;  %s785_s21 = ssub.s32 (%p1235_p4), 36, %s1260_s9 }
  0x18   : > { %s947_s24 = sshll.u32 %s1269_s12, 4  ;;  %v989_v44 = vpack.c.bf16 %v443_v43, %v442_v42  ;;  %v992_v47 = vpack.c.bf16 %v445_v46, %v444_v45  ;;  %v446_v48 = vld [vmem:[%s1636_s1 + $0xf0] sm:$0xff]  ;;  %v447_v49 = vld [vmem:[%s1636_s1 + $0xf8] sm:$0xff]  ;;  %s936_s6 = sshll.u32 %s1269_s12, 3 }
  0x19   : > { %s1283_s30 = scalar_lea.vmem %s1635_s0, %s947_s24  ;;  %957 = vmatpush1.bf16.msra.mxu0 %v956_v9  ;;  %1015 = vmatpush1.bf16.msra.mxu1 %v956_v9  ;;  %v995_v50 = vpack.c.bf16 %v447_v49, %v446_v48  ;;  %s1460_s10 = scalar_lea.vmem %s1638_s3, %s936_s6  ;;  %v1465_v49 = vld [vmem:[%s1637_s2] ss:$0 sm:$0xff] }
  0x1a   : > { %v353_v12 = vld [vmem:[%s1283_s30 + $0x8] sm:$0xff]  ;;  %958 = vmatprep.subr.bf16.mxu0 %v1166_v3  ;;  %1000 = vmatprep.subr.bf16.mxu1 %v1166_v3  ;;  %v352_v51 = vld [vmem:[%s1283_s30] sm:$0xff]  ;;  %v355_v53 = vld [vmem:[%s1283_s30 + $0x18] sm:$0xff]  ;;  %p786_p12 = scmp.lt.s32.totalorder (%p1235_p4), %s785_s21, 32 }
  0x1b   : > { %v385_v14 = vld [vmem:[%s1283_s30 + $0x108] sm:$0xff]  ;;  %519 = vmatprep.mubr.f32.mxu0 %v353_v12  ;;  %v384_v52 = vld [vmem:[%s1283_s30 + $0x100] sm:$0xff]  ;;  %v387_v54 = vld [vmem:[%s1283_s30 + $0x118] sm:$0xff] }
  0x1c   : > { %599 = vmatprep.mubr.f32.mxu1 %v385_v14  ;;  %v354_v55 = vld [vmem:[%s1283_s30 + $0x10] sm:$0xff]  ;;  %v357_v57 = vld [vmem:[%s1283_s30 + $0x28] sm:$0xff]  ;;  %v356_v59 = vld [vmem:[%s1283_s30 + $0x20] sm:$0xff] }
  0x1d   : > { %960 = vmatpush1.bf16.msra.mxu0 %v959_v13  ;;  %1016 = vmatpush1.bf16.msra.mxu1 %v959_v13  ;;  %v386_v56 = vld [vmem:[%s1283_s30 + $0x110] sm:$0xff]  ;;  %v389_v58 = vld [vmem:[%s1283_s30 + $0x128] sm:$0xff]  ;;  %v388_v60 = vld [vmem:[%s1283_s30 + $0x120] sm:$0xff] }
  0x1e   : > { %961 = vmatprep.subr.bf16.mxu0 %v1166_v3  ;;  %1001 = vmatprep.subr.bf16.mxu1 %v1166_v3  ;;  %v359_v61 = vld [vmem:[%s1283_s30 + $0x38] sm:$0xff]  ;;  %v358_v63 = vld [vmem:[%s1283_s30 + $0x30] sm:$0xff]  ;;  %v361_v1 = vld [vmem:[%s1283_s30 + $0x48] sm:$0xff] }
  0x1f   : > { %v391_v62 = vld [vmem:[%s1283_s30 + $0x138] sm:$0xff]  ;;  %v390_v0 = vld [vmem:[%s1283_s30 + $0x130] sm:$0xff]  ;;  %v393_v2 = vld [vmem:[%s1283_s30 + $0x148] sm:$0xff] }
  0x20   : > { %v392_v4 = vld [vmem:[%s1283_s30 + $0x140] sm:$0xff]  ;;  %v363_v5 = vld [vmem:[%s1283_s30 + $0x58] sm:$0xff]  ;;  %v362_v7 = vld [vmem:[%s1283_s30 + $0x50] sm:$0xff] }
  0x21   : > { %963 = vmatpush1.bf16.msra.mxu0 %v962_v17  ;;  %1017 = vmatpush1.bf16.msra.mxu1 %v962_v17  ;;  %v395_v6 = vld [vmem:[%s1283_s30 + $0x158] sm:$0xff]  ;;  %v394_v8 = vld [vmem:[%s1283_s30 + $0x150] sm:$0xff]  ;;  %v365_v9 = vld [vmem:[%s1283_s30 + $0x68] sm:$0xff] }
  0x22   : > { %964 = vmatprep.subr.bf16.mxu0 %v1166_v3  ;;  %1002 = vmatprep.subr.bf16.mxu1 %v1166_v3  ;;  %v397_v10 = vld [vmem:[%s1283_s30 + $0x168] sm:$0xff]  ;;  %v364_v11 = vld [vmem:[%s1283_s30 + $0x60] sm:$0xff]  ;;  %v367_v13 = vld [vmem:[%s1283_s30 + $0x78] sm:$0xff] }
  0x23   : > { %v396_v12 = vld [vmem:[%s1283_s30 + $0x160] sm:$0xff]  ;;  %v399_v14 = vld [vmem:[%s1283_s30 + $0x178] sm:$0xff]  ;;  %v366_v15 = vld [vmem:[%s1283_s30 + $0x70] sm:$0xff] }
  0x24   : > { %v398_v16 = vld [vmem:[%s1283_s30 + $0x170] sm:$0xff]  ;;  %v369_v17 = vld [vmem:[%s1283_s30 + $0x88] sm:$0xff]  ;;  %v368_v19 = vld [vmem:[%s1283_s30 + $0x80] sm:$0xff] }
  0x25   : > { %966 = vmatpush1.bf16.msra.mxu0 %v965_v20  ;;  %1018 = vmatpush1.bf16.msra.mxu1 %v965_v20  ;;  %v401_v18 = vld [vmem:[%s1283_s30 + $0x188] sm:$0xff]  ;;  %v400_v20 = vld [vmem:[%s1283_s30 + $0x180] sm:$0xff]  ;;  %v371_v21 = vld [vmem:[%s1283_s30 + $0x98] sm:$0xff] }
  0x26   : > { %967 = vmatprep.subr.bf16.mxu0 %v1166_v3  ;;  %1003 = vmatprep.subr.bf16.mxu1 %v1166_v3  ;;  %v403_v22 = vld [vmem:[%s1283_s30 + $0x198] sm:$0xff]  ;;  %v402_v24 = vld [vmem:[%s1283_s30 + $0x190] sm:$0xff]  ;;  %v373_v25 = vld [vmem:[%s1283_s30 + $0xa8] sm:$0xff] }
  0x27   : > { %v372_v27 = vld [vmem:[%s1283_s30 + $0xa0] sm:$0xff]  ;;  %v407_v30 = vld [vmem:[%s1283_s30 + $0x1b8] sm:$0xff]  ;;  %v374_v31 = vld [vmem:[%s1283_s30 + $0xb0] sm:$0xff] }
  0x28   : > { %v404_v28 = vld [vmem:[%s1283_s30 + $0x1a0] sm:$0xff]  ;;  %v377_v33 = vld [vmem:[%s1283_s30 + $0xc8] sm:$0xff]  ;;  %v379_v37 = vld [vmem:[%s1283_s30 + $0xd8] sm:$0xff] }
  0x29   : > { %969 = vmatpush1.bf16.msra.mxu0 %v968_v23  ;;  %1019 = vmatpush1.bf16.msra.mxu1 %v968_v23  ;;  %v370_v23 = vld [vmem:[%s1283_s30 + $0x90] sm:$0xff]  ;;  %v409_v34 = vld [vmem:[%s1283_s30 + $0x1c8] sm:$0xff]  ;;  %v408_v36 = vld [vmem:[%s1283_s30 + $0x1c0] sm:$0xff] }
  0x2a   : > { %970 = vmatprep.subr.bf16.mxu0 %v1166_v3  ;;  %1004 = vmatprep.subr.bf16.mxu1 %v1166_v3  ;;  %v378_v39 = vld [vmem:[%s1283_s30 + $0xd0] sm:$0xff]  ;;  %v413_v42 = vld [vmem:[%s1283_s30 + $0x1e8] sm:$0xff]  ;;  %v380_v43 = vld [vmem:[%s1283_s30 + $0xe0] sm:$0xff] }
  0x2b   : > { %v410_v40 = vld [vmem:[%s1283_s30 + $0x1d0] sm:$0xff]  ;;  %v383_v45 = vld [vmem:[%s1283_s30 + $0xf8] sm:$0xff] }
  0x2c   : > { %v415_v46 = vld [vmem:[%s1283_s30 + $0x1f8] sm:$0xff]  ;;  %v414_v48 = vld [vmem:[%s1283_s30 + $0x1f0] sm:$0xff] }
  0x2d   : > { %972 = vmatpush1.bf16.msra.mxu0 %v971_v26  ;;  %1020 = vmatpush1.bf16.msra.mxu1 %v971_v26  ;;  %v405_v26 = vld [vmem:[%s1283_s30 + $0x1a8] sm:$0xff] }
  0x2e   : > { %973 = vmatprep.subr.bf16.mxu0 %v1166_v3  ;;  %1005 = vmatprep.subr.bf16.mxu1 %v1166_v3 }
  0x31   : > { %975 = vmatpush1.bf16.msra.mxu0 %v974_v29  ;;  %1021 = vmatpush1.bf16.msra.mxu1 %v974_v29  ;;  %v375_v29 = vld [vmem:[%s1283_s30 + $0xb8] sm:$0xff] }
  0x32   : > { %976 = vmatprep.subr.bf16.mxu0 %v1166_v3  ;;  %1006 = vmatprep.subr.bf16.mxu1 %v1166_v3 }
  0x35   : > { %978 = vmatpush1.bf16.msra.mxu0 %v977_v32  ;;  %1022 = vmatpush1.bf16.msra.mxu1 %v977_v32  ;;  %v406_v32 = vld [vmem:[%s1283_s30 + $0x1b0] sm:$0xff] }
  0x36   : > { %979 = vmatprep.subr.bf16.mxu0 %v1166_v3  ;;  %1007 = vmatprep.subr.bf16.mxu1 %v1166_v3 }
  0x39   : > { %981 = vmatpush1.bf16.msra.mxu0 %v980_v35  ;;  %1023 = vmatpush1.bf16.msra.mxu1 %v980_v35  ;;  %v376_v35 = vld [vmem:[%s1283_s30 + $0xc0] sm:$0xff] }
  0x3a   : > { %982 = vmatprep.subr.bf16.mxu0 %v1166_v3  ;;  %1008 = vmatprep.subr.bf16.mxu1 %v1166_v3 }
  0x3d   : > { %984 = vmatpush1.bf16.msra.mxu0 %v983_v38  ;;  %1024 = vmatpush1.bf16.msra.mxu1 %v983_v38  ;;  %v411_v38 = vld [vmem:[%s1283_s30 + $0x1d8] sm:$0xff] }
  0x3e   : > { %985 = vmatprep.subr.bf16.mxu0 %v1166_v3  ;;  %1009 = vmatprep.subr.bf16.mxu1 %v1166_v3 }
  0x41   : > { %987 = vmatpush1.bf16.msra.mxu0 %v986_v41  ;;  %1025 = vmatpush1.bf16.msra.mxu1 %v986_v41  ;;  %v381_v41 = vld [vmem:[%s1283_s30 + $0xe8] sm:$0xff] }
  0x42   : > { %988 = vmatprep.subr.bf16.mxu0 %v1166_v3  ;;  %1010 = vmatprep.subr.bf16.mxu1 %v1166_v3 }
  0x45   : > { %990 = vmatpush1.bf16.msra.mxu0 %v989_v44  ;;  %1026 = vmatpush1.bf16.msra.mxu1 %v989_v44  ;;  %v412_v44 = vld [vmem:[%s1283_s30 + $0x1e0] sm:$0xff] }
  0x46   : > { %991 = vmatprep.subr.bf16.mxu0 %v1166_v3  ;;  %1011 = vmatprep.subr.bf16.mxu1 %v1166_v3 }
  0x49   : > { %993 = vmatpush1.bf16.msra.mxu0 %v992_v47  ;;  %1027 = vmatpush1.bf16.msra.mxu1 %v992_v47  ;;  %v382_v47 = vld [vmem:[%s1283_s30 + $0xf0] sm:$0xff] }
  0x4a   : > { %994 = vmatprep.subr.bf16.mxu0 %v1166_v3  ;;  %1012 = vmatprep.subr.bf16.mxu1 %v1166_v3  ;;  %v360_v3 = vld [vmem:[%s1283_s30 + $0x40] sm:$0xff]  ;;  %s931_s30 = sshll.u32 %s299_s5, 8 }
  0x4b   : > { %s1475_s12 = scalar_lea.vmem [#allocation2], %s931_s30 }
  0x4d   : > { %996 = vmatpush1.bf16.msra.mxu0 %v995_v50  ;;  %1028 = vmatpush1.bf16.msra.mxu1 %v995_v50 }
  0x50   : > { %520 = vmatmul.mubr.f32.vlgmr.msra.gmra.mrb[0].mxu0 %v352_v51  ;;  %600 = vmatmul.mubr.f32.vlgmr.msra.gmra.mrb[0].mxu1 %v384_v52  ;;  %v680_v51 = vld [vmem:[%s1460_s10] sm:$0xff] }
  0x51   : > { %524 = vmatprep.mubr.f32.mxu0 %v355_v53  ;;  %604 = vmatprep.mubr.f32.mxu1 %v387_v54  ;;  %v696_v53 = vld [vmem:[%s1460_s10 + $0x80] sm:$0xff] }
  0x54   : > { %525 = vmatmul.mubr.f32.gmra.mrb[2].mxu0 %v354_v55  ;;  %605 = vmatmul.mubr.f32.gmra.mrb[2].mxu1 %v386_v56 }
  0x55   : > { %529 = vmatprep.mubr.f32.mxu0 %v357_v57  ;;  %609 = vmatprep.mubr.f32.mxu1 %v389_v58 }
  0x58   : > { %530 = vmatmul.mubr.f32.gmra.mrb[4].mxu0 %v356_v59  ;;  %610 = vmatmul.mubr.f32.gmra.mrb[4].mxu1 %v388_v60 }
  0x59   : > { %534 = vmatprep.mubr.f32.mxu0 %v359_v61  ;;  %614 = vmatprep.mubr.f32.mxu1 %v391_v62  ;;  %v681_v61 = vld [vmem:[%s1460_s10 + $0x8] sm:$0xff] }
  0x5c   : > { %535 = vmatmul.mubr.f32.gmra.mrb[6].mxu0 %v358_v63  ;;  %615 = vmatmul.mubr.f32.gmra.mrb[6].mxu1 %v390_v0  ;;  %v697_v63 = vld [vmem:[%s1460_s10 + $0x88] sm:$0xff] }
  0x5d   : > { %539 = vmatprep.mubr.f32.mxu0 %v361_v1  ;;  %619 = vmatprep.mubr.f32.mxu1 %v393_v2 }
  0x60   : > { %540 = vmatmul.mubr.f32.gmra.mrb[8].mxu0 %v360_v3  ;;  %620 = vmatmul.mubr.f32.gmra.mrb[8].mxu1 %v392_v4 }
  0x61   : > { %544 = vmatprep.mubr.f32.mxu0 %v363_v5  ;;  %624 = vmatprep.mubr.f32.mxu1 %v395_v6 }
  0x64   : > { %545 = vmatmul.mubr.f32.gmra.mrb[10].mxu0 %v362_v7  ;;  %625 = vmatmul.mubr.f32.gmra.mrb[10].mxu1 %v394_v8  ;;  %v682_v7 = vld [vmem:[%s1460_s10 + $0x10] sm:$0xff] }
  0x65   : > { %549 = vmatprep.mubr.f32.mxu0 %v365_v9  ;;  %629 = vmatprep.mubr.f32.mxu1 %v397_v10  ;;  %v698_v9 = vld [vmem:[%s1460_s10 + $0x90] sm:$0xff] }
  0x68   : > { %550 = vmatmul.mubr.f32.gmra.mrb[12].mxu0 %v364_v11  ;;  %630 = vmatmul.mubr.f32.gmra.mrb[12].mxu1 %v396_v12 }
  0x69   : > { %554 = vmatprep.mubr.f32.mxu0 %v367_v13  ;;  %634 = vmatprep.mubr.f32.mxu1 %v399_v14 }
  0x6c   : > { %555 = vmatmul.mubr.f32.gmra.mrb[14].mxu0 %v366_v15  ;;  %635 = vmatmul.mubr.f32.gmra.mrb[14].mxu1 %v398_v16 }
  0x6d   : > { %559 = vmatprep.mubr.f32.mxu0 %v369_v17  ;;  %639 = vmatprep.mubr.f32.mxu1 %v401_v18  ;;  %v683_v17 = vld [vmem:[%s1460_s10 + $0x18] sm:$0xff] }
  0x70   : > { %560 = vmatmul.mubr.f32.gmra.mrb[16].mxu0 %v368_v19  ;;  %640 = vmatmul.mubr.f32.gmra.mrb[16].mxu1 %v400_v20  ;;  %v699_v19 = vld [vmem:[%s1460_s10 + $0x98] sm:$0xff] }
  0x71   : > { %564 = vmatprep.mubr.f32.mxu0 %v371_v21  ;;  %644 = vmatprep.mubr.f32.mxu1 %v403_v22 }
  0x74   : > { %565 = vmatmul.mubr.f32.gmra.mrb[18].mxu0 %v370_v23  ;;  %645 = vmatmul.mubr.f32.gmra.mrb[18].mxu1 %v402_v24 }
  0x75   : > { %569 = vmatprep.mubr.f32.mxu0 %v373_v25  ;;  %649 = vmatprep.mubr.f32.mxu1 %v405_v26 }
  0x78   : > { %570 = vmatmul.mubr.f32.gmra.mrb[20].mxu0 %v372_v27  ;;  %650 = vmatmul.mubr.f32.gmra.mrb[20].mxu1 %v404_v28  ;;  %v684_v27 = vld [vmem:[%s1460_s10 + $0x20] sm:$0xff] }
  0x79   : > { %574 = vmatprep.mubr.f32.mxu0 %v375_v29  ;;  %654 = vmatprep.mubr.f32.mxu1 %v407_v30  ;;  %v700_v29 = vld [vmem:[%s1460_s10 + $0xa0] sm:$0xff] }
  0x7c   : > { %575 = vmatmul.mubr.f32.gmra.mrb[22].mxu0 %v374_v31  ;;  %655 = vmatmul.mubr.f32.gmra.mrb[22].mxu1 %v406_v32 }
  0x7d   : > { %579 = vmatprep.mubr.f32.mxu0 %v377_v33  ;;  %659 = vmatprep.mubr.f32.mxu1 %v409_v34 }
  0x80   : > { %580 = vmatmul.mubr.f32.gmra.mrb[24].mxu0 %v376_v35  ;;  %660 = vmatmul.mubr.f32.gmra.mrb[24].mxu1 %v408_v36 }
  0x81   : > { %584 = vmatprep.mubr.f32.mxu0 %v379_v37  ;;  %664 = vmatprep.mubr.f32.mxu1 %v411_v38  ;;  %v685_v37 = vld [vmem:[%s1460_s10 + $0x28] sm:$0xff] }
  0x84   : > { %585 = vmatmul.mubr.f32.gmra.mrb[26].mxu0 %v378_v39  ;;  %665 = vmatmul.mubr.f32.gmra.mrb[26].mxu1 %v410_v40  ;;  %v701_v39 = vld [vmem:[%s1460_s10 + $0xa8] sm:$0xff] }
  0x85   : > { %589 = vmatprep.mubr.f32.mxu0 %v381_v41  ;;  %669 = vmatprep.mubr.f32.mxu1 %v413_v42 }
  0x88   : > { %590 = vmatmul.mubr.f32.gmra.mrb[28].mxu0 %v380_v43  ;;  %670 = vmatmul.mubr.f32.gmra.mrb[28].mxu1 %v412_v44 }
  0x89   : > { %594 = vmatprep.mubr.f32.mxu0 %v383_v45  ;;  %674 = vmatprep.mubr.f32.mxu1 %v415_v46 }
  0x8c   : > { %595 = vmatmul.mubr.f32.gmra.mrb[30].mxu0 %v382_v47  ;;  %675 = vmatmul.mubr.f32.gmra.mrb[30].mxu1 %v414_v48  ;;  %v686_v47 = vld [vmem:[%s1460_s10 + $0x30] sm:$0xff] }
 0x123   : > { %v521_v50 = vpop.f32.mrb[0].mxu0  ;;  %v601_v52 = vpop.f32.mrb[0].mxu1 }
 0x124   : > { %v522_v54 = vadd.f32 %v1465_v49, %v521_v50  ;;  %v602_v55 = vadd.f32 %v1465_v49, %v601_v52  ;;  %v523_v56 = vpop.f32.mrb[1].mxu0  ;;  %v603_v57 = vpop.f32.mrb[1].mxu1  ;;  %v702_v50 = vld [vmem:[%s1460_s10 + $0xb0] sm:$0xff] }
 0x126   : > { %v712_v58 = vadd.f32 %v680_v51, %v522_v54  ;;  %v728_v59 = vadd.f32 %v696_v53, %v602_v55 }
 0x127   : > { %v526_v60 = vpop.f32.mrb[2].mxu0  ;;  %v606_v62 = vpop.f32.mrb[2].mxu1 }
 0x128   : > { %744 = vst [vmem:[%s1475_s12] sm:$0xff] %v712_v58  ;;  %760 = vst [vmem:[%s1475_s12 + $0x80] sm:$0xff] %v728_v59  ;;  %v527_v0 = vadd.f32 %v1465_v49, %v526_v60  ;;  %v607_v1 = vadd.f32 %v1465_v49, %v606_v62  ;;  %v528_v2 = vpop.f32.mrb[3].mxu0  ;;  %v608_v3 = vpop.f32.mrb[3].mxu1  ;;  %v687_v58 = vld [vmem:[%s1460_s10 + $0x38] sm:$0xff] }
 0x129   : > { %v703_v60 = vld [vmem:[%s1460_s10 + $0xb8] sm:$0xff] }
 0x12a   : > { %v713_v4 = vadd.f32 %v681_v61, %v527_v0  ;;  %v729_v5 = vadd.f32 %v697_v63, %v607_v1 }
 0x12b   : > { %v531_v6 = vpop.f32.mrb[4].mxu0  ;;  %v611_v8 = vpop.f32.mrb[4].mxu1 }
 0x12c   : > { %745 = vst [vmem:[%s1475_s12 + $0x8] sm:$0xff] %v713_v4  ;;  %761 = vst [vmem:[%s1475_s12 + $0x88] sm:$0xff] %v729_v5  ;;  %v532_v10 = vadd.f32 %v1465_v49, %v531_v6  ;;  %v612_v11 = vadd.f32 %v1465_v49, %v611_v8  ;;  %v533_v12 = vpop.f32.mrb[5].mxu0  ;;  %v613_v13 = vpop.f32.mrb[5].mxu1  ;;  %v688_v4 = vld [vmem:[%s1460_s10 + $0x40] sm:$0xff] }
 0x12d   : > { %v704_v6 = vld [vmem:[%s1460_s10 + $0xc0] sm:$0xff] }
 0x12e   : > { %v714_v14 = vadd.f32 %v682_v7, %v532_v10  ;;  %v730_v15 = vadd.f32 %v698_v9, %v612_v11 }
 0x12f   : > { %v536_v16 = vpop.f32.mrb[6].mxu0  ;;  %v616_v18 = vpop.f32.mrb[6].mxu1 }
 0x130   : > { %746 = vst [vmem:[%s1475_s12 + $0x10] sm:$0xff] %v714_v14  ;;  %762 = vst [vmem:[%s1475_s12 + $0x90] sm:$0xff] %v730_v15  ;;  %v537_v20 = vadd.f32 %v1465_v49, %v536_v16  ;;  %v617_v21 = vadd.f32 %v1465_v49, %v616_v18  ;;  %v538_v22 = vpop.f32.mrb[7].mxu0  ;;  %v618_v23 = vpop.f32.mrb[7].mxu1  ;;  %v689_v14 = vld [vmem:[%s1460_s10 + $0x48] sm:$0xff] }
 0x131   : > { %v705_v16 = vld [vmem:[%s1460_s10 + $0xc8] sm:$0xff] }
 0x132   : > { %v715_v24 = vadd.f32 %v683_v17, %v537_v20  ;;  %v731_v25 = vadd.f32 %v699_v19, %v617_v21 }
 0x133   : > { %v541_v26 = vpop.f32.mrb[8].mxu0  ;;  %v621_v28 = vpop.f32.mrb[8].mxu1 }
 0x134   : > { %747 = vst [vmem:[%s1475_s12 + $0x18] sm:$0xff] %v715_v24  ;;  %763 = vst [vmem:[%s1475_s12 + $0x98] sm:$0xff] %v731_v25  ;;  %v542_v30 = vadd.f32 %v1465_v49, %v541_v26  ;;  %v622_v31 = vadd.f32 %v1465_v49, %v621_v28  ;;  %v543_v32 = vpop.f32.mrb[9].mxu0  ;;  %v623_v33 = vpop.f32.mrb[9].mxu1  ;;  %v690_v24 = vld [vmem:[%s1460_s10 + $0x50] sm:$0xff] }
 0x135   : > { %v706_v26 = vld [vmem:[%s1460_s10 + $0xd0] sm:$0xff] }
 0x136   : > { %v716_v34 = vadd.f32 %v684_v27, %v542_v30  ;;  %v732_v35 = vadd.f32 %v700_v29, %v622_v31 }
 0x137   : > { %v546_v36 = vpop.f32.mrb[10].mxu0  ;;  %v626_v38 = vpop.f32.mrb[10].mxu1 }
 0x138   : > { %748 = vst [vmem:[%s1475_s12 + $0x20] sm:$0xff] %v716_v34  ;;  %764 = vst [vmem:[%s1475_s12 + $0xa0] sm:$0xff] %v732_v35  ;;  %v547_v40 = vadd.f32 %v1465_v49, %v546_v36  ;;  %v627_v41 = vadd.f32 %v1465_v49, %v626_v38  ;;  %v548_v42 = vpop.f32.mrb[11].mxu0  ;;  %v628_v43 = vpop.f32.mrb[11].mxu1  ;;  %v691_v34 = vld [vmem:[%s1460_s10 + $0x58] sm:$0xff] }
 0x139   : > { %v707_v36 = vld [vmem:[%s1460_s10 + $0xd8] sm:$0xff] }
 0x13a   : > { %v717_v44 = vadd.f32 %v685_v37, %v547_v40  ;;  %v733_v45 = vadd.f32 %v701_v39, %v627_v41 }
 0x13b   : > { %v551_v46 = vpop.f32.mrb[12].mxu0  ;;  %v631_v48 = vpop.f32.mrb[12].mxu1 }
 0x13c   : > { %749 = vst [vmem:[%s1475_s12 + $0x28] sm:$0xff] %v717_v44  ;;  %765 = vst [vmem:[%s1475_s12 + $0xa8] sm:$0xff] %v733_v45  ;;  %v552_v51 = vadd.f32 %v1465_v49, %v551_v46  ;;  %v632_v52 = vadd.f32 %v1465_v49, %v631_v48  ;;  %v553_v53 = vpop.f32.mrb[13].mxu0  ;;  %v633_v54 = vpop.f32.mrb[13].mxu1  ;;  %v692_v44 = vld [vmem:[%s1460_s10 + $0x60] sm:$0xff] }
 0x13d   : > { %v708_v46 = vld [vmem:[%s1460_s10 + $0xe0] sm:$0xff] }
 0x13e   : > { %v718_v55 = vadd.f32 %v686_v47, %v552_v51  ;;  %v734_v56 = vadd.f32 %v702_v50, %v632_v52 }
 0x13f   : > { %v556_v57 = vpop.f32.mrb[14].mxu0  ;;  %v636_v59 = vpop.f32.mrb[14].mxu1 }
 0x140   : > { %750 = vst [vmem:[%s1475_s12 + $0x30] sm:$0xff] %v718_v55  ;;  %766 = vst [vmem:[%s1475_s12 + $0xb0] sm:$0xff] %v734_v56  ;;  %v557_v61 = vadd.f32 %v1465_v49, %v556_v57  ;;  %v637_v62 = vadd.f32 %v1465_v49, %v636_v59  ;;  %v558_v63 = vpop.f32.mrb[15].mxu0  ;;  %v638_v0 = vpop.f32.mrb[15].mxu1  ;;  %v693_v55 = vld [vmem:[%s1460_s10 + $0x68] sm:$0xff] }
 0x141   : > { %v709_v57 = vld [vmem:[%s1460_s10 + $0xe8] sm:$0xff] }
 0x142   : > { %v719_v1 = vadd.f32 %v687_v58, %v557_v61  ;;  %v735_v2 = vadd.f32 %v703_v60, %v637_v62 }
 0x143   : > { %v561_v3 = vpop.f32.mrb[16].mxu0  ;;  %v641_v5 = vpop.f32.mrb[16].mxu1 }
 0x144   : > { %751 = vst [vmem:[%s1475_s12 + $0x38] sm:$0xff] %v719_v1  ;;  %767 = vst [vmem:[%s1475_s12 + $0xb8] sm:$0xff] %v735_v2  ;;  %v562_v7 = vadd.f32 %v1465_v49, %v561_v3  ;;  %v642_v8 = vadd.f32 %v1465_v49, %v641_v5  ;;  %v563_v9 = vpop.f32.mrb[17].mxu0  ;;  %v643_v10 = vpop.f32.mrb[17].mxu1  ;;  %v694_v1 = vld [vmem:[%s1460_s10 + $0x70] sm:$0xff] }
 0x145   : > { %v710_v3 = vld [vmem:[%s1460_s10 + $0xf0] sm:$0xff] }
 0x146   : > { %v720_v11 = vadd.f32 %v688_v4, %v562_v7  ;;  %v736_v12 = vadd.f32 %v704_v6, %v642_v8 }
 0x147   : > { %v566_v13 = vpop.f32.mrb[18].mxu0  ;;  %v646_v15 = vpop.f32.mrb[18].mxu1 }
 0x148   : > { %752 = vst [vmem:[%s1475_s12 + $0x40] sm:$0xff] %v720_v11  ;;  %768 = vst [vmem:[%s1475_s12 + $0xc0] sm:$0xff] %v736_v12  ;;  %v567_v17 = vadd.f32 %v1465_v49, %v566_v13  ;;  %v647_v18 = vadd.f32 %v1465_v49, %v646_v15  ;;  %v568_v19 = vpop.f32.mrb[19].mxu0  ;;  %v648_v20 = vpop.f32.mrb[19].mxu1  ;;  %v695_v11 = vld [vmem:[%s1460_s10 + $0x78] sm:$0xff] }
 0x149   : > { %v711_v13 = vld [vmem:[%s1460_s10 + $0xf8] sm:$0xff] }
 0x14a   : > { %v721_v21 = vadd.f32 %v689_v14, %v567_v17  ;;  %v737_v22 = vadd.f32 %v705_v16, %v647_v18 }
 0x14b   : > { %v571_v23 = vpop.f32.mrb[20].mxu0  ;;  %v651_v25 = vpop.f32.mrb[20].mxu1 }
 0x14c   : > { %753 = vst [vmem:[%s1475_s12 + $0x48] sm:$0xff] %v721_v21  ;;  %769 = vst [vmem:[%s1475_s12 + $0xc8] sm:$0xff] %v737_v22  ;;  %v572_v27 = vadd.f32 %v1465_v49, %v571_v23  ;;  %v652_v28 = vadd.f32 %v1465_v49, %v651_v25  ;;  %v573_v29 = vpop.f32.mrb[21].mxu0  ;;  %v653_v30 = vpop.f32.mrb[21].mxu1 }
 0x14e   : > { %v722_v31 = vadd.f32 %v690_v24, %v572_v27  ;;  %v738_v32 = vadd.f32 %v706_v26, %v652_v28 }
 0x14f   : > { %v576_v33 = vpop.f32.mrb[22].mxu0  ;;  %v656_v35 = vpop.f32.mrb[22].mxu1 }
 0x150   : > { %754 = vst [vmem:[%s1475_s12 + $0x50] sm:$0xff] %v722_v31  ;;  %770 = vst [vmem:[%s1475_s12 + $0xd0] sm:$0xff] %v738_v32  ;;  %v577_v37 = vadd.f32 %v1465_v49, %v576_v33  ;;  %v657_v38 = vadd.f32 %v1465_v49, %v656_v35  ;;  %v578_v39 = vpop.f32.mrb[23].mxu0  ;;  %v658_v40 = vpop.f32.mrb[23].mxu1 }
 0x152   : > { %v723_v41 = vadd.f32 %v691_v34, %v577_v37  ;;  %v739_v42 = vadd.f32 %v707_v36, %v657_v38 }
 0x153   : > { %v581_v43 = vpop.f32.mrb[24].mxu0  ;;  %v661_v45 = vpop.f32.mrb[24].mxu1 }
 0x154   : > { %755 = vst [vmem:[%s1475_s12 + $0x58] sm:$0xff] %v723_v41  ;;  %771 = vst [vmem:[%s1475_s12 + $0xd8] sm:$0xff] %v739_v42  ;;  %v582_v47 = vadd.f32 %v1465_v49, %v581_v43  ;;  %v662_v48 = vadd.f32 %v1465_v49, %v661_v45  ;;  %v583_v50 = vpop.f32.mrb[25].mxu0  ;;  %v663_v51 = vpop.f32.mrb[25].mxu1 }
 0x156   : > { %v724_v52 = vadd.f32 %v692_v44, %v582_v47  ;;  %v740_v53 = vadd.f32 %v708_v46, %v662_v48 }
 0x157   : > { %v586_v54 = vpop.f32.mrb[26].mxu0  ;;  %v666_v56 = vpop.f32.mrb[26].mxu1 }
 0x158   : > { %756 = vst [vmem:[%s1475_s12 + $0x60] sm:$0xff] %v724_v52  ;;  %772 = vst [vmem:[%s1475_s12 + $0xe0] sm:$0xff] %v740_v53  ;;  %v587_v58 = vadd.f32 %v1465_v49, %v586_v54  ;;  %v667_v59 = vadd.f32 %v1465_v49, %v666_v56  ;;  %v588_v60 = vpop.f32.mrb[27].mxu0  ;;  %v668_v61 = vpop.f32.mrb[27].mxu1 }
 0x15a   : > { %v725_v62 = vadd.f32 %v693_v55, %v587_v58  ;;  %v741_v63 = vadd.f32 %v709_v57, %v667_v59 }
 0x15b   : > { %v591_v0 = vpop.f32.mrb[28].mxu0  ;;  %v671_v2 = vpop.f32.mrb[28].mxu1 }
 0x15c   : > { %757 = vst [vmem:[%s1475_s12 + $0x68] sm:$0xff] %v725_v62  ;;  %773 = vst [vmem:[%s1475_s12 + $0xe8] sm:$0xff] %v741_v63  ;;  %v592_v4 = vadd.f32 %v1465_v49, %v591_v0  ;;  %v672_v5 = vadd.f32 %v1465_v49, %v671_v2  ;;  %v593_v6 = vpop.f32.mrb[29].mxu0  ;;  %v673_v7 = vpop.f32.mrb[29].mxu1 }
 0x15e   : > { %v726_v8 = vadd.f32 %v694_v1, %v592_v4  ;;  %v742_v9 = vadd.f32 %v710_v3, %v672_v5  ;;  %783 = sbr.rel (!%p1235_p4) target bundleno = 385 (0x181), region = 40 }
 0x15f   : > { %v596_v10 = vpop.f32.mrb[30].mxu0  ;;  %v676_v12 = vpop.f32.mrb[30].mxu1 }
 0x160   : > { %758 = vst [vmem:[%s1475_s12 + $0x70] sm:$0xff] %v726_v8  ;;  %774 = vst [vmem:[%s1475_s12 + $0xf0] sm:$0xff] %v742_v9  ;;  %v597_v14 = vadd.f32 %v1465_v49, %v596_v10  ;;  %v677_v15 = vadd.f32 %v1465_v49, %v676_v12  ;;  %v598_v16 = vpop.f32.mrb[31].mxu0  ;;  %v678_v17 = vpop.f32.mrb[31].mxu1 }
 0x162   : > { %v727_v18 = vadd.f32 %v695_v11, %v597_v14  ;;  %v743_v19 = vadd.f32 %v711_v13, %v677_v15 }
 0x164   : > { %759 = vst [vmem:[%s1475_s12 + $0x78] sm:$0xff] %v727_v18  ;;  %775 = vst [vmem:[%s1475_s12 + $0xf8] sm:$0xff] %v743_v19 }
 0x165   : > { %s1650_s21 = smov (!%p786_p12, %s785_s21), 32 }
 0x166   : > { %s1574_s22 = sshll.u32 %s1650_s21, 7 }
 0x167   : > { %s790_s24 = ssub.s32 4096, %s1574_s22 }
 0x168   : > { %791 = vsyncadd %s1569_s14, %s790_s24  ;;  %p941_p13 = scmp.ne.s32.totalorder %s1574_s22, 0  ;;  %s948_s26 = sshll.u32 %s1156_s18, 12 }
 0x169   : > { %s1583_s5 = scalar_lea.hbm %s1639_s4, %s948_s26  ;;  %s799_s9 = sshll.u32 %s1475_s12, 4  ;;  %s1586_s9 = int_to_ptr.vmem [resolvable:$true] %s799_s9 }
 0x16a   : > { %s1086_s6 = scalar_lea.vmem %s1586_s9, %s1574_s22  ;;  %s1167_s7 = smov [#allocation2]  }
 0x16b   : > { %p1087_p0 = scmp.ne.s32.totalorder %s1586_s9, %s1086_s6  ;;  %s1090_s8 = sshll.u32 %s1167_s7, 4  ;;  %s1091_s8 = int_to_ptr.vmem [resolvable:$false] %s1090_s8 }
 0x16c   : > { %s1092_s18 = scalar_lea.vmem %s1091_s8, 8192  ;;  %p1093_p3 = scmp.lt.s32.totalorder %s1586_s9, %s1091_s8 }
 0x16d   : > { %p1088_p1 = pnand %p1087_p0, %p941_p13  ;;  %p1094_p4 = scmp.lt.s32.totalorder %s1092_s18, %s1086_s6 }
 0x16f   : > { %p1089_p2 = pneg %p1088_p1  ;;  %p1095_p5 = por %p1094_p4, %p1093_p3 }
 0x171   : > { %p1096_p6 = pnand %p1095_p5, %p1089_p2 }
 0x173   : > { %1099 = shalt.err (!%p1096_p6)
}
 0x174   : > { %s1100_s10 = scalar_lea.hbm %s1583_s5, %s1574_s22  ;;  %s1104_s30 = scalar_lea.hbm %s1639_s4, 4608 }
 0x175   : > { %p1101_p7 = scmp.ne.s32.totalorder %s1583_s5, %s1100_s10  ;;  %p1105_p11 = scmp.lt.u32.totalorder %s1583_s5, %s1639_s4 }
 0x176   : > { %p1106_p12 = scmp.lt.u32.totalorder %s1104_s30, %s1100_s10  ;;  %p1108_p1 = scmp.lt.u32.totalorder %s1100_s10, %s1583_s5 }
 0x177   : > { %p1102_p9 = pnand %p1101_p7, %p941_p13 }
 0x178   : > { %p1107_p0 = por %p1106_p12, %p1105_p11 }
 0x179   : > { %p1103_p10 = pneg %p1102_p9 }
 0x17a   : > { %p1109_p2 = por %p1108_p1, %p1107_p0 }
 0x17c   : > { %p1110_p3 = pnand %p1109_p2, %p1103_p10 }
 0x17e   : > { %1113 = shalt.err (!%p1110_p3)
}
 0x17f   : > { %s1168_s24 = smov 128   ;;  %s1169_s26 = smov 8  }
 0x180   : > { %805 = dma.vmem_to_hbm [thread:$0]  (%p941_p13), %s1586_s9, %s1574_s22, %s1583_s5, %s1569_s14, %s1168_s24, %s1168_s24, %s1169_s26  }
 0x181 PF: > { %p1034_p4 = scmp.ge.s32.totalorder %s1164_s20, 2  ;;  %s814_s29 = sand.u32 1, %s1144_s15  }
 0x182   : > { %s815_s25 = scalar_lea.sflag [#allocation3], %s814_s29 }
 0x183   : > { %p1031_p5 = pnand %p1034_p4, %p1242_p8 }
 0x185   : > { %1139 = dma.done.wait (!%p1031_p5), %s815_s25, 4096  }
 0x186   : > { %1141 = vsyncadd (!%p1031_p5), %s815_s25, 4294963200  ;;  %s17_s20 = sadd.s32 1, %s1164_s20   ;;  %s1642_s15 = smov %s1148_s16 }
 0x187   : > { %p14_p6 = scmp.ge.s32.totalorder %s17_s20, 4   ;;  %s1643_s16 = smov %s1152_s17 }
 0x188   : > { %s1644_s17 = smov %s1248_s28  ;;  %s1645_s18 = smov %s1160_s19 }
 0x189   : > { %s1646_s19 = smov %s1648_s23  ;;  %16 = sbr.rel (!%p14_p6) target bundleno = 4 (0x4), region = 80 }
 0x190   :  { %820 = vsyncpa [#allocation3], 1 }
 0x191   :  { %822 = vsyncpa [#allocation3 + $0x1], 1 }

// kernel: conformer_forward.15
= control target key start
LH: loop header
LB: loop body
LE: loop exit
PB: predicated region body
PF: predicated region fallthrough
CT: control target
= control target key end

     0   :  { %s2299_s18 = smov 0   ;;  %s2301_s19 = smov 0   ;;  %s3435_s0 = inlined_call_operand.vmem [shape: f32[1,288,128], index: 0, kind: input, shape index: {}]   ;;  %s3436_s1 = inlined_call_operand.vmem [shape: f32[1,128,384], index: 1, kind: input, shape index: {}]   ;;  %s3437_s2 = inlined_call_operand.vmem [shape: f32[1,128], index: 2, kind: input, shape index: {}]   ;;  %s3438_s3 = inlined_call_operand.vmem [shape: f32[1,128], index: 3, kind: input, shape index: {}]   ;;  %s3439_s4 = inlined_call_operand.vmem [shape: f32[1,384], index: 4, kind: input, shape index: {}]   ;;  %s3440_s5 = inlined_call_operand.vmem [shape: f32[1,288,384], index: 5, kind: output, shape index: {}]  }
   0x1   :  { %s2303_s20 = smov 0   ;;  %s2305_s21 = smov 0  }
   0x2   :  { %s2307_s22 = smov 0  }
   0x3 LB: > { %s1756_s23 = sadd.s32 4294967295, %s2234_s22   ;;  %s30_s24 = sadd.s32 1, %s2230_s21  ;;  %s2234_s22 = sphi %s2307_s22, %s15_s22   ;;  %s2230_s21 = sphi %s2305_s21, %s3450_s21   ;;  %s2226_s20 = sphi %s2303_s20, %s3449_s20   ;;  %s2222_s19 = sphi %s2301_s19, %s3448_s19   ;;  %s2218_s18 = sphi %s2299_s18, %s3447_s18  }
   0x4   : > { %p32_p0 = scmp.ge.s32.totalorder %s30_s24, 2  ;;  %s165_s25 = sadd.s32 1, %s2222_s19 }
   0x5   : > { %p175_p1 = scmp.ne.s32.totalorder %s2222_s19, %s2218_s18  ;;  %p176_p2 = scmp.eq.s32.totalorder %s1756_s23, 1 }
   0x6   : > { %s3452_s24 = smov (%p32_p0, %s30_s24), 0  ;;  %p1762_p4 = scmp.ge.s32.totalorder %s2234_s22, 1 }
   0x7   : > { %p2331_p3 = por %p176_p2, %p175_p1  ;;  %s159_s27 = ssub.s32 %s2230_s21, %s3452_s24 }
   0x8   : > { %p240_p5 = scmp.lt.s32.totalorder %s2234_s22, 3  ;;  %p163_p6 = scmp.eq.s32.totalorder %s159_s27, 0 }
   0xa   : > { %p241_p7 = pnand %p1762_p4, %p240_p5 }
   0xb   : > { %s2340_s28 = scalar_select %p163_p6, %s2222_s19, %s165_s25  }
   0xc   : > { %244 = sbr.rel (%p241_p7) target bundleno = 733 (0x2dd), region = 40  ;;  %s2343_s29 = sshll.u32 (!%p241_p7), %s2226_s20, 5  ;;  %v776_v32 = vld [vmem:[%s3436_s1 + $0x8] sm:$0xff] (!%p241_p7)  ;;  %v779_v33 = vld [vmem:[%s3436_s1 + $0x20] sm:$0xff] (!%p241_p7)  ;;  %v778_v36 = vld [vmem:[%s3436_s1 + $0x18] sm:$0xff] (!%p241_p7) }
   0xd   : > { %p285_p8 = scmp.lt.s32.totalorder (!%p241_p7), %s2343_s29, 35  ;;  %v775_v34 = vld [vmem:[%s3436_s1] sm:$0xff] (!%p241_p7)  ;;  %v1908_v35 = vpack.c.bf16 (!%p241_p7), %v779_v33, %v776_v32  ;;  %v782_v37 = vld [vmem:[%s3436_s1 + $0x38] sm:$0xff] (!%p241_p7)  ;;  %v785_v38 = vld [vmem:[%s3436_s1 + $0x50] sm:$0xff] (!%p241_p7)  ;;  %s277_s14 = sand.u32 (!%p241_p7), 1, %s2218_s18  }
   0xe   : > { %v1910_v39 = vpack.c.bf16 (!%p241_p7), %v778_v36, %v775_v34  ;;  %v1912_v40 = vpack.c.bf16 (!%p241_p7), %v785_v38, %v782_v37  ;;  %v781_v41 = vld [vmem:[%s3436_s1 + $0x30] sm:$0xff] (!%p241_p7)  ;;  %v784_v42 = vld [vmem:[%s3436_s1 + $0x48] sm:$0xff] (!%p241_p7)  ;;  %v791_v44 = vld [vmem:[%s3436_s1 + $0x80] sm:$0xff] (!%p241_p7)  ;;  %s1988_s17 = smul.u32 (!%p241_p7), 768, %s277_s14 }
   0xf   : > { %v788_v43 = vld [vmem:[%s3436_s1 + $0x68] sm:$0xff] (!%p241_p7)  ;;  %1909 = vmatprep.subr.bf16.mxu0 (!%p241_p7), %v1908_v35  ;;  %1972 = vmatprep.subr.bf16.mxu1 (!%p241_p7), %v1908_v35  ;;  %v1914_v45 = vpack.c.bf16 (!%p241_p7), %v784_v42, %v781_v41  ;;  %v787_v47 = vld [vmem:[%s3436_s1 + $0x60] sm:$0xff] (!%p241_p7)  ;;  %v790_v48 = vld [vmem:[%s3436_s1 + $0x78] sm:$0xff] (!%p241_p7) }
  0x10   : > { %1911 = vmatpush1.bf16.msra.mxu0 (!%p241_p7), %v1910_v39  ;;  %1980 = vmatpush1.bf16.msra.mxu1 (!%p241_p7), %v1910_v39  ;;  %v1916_v46 = vpack.c.bf16 (!%p241_p7), %v791_v44, %v788_v43  ;;  %v1918_v49 = vpack.c.bf16 (!%p241_p7), %v790_v48, %v787_v47  ;;  %v794_v48 = vld [vmem:[%s3436_s1 + $0x98] sm:$0xff] (!%p241_p7)  ;;  %s3016_s18 = scalar_lea.vmem (!%p241_p7), [#allocation2], %s1988_s17  }
  0x11   : > { %1913 = vmatprep.subr.bf16.mxu0 (!%p241_p7), %v1912_v40  ;;  %1973 = vmatprep.subr.bf16.mxu1 (!%p241_p7), %v1912_v40 }
  0x13   : > { %s286_s30 = scalar_select %p285_p8, %s2343_s29, 35 }
  0x14   : > { %1915 = vmatpush1.bf16.msra.mxu0 %v1914_v45  ;;  %1981 = vmatpush1.bf16.msra.mxu1 %v1914_v45  ;;  %s1427_s23 = ssub.s32 (%p2331_p3), 36, %s2343_s29  ;;  %s1989_s25 = smul.u32 (%p2331_p3), 768, %s2226_s20 }
  0x15   : > { %s1764_s6 = sshll.u32 %s286_s30, 3  ;;  %1917 = vmatprep.subr.bf16.mxu0 %v1916_v46  ;;  %1974 = vmatprep.subr.bf16.mxu1 %v1916_v46  ;;  %p1428_p9 = scmp.lt.s32.totalorder (%p2331_p3), %s1427_s23, 32 }
  0x16   : > { %s2350_s9 = scalar_lea.vmem %s3435_s0, %s1764_s6  ;;  %s3219_s6 = scalar_lea.vmem (%p2331_p3), %s3440_s5, %s1989_s25  }
  0x17   : > { %v2353_v0 = vld [vmem:[%s2350_s9] sm:$0xff]  ;;  %v2356_v1 = vld [vmem:[%s2350_s9 + $0x8] sm:$0xff]  ;;  %v2369_v4 = vld [vmem:[%s2350_s9 + $0x10] sm:$0xff] }
  0x18   : > { %344 = vadd.xlane.f32.xlu0 %v2353_v0  ;;  %346 = vadd.xlane.f32.xlu1 %v2356_v1  ;;  %v2361_v2 = vld [vmem:[%s2350_s9 + $0xc0] sm:$0xff]  ;;  %v2364_v3 = vld [vmem:[%s2350_s9 + $0xc8] sm:$0xff]  ;;  %v2372_v5 = vld [vmem:[%s2350_s9 + $0xd0] sm:$0xff] }
  0x19   : > { %v2377_v6 = vld [vmem:[%s2350_s9 + $0x18] sm:$0xff]  ;;  %v2385_v8 = vld [vmem:[%s2350_s9 + $0x20] sm:$0xff]  ;;  %v2393_v10 = vld [vmem:[%s2350_s9 + $0x28] sm:$0xff]  ;;  %1919 = vmatpush1.bf16.msra.mxu0 %v1918_v49  ;;  %1982 = vmatpush1.bf16.msra.mxu1 %v1918_v49 }
  0x1a   : > { %v2380_v7 = vld [vmem:[%s2350_s9 + $0xd8] sm:$0xff]  ;;  %v2388_v9 = vld [vmem:[%s2350_s9 + $0xe0] sm:$0xff]  ;;  %v2396_v11 = vld [vmem:[%s2350_s9 + $0xe8] sm:$0xff] }
  0x1b   : > { %v2401_v12 = vld [vmem:[%s2350_s9 + $0x30] sm:$0xff]  ;;  %v2409_v14 = vld [vmem:[%s2350_s9 + $0x38] sm:$0xff]  ;;  %v2417_v16 = vld [vmem:[%s2350_s9 + $0x40] sm:$0xff] }
  0x1c   : > { %392 = vadd.xlane.f32.xlu0 %v2361_v2  ;;  %394 = vadd.xlane.f32.xlu1 %v2364_v3  ;;  %v2404_v13 = vld [vmem:[%s2350_s9 + $0xf0] sm:$0xff]  ;;  %v2412_v15 = vld [vmem:[%s2350_s9 + $0xf8] sm:$0xff]  ;;  %v2420_v17 = vld [vmem:[%s2350_s9 + $0x48] sm:$0xff] }
  0x1d   : > { %v2425_v18 = vld [vmem:[%s2350_s9 + $0x50] sm:$0xff]  ;;  %v2428_v19 = vld [vmem:[%s2350_s9 + $0x58] sm:$0xff]  ;;  %v2433_v20 = vld [vmem:[%s2350_s9 + $0x60] sm:$0xff] }
  0x1e   : > { %v2436_v21 = vld [vmem:[%s2350_s9 + $0x68] sm:$0xff]  ;;  %v2441_v22 = vld [vmem:[%s2350_s9 + $0x70] sm:$0xff]  ;;  %v2444_v23 = vld [vmem:[%s2350_s9 + $0x78] sm:$0xff] }
  0x1f   : > { %v2449_v24 = vld [vmem:[%s2350_s9 + $0x80] sm:$0xff]  ;;  %v2452_v25 = vld [vmem:[%s2350_s9 + $0x88] sm:$0xff]  ;;  %v2457_v26 = vld [vmem:[%s2350_s9 + $0x90] sm:$0xff] }
  0x20   : > { %348 = vadd.xlane.f32.xlu0 %v2369_v4  ;;  %396 = vadd.xlane.f32.xlu1 %v2372_v5  ;;  %v2460_v27 = vld [vmem:[%s2350_s9 + $0x98] sm:$0xff]  ;;  %v2465_v28 = vld [vmem:[%s2350_s9 + $0xa0] sm:$0xff]  ;;  %v2468_v29 = vld [vmem:[%s2350_s9 + $0xa8] sm:$0xff] }
  0x21   : > { %v2473_v30 = vld [vmem:[%s2350_s9 + $0xb0] sm:$0xff]  ;;  %v2476_v31 = vld [vmem:[%s2350_s9 + $0xb8] sm:$0xff] }
  0x22   : > { %v797_v49 = vld [vmem:[%s3436_s1 + $0xb0] sm:$0xff] }
  0x24   : > { %350 = vadd.xlane.f32.xlu0 %v2377_v6  ;;  %398 = vadd.xlane.f32.xlu1 %v2380_v7 }
  0x28   : > { %352 = vadd.xlane.f32.xlu0 %v2385_v8  ;;  %400 = vadd.xlane.f32.xlu1 %v2388_v9 }
  0x2c   : > { %354 = vadd.xlane.f32.xlu0 %v2393_v10  ;;  %402 = vadd.xlane.f32.xlu1 %v2396_v11 }
  0x30   : > { %356 = vadd.xlane.f32.xlu0 %v2401_v12  ;;  %404 = vadd.xlane.f32.xlu1 %v2404_v13 }
  0x34   : > { %358 = vadd.xlane.f32.xlu0 %v2409_v14  ;;  %406 = vadd.xlane.f32.xlu1 %v2412_v15 }
  0x38   : > { %360 = vadd.xlane.f32.xlu0 %v2417_v16  ;;  %362 = vadd.xlane.f32.xlu1 %v2420_v17 }
  0x3c   : > { %364 = vadd.xlane.f32.xlu0 %v2425_v18  ;;  %366 = vadd.xlane.f32.xlu1 %v2428_v19 }
  0x40   : > { %368 = vadd.xlane.f32.xlu0 %v2433_v20  ;;  %370 = vadd.xlane.f32.xlu1 %v2436_v21 }
  0x44   : > { %372 = vadd.xlane.f32.xlu0 %v2441_v22  ;;  %374 = vadd.xlane.f32.xlu1 %v2444_v23 }
  0x48   : > { %376 = vadd.xlane.f32.xlu0 %v2449_v24  ;;  %378 = vadd.xlane.f32.xlu1 %v2452_v25 }
  0x4c   : > { %380 = vadd.xlane.f32.xlu0 %v2457_v26  ;;  %382 = vadd.xlane.f32.xlu1 %v2460_v27 }
  0x50   : > { %384 = vadd.xlane.f32.xlu0 %v2465_v28  ;;  %386 = vadd.xlane.f32.xlu1 %v2468_v29 }
  0x54   : > { %388 = vadd.xlane.f32.xlu0 %v2473_v30  ;;  %390 = vadd.xlane.f32.xlu1 %v2476_v31 }
  0xa5   : > { %v345_v50 = vpop.xlane.xlu0 %344  ;;  %v347_v51 = vpop.xlane.xlu1 %346 }
  0xa6   : > { %v409_v52 = vmul.f32 0.0078125, %v345_v50  ;;  %v410_v53 = vmul.f32 0.0078125, %v347_v51 }
  0xa8   : > { %v2517_v54 = vsub.f32 %v2353_v0, %v409_v52  ;;  %v2520_v55 = vsub.f32 %v2356_v1, %v410_v53  ;;  %v793_v52 = vld [vmem:[%s3436_s1 + $0x90] sm:$0xff] }
  0xa9   : > { %v393_v56 = vpop.xlane.xlu0 %392  ;;  %v395_v57 = vpop.xlane.xlu1 %394 }
  0xaa   : > { %v433_v58 = vmul.f32 0.0078125, %v393_v56  ;;  %v473_v59 = vmul.f32 %v2517_v54, %v2517_v54  ;;  %v434_v60 = vmul.f32 0.0078125, %v395_v57  ;;  %v474_v63 = vmul.f32 %v2520_v55, %v2520_v55 }
  0xac   : > { %v2525_v61 = vsub.f32 %v2361_v2, %v433_v58  ;;  %505 = vadd.xlane.f32.xlu0 %v473_v59  ;;  %v2528_v62 = vsub.f32 %v2364_v3, %v434_v60 }
  0xad   : > { %v349_v0 = vpop.xlane.xlu0 %348  ;;  %v397_v1 = vpop.xlane.xlu1 %396 }
  0xae   : > { %v411_v32 = vmul.f32 0.0078125, %v349_v0  ;;  %v497_v33 = vmul.f32 %v2525_v61, %v2525_v61  ;;  %v435_v34 = vmul.f32 0.0078125, %v397_v1  ;;  %v498_v3 = vmul.f32 %v2528_v62, %v2528_v62 }
  0xb0   : > { %v2535_v35 = vsub.f32 %v2369_v4, %v411_v32  ;;  %507 = vadd.xlane.f32.xlu0 %v474_v63  ;;  %553 = vadd.xlane.f32.xlu1 %v497_v33  ;;  %v2538_v2 = vsub.f32 %v2372_v5, %v435_v34  ;;  %v800_v32 = vld [vmem:[%s3436_s1 + $0xc8] sm:$0xff] }
  0xb1   : > { %v351_v36 = vpop.xlane.xlu0 %350  ;;  %v399_v37 = vpop.xlane.xlu1 %398 }
  0xb2   : > { %v412_v38 = vmul.f32 0.0078125, %v351_v36  ;;  %v475_v39 = vmul.f32 %v2535_v35, %v2535_v35  ;;  %v436_v40 = vmul.f32 0.0078125, %v399_v37  ;;  %v499_v5 = vmul.f32 %v2538_v2, %v2538_v2  ;;  %v802_v36 = vld [vmem:[%s3436_s1 + $0xd8] sm:$0xff] }
  0xb4   : > { %v2545_v41 = vsub.f32 %v2377_v6, %v412_v38  ;;  %555 = vadd.xlane.f32.xlu1 %v498_v3  ;;  %509 = vadd.xlane.f32.xlu0 %v475_v39  ;;  %v2548_v4 = vsub.f32 %v2380_v7, %v436_v40  ;;  %v799_v3 = vld [vmem:[%s3436_s1 + $0xc0] sm:$0xff] }
  0xb5   : > { %v353_v42 = vpop.xlane.xlu0 %352  ;;  %v401_v43 = vpop.xlane.xlu1 %400  ;;  %v1926_v38 = vpack.c.bf16 %v802_v36, %v799_v3  ;;  %v818_v36 = vld [vmem:[%s3436_s1 + $0x158] sm:$0xff] }
  0xb6   : > { %v413_v44 = vmul.f32 0.0078125, %v353_v42  ;;  %v476_v45 = vmul.f32 %v2545_v41, %v2545_v41  ;;  %v437_v46 = vmul.f32 0.0078125, %v401_v43  ;;  %v500_v7 = vmul.f32 %v2548_v4, %v2548_v4 }
  0xb8   : > { %v2555_v47 = vsub.f32 %v2385_v8, %v413_v44  ;;  %557 = vadd.xlane.f32.xlu1 %v499_v5  ;;  %511 = vadd.xlane.f32.xlu0 %v476_v45  ;;  %v2558_v6 = vsub.f32 %v2388_v9, %v437_v46  ;;  %v1920_v8 = vpack.c.bf16 %v797_v49, %v794_v48  ;;  %v796_v9 = vld [vmem:[%s3436_s1 + $0xa8] sm:$0xff]  ;;  %v806_v44 = vld [vmem:[%s3436_s1 + $0xf8] sm:$0xff] }
  0xb9   : > { %v355_v50 = vpop.xlane.xlu0 %354  ;;  %v403_v51 = vpop.xlane.xlu1 %402  ;;  %v1922_v58 = vpack.c.bf16 %v796_v9, %v793_v52  ;;  %v808_v48 = vld [vmem:[%s3436_s1 + $0x108] sm:$0xff] }
  0xba   : > { %v414_v53 = vmul.f32 0.0078125, %v355_v50  ;;  %v477_v56 = vmul.f32 %v2555_v47, %v2555_v47  ;;  %v438_v57 = vmul.f32 0.0078125, %v403_v51  ;;  %1921 = vmatprep.subr.bf16.mxu0 %v1920_v8  ;;  %1975 = vmatprep.subr.bf16.mxu1 %v1920_v8  ;;  %v501_v63 = vmul.f32 %v2558_v6, %v2558_v6 }
  0xbb   : > { %1923 = vmatpush1.bf16.msra.mxu0 %v1922_v58  ;;  %1983 = vmatpush1.bf16.msra.mxu1 %v1922_v58 }
  0xbc   : > { %v2577_v59 = vsub.f32 %v2393_v10, %v414_v53  ;;  %559 = vadd.xlane.f32.xlu1 %v500_v7  ;;  %513 = vadd.xlane.f32.xlu0 %v477_v56  ;;  %v2580_v60 = vsub.f32 %v2396_v11, %v438_v57  ;;  %v803_v10 = vld [vmem:[%s3436_s1 + $0xe0] sm:$0xff]  ;;  %v805_v7 = vld [vmem:[%s3436_s1 + $0xf0] sm:$0xff]  ;;  %v812_v56 = vld [vmem:[%s3436_s1 + $0x128] sm:$0xff] }
  0xbd   : > { %v357_v0 = vpop.xlane.xlu0 %356  ;;  %v405_v1 = vpop.xlane.xlu1 %404  ;;  %v1924_v37 = vpack.c.bf16 %v803_v10, %v800_v32  ;;  %v1930_v50 = vpack.c.bf16 %v808_v48, %v805_v7 }
  0xbe   : > { %v415_v33 = vmul.f32 0.0078125, %v357_v0  ;;  %v478_v11 = vmul.f32 %v2577_v59, %v2577_v59  ;;  %v439_v34 = vmul.f32 0.0078125, %v405_v1  ;;  %v502_v5 = vmul.f32 %v2580_v60, %v2580_v60  ;;  %v814_v0 = vld [vmem:[%s3436_s1 + $0x138] sm:$0xff] }
  0xbf   : > { %1925 = vmatprep.subr.bf16.mxu0 %v1924_v37  ;;  %1976 = vmatprep.subr.bf16.mxu1 %v1924_v37 }
  0xc0   : > { %v2599_v39 = vsub.f32 %v2401_v12, %v415_v33  ;;  %561 = vadd.xlane.f32.xlu1 %v501_v63  ;;  %515 = vadd.xlane.f32.xlu0 %v478_v11  ;;  %v2602_v40 = vsub.f32 %v2404_v13, %v439_v34  ;;  %v809_v12 = vld [vmem:[%s3436_s1 + $0x110] sm:$0xff]  ;;  %v811_v63 = vld [vmem:[%s3436_s1 + $0x120] sm:$0xff] }
  0xc1   : > { %v359_v42 = vpop.xlane.xlu0 %358  ;;  %v407_v43 = vpop.xlane.xlu1 %406  ;;  %1927 = vmatpush1.bf16.msra.mxu0 %v1926_v38  ;;  %1984 = vmatpush1.bf16.msra.mxu1 %v1926_v38  ;;  %v1928_v49 = vpack.c.bf16 %v809_v12, %v806_v44  ;;  %v1934_v32 = vpack.c.bf16 %v814_v0, %v811_v63 }
  0xc2   : > { %v416_v45 = vmul.f32 0.0078125, %v359_v42  ;;  %v479_v13 = vmul.f32 %v2599_v39, %v2599_v39  ;;  %v440_v46 = vmul.f32 0.0078125, %v407_v43  ;;  %v503_v52 = vmul.f32 %v2602_v40, %v2602_v40  ;;  %v820_v42 = vld [vmem:[%s3436_s1 + $0x168] sm:$0xff] }
  0xc3   : > { %1929 = vmatprep.subr.bf16.mxu0 %v1928_v49  ;;  %1977 = vmatprep.subr.bf16.mxu1 %v1928_v49 }
  0xc4   : > { %v2621_v51 = vsub.f32 %v2409_v14, %v416_v45  ;;  %563 = vadd.xlane.f32.xlu1 %v502_v5  ;;  %517 = vadd.xlane.f32.xlu0 %v479_v13  ;;  %v2624_v8 = vsub.f32 %v2412_v15, %v440_v46  ;;  %v815_v14 = vld [vmem:[%s3436_s1 + $0x140] sm:$0xff]  ;;  %v817_v5 = vld [vmem:[%s3436_s1 + $0x150] sm:$0xff] }
  0xc5   : > { %v361_v9 = vpop.xlane.xlu0 %360  ;;  %v363_v53 = vpop.xlane.xlu1 %362  ;;  %1931 = vmatpush1.bf16.msra.mxu0 %v1930_v50  ;;  %1985 = vmatpush1.bf16.msra.mxu1 %v1930_v50  ;;  %v1932_v1 = vpack.c.bf16 %v815_v14, %v812_v56  ;;  %v1938_v44 = vpack.c.bf16 %v820_v42, %v817_v5  ;;  %v2268_v56 = vmov 0.0   ;;  %v780_v14 = vld [vmem:[%s3436_s1 + $0x28] sm:$0xff] }
  0xc6   : > { %v417_v57 = vmul.f32 0.0078125, %v361_v9  ;;  %v480_v15 = vmul.f32 %v2621_v51, %v2621_v51  ;;  %v418_v58 = vmul.f32 0.0078125, %v363_v53  ;;  %v504_v11 = vmul.f32 %v2624_v8, %v2624_v8  ;;  %904 = vmatprep.mubr.f32.mxu0 %v2268_v56  ;;  %1048 = vmatprep.mubr.f32.mxu1 %v2268_v56 }
  0xc7   : > { %1933 = vmatprep.subr.bf16.mxu0 %v1932_v1  ;;  %1978 = vmatprep.subr.bf16.mxu1 %v1932_v1 }
  0xc8   : > { %v2643_v10 = vsub.f32 %v2417_v16, %v417_v57  ;;  %565 = vadd.xlane.f32.xlu1 %v503_v52  ;;  %519 = vadd.xlane.f32.xlu0 %v480_v15  ;;  %v2646_v33 = vsub.f32 %v2420_v17, %v418_v58  ;;  %v821_v16 = vld [vmem:[%s3436_s1 + $0x170] sm:$0xff] }
  0xc9   : > { %v365_v34 = vpop.xlane.xlu0 %364  ;;  %v367_v3 = vpop.xlane.xlu1 %366  ;;  %1935 = vmatpush1.bf16.msra.mxu0 %v1934_v32  ;;  %1986 = vmatpush1.bf16.msra.mxu1 %v1934_v32  ;;  %v1936_v43 = vpack.c.bf16 %v821_v16, %v818_v36 }
  0xca   : > { %v419_v37 = vmul.f32 0.0078125, %v365_v34  ;;  %v481_v17 = vmul.f32 %v2643_v10, %v2643_v10  ;;  %v420_v38 = vmul.f32 0.0078125, %v367_v3  ;;  %v482_v13 = vmul.f32 %v2646_v33, %v2646_v33 }
  0xcb   : > { %1937 = vmatprep.subr.bf16.mxu0 %v1936_v43  ;;  %1979 = vmatprep.subr.bf16.mxu1 %v1936_v43 }
  0xcc   : > { %v2665_v12 = vsub.f32 %v2425_v18, %v419_v37  ;;  %567 = vadd.xlane.f32.xlu1 %v504_v11  ;;  %521 = vadd.xlane.f32.xlu0 %v481_v17  ;;  %v2668_v45 = vsub.f32 %v2428_v19, %v420_v38 }
  0xcd   : > { %v369_v46 = vpop.xlane.xlu0 %368  ;;  %v371_v7 = vpop.xlane.xlu1 %370  ;;  %1939 = vmatpush1.bf16.msra.mxu0 %v1938_v44  ;;  %1987 = vmatpush1.bf16.msra.mxu1 %v1938_v44 }
  0xce   : > { %v421_v48 = vmul.f32 0.0078125, %v369_v46  ;;  %v483_v49 = vmul.f32 %v2665_v12, %v2665_v12  ;;  %v422_v50 = vmul.f32 0.0078125, %v371_v7  ;;  %v484_v52 = vmul.f32 %v2668_v45, %v2668_v45 }
  0xd0   : > { %v2675_v18 = vsub.f32 %v2433_v20, %v421_v48  ;;  %523 = vadd.xlane.f32.xlu1 %v482_v13  ;;  %525 = vadd.xlane.f32.xlu0 %v483_v49  ;;  %v2678_v19 = vsub.f32 %v2436_v21, %v422_v50  ;;  %v777_v20 = vld [vmem:[%s3436_s1 + $0x10] sm:$0xff] }
  0xd1   : > { %v373_v9 = vpop.xlane.xlu0 %372  ;;  %v375_v53 = vpop.xlane.xlu1 %374  ;;  %v2692_v58 = vpack.c.bf16 %v780_v14, %v777_v20 }
  0xd2   : > { %v423_v21 = vmul.f32 0.0078125, %v373_v9  ;;  %v485_v57 = vmul.f32 %v2675_v18, %v2675_v18  ;;  %v424_v15 = vmul.f32 0.0078125, %v375_v53  ;;  %v486_v1 = vmul.f32 %v2678_v19, %v2678_v19 }
  0xd3   : > { %1941 = vmatprep.subr.bf16.mxu1 %v2692_v58 }
  0xd4   : > { %v2695_v63 = vsub.f32 %v2441_v22, %v423_v21  ;;  %527 = vadd.xlane.f32.xlu1 %v484_v52  ;;  %529 = vadd.xlane.f32.xlu0 %v485_v57  ;;  %v2698_v0 = vsub.f32 %v2444_v23, %v424_v15 }
  0xd5   : > { %v377_v32 = vpop.xlane.xlu0 %376  ;;  %v379_v11 = vpop.xlane.xlu1 %378 }
  0xd6   : > { %v425_v34 = vmul.f32 0.0078125, %v377_v32  ;;  %v487_v3 = vmul.f32 %v2695_v63, %v2695_v63  ;;  %v426_v36 = vmul.f32 0.0078125, %v379_v11  ;;  %v488_v16 = vmul.f32 %v2698_v0, %v2698_v0 }
  0xd8   : > { %v2706_v22 = vsub.f32 %v2449_v24, %v425_v34  ;;  %531 = vadd.xlane.f32.xlu1 %v486_v1  ;;  %533 = vadd.xlane.f32.xlu0 %v487_v3  ;;  %v2709_v23 = vsub.f32 %v2452_v25, %v426_v36 }
  0xd9   : > { %v381_v37 = vpop.xlane.xlu0 %380  ;;  %v383_v17 = vpop.xlane.xlu1 %382 }
  0xda   : > { %v427_v38 = vmul.f32 0.0078125, %v381_v37  ;;  %v489_v5 = vmul.f32 %v2706_v22, %v2706_v22  ;;  %v428_v42 = vmul.f32 0.0078125, %v383_v17  ;;  %v490_v25 = vmul.f32 %v2709_v23, %v2709_v23 }
  0xdc   : > { %v2716_v43 = vsub.f32 %v2457_v26, %v427_v38  ;;  %535 = vadd.xlane.f32.xlu1 %v488_v16  ;;  %537 = vadd.xlane.f32.xlu0 %v489_v5  ;;  %v2719_v24 = vsub.f32 %v2460_v27, %v428_v42 }
  0xdd   : > { %v385_v44 = vpop.xlane.xlu0 %384  ;;  %v387_v13 = vpop.xlane.xlu1 %386 }
  0xde   : > { %v429_v46 = vmul.f32 0.0078125, %v385_v44  ;;  %v491_v7 = vmul.f32 %v2716_v43, %v2716_v43  ;;  %v430_v48 = vmul.f32 0.0078125, %v387_v13  ;;  %v492_v27 = vmul.f32 %v2719_v24, %v2719_v24 }
  0xe0   : > { %v2726_v49 = vsub.f32 %v2465_v28, %v429_v46  ;;  %539 = vadd.xlane.f32.xlu1 %v490_v25  ;;  %541 = vadd.xlane.f32.xlu0 %v491_v7  ;;  %v2729_v26 = vsub.f32 %v2468_v29, %v430_v48 }
  0xe1   : > { %v389_v50 = vpop.xlane.xlu0 %388  ;;  %v391_v52 = vpop.xlane.xlu1 %390 }
  0xe2   : > { %v431_v9 = vmul.f32 0.0078125, %v389_v50  ;;  %v493_v53 = vmul.f32 %v2726_v49, %v2726_v49  ;;  %v432_v20 = vmul.f32 0.0078125, %v391_v52  ;;  %v494_v29 = vmul.f32 %v2729_v26, %v2729_v26  ;;  %v2750_v50 = vld [vmem:[%s3437_s2] ss:$0 sm:$0xff] }
  0xe4   : > { %v2736_v14 = vsub.f32 %v2473_v30, %v431_v9  ;;  %543 = vadd.xlane.f32.xlu1 %v492_v27  ;;  %545 = vadd.xlane.f32.xlu0 %v493_v53  ;;  %v2739_v28 = vsub.f32 %v2476_v31, %v432_v20 }
  0xe6   : > { %v495_v21 = vmul.f32 %v2736_v14, %v2736_v14  ;;  %v496_v57 = vmul.f32 %v2739_v28, %v2739_v28 }
  0xe8   : > { %547 = vadd.xlane.f32.xlu1 %v494_v29  ;;  %549 = vadd.xlane.f32.xlu0 %v495_v21  ;;  %v2756_v21 = vld [vmem:[%s3438_s3] ss:$0 sm:$0xff] }
  0xec   : > { %551 = vadd.xlane.f32.xlu1 %v496_v57 }
 0x139   : > { %v506_v15 = vpop.xlane.xlu0 %505 }
 0x13a   : > { %v569_v30 = vmul.f32 0.0078125, %v506_v15 }
 0x13c   : > { %v601_v1 = vadd.f32 1e-06, %v569_v30 }
 0x13d   : > { %v554_v32 = vpop.xlane.xlu1 %553  ;;  %v508_v11 = vpop.xlane.xlu0 %507 }
 0x13e   : > { %2096 = vrsqrt.f32 %v601_v1  ;;  %v593_v31 = vmul.f32 0.0078125, %v554_v32  ;;  %v570_v34 = vmul.f32 0.0078125, %v508_v11 }
 0x140   : > { %v625_v3 = vadd.f32 1e-06, %v593_v31  ;;  %v602_v36 = vadd.f32 1e-06, %v570_v34 }
 0x141   : > { %v556_v16 = vpop.xlane.xlu1 %555  ;;  %v510_v37 = vpop.xlane.xlu0 %509 }
 0x142   : > { %2098 = vrsqrt.f32 %v625_v3  ;;  %v594_v17 = vmul.f32 0.0078125, %v556_v16  ;;  %v571_v38 = vmul.f32 0.0078125, %v510_v37  ;;  %v783_v37 = vld [vmem:[%s3436_s1 + $0x40] sm:$0xff] }
 0x143   : > { %2100 = vrsqrt.f32 %v602_v36 }
 0x144   : > { %v626_v5 = vadd.f32 1e-06, %v594_v17  ;;  %v603_v42 = vadd.f32 1e-06, %v571_v38  ;;  %v786_v17 = vld [vmem:[%s3436_s1 + $0x58] sm:$0xff] }
 0x145   : > { %v558_v25 = vpop.xlane.xlu1 %557  ;;  %v512_v44 = vpop.xlane.xlu0 %511 }
 0x146   : > { %2102 = vrsqrt.f32 %v626_v5  ;;  %v595_v13 = vmul.f32 0.0078125, %v558_v25  ;;  %v572_v46 = vmul.f32 0.0078125, %v512_v44 }
 0x147   : > { %2104 = vrsqrt.f32 %v603_v42 }
 0x148   : > { %v2097_v7 = vpop.eup %2096  ;;  %v627_v48 = vadd.f32 1e-06, %v595_v13  ;;  %v604_v27 = vadd.f32 1e-06, %v572_v46 }
 0x149   : > { %v560_v52 = vpop.xlane.xlu1 %559  ;;  %v514_v9 = vpop.xlane.xlu0 %513  ;;  %v665_v53 = vmul.f32 %v2097_v7, %v2517_v54  ;;  %v1944_v7 = vpack.c.bf16 %v786_v17, %v783_v37  ;;  %v795_v37 = vld [vmem:[%s3436_s1 + $0xa0] sm:$0xff]  ;;  %v798_v17 = vld [vmem:[%s3436_s1 + $0xb8] sm:$0xff] }
 0x14a   : > { %2106 = vrsqrt.f32 %v627_v48  ;;  %v596_v20 = vmul.f32 0.0078125, %v560_v52  ;;  %v573_v29 = vmul.f32 0.0078125, %v514_v9  ;;  %v792_v52 = vld [vmem:[%s3436_s1 + $0x88] sm:$0xff] }
 0x14b   : > { %2108 = vrsqrt.f32 %v604_v27  ;;  %v704_v57 = vmul.f32 %v2750_v50, %v665_v53  ;;  %v789_v27 = vld [vmem:[%s3436_s1 + $0x70] sm:$0xff] }
 0x14c   : > { %v2099_v15 = vpop.eup %2098  ;;  %v628_v30 = vadd.f32 1e-06, %v596_v20  ;;  %v605_v1 = vadd.f32 1e-06, %v573_v29 }
 0x14d   : > { %v2101_v32 = vpop.eup %2100  ;;  %v562_v11 = vpop.xlane.xlu1 %561  ;;  %v2760_v34 = vadd.f32 %v2756_v21, %v704_v57  ;;  %v689_v54 = vmul.f32 %v2099_v15, %v2525_v61 }
 0x14e   : > { %v516_v31 = vpop.xlane.xlu0 %515  ;;  %2110 = vrsqrt.f32 %v628_v30  ;;  %v597_v3 = vmul.f32 0.0078125, %v562_v11  ;;  %v666_v16 = vmul.f32 %v2101_v32, %v2520_v55 }
 0x14f   : > { %v574_v36 = vmul.f32 0.0078125, %v516_v31  ;;  %2112 = vrsqrt.f32 %v605_v1  ;;  %905 = vmatmul.mubr.f32.vlgmr.msra.gmra.mrb[0].mxu0 %v2760_v34  ;;  %v728_v38 = vmul.f32 %v2750_v50, %v689_v54  ;;  %v1948_v1 = vpack.c.bf16 %v792_v52, %v789_v27  ;;  %v804_v52 = vld [vmem:[%s3436_s1 + $0xe8] sm:$0xff] }
 0x150   : > { %v2103_v5 = vpop.eup %2102  ;;  %v629_v61 = vadd.f32 1e-06, %v597_v3  ;;  %910 = vmatprep.mubr.f32.mxu0 %v2268_v56  ;;  %v705_v55 = vmul.f32 %v2750_v50, %v666_v16 }
 0x151   : > { %v606_v42 = vadd.f32 1e-06, %v574_v36  ;;  %v2105_v25 = vpop.eup %2104  ;;  %v564_v44 = vpop.xlane.xlu1 %563  ;;  %v2775_v46 = vadd.f32 %v2756_v21, %v728_v38  ;;  %v690_v48 = vmul.f32 %v2103_v5, %v2528_v62 }
 0x152   : > { %v518_v13 = vpop.xlane.xlu0 %517  ;;  %2114 = vrsqrt.f32 %v629_v61  ;;  %v598_v9 = vmul.f32 0.0078125, %v564_v44  ;;  %v2785_v20 = vadd.f32 %v2756_v21, %v705_v55  ;;  %v667_v29 = vmul.f32 %v2105_v25, %v2535_v35 }
 0x153   : > { %v575_v53 = vmul.f32 0.0078125, %v518_v13  ;;  %2116 = vrsqrt.f32 %v606_v42  ;;  %1049 = vmatmul.mubr.f32.vlgmr.msra.gmra.mrb[0].mxu1 %v2775_v46  ;;  %v729_v62 = vmul.f32 %v2750_v50, %v690_v48  ;;  %v1952_v48 = vpack.c.bf16 %v798_v17, %v795_v37  ;;  %v807_v37 = vld [vmem:[%s3436_s1 + $0x100] sm:$0xff]  ;;  %v810_v17 = vld [vmem:[%s3436_s1 + $0x118] sm:$0xff] }
 0x154   : > { %v2107_v57 = vpop.eup %2106  ;;  %v630_v15 = vadd.f32 1e-06, %v598_v9  ;;  %911 = vmatmul.mubr.f32.gmra.mrb[2].mxu0 %v2785_v20  ;;  %1943 = vmatpush3.bf16.msra.mxu1 %v2692_v58  ;;  %v706_v54 = vmul.f32 %v2750_v50, %v667_v29 }
 0x155   : > { %v607_v30 = vadd.f32 1e-06, %v575_v53  ;;  %v2109_v32 = vpop.eup %2108  ;;  %v566_v11 = vpop.xlane.xlu1 %565  ;;  %916 = vmatprep.mubr.f32.mxu0 %v2268_v56  ;;  %1054 = vmatprep.mubr.f32.mxu1 %v2268_v56  ;;  %v2796_v35 = vadd.f32 %v2756_v21, %v729_v62  ;;  %v691_v3 = vmul.f32 %v2107_v57, %v2538_v2 }
 0x156   : > { %v520_v31 = vpop.xlane.xlu0 %519  ;;  %2118 = vrsqrt.f32 %v630_v15  ;;  %v599_v36 = vmul.f32 0.0078125, %v566_v11  ;;  %1945 = vmatprep.subr.bf16.mxu1 %v1944_v7  ;;  %v668_v58 = vmul.f32 %v2109_v32, %v2545_v41  ;;  %v2807_v38 = vadd.f32 %v2756_v21, %v706_v54 }
 0x157   : > { %v576_v16 = vmul.f32 0.0078125, %v520_v31  ;;  %2120 = vrsqrt.f32 %v607_v30  ;;  %1055 = vmatmul.mubr.f32.gmra.mrb[2].mxu1 %v2796_v35  ;;  %v730_v2 = vmul.f32 %v2750_v50, %v691_v3 }
 0x158   : > { %v2111_v5 = vpop.eup %2110  ;;  %v631_v61 = vadd.f32 1e-06, %v599_v36  ;;  %1947 = vmatpush3.bf16.msra.mxu1 %v1944_v7  ;;  %1060 = vmatprep.mubr.f32.mxu1 %v2268_v56  ;;  %v707_v41 = vmul.f32 %v2750_v50, %v668_v58  ;;  %v801_v7 = vld [vmem:[%s3436_s1 + $0xd0] sm:$0xff] }
 0x159   : > { %v608_v42 = vadd.f32 1e-06, %v576_v16  ;;  %v2113_v55 = vpop.eup %2112  ;;  %917 = vmatmul.mubr.f32.gmra.mrb[4].mxu0 %v2807_v38  ;;  %v568_v25 = vpop.xlane.xlu1 %567  ;;  %1949 = vmatprep.subr.bf16.mxu1 %v1948_v1  ;;  %v2815_v13 = vadd.f32 %v2756_v21, %v730_v2  ;;  %v692_v27 = vmul.f32 %v2111_v5, %v2548_v4  ;;  %v1956_v32 = vpack.c.bf16 %v804_v52, %v801_v7  ;;  %v816_v52 = vld [vmem:[%s3436_s1 + $0x148] sm:$0xff] }
 0x15a   : > { %v522_v44 = vpop.xlane.xlu0 %521  ;;  %2122 = vrsqrt.f32 %v631_v61  ;;  %v600_v9 = vmul.f32 0.0078125, %v568_v25  ;;  %922 = vmatprep.mubr.f32.mxu0 %v2268_v56  ;;  %v2826_v29 = vadd.f32 %v2756_v21, %v707_v41  ;;  %v669_v4 = vmul.f32 %v2113_v55, %v2555_v47 }
 0x15b   : > { %v577_v53 = vmul.f32 0.0078125, %v522_v44  ;;  %2124 = vrsqrt.f32 %v608_v42  ;;  %1061 = vmatmul.mubr.f32.gmra.mrb[4].mxu1 %v2815_v13  ;;  %v731_v62 = vmul.f32 %v2750_v50, %v692_v27  ;;  %v1960_v27 = vpack.c.bf16 %v810_v17, %v807_v37  ;;  %v822_v37 = vld [vmem:[%s3436_s1 + $0x178] sm:$0xff] }
 0x15c   : > { %v2115_v57 = vpop.eup %2114  ;;  %v632_v15 = vadd.f32 1e-06, %v600_v9  ;;  %1951 = vmatpush3.bf16.msra.mxu1 %v1948_v1  ;;  %1066 = vmatprep.mubr.f32.mxu1 %v2268_v56  ;;  %v708_v3 = vmul.f32 %v2750_v50, %v669_v4 }
 0x15d   : > { %v609_v30 = vadd.f32 1e-06, %v577_v53  ;;  %v2117_v11 = vpop.eup %2116  ;;  %923 = vmatmul.mubr.f32.gmra.mrb[6].mxu0 %v2826_v29  ;;  %v524_v31 = vpop.xlane.xlu1 %523  ;;  %1953 = vmatprep.subr.bf16.mxu1 %v1952_v48  ;;  %v2835_v36 = vadd.f32 %v2756_v21, %v731_v62  ;;  %v693_v47 = vmul.f32 %v2115_v57, %v2558_v6 }
 0x15e   : > { %v526_v54 = vpop.xlane.xlu0 %525  ;;  %2126 = vrsqrt.f32 %v632_v15  ;;  %v578_v16 = vmul.f32 0.0078125, %v524_v31  ;;  %928 = vmatprep.mubr.f32.mxu0 %v2268_v56  ;;  %v670_v1 = vmul.f32 %v2117_v11, %v2577_v59  ;;  %v2847_v2 = vadd.f32 %v2756_v21, %v708_v3 }
 0x15f   : > { %v579_v58 = vmul.f32 0.0078125, %v526_v54  ;;  %2128 = vrsqrt.f32 %v609_v30  ;;  %1067 = vmatmul.mubr.f32.gmra.mrb[6].mxu1 %v2835_v36  ;;  %v732_v6 = vmul.f32 %v2750_v50, %v693_v47 }
 0x160   : > { %v2119_v5 = vpop.eup %2118  ;;  %v610_v61 = vadd.f32 1e-06, %v578_v16  ;;  %1955 = vmatpush3.bf16.msra.mxu1 %v1952_v48  ;;  %1072 = vmatprep.mubr.f32.mxu1 %v2268_v56  ;;  %v709_v59 = vmul.f32 %v2750_v50, %v670_v1  ;;  %v813_v48 = vld [vmem:[%s3436_s1 + $0x130] sm:$0xff]  ;;  %v819_v1 = vld [vmem:[%s3436_s1 + $0x160] sm:$0xff] }
 0x161   : > { %v611_v42 = vadd.f32 1e-06, %v579_v58  ;;  %v2121_v41 = vpop.eup %2120  ;;  %929 = vmatmul.mubr.f32.gmra.mrb[8].mxu0 %v2847_v2  ;;  %v528_v55 = vpop.xlane.xlu1 %527  ;;  %1957 = vmatprep.subr.bf16.mxu1 %v1956_v32  ;;  %v2855_v44 = vadd.f32 %v2756_v21, %v732_v6  ;;  %v694_v7 = vmul.f32 %v2119_v5, %v2580_v60  ;;  %v1964_v30 = vpack.c.bf16 %v816_v52, %v813_v48 }
 0x162   : > { %v530_v25 = vpop.xlane.xlu0 %529  ;;  %2130 = vrsqrt.f32 %v610_v61  ;;  %v580_v9 = vmul.f32 0.0078125, %v528_v55  ;;  %934 = vmatprep.mubr.f32.mxu0 %v2268_v56  ;;  %v2866_v4 = vadd.f32 %v2756_v21, %v709_v59  ;;  %v671_v60 = vmul.f32 %v2121_v41, %v2599_v39 }
 0x163   : > { %v581_v53 = vmul.f32 0.0078125, %v530_v25  ;;  %2132 = vrsqrt.f32 %v611_v42  ;;  %1073 = vmatmul.mubr.f32.gmra.mrb[8].mxu1 %v2855_v44  ;;  %v733_v62 = vmul.f32 %v2750_v50, %v694_v7  ;;  %v1968_v55 = vpack.c.bf16 %v822_v37, %v819_v1 }
 0x164   : > { %v2123_v57 = vpop.eup %2122  ;;  %v612_v15 = vadd.f32 1e-06, %v580_v9  ;;  %1959 = vmatpush3.bf16.msra.mxu1 %v1956_v32  ;;  %1078 = vmatprep.mubr.f32.mxu1 %v2268_v56  ;;  %v710_v3 = vmul.f32 %v2750_v50, %v671_v60 }
 0x165   : > { %v2125_v11 = vpop.eup %2124  ;;  %935 = vmatmul.mubr.f32.gmra.mrb[10].mxu0 %v2866_v4  ;;  %v532_v31 = vpop.xlane.xlu1 %531  ;;  %1961 = vmatprep.subr.bf16.mxu1 %v1960_v27  ;;  %v2875_v47 = vadd.f32 %v2756_v21, %v733_v62  ;;  %v695_v39 = vmul.f32 %v2123_v57, %v2602_v40  ;;  %v613_v16 = vadd.f32 1e-06, %v581_v53 }
 0x166   : > { %v534_v54 = vpop.xlane.xlu0 %533  ;;  %2134 = vrsqrt.f32 %v612_v15  ;;  %v582_v58 = vmul.f32 0.0078125, %v532_v31  ;;  %940 = vmatprep.mubr.f32.mxu0 %v2268_v56  ;;  %v672_v32 = vmul.f32 %v2125_v11, %v2621_v51  ;;  %v2887_v17 = vadd.f32 %v2756_v21, %v710_v3 }
 0x167   : > { %1079 = vmatmul.mubr.f32.gmra.mrb[10].mxu1 %v2875_v47  ;;  %v734_v40 = vmul.f32 %v2750_v50, %v695_v39  ;;  %v583_v5 = vmul.f32 0.0078125, %v534_v54  ;;  %2136 = vrsqrt.f32 %v613_v16 }
 0x168   : > { %v2127_v6 = vpop.eup %2126  ;;  %1963 = vmatpush3.bf16.msra.mxu1 %v1960_v27  ;;  %1084 = vmatprep.mubr.f32.mxu1 %v2268_v56  ;;  %v711_v51 = vmul.f32 %v2750_v50, %v672_v32  ;;  %v614_v7 = vadd.f32 1e-06, %v582_v58 }
 0x169   : > { %v2129_v61 = vpop.eup %2128  ;;  %941 = vmatmul.mubr.f32.gmra.mrb[12].mxu0 %v2887_v17  ;;  %v536_v42 = vpop.xlane.xlu1 %535  ;;  %1965 = vmatprep.subr.bf16.mxu1 %v1964_v30  ;;  %v2895_v41 = vadd.f32 %v2756_v21, %v734_v40  ;;  %v696_v25 = vmul.f32 %v2127_v6, %v2624_v8  ;;  %v615_v60 = vadd.f32 1e-06, %v583_v5 }
 0x16a   : > { %v538_v59 = vpop.xlane.xlu0 %537  ;;  %946 = vmatprep.mubr.f32.mxu0 %v2268_v56  ;;  %v2900_v27 = vadd.f32 %v2756_v21, %v711_v51  ;;  %v673_v52 = vmul.f32 %v2129_v61, %v2643_v10  ;;  %v584_v57 = vmul.f32 0.0078125, %v536_v42  ;;  %2138 = vrsqrt.f32 %v614_v7 }
 0x16b   : > { %v585_v48 = vmul.f32 0.0078125, %v538_v59  ;;  %1085 = vmatmul.mubr.f32.gmra.mrb[12].mxu1 %v2895_v41  ;;  %v735_v9 = vmul.f32 %v2750_v50, %v696_v25 }
 0x16c   : > { %v2131_v53 = vpop.eup %2130  ;;  %1967 = vmatpush3.bf16.msra.mxu1 %v1964_v30  ;;  %1090 = vmatprep.mubr.f32.mxu1 %v2268_v56  ;;  %v712_v31 = vmul.f32 %v2750_v50, %v673_v52 }
 0x16d   : > { %v617_v62 = vadd.f32 1e-06, %v585_v48  ;;  %v2133_v8 = vpop.eup %2132  ;;  %947 = vmatmul.mubr.f32.gmra.mrb[14].mxu0 %v2900_v27  ;;  %v540_v15 = vpop.xlane.xlu1 %539  ;;  %1969 = vmatprep.subr.bf16.mxu1 %v1968_v55  ;;  %v2909_v54 = vadd.f32 %v2756_v21, %v735_v9  ;;  %v674_v10 = vmul.f32 %v2131_v53, %v2646_v33  ;;  %v616_v33 = vadd.f32 1e-06, %v584_v57 }
 0x16e   : > { %v542_v11 = vpop.xlane.xlu0 %541  ;;  %v586_v3 = vmul.f32 0.0078125, %v540_v15  ;;  %952 = vmatprep.mubr.f32.mxu0 %v2268_v56  ;;  %v2914_v30 = vadd.f32 %v2756_v21, %v712_v31  ;;  %v675_v58 = vmul.f32 %v2133_v8, %v2665_v12 }
 0x16f   : > { %v587_v39 = vmul.f32 0.0078125, %v542_v11  ;;  %2140 = vrsqrt.f32 %v617_v62  ;;  %1091 = vmatmul.mubr.f32.gmra.mrb[14].mxu1 %v2909_v54  ;;  %v713_v16 = vmul.f32 %v2750_v50, %v674_v10 }
 0x170   : > { %v2135_v32 = vpop.eup %2134  ;;  %v618_v1 = vadd.f32 1e-06, %v586_v3  ;;  %1971 = vmatpush3.bf16.msra.mxu1 %v1968_v55  ;;  %1860 = vmatprep.mubr.f32.mxu1 %v2760_v34  ;;  %2142 = vrsqrt.f32 %v615_v60  ;;  %v714_v12 = vmul.f32 %v2750_v50, %v675_v58 }
 0x171   : > { %v619_v37 = vadd.f32 1e-06, %v587_v39  ;;  %953 = vmatmul.mubr.f32.gmra.mrb[16].mxu0 %v2914_v30  ;;  %v544_v40 = vpop.xlane.xlu1 %543  ;;  %v2922_v5 = vadd.f32 %v2756_v21, %v713_v16  ;;  %v676_v34 = vmul.f32 %v2135_v32, %v2668_v45  ;;  %v2137_v42 = vpop.eup %2136 }
 0x172   : > { %v546_v6 = vpop.xlane.xlu0 %545  ;;  %2144 = vrsqrt.f32 %v618_v1  ;;  %v588_v51 = vmul.f32 0.0078125, %v544_v40  ;;  %958 = vmatprep.mubr.f32.mxu0 %v2268_v56  ;;  %v677_v9 = vmul.f32 %v2137_v42, %v2675_v18 }
 0x173   : > { %v589_v61 = vmul.f32 0.0078125, %v546_v6  ;;  %2146 = vrsqrt.f32 %v619_v37  ;;  %1861 = vmatmul.mubr.f32.vlgmr.msra.gmra.mrb[16].mxu1 %v2785_v20  ;;  %v753_v20 = vadd.f32 %v2756_v21, %v714_v12  ;;  %v715_v45 = vmul.f32 %v2750_v50, %v676_v34 }
 0x174   : > { %v620_v59 = vadd.f32 1e-06, %v588_v51  ;;  %1863 = vmatprep.mubr.f32.mxu1 %v2807_v38  ;;  %2148 = vrsqrt.f32 %v616_v33  ;;  %v2139_v38 = vpop.eup %2138  ;;  %v716_v18 = vmul.f32 %v2750_v50, %v677_v9 }
 0x175   : > { %v621_v55 = vadd.f32 1e-06, %v589_v61  ;;  %959 = vmatmul.mubr.f32.gmra.mrb[18].mxu0 %v2922_v5  ;;  %v548_v25 = vpop.xlane.xlu1 %547  ;;  %v678_v31 = vmul.f32 %v2139_v38, %v2678_v19 }
 0x176   : > { %v550_v7 = vpop.xlane.xlu0 %549  ;;  %2150 = vrsqrt.f32 %v620_v59  ;;  %v590_v48 = vmul.f32 0.0078125, %v548_v25  ;;  %964 = vmatprep.mubr.f32.mxu0 %v2268_v56  ;;  %v755_v19 = vadd.f32 %v2756_v21, %v716_v18 }
 0x177   : > { %v591_v52 = vmul.f32 0.0078125, %v550_v7  ;;  %2152 = vrsqrt.f32 %v621_v55  ;;  %1864 = vmatmul.mubr.f32.gmra.mrb[18].mxu1 %v2826_v29  ;;  %v754_v29 = vadd.f32 %v2756_v21, %v715_v45 }
 0x178   : > { %v622_v53 = vadd.f32 1e-06, %v590_v48  ;;  %1866 = vmatprep.mubr.f32.mxu1 %v2847_v2 }
 0x179   : > { %v623_v60 = vadd.f32 1e-06, %v591_v52  ;;  %v2141_v62 = vpop.eup %2140  ;;  %965 = vmatmul.mubr.f32.gmra.mrb[20].mxu0 %v753_v20  ;;  %v552_v8 = vpop.xlane.xlu1 %551 }
 0x17a   : > { %2154 = vrsqrt.f32 %v622_v53  ;;  %v592_v57 = vmul.f32 0.0078125, %v552_v8  ;;  %970 = vmatprep.mubr.f32.mxu0 %v2268_v56  ;;  %v681_v15 = vmul.f32 %v2141_v62, %v2706_v22  ;;  %v2143_v11 = vpop.eup %2142 }
 0x17b   : > { %2156 = vrsqrt.f32 %v623_v60  ;;  %1867 = vmatmul.mubr.f32.gmra.mrb[20].mxu1 %v2866_v4  ;;  %v679_v32 = vmul.f32 %v2143_v11, %v2695_v63 }
 0x17c   : > { %v2145_v2 = vpop.eup %2144  ;;  %v624_v10 = vadd.f32 1e-06, %v592_v57  ;;  %1869 = vmatprep.mubr.f32.mxu1 %v2887_v17  ;;  %v720_v3 = vmul.f32 %v2750_v50, %v681_v15  ;;  %v717_v17 = vmul.f32 %v2750_v50, %v678_v31 }
 0x17d   : > { %v2147_v39 = vpop.eup %2146  ;;  %971 = vmatmul.mubr.f32.gmra.mrb[22].mxu0 %v754_v29  ;;  %v682_v22 = vmul.f32 %v2145_v2, %v2709_v23 }
 0x17e   : > { %2158 = vrsqrt.f32 %v624_v10  ;;  %976 = vmatprep.mubr.f32.mxu0 %v2268_v56  ;;  %v759_v16 = vadd.f32 %v2756_v21, %v720_v3  ;;  %v683_v4 = vmul.f32 %v2147_v39, %v2716_v43  ;;  %v2149_v58 = vpop.eup %2148  ;;  %v756_v63 = vadd.f32 %v2756_v21, %v717_v17 }
 0x17f   : > { %1870 = vmatmul.mubr.f32.gmra.mrb[22].mxu1 %v2900_v27  ;;  %v721_v1 = vmul.f32 %v2750_v50, %v682_v22  ;;  %v680_v51 = vmul.f32 %v2149_v58, %v2698_v0 }
 0x180   : > { %v2151_v37 = vpop.eup %2150  ;;  %1872 = vmatprep.mubr.f32.mxu1 %v2914_v30  ;;  %v722_v23 = vmul.f32 %v2750_v50, %v683_v4  ;;  %v718_v30 = vmul.f32 %v2750_v50, %v679_v32 }
 0x181   : > { %v2153_v33 = vpop.eup %2152  ;;  %977 = vmatmul.mubr.f32.gmra.mrb[24].mxu0 %v755_v19  ;;  %v760_v43 = vadd.f32 %v2756_v21, %v721_v1  ;;  %v684_v40 = vmul.f32 %v2151_v37, %v2719_v24  ;;  %v719_v55 = vmul.f32 %v2750_v50, %v680_v51 }
 0x182   : > { %982 = vmatprep.mubr.f32.mxu0 %v2268_v56  ;;  %v761_v27 = vadd.f32 %v2756_v21, %v722_v23  ;;  %v685_v6 = vmul.f32 %v2153_v33, %v2726_v49  ;;  %v757_v0 = vadd.f32 %v2756_v21, %v718_v30 }
 0x183   : > { %1873 = vmatmul.mubr.f32.gmra.mrb[24].mxu1 %v2922_v5  ;;  %v723_v61 = vmul.f32 %v2750_v50, %v684_v40 }
 0x184   : > { %v2155_v12 = vpop.eup %2154  ;;  %1875 = vmatprep.mubr.f32.mxu1 %v753_v20  ;;  %v724_v24 = vmul.f32 %v2750_v50, %v685_v6  ;;  %v758_v20 = vadd.f32 %v2756_v21, %v719_v55 }
 0x185   : > { %v2157_v34 = vpop.eup %2156  ;;  %983 = vmatmul.mubr.f32.gmra.mrb[26].mxu0 %v756_v63  ;;  %v762_v42 = vadd.f32 %v2756_v21, %v723_v61  ;;  %v686_v49 = vmul.f32 %v2155_v12, %v2729_v26 }
 0x186   : > { %988 = vmatprep.mubr.f32.mxu0 %v2268_v56  ;;  %v763_v5 = vadd.f32 %v2756_v21, %v724_v24  ;;  %v687_v59 = vmul.f32 %v2157_v34, %v2736_v14 }
 0x187   : > { %1876 = vmatmul.mubr.f32.gmra.mrb[26].mxu1 %v754_v29  ;;  %v725_v25 = vmul.f32 %v2750_v50, %v686_v49 }
 0x188   : > { %v2159_v7 = vpop.eup %2158  ;;  %1878 = vmatprep.mubr.f32.mxu1 %v755_v19  ;;  %v726_v48 = vmul.f32 %v2750_v50, %v687_v59 }
 0x189   : > { %989 = vmatmul.mubr.f32.gmra.mrb[28].mxu0 %v757_v0  ;;  %v764_v26 = vadd.f32 %v2756_v21, %v725_v25  ;;  %v688_v52 = vmul.f32 %v2159_v7, %v2739_v28  ;;  %v825_v28 = vlaneseq }
 0x18a   : > { %994 = vmatprep.mubr.f32.mxu0 %v2268_v56  ;;  %v765_v14 = vadd.f32 %v2756_v21, %v726_v48 }
 0x18b   : > { %1879 = vmatmul.mubr.f32.gmra.mrb[28].mxu1 %v756_v63  ;;  %v727_v45 = vmul.f32 %v2750_v50, %v688_v52  ;;  %v2998_v50 = vshrl.u32 %v825_v28, 7 }
 0x18c   : > { %1881 = vmatprep.mubr.f32.mxu1 %v757_v0 }
 0x18d   : > { %995 = vmatmul.mubr.f32.gmra.mrb[30].mxu0 %v758_v20  ;;  %v766_v9 = vadd.f32 %v2756_v21, %v727_v45  ;;  %v827_v21 = vsub.s32 0, %v2998_v50  ;;  %v835_v45 = vsub.s32 2, %v2998_v50 }
 0x18e   : > { %1000 = vmatprep.mubr.f32.mxu0 %v2268_v56 }
 0x18f   : > { %1882 = vmatmul.mubr.f32.gmra.mrb[30].mxu1 %v758_v20 }
 0x190   : > { %1884 = vmatprep.mubr.f32.mxu1 %v759_v16 }
 0x191   : > { %1001 = vmatmul.mubr.f32.gmra.mrb[32].mxu0 %v759_v16 }
 0x192   : > { %1006 = vmatprep.mubr.f32.mxu0 %v2268_v56 }
 0x193   : > { %1885 = vmatmul.mubr.f32.gmra.mrb[32].mxu1 %v760_v43 }
 0x194   : > { %1887 = vmatprep.mubr.f32.mxu1 %v761_v27 }
 0x195   : > { %1007 = vmatmul.mubr.f32.gmra.mrb[34].mxu0 %v760_v43 }
 0x196   : > { %1012 = vmatprep.mubr.f32.mxu0 %v2268_v56 }
 0x197   : > { %1888 = vmatmul.mubr.f32.gmra.mrb[34].mxu1 %v762_v42 }
 0x198   : > { %1890 = vmatprep.mubr.f32.mxu1 %v763_v5 }
 0x199   : > { %1013 = vmatmul.mubr.f32.gmra.mrb[36].mxu0 %v761_v27 }
 0x19a   : > { %1018 = vmatprep.mubr.f32.mxu0 %v2268_v56 }
 0x19b   : > { %1891 = vmatmul.mubr.f32.gmra.mrb[36].mxu1 %v764_v26 }
 0x19c   : > { %1893 = vmatprep.mubr.f32.mxu1 %v765_v14 }
 0x19d   : > { %1019 = vmatmul.mubr.f32.gmra.mrb[38].mxu0 %v762_v42 }
 0x19e   : > { %1024 = vmatprep.mubr.f32.mxu0 %v2268_v56 }
 0x19f   : > { %1894 = vmatmul.mubr.f32.gmra.mrb[38].mxu1 %v766_v9 }
 0x1a0   : > { %1896 = vmatprep.mubr.f32.mxu1 %v2775_v46  ;;  %v3005_v46 = vld [vmem:[%s3439_s4] sm:$0x7] }
 0x1a1   : > { %1025 = vmatmul.mubr.f32.gmra.mrb[40].mxu0 %v763_v5 }
 0x1a2   : > { %1030 = vmatprep.mubr.f32.mxu0 %v2268_v56 }
 0x1a3   : > { %1897 = vmatmul.mubr.f32.gmra.mrb[40].mxu1 %v2796_v35  ;;  %v3009_v35 = vrot.slane %v3005_v46, %v827_v21 }
 0x1a4   : > { %1899 = vmatprep.mubr.f32.mxu1 %v2815_v13 }
 0x1a5   : > { %1031 = vmatmul.mubr.f32.gmra.mrb[42].mxu0 %v764_v26 }
 0x1a6   : > { %1036 = vmatprep.mubr.f32.mxu0 %v2268_v56 }
 0x1a7   : > { %1900 = vmatmul.mubr.f32.gmra.mrb[42].mxu1 %v2835_v36 }
 0x1a8   : > { %1902 = vmatprep.mubr.f32.mxu1 %v2855_v44 }
 0x1a9   : > { %1037 = vmatmul.mubr.f32.gmra.mrb[44].mxu0 %v765_v14 }
 0x1aa   : > { %1042 = vmatprep.mubr.f32.mxu0 %v2268_v56  ;;  %v831_v56 = vsub.s32 1, %v2998_v50 }
 0x1ab   : > { %1903 = vmatmul.mubr.f32.gmra.mrb[44].mxu1 %v2875_v47 }
 0x1ac   : > { %1905 = vmatprep.mubr.f32.mxu1 %v2895_v41  ;;  %v3012_v13 = vrot.slane %v3005_v46, %v831_v56 }
 0x1ad   : > { %1043 = vmatmul.mubr.f32.gmra.mrb[46].mxu0 %v766_v9 }
 0x1af   : > { %1906 = vmatmul.mubr.f32.gmra.mrb[46].mxu1 %v2909_v54 }
 0x222   : > { %v906_v36 = vpop.f32.mrb[0].mxu0 }
 0x223   : > { %v907_v44 = vadd.f32 %v906_v36, %v3009_v35  ;;  %v908_v47 = vpop.f32.mrb[1].mxu0 }
 0x224   : > { %v909_v41 = vadd.f32 %v908_v47, %v3012_v13 }
 0x225   : > { %1322 = vst [vmem:[%s3016_s18] sm:$0xff] %v907_v44 }
 0x226   : > { %1323 = vst [vmem:[%s3016_s18 + $0x8] sm:$0xff] %v909_v41  ;;  %v1050_v54 = vpop.f32.mrb[0].mxu1  ;;  %v3078_v41 = vrot.slane %v3005_v46, %v835_v45 }
 0x227   : > { %v912_v38 = vpop.f32.mrb[2].mxu0  ;;  %v1051_v53 = vadd.f32 %v1050_v54, %v3009_v35  ;;  %v1052_v60 = vpop.f32.mrb[1].mxu1 }
 0x228   : > { %v913_v62 = vadd.f32 %v912_v38, %v3009_v35  ;;  %v914_v8 = vpop.f32.mrb[3].mxu0  ;;  %v1053_v57 = vadd.f32 %v1052_v60, %v3012_v13 }
 0x229   : > { %1394 = vst [vmem:[%s3016_s18 + $0x240] sm:$0xff] %v1051_v53  ;;  %v915_v15 = vadd.f32 %v914_v8, %v3012_v13 }
 0x22a   : > { %1325 = vst [vmem:[%s3016_s18 + $0x18] sm:$0xff] %v913_v62  ;;  %1395 = vst [vmem:[%s3016_s18 + $0x248] sm:$0xff] %v1053_v57  ;;  %v1056_v11 = vpop.f32.mrb[2].mxu1 }
 0x22b   : > { %1326 = vst [vmem:[%s3016_s18 + $0x20] sm:$0xff] %v915_v15  ;;  %v1057_v29 = vadd.f32 %v1056_v11, %v3009_v35  ;;  %v1058_v18 = vpop.f32.mrb[3].mxu1 }
 0x22c   : > { %v918_v31 = vpop.f32.mrb[4].mxu0  ;;  %v1059_v2 = vadd.f32 %v1058_v18, %v3012_v13 }
 0x22d   : > { %v919_v10 = vadd.f32 %v918_v31, %v3009_v35  ;;  %1397 = vst [vmem:[%s3016_s18 + $0x258] sm:$0xff] %v1057_v29  ;;  %v920_v3 = vpop.f32.mrb[5].mxu0 }
 0x22e   : > { %v921_v39 = vadd.f32 %v920_v3, %v3012_v13  ;;  %1398 = vst [vmem:[%s3016_s18 + $0x260] sm:$0xff] %v1059_v2  ;;  %v1062_v22 = vpop.f32.mrb[4].mxu1 }
 0x22f   : > { %1328 = vst [vmem:[%s3016_s18 + $0x30] sm:$0xff] %v919_v10  ;;  %v1063_v16 = vadd.f32 %v1062_v22, %v3009_v35  ;;  %v1064_v4 = vpop.f32.mrb[5].mxu1 }
 0x230   : > { %1329 = vst [vmem:[%s3016_s18 + $0x38] sm:$0xff] %v921_v39  ;;  %v924_v58 = vpop.f32.mrb[6].mxu0  ;;  %v1065_v19 = vadd.f32 %v1064_v4, %v3012_v13 }
 0x231   : > { %v925_v17 = vadd.f32 %v924_v58, %v3009_v35  ;;  %1400 = vst [vmem:[%s3016_s18 + $0x270] sm:$0xff] %v1063_v16  ;;  %v926_v32 = vpop.f32.mrb[7].mxu0 }
 0x232   : > { %v927_v1 = vadd.f32 %v926_v32, %v3012_v13  ;;  %1401 = vst [vmem:[%s3016_s18 + $0x278] sm:$0xff] %v1065_v19  ;;  %v1068_v37 = vpop.f32.mrb[6].mxu1 }
 0x233   : > { %1331 = vst [vmem:[%s3016_s18 + $0x48] sm:$0xff] %v925_v17  ;;  %v1069_v23 = vadd.f32 %v1068_v37, %v3009_v35  ;;  %v1070_v33 = vpop.f32.mrb[7].mxu1 }
 0x234   : > { %1332 = vst [vmem:[%s3016_s18 + $0x50] sm:$0xff] %v927_v1  ;;  %v930_v43 = vpop.f32.mrb[8].mxu0  ;;  %v1071_v40 = vadd.f32 %v1070_v33, %v3012_v13 }
 0x235   : > { %v931_v27 = vadd.f32 %v930_v43, %v3009_v35  ;;  %1403 = vst [vmem:[%s3016_s18 + $0x288] sm:$0xff] %v1069_v23  ;;  %v932_v6 = vpop.f32.mrb[9].mxu0 }
 0x236   : > { %v933_v63 = vadd.f32 %v932_v6, %v3012_v13  ;;  %1404 = vst [vmem:[%s3016_s18 + $0x290] sm:$0xff] %v1071_v40  ;;  %v1074_v30 = vpop.f32.mrb[8].mxu1 }
 0x237   : > { %1334 = vst [vmem:[%s3016_s18 + $0x60] sm:$0xff] %v931_v27  ;;  %v1075_v51 = vadd.f32 %v1074_v30, %v3009_v35  ;;  %v1076_v61 = vpop.f32.mrb[9].mxu1 }
 0x238   : > { %1335 = vst [vmem:[%s3016_s18 + $0x68] sm:$0xff] %v933_v63  ;;  %v936_v12 = vpop.f32.mrb[10].mxu0  ;;  %v1077_v24 = vadd.f32 %v1076_v61, %v3012_v13 }
 0x239   : > { %v937_v34 = vadd.f32 %v936_v12, %v3009_v35  ;;  %1406 = vst [vmem:[%s3016_s18 + $0x2a0] sm:$0xff] %v1075_v51  ;;  %v938_v42 = vpop.f32.mrb[11].mxu0 }
 0x23a   : > { %v939_v49 = vadd.f32 %v938_v42, %v3012_v13  ;;  %1407 = vst [vmem:[%s3016_s18 + $0x2a8] sm:$0xff] %v1077_v24  ;;  %v1080_v5 = vpop.f32.mrb[10].mxu1 }
 0x23b   : > { %1337 = vst [vmem:[%s3016_s18 + $0x78] sm:$0xff] %v937_v34  ;;  %v1081_v59 = vadd.f32 %v1080_v5, %v3009_v35  ;;  %v1082_v0 = vpop.f32.mrb[11].mxu1 }
 0x23c   : > { %1338 = vst [vmem:[%s3016_s18 + $0x80] sm:$0xff] %v939_v49  ;;  %v942_v55 = vpop.f32.mrb[12].mxu0  ;;  %v1083_v25 = vadd.f32 %v1082_v0, %v3012_v13 }
 0x23d   : > { %v943_v7 = vadd.f32 %v942_v55, %v3009_v35  ;;  %1409 = vst [vmem:[%s3016_s18 + $0x2b8] sm:$0xff] %v1081_v59  ;;  %v944_v48 = vpop.f32.mrb[13].mxu0 }
 0x23e   : > { %v945_v26 = vadd.f32 %v944_v48, %v3012_v13  ;;  %1410 = vst [vmem:[%s3016_s18 + $0x2c0] sm:$0xff] %v1083_v25  ;;  %v1086_v52 = vpop.f32.mrb[12].mxu1 }
 0x23f   : > { %1340 = vst [vmem:[%s3016_s18 + $0x90] sm:$0xff] %v943_v7  ;;  %v1087_v14 = vadd.f32 %v1086_v52, %v3009_v35  ;;  %v1088_v20 = vpop.f32.mrb[13].mxu1 }
 0x240   : > { %1341 = vst [vmem:[%s3016_s18 + $0x98] sm:$0xff] %v945_v26  ;;  %v948_v9 = vpop.f32.mrb[14].mxu0  ;;  %v1089_v28 = vadd.f32 %v1088_v20, %v3012_v13 }
 0x241   : > { %v949_v21 = vadd.f32 %v948_v9, %v3009_v35  ;;  %1412 = vst [vmem:[%s3016_s18 + $0x2d0] sm:$0xff] %v1087_v14  ;;  %v950_v56 = vpop.f32.mrb[15].mxu0 }
 0x242   : > { %v951_v36 = vadd.f32 %v950_v56, %v3012_v13  ;;  %1413 = vst [vmem:[%s3016_s18 + $0x2d8] sm:$0xff] %v1089_v28  ;;  %v1092_v44 = vpop.f32.mrb[14].mxu1 }
 0x243   : > { %1343 = vst [vmem:[%s3016_s18 + $0xa8] sm:$0xff] %v949_v21  ;;  %v1093_v47 = vadd.f32 %v1092_v44, %v3009_v35  ;;  %v1094_v50 = vpop.f32.mrb[15].mxu1 }
 0x244   : > { %1344 = vst [vmem:[%s3016_s18 + $0xb0] sm:$0xff] %v951_v36  ;;  %v954_v54 = vpop.f32.mrb[16].mxu0  ;;  %v1095_v38 = vadd.f32 %v1094_v50, %v3012_v13 }
 0x245   : > { %v955_v53 = vadd.f32 %v954_v54, %v3009_v35  ;;  %1415 = vst [vmem:[%s3016_s18 + $0x2e8] sm:$0xff] %v1093_v47  ;;  %v956_v60 = vpop.f32.mrb[17].mxu0 }
 0x246   : > { %v957_v62 = vadd.f32 %v956_v60, %v3012_v13  ;;  %1416 = vst [vmem:[%s3016_s18 + $0x2f0] sm:$0xff] %v1095_v38  ;;  %v1862_v8 = vpop.f32.mrb[16].mxu1 }
 0x247   : > { %1346 = vst [vmem:[%s3016_s18 + $0xc0] sm:$0xff] %v955_v53  ;;  %v1169_v46 = vadd.f32 %v1862_v8, %v3078_v41  ;;  %v1163_v57 = vpop.f32.mrb[17].mxu1 }
 0x248   : > { %1347 = vst [vmem:[%s3016_s18 + $0xc8] sm:$0xff] %v957_v62  ;;  %v960_v15 = vpop.f32.mrb[18].mxu0  ;;  %v1164_v11 = vadd.f32 %v1163_v57, %v3078_v41 }
 0x249   : > { %v961_v29 = vadd.f32 %v960_v15, %v3009_v35  ;;  %1327 = vst [vmem:[%s3016_s18 + $0x28] sm:$0xff] %v1169_v46  ;;  %v962_v18 = vpop.f32.mrb[19].mxu0 }
 0x24a   : > { %v963_v31 = vadd.f32 %v962_v18, %v3012_v13  ;;  %1324 = vst [vmem:[%s3016_s18 + $0x10] sm:$0xff] %v1164_v11  ;;  %v1865_v2 = vpop.f32.mrb[18].mxu1 }
 0x24b   : > { %1349 = vst [vmem:[%s3016_s18 + $0xd8] sm:$0xff] %v961_v29  ;;  %v1179_v10 = vadd.f32 %v1865_v2, %v3078_v41  ;;  %v1173_v3 = vpop.f32.mrb[19].mxu1 }
 0x24c   : > { %1350 = vst [vmem:[%s3016_s18 + $0xe0] sm:$0xff] %v963_v31  ;;  %v966_v39 = vpop.f32.mrb[20].mxu0  ;;  %v1174_v22 = vadd.f32 %v1173_v3, %v3078_v41 }
 0x24d   : > { %v967_v16 = vadd.f32 %v966_v39, %v3009_v35  ;;  %1333 = vst [vmem:[%s3016_s18 + $0x58] sm:$0xff] %v1179_v10  ;;  %v968_v4 = vpop.f32.mrb[21].mxu0 }
 0x24e   : > { %v969_v58 = vadd.f32 %v968_v4, %v3012_v13  ;;  %1330 = vst [vmem:[%s3016_s18 + $0x40] sm:$0xff] %v1174_v22  ;;  %v1868_v19 = vpop.f32.mrb[20].mxu1 }
 0x24f   : > { %1352 = vst [vmem:[%s3016_s18 + $0xf0] sm:$0xff] %v967_v16  ;;  %v1189_v17 = vadd.f32 %v1868_v19, %v3078_v41  ;;  %v1183_v32 = vpop.f32.mrb[21].mxu1 }
 0x250   : > { %1353 = vst [vmem:[%s3016_s18 + $0xf8] sm:$0xff] %v969_v58  ;;  %v972_v1 = vpop.f32.mrb[22].mxu0  ;;  %v1184_v37 = vadd.f32 %v1183_v32, %v3078_v41 }
 0x251   : > { %v973_v23 = vadd.f32 %v972_v1, %v3009_v35  ;;  %1339 = vst [vmem:[%s3016_s18 + $0x88] sm:$0xff] %v1189_v17  ;;  %v974_v33 = vpop.f32.mrb[23].mxu0 }
 0x252   : > { %v975_v43 = vadd.f32 %v974_v33, %v3012_v13  ;;  %1336 = vst [vmem:[%s3016_s18 + $0x70] sm:$0xff] %v1184_v37  ;;  %v1871_v40 = vpop.f32.mrb[22].mxu1 }
 0x253   : > { %1355 = vst [vmem:[%s3016_s18 + $0x108] sm:$0xff] %v973_v23  ;;  %v1199_v27 = vadd.f32 %v1871_v40, %v3078_v41  ;;  %v1193_v6 = vpop.f32.mrb[23].mxu1 }
 0x254   : > { %1356 = vst [vmem:[%s3016_s18 + $0x110] sm:$0xff] %v975_v43  ;;  %v978_v63 = vpop.f32.mrb[24].mxu0  ;;  %v1194_v30 = vadd.f32 %v1193_v6, %v3078_v41 }
 0x255   : > { %v979_v51 = vadd.f32 %v978_v63, %v3009_v35  ;;  %1345 = vst [vmem:[%s3016_s18 + $0xb8] sm:$0xff] %v1199_v27  ;;  %v980_v61 = vpop.f32.mrb[25].mxu0 }
 0x256   : > { %v981_v12 = vadd.f32 %v980_v61, %v3012_v13  ;;  %1342 = vst [vmem:[%s3016_s18 + $0xa0] sm:$0xff] %v1194_v30  ;;  %v1874_v24 = vpop.f32.mrb[24].mxu1 }
 0x257   : > { %1358 = vst [vmem:[%s3016_s18 + $0x120] sm:$0xff] %v979_v51  ;;  %v1209_v34 = vadd.f32 %v1874_v24, %v3078_v41  ;;  %v1203_v42 = vpop.f32.mrb[25].mxu1 }
 0x258   : > { %1359 = vst [vmem:[%s3016_s18 + $0x128] sm:$0xff] %v981_v12  ;;  %v984_v49 = vpop.f32.mrb[26].mxu0  ;;  %v1204_v5 = vadd.f32 %v1203_v42, %v3078_v41 }
 0x259   : > { %v985_v59 = vadd.f32 %v984_v49, %v3009_v35  ;;  %1351 = vst [vmem:[%s3016_s18 + $0xe8] sm:$0xff] %v1209_v34  ;;  %v986_v0 = vpop.f32.mrb[27].mxu0 }
 0x25a   : > { %v987_v55 = vadd.f32 %v986_v0, %v3012_v13  ;;  %1348 = vst [vmem:[%s3016_s18 + $0xd0] sm:$0xff] %v1204_v5  ;;  %v1877_v25 = vpop.f32.mrb[26].mxu1 }
 0x25b   : > { %1361 = vst [vmem:[%s3016_s18 + $0x138] sm:$0xff] %v985_v59  ;;  %v1219_v7 = vadd.f32 %v1877_v25, %v3078_v41  ;;  %v1213_v48 = vpop.f32.mrb[27].mxu1 }
 0x25c   : > { %1362 = vst [vmem:[%s3016_s18 + $0x140] sm:$0xff] %v987_v55  ;;  %v990_v26 = vpop.f32.mrb[28].mxu0  ;;  %v1214_v52 = vadd.f32 %v1213_v48, %v3078_v41 }
 0x25d   : > { %v991_v14 = vadd.f32 %v990_v26, %v3009_v35  ;;  %1357 = vst [vmem:[%s3016_s18 + $0x118] sm:$0xff] %v1219_v7  ;;  %v992_v20 = vpop.f32.mrb[29].mxu0 }
 0x25e   : > { %v993_v45 = vadd.f32 %v992_v20, %v3012_v13  ;;  %1354 = vst [vmem:[%s3016_s18 + $0x100] sm:$0xff] %v1214_v52  ;;  %v1880_v9 = vpop.f32.mrb[28].mxu1 }
 0x25f   : > { %1364 = vst [vmem:[%s3016_s18 + $0x150] sm:$0xff] %v991_v14  ;;  %v1229_v28 = vadd.f32 %v1880_v9, %v3078_v41  ;;  %v1223_v21 = vpop.f32.mrb[29].mxu1 }
 0x260   : > { %1365 = vst [vmem:[%s3016_s18 + $0x158] sm:$0xff] %v993_v45  ;;  %v996_v56 = vpop.f32.mrb[30].mxu0  ;;  %v1224_v36 = vadd.f32 %v1223_v21, %v3078_v41 }
 0x261   : > { %v997_v44 = vadd.f32 %v996_v56, %v3009_v35  ;;  %1363 = vst [vmem:[%s3016_s18 + $0x148] sm:$0xff] %v1229_v28  ;;  %v998_v47 = vpop.f32.mrb[31].mxu0 }
 0x262   : > { %v999_v50 = vadd.f32 %v998_v47, %v3012_v13  ;;  %1360 = vst [vmem:[%s3016_s18 + $0x130] sm:$0xff] %v1224_v36  ;;  %v1883_v54 = vpop.f32.mrb[30].mxu1 }
 0x263   : > { %1367 = vst [vmem:[%s3016_s18 + $0x168] sm:$0xff] %v997_v44  ;;  %v1239_v38 = vadd.f32 %v1883_v54, %v3078_v41  ;;  %v1233_v53 = vpop.f32.mrb[31].mxu1 }
 0x264   : > { %1368 = vst [vmem:[%s3016_s18 + $0x170] sm:$0xff] %v999_v50  ;;  %v1002_v60 = vpop.f32.mrb[32].mxu0  ;;  %v1234_v62 = vadd.f32 %v1233_v53, %v3078_v41 }
 0x265   : > { %v1003_v8 = vadd.f32 %v1002_v60, %v3009_v35  ;;  %1369 = vst [vmem:[%s3016_s18 + $0x178] sm:$0xff] %v1239_v38  ;;  %v1004_v46 = vpop.f32.mrb[33].mxu0 }
 0x266   : > { %v1005_v57 = vadd.f32 %v1004_v46, %v3012_v13  ;;  %1366 = vst [vmem:[%s3016_s18 + $0x160] sm:$0xff] %v1234_v62  ;;  %v1886_v15 = vpop.f32.mrb[32].mxu1 }
 0x267   : > { %1370 = vst [vmem:[%s3016_s18 + $0x180] sm:$0xff] %v1003_v8  ;;  %v1249_v11 = vadd.f32 %v1886_v15, %v3078_v41  ;;  %v1243_v29 = vpop.f32.mrb[33].mxu1 }
 0x268   : > { %1371 = vst [vmem:[%s3016_s18 + $0x188] sm:$0xff] %v1005_v57  ;;  %v1008_v18 = vpop.f32.mrb[34].mxu0  ;;  %v1244_v31 = vadd.f32 %v1243_v29, %v3078_v41 }
 0x269   : > { %v1009_v2 = vadd.f32 %v1008_v18, %v3009_v35  ;;  %1375 = vst [vmem:[%s3016_s18 + $0x1a8] sm:$0xff] %v1249_v11  ;;  %v1010_v10 = vpop.f32.mrb[35].mxu0 }
 0x26a   : > { %v1011_v3 = vadd.f32 %v1010_v10, %v3012_v13  ;;  %1372 = vst [vmem:[%s3016_s18 + $0x190] sm:$0xff] %v1244_v31  ;;  %v1889_v39 = vpop.f32.mrb[34].mxu1 }
 0x26b   : > { %1373 = vst [vmem:[%s3016_s18 + $0x198] sm:$0xff] %v1009_v2  ;;  %v1259_v22 = vadd.f32 %v1889_v39, %v3078_v41  ;;  %v1253_v16 = vpop.f32.mrb[35].mxu1 }
 0x26c   : > { %1374 = vst [vmem:[%s3016_s18 + $0x1a0] sm:$0xff] %v1011_v3  ;;  %v1014_v4 = vpop.f32.mrb[36].mxu0  ;;  %v1254_v58 = vadd.f32 %v1253_v16, %v3078_v41 }
 0x26d   : > { %v1015_v19 = vadd.f32 %v1014_v4, %v3009_v35  ;;  %1381 = vst [vmem:[%s3016_s18 + $0x1d8] sm:$0xff] %v1259_v22  ;;  %v1016_v17 = vpop.f32.mrb[37].mxu0 }
 0x26e   : > { %v1017_v32 = vadd.f32 %v1016_v17, %v3012_v13  ;;  %1378 = vst [vmem:[%s3016_s18 + $0x1c0] sm:$0xff] %v1254_v58  ;;  %v1892_v1 = vpop.f32.mrb[36].mxu1 }
 0x26f   : > { %1376 = vst [vmem:[%s3016_s18 + $0x1b0] sm:$0xff] %v1015_v19  ;;  %v1269_v37 = vadd.f32 %v1892_v1, %v3078_v41  ;;  %v1263_v23 = vpop.f32.mrb[37].mxu1 }
 0x270   : > { %1377 = vst [vmem:[%s3016_s18 + $0x1b8] sm:$0xff] %v1017_v32  ;;  %v1020_v33 = vpop.f32.mrb[38].mxu0  ;;  %v1264_v43 = vadd.f32 %v1263_v23, %v3078_v41 }
 0x271   : > { %v1021_v40 = vadd.f32 %v1020_v33, %v3009_v35  ;;  %1387 = vst [vmem:[%s3016_s18 + $0x208] sm:$0xff] %v1269_v37  ;;  %v1022_v27 = vpop.f32.mrb[39].mxu0 }
 0x272   : > { %v1023_v6 = vadd.f32 %v1022_v27, %v3012_v13  ;;  %1384 = vst [vmem:[%s3016_s18 + $0x1f0] sm:$0xff] %v1264_v43  ;;  %v1895_v63 = vpop.f32.mrb[38].mxu1 }
 0x273   : > { %1379 = vst [vmem:[%s3016_s18 + $0x1c8] sm:$0xff] %v1021_v40  ;;  %v1279_v30 = vadd.f32 %v1895_v63, %v3078_v41  ;;  %v1273_v51 = vpop.f32.mrb[39].mxu1 }
 0x274   : > { %1380 = vst [vmem:[%s3016_s18 + $0x1d0] sm:$0xff] %v1023_v6  ;;  %v1026_v61 = vpop.f32.mrb[40].mxu0  ;;  %v1274_v12 = vadd.f32 %v1273_v51, %v3078_v41 }
 0x275   : > { %v1027_v24 = vadd.f32 %v1026_v61, %v3009_v35  ;;  %1393 = vst [vmem:[%s3016_s18 + $0x238] sm:$0xff] %v1279_v30  ;;  %v1028_v34 = vpop.f32.mrb[41].mxu0 }
 0x276   : > { %v1029_v42 = vadd.f32 %v1028_v34, %v3012_v13  ;;  %1390 = vst [vmem:[%s3016_s18 + $0x220] sm:$0xff] %v1274_v12  ;;  %v1898_v49 = vpop.f32.mrb[40].mxu1 }
 0x277   : > { %1382 = vst [vmem:[%s3016_s18 + $0x1e0] sm:$0xff] %v1027_v24  ;;  %v1289_v5 = vadd.f32 %v1898_v49, %v3078_v41  ;;  %v1283_v59 = vpop.f32.mrb[41].mxu1 }
 0x278   : > { %1383 = vst [vmem:[%s3016_s18 + $0x1e8] sm:$0xff] %v1029_v42  ;;  %v1032_v0 = vpop.f32.mrb[42].mxu0  ;;  %v1284_v55 = vadd.f32 %v1283_v59, %v3078_v41 }
 0x279   : > { %v1033_v25 = vadd.f32 %v1032_v0, %v3009_v35  ;;  %1399 = vst [vmem:[%s3016_s18 + $0x268] sm:$0xff] %v1289_v5  ;;  %v1034_v7 = vpop.f32.mrb[43].mxu0 }
 0x27a   : > { %v1035_v48 = vadd.f32 %v1034_v7, %v3012_v13  ;;  %1396 = vst [vmem:[%s3016_s18 + $0x250] sm:$0xff] %v1284_v55  ;;  %v1901_v26 = vpop.f32.mrb[42].mxu1 }
 0x27b   : > { %1385 = vst [vmem:[%s3016_s18 + $0x1f8] sm:$0xff] %v1033_v25  ;;  %v1299_v52 = vadd.f32 %v1901_v26, %v3078_v41  ;;  %v1293_v14 = vpop.f32.mrb[43].mxu1 }
 0x27c   : > { %1386 = vst [vmem:[%s3016_s18 + $0x200] sm:$0xff] %v1035_v48  ;;  %v1038_v20 = vpop.f32.mrb[44].mxu0  ;;  %v1294_v45 = vadd.f32 %v1293_v14, %v3078_v41 }
 0x27d   : > { %v1039_v9 = vadd.f32 %v1038_v20, %v3009_v35  ;;  %1405 = vst [vmem:[%s3016_s18 + $0x298] sm:$0xff] %v1299_v52  ;;  %v1040_v28 = vpop.f32.mrb[45].mxu0 }
 0x27e   : > { %v1041_v21 = vadd.f32 %v1040_v28, %v3012_v13  ;;  %1402 = vst [vmem:[%s3016_s18 + $0x280] sm:$0xff] %v1294_v45  ;;  %v1904_v56 = vpop.f32.mrb[44].mxu1 }
 0x27f   : > { %1388 = vst [vmem:[%s3016_s18 + $0x210] sm:$0xff] %v1039_v9  ;;  %v1309_v36 = vadd.f32 %v1904_v56, %v3078_v41  ;;  %v1303_v44 = vpop.f32.mrb[45].mxu1 }
 0x280   : > { %1389 = vst [vmem:[%s3016_s18 + $0x218] sm:$0xff] %v1041_v21  ;;  %v1044_v47 = vpop.f32.mrb[46].mxu0  ;;  %v1304_v50 = vadd.f32 %v1303_v44, %v3078_v41  ;;  %1424 = sbr.rel (!%p2331_p3) target bundleno = 733 (0x2dd), region = 44 }
 0x281   : > { %v1045_v54 = vadd.f32 %v1044_v47, %v3009_v35  ;;  %1411 = vst [vmem:[%s3016_s18 + $0x2c8] sm:$0xff] %v1309_v36  ;;  %v1046_v38 = vpop.f32.mrb[47].mxu0 }
 0x282   : > { %v1047_v53 = vadd.f32 %v1046_v38, %v3012_v13  ;;  %1408 = vst [vmem:[%s3016_s18 + $0x2b0] sm:$0xff] %v1304_v50  ;;  %v1907_v60 = vpop.f32.mrb[46].mxu1 }
 0x283   : > { %1391 = vst [vmem:[%s3016_s18 + $0x228] sm:$0xff] %v1045_v54  ;;  %v1319_v62 = vadd.f32 %v1907_v60, %v3078_v41  ;;  %v1313_v8 = vpop.f32.mrb[47].mxu1 }
 0x284   : > { %1392 = vst [vmem:[%s3016_s18 + $0x230] sm:$0xff] %v1047_v53  ;;  %v1314_v46 = vadd.f32 %v1313_v8, %v3078_v41 }
 0x285   : > { %1417 = vst [vmem:[%s3016_s18 + $0x2f8] sm:$0xff] %v1319_v62 }
 0x286   : > { %1414 = vst [vmem:[%s3016_s18 + $0x2e0] sm:$0xff] %v1314_v46 }
 0x287   : > { %s3454_s23 = smov (!%p1428_p9, %s1427_s23), 32 }
 0x288   : > { %s1769_s7 = smul.u32 384, %s3454_s23 }
 0x28a   : > { %p1773_p10 = scmp.eq.s32.totalorder %s1769_s7, 0 }
 0x28b   : > { %2160 = sdivrem.u32 (!%p1773_p10), %s3454_s23, 22 }
 0x28c   : > { %1441 = sbr.rel (%p1773_p10) target bundleno = 733 (0x2dd), region = 48 }
 0x294   : > { %s3225_s26 = spop.drf %2160 }
 0x295   : > { %p1774_p11 = scmp.le.s32.totalorder %s3225_s26, 0 }
 0x296   : > { %s3442_s20 = smov (!%p1774_p11), %s3219_s6  ;;  %s3443_s29 = smov (!%p1774_p11), %s3016_s18 }
 0x297   : > { %1683 = sbr.rel (%p1774_p11) target bundleno = 704 (0x2c0), region = 102  ;;  %s3234_s8 = smov (!%p1774_p11), 0  }
 0x298   : > { %s3236_s9 = smov (!%p1774_p11), 0  }
 0x29e LB: >> { %v1455_v35 = vld [vmem:[%s2242_s29] sm:$0xff]  ;;  %v1457_v13 = vld [vmem:[%s2242_s29 + $0x18] sm:$0xff]  ;;  %v1459_v41 = vld [vmem:[%s2242_s29 + $0x30] sm:$0xff]  ;;  %s1587_s10 = sadd.s32 1, %s2246_s8  ;;  %s1449_s9 = sadd.s32 1, %s2250_s9   ;;  %s2250_s9 = sphi %s3236_s9, %s1449_s9   ;;  %s2246_s8 = sphi %s3234_s8, %s3446_s8   ;;  %s2242_s29 = sphi %s3443_s29, %s3445_s29   ;;  %s2238_s20 = sphi %s3442_s20, %s3444_s20  }
 0x29f   : >> { %1456 = vst [vmem:[%s2238_s20] sm:$0xff] %v1455_v35  ;;  %1458 = vst [vmem:[%s2238_s20 + $0x18] sm:$0xff] %v1457_v13  ;;  %v1461_v57 = vld [vmem:[%s2242_s29 + $0x48] sm:$0xff]  ;;  %v1463_v15 = vld [vmem:[%s2242_s29 + $0x60] sm:$0xff]  ;;  %p1588_p12 = scmp.ge.s32.totalorder %s1587_s10, %s3225_s26  ;;  %p1448_p13 = scmp.ge.s32.totalorder %s1449_s9, %s3225_s26 }
 0x2a0   : >> { %1460 = vst [vmem:[%s2238_s20 + $0x30] sm:$0xff] %v1459_v41  ;;  %v1465_v11 = vld [vmem:[%s2242_s29 + $0x78] sm:$0xff]  ;;  %1462 = vst [vmem:[%s2238_s20 + $0x48] sm:$0xff] %v1461_v57  ;;  %v1467_v29 = vld [vmem:[%s2242_s29 + $0x90] sm:$0xff] }
 0x2a1   : >> { %1464 = vst [vmem:[%s2238_s20 + $0x60] sm:$0xff] %v1463_v15  ;;  %1466 = vst [vmem:[%s2238_s20 + $0x78] sm:$0xff] %v1465_v11  ;;  %v1469_v18 = vld [vmem:[%s2242_s29 + $0xa8] sm:$0xff]  ;;  %v1471_v31 = vld [vmem:[%s2242_s29 + $0xc0] sm:$0xff]  ;;  %s3456_s10 = smov (%p1588_p12, %s1587_s10), 0 }
 0x2a2   : >> { %1468 = vst [vmem:[%s2238_s20 + $0x90] sm:$0xff] %v1467_v29  ;;  %1470 = vst [vmem:[%s2238_s20 + $0xa8] sm:$0xff] %v1469_v18  ;;  %v1473_v2 = vld [vmem:[%s2242_s29 + $0xd8] sm:$0xff]  ;;  %v1475_v10 = vld [vmem:[%s2242_s29 + $0xf0] sm:$0xff]  ;;  %s1590_s11 = smul.u32 528, %s3456_s10  ;;  %s3446_s8 = smov %s3456_s10 }
 0x2a3   : >> { %1472 = vst [vmem:[%s2238_s20 + $0xc0] sm:$0xff] %v1471_v31  ;;  %v1477_v3 = vld [vmem:[%s2242_s29 + $0x108] sm:$0xff]  ;;  %1474 = vst [vmem:[%s2238_s20 + $0xd8] sm:$0xff] %v1473_v2  ;;  %v1479_v39 = vld [vmem:[%s2242_s29 + $0x120] sm:$0xff] }
 0x2a4   : >> { %1476 = vst [vmem:[%s2238_s20 + $0xf0] sm:$0xff] %v1475_v10  ;;  %1478 = vst [vmem:[%s2238_s20 + $0x108] sm:$0xff] %v1477_v3  ;;  %v1481_v22 = vld [vmem:[%s2242_s29 + $0x138] sm:$0xff]  ;;  %v1483_v16 = vld [vmem:[%s2242_s29 + $0x150] sm:$0xff]  ;;  %s3298_s12 = scalar_lea.vmem %s3016_s18, %s1590_s11 [#allocation2]   ;;  %s3301_s13 = scalar_lea.vmem %s3219_s6, %s1590_s11  }
 0x2a5   : >> { %1480 = vst [vmem:[%s2238_s20 + $0x120] sm:$0xff] %v1479_v39  ;;  %1482 = vst [vmem:[%s2238_s20 + $0x138] sm:$0xff] %v1481_v22  ;;  %v1485_v4 = vld [vmem:[%s2242_s29 + $0x168] sm:$0xff]  ;;  %v1487_v58 = vld [vmem:[%s2242_s29 + $0x180] sm:$0xff] }
 0x2a6   : >> { %1484 = vst [vmem:[%s2238_s20 + $0x150] sm:$0xff] %v1483_v16  ;;  %v1489_v19 = vld [vmem:[%s2242_s29 + $0x198] sm:$0xff]  ;;  %1486 = vst [vmem:[%s2238_s20 + $0x168] sm:$0xff] %v1485_v4  ;;  %v1491_v17 = vld [vmem:[%s2242_s29 + $0x1b0] sm:$0xff] }
 0x2a7   : >> { %1488 = vst [vmem:[%s2238_s20 + $0x180] sm:$0xff] %v1487_v58  ;;  %1490 = vst [vmem:[%s2238_s20 + $0x198] sm:$0xff] %v1489_v19  ;;  %v1493_v32 = vld [vmem:[%s2242_s29 + $0x1c8] sm:$0xff]  ;;  %v1495_v1 = vld [vmem:[%s2242_s29 + $0x1e0] sm:$0xff] }
 0x2a8   : >> { %1492 = vst [vmem:[%s2238_s20 + $0x1b0] sm:$0xff] %v1491_v17  ;;  %1494 = vst [vmem:[%s2238_s20 + $0x1c8] sm:$0xff] %v1493_v32  ;;  %v1497_v37 = vld [vmem:[%s2242_s29 + $0x1f8] sm:$0xff]  ;;  %v1499_v23 = vld [vmem:[%s2242_s29 + $0x8] sm:$0xff] }
 0x2a9   : >> { %1496 = vst [vmem:[%s2238_s20 + $0x1e0] sm:$0xff] %v1495_v1  ;;  %v1501_v33 = vld [vmem:[%s2242_s29 + $0x20] sm:$0xff]  ;;  %1498 = vst [vmem:[%s2238_s20 + $0x1f8] sm:$0xff] %v1497_v37  ;;  %v1503_v43 = vld [vmem:[%s2242_s29 + $0x38] sm:$0xff] }
 0x2aa   : >> { %1500 = vst [vmem:[%s2238_s20 + $0x8] sm:$0xff] %v1499_v23  ;;  %1502 = vst [vmem:[%s2238_s20 + $0x20] sm:$0xff] %v1501_v33  ;;  %v1505_v40 = vld [vmem:[%s2242_s29 + $0x50] sm:$0xff]  ;;  %v1507_v27 = vld [vmem:[%s2242_s29 + $0x68] sm:$0xff] }
 0x2ab   : >> { %1504 = vst [vmem:[%s2238_s20 + $0x38] sm:$0xff] %v1503_v43  ;;  %1506 = vst [vmem:[%s2238_s20 + $0x50] sm:$0xff] %v1505_v40  ;;  %v1509_v6 = vld [vmem:[%s2242_s29 + $0x80] sm:$0xff]  ;;  %v1511_v63 = vld [vmem:[%s2242_s29 + $0x98] sm:$0xff] }
 0x2ac   : >> { %1508 = vst [vmem:[%s2238_s20 + $0x68] sm:$0xff] %v1507_v27  ;;  %v1513_v30 = vld [vmem:[%s2242_s29 + $0xb0] sm:$0xff]  ;;  %1510 = vst [vmem:[%s2238_s20 + $0x80] sm:$0xff] %v1509_v6  ;;  %v1515_v51 = vld [vmem:[%s2242_s29 + $0xc8] sm:$0xff] }
 0x2ad   : >> { %1512 = vst [vmem:[%s2238_s20 + $0x98] sm:$0xff] %v1511_v63  ;;  %1514 = vst [vmem:[%s2238_s20 + $0xb0] sm:$0xff] %v1513_v30  ;;  %v1517_v61 = vld [vmem:[%s2242_s29 + $0xe0] sm:$0xff]  ;;  %v1519_v12 = vld [vmem:[%s2242_s29 + $0xf8] sm:$0xff] }
 0x2ae   : >> { %1516 = vst [vmem:[%s2238_s20 + $0xc8] sm:$0xff] %v1515_v51  ;;  %1518 = vst [vmem:[%s2238_s20 + $0xe0] sm:$0xff] %v1517_v61  ;;  %v1521_v24 = vld [vmem:[%s2242_s29 + $0x110] sm:$0xff]  ;;  %v1523_v34 = vld [vmem:[%s2242_s29 + $0x128] sm:$0xff] }
 0x2af   : >> { %1520 = vst [vmem:[%s2238_s20 + $0xf8] sm:$0xff] %v1519_v12  ;;  %v1525_v42 = vld [vmem:[%s2242_s29 + $0x140] sm:$0xff]  ;;  %1522 = vst [vmem:[%s2238_s20 + $0x110] sm:$0xff] %v1521_v24  ;;  %v1527_v49 = vld [vmem:[%s2242_s29 + $0x158] sm:$0xff] }
 0x2b0   : >> { %1524 = vst [vmem:[%s2238_s20 + $0x128] sm:$0xff] %v1523_v34  ;;  %1526 = vst [vmem:[%s2238_s20 + $0x140] sm:$0xff] %v1525_v42  ;;  %v1529_v5 = vld [vmem:[%s2242_s29 + $0x170] sm:$0xff]  ;;  %v1531_v59 = vld [vmem:[%s2242_s29 + $0x188] sm:$0xff] }
 0x2b1   : >> { %1528 = vst [vmem:[%s2238_s20 + $0x158] sm:$0xff] %v1527_v49  ;;  %1530 = vst [vmem:[%s2238_s20 + $0x170] sm:$0xff] %v1529_v5  ;;  %v1533_v0 = vld [vmem:[%s2242_s29 + $0x1a0] sm:$0xff]  ;;  %v1535_v55 = vld [vmem:[%s2242_s29 + $0x1b8] sm:$0xff] }
 0x2b2   : >> { %1532 = vst [vmem:[%s2238_s20 + $0x188] sm:$0xff] %v1531_v59  ;;  %v1537_v25 = vld [vmem:[%s2242_s29 + $0x1d0] sm:$0xff]  ;;  %1534 = vst [vmem:[%s2238_s20 + $0x1a0] sm:$0xff] %v1533_v0  ;;  %v1539_v7 = vld [vmem:[%s2242_s29 + $0x1e8] sm:$0xff] }
 0x2b3   : >> { %1536 = vst [vmem:[%s2238_s20 + $0x1b8] sm:$0xff] %v1535_v55  ;;  %1538 = vst [vmem:[%s2238_s20 + $0x1d0] sm:$0xff] %v1537_v25  ;;  %v1541_v48 = vld [vmem:[%s2242_s29 + $0x200] sm:$0xff]  ;;  %v1543_v26 = vld [vmem:[%s2242_s29 + $0x10] sm:$0xff] }
 0x2b4   : >> { %1540 = vst [vmem:[%s2238_s20 + $0x1e8] sm:$0xff] %v1539_v7  ;;  %1542 = vst [vmem:[%s2238_s20 + $0x200] sm:$0xff] %v1541_v48  ;;  %v1545_v52 = vld [vmem:[%s2242_s29 + $0x28] sm:$0xff]  ;;  %v1547_v14 = vld [vmem:[%s2242_s29 + $0x40] sm:$0xff] }
 0x2b5   : >> { %1544 = vst [vmem:[%s2238_s20 + $0x10] sm:$0xff] %v1543_v26  ;;  %v1549_v20 = vld [vmem:[%s2242_s29 + $0x58] sm:$0xff]  ;;  %1546 = vst [vmem:[%s2238_s20 + $0x28] sm:$0xff] %v1545_v52  ;;  %v1551_v45 = vld [vmem:[%s2242_s29 + $0x70] sm:$0xff] }
 0x2b6   : >> { %1548 = vst [vmem:[%s2238_s20 + $0x40] sm:$0xff] %v1547_v14  ;;  %1550 = vst [vmem:[%s2238_s20 + $0x58] sm:$0xff] %v1549_v20  ;;  %v1553_v9 = vld [vmem:[%s2242_s29 + $0x88] sm:$0xff]  ;;  %v1555_v28 = vld [vmem:[%s2242_s29 + $0xa0] sm:$0xff] }
 0x2b7   : >> { %1552 = vst [vmem:[%s2238_s20 + $0x70] sm:$0xff] %v1551_v45  ;;  %1554 = vst [vmem:[%s2238_s20 + $0x88] sm:$0xff] %v1553_v9  ;;  %v1557_v21 = vld [vmem:[%s2242_s29 + $0xb8] sm:$0xff]  ;;  %v1559_v56 = vld [vmem:[%s2242_s29 + $0xd0] sm:$0xff] }
 0x2b8   : >> { %1556 = vst [vmem:[%s2238_s20 + $0xa0] sm:$0xff] %v1555_v28  ;;  %v1561_v36 = vld [vmem:[%s2242_s29 + $0xe8] sm:$0xff]  ;;  %1558 = vst [vmem:[%s2238_s20 + $0xb8] sm:$0xff] %v1557_v21  ;;  %v1563_v44 = vld [vmem:[%s2242_s29 + $0x100] sm:$0xff] }
 0x2b9   : >> { %1560 = vst [vmem:[%s2238_s20 + $0xd0] sm:$0xff] %v1559_v56  ;;  %1562 = vst [vmem:[%s2238_s20 + $0xe8] sm:$0xff] %v1561_v36  ;;  %v1565_v47 = vld [vmem:[%s2242_s29 + $0x118] sm:$0xff]  ;;  %v1567_v50 = vld [vmem:[%s2242_s29 + $0x130] sm:$0xff]  ;;  %1451 = sbr.rel (!%p1448_p13) target bundleno = 670 (0x29e), region = 108 }
 0x2ba   : >> { %1564 = vst [vmem:[%s2238_s20 + $0x100] sm:$0xff] %v1563_v44  ;;  %1566 = vst [vmem:[%s2238_s20 + $0x118] sm:$0xff] %v1565_v47  ;;  %v1569_v54 = vld [vmem:[%s2242_s29 + $0x148] sm:$0xff]  ;;  %v1571_v38 = vld [vmem:[%s2242_s29 + $0x160] sm:$0xff] }
 0x2bb   : >> { %1568 = vst [vmem:[%s2238_s20 + $0x130] sm:$0xff] %v1567_v50  ;;  %v1573_v53 = vld [vmem:[%s2242_s29 + $0x178] sm:$0xff]  ;;  %1570 = vst [vmem:[%s2238_s20 + $0x148] sm:$0xff] %v1569_v54  ;;  %v1575_v60 = vld [vmem:[%s2242_s29 + $0x190] sm:$0xff] }
 0x2bc   : >> { %1572 = vst [vmem:[%s2238_s20 + $0x160] sm:$0xff] %v1571_v38  ;;  %1574 = vst [vmem:[%s2238_s20 + $0x178] sm:$0xff] %v1573_v53  ;;  %v1577_v62 = vld [vmem:[%s2242_s29 + $0x1a8] sm:$0xff]  ;;  %v1579_v8 = vld [vmem:[%s2242_s29 + $0x1c0] sm:$0xff] }
 0x2bd   : >> { %1576 = vst [vmem:[%s2238_s20 + $0x190] sm:$0xff] %v1575_v60  ;;  %1578 = vst [vmem:[%s2238_s20 + $0x1a8] sm:$0xff] %v1577_v62  ;;  %v1581_v46 = vld [vmem:[%s2242_s29 + $0x1d8] sm:$0xff]  ;;  %v1583_v35 = vld [vmem:[%s2242_s29 + $0x1f0] sm:$0xff] }
 0x2be   : >> { %1580 = vst [vmem:[%s2238_s20 + $0x1c0] sm:$0xff] %v1579_v8  ;;  %v1585_v13 = vld [vmem:[%s2242_s29 + $0x208] sm:$0xff]  ;;  %1582 = vst [vmem:[%s2238_s20 + $0x1d8] sm:$0xff] %v1581_v46  ;;  %s3445_s29 = smov %s3298_s12 }
 0x2bf   : >> { %1584 = vst [vmem:[%s2238_s20 + $0x1f0] sm:$0xff] %v1583_v35  ;;  %1586 = vst [vmem:[%s2238_s20 + $0x208] sm:$0xff] %v1585_v13  ;;  %s3444_s20 = smov %s3301_s13 }
 0x2c0 PF: > { %2162 = sdivrem.u32 %s3454_s23, 22 }
 0x2c1   : > { %s1775_s14 = smul.u32 528, %s3225_s26 }
 0x2c3   : > { %s3406_s15 = scalar_lea.vmem %s3016_s18, %s1775_s14 [#allocation2]   ;;  %s3409_s16 = scalar_lea.vmem %s3219_s6, %s1775_s14  }
 0x2c9   : > { %s3411_s17 = spop.drf %2162 }
 0x2ca   : > { %p1777_p0 = scmp.le.s32.totalorder %s3411_s17, 0 }
 0x2cb   : > { %s2252_s25 = smov (!%p1777_p0), %s3409_s16   ;;  %s2256_s27 = smov (!%p1777_p0), %s3406_s15  }
 0x2cc   : > { %1697 = sbr.rel (%p1777_p0) target bundleno = 733 (0x2dd), region = 113  ;;  %s2260_s30 = smov (!%p1777_p0), 0  }
 0x2cd   : > { %s2264_s7 = smov (!%p1777_p0), 0  }
 0x2d3 LB: >> { %v1610_v41 = vld [vmem:[%s2258_s27] sm:$0xff]  ;;  %v1612_v57 = vld [vmem:[%s2258_s27 + $0x8] sm:$0xff]  ;;  %v1614_v15 = vld [vmem:[%s2258_s27 + $0x10] sm:$0xff]  ;;  %s1616_s18 = sadd.s32 1, %s2262_s30  ;;  %s1604_s7 = sadd.s32 1, %s2266_s7   ;;  %s2266_s7 = sphi %s2264_s7, %s1604_s7   ;;  %s2262_s30 = sphi %s2260_s30, %s2261_s30   ;;  %s2258_s27 = sphi %s2256_s27, %s1621_s27   ;;  %s2254_s25 = sphi %s2252_s25, %s1622_s25  }
 0x2d4   : >> { %1611 = vst [vmem:[%s2254_s25] sm:$0xff] %v1610_v41  ;;  %1613 = vst [vmem:[%s2254_s25 + $0x8] sm:$0xff] %v1612_v57  ;;  %p1617_p1 = scmp.ge.s32.totalorder %s1616_s18, %s3411_s17  ;;  %p1603_p2 = scmp.ge.s32.totalorder %s1604_s7, %s3411_s17 }
 0x2d5   : >> { %1615 = vst [vmem:[%s2254_s25 + $0x10] sm:$0xff] %v1614_v15 }
 0x2d6   : >> { %s3458_s18 = smov (%p1617_p1, %s1616_s18), 0  ;;  %1606 = sbr.rel (!%p1603_p2) target bundleno = 723 (0x2d3), region = 119 }
 0x2d7   : >> { %s1619_s23 = smul.u32 24, %s3458_s18  ;;  %s2261_s30 = smov %s3458_s18  }
 0x2d9   : >> { %s1621_s27 = scalar_lea.vmem %s3406_s15, %s1619_s23 [#allocation2]   ;;  %s1622_s25 = scalar_lea.vmem %s3409_s16, %s1619_s23  }
 0x2dd PF: > { %s15_s22 = sadd.s32 1, %s2234_s22   ;;  %s3447_s18 = smov %s2222_s19 }
 0x2de   : > { %p12_p3 = scmp.ge.s32.totalorder %s15_s22, 4   ;;  %s3448_s19 = smov %s2340_s28 }
 0x2df   : > { %s3449_s20 = smov %s2230_s21  ;;  %s3450_s21 = smov %s3452_s24 }
 0x2e0   :  { %14 = sbr.rel (!%p12_p3) target bundleno = 3 (0x3), region = 130 }

</bundles_post_ra>
